<compile_context>
chip_gen: v7x
topology: tpu7x:2x2x1
jax: 0.10.0
libtpu: 0.0.40
codegen_flags: <defaults>
</compile_context>

<pallas_src>
import functools

import jax
import jax.numpy as jnp
from jax.experimental import pallas as pl
from jax.experimental.pallas import tpu as pltpu

D_IN = 512
D_HID = 2048
D_OUT = 512


def encoder_kernel(x_ref, w1_ref, b1_ref, wh_ref, bh_ref, mean_ref, logvar_ref):
    # Hidden layer: Linear(512 -> 2048) + ReLU   (bf16 inputs, f32 accumulation)
    h = jnp.dot(x_ref[...], w1_ref[...], preferred_element_type=jnp.float32)
    h = jnp.maximum(h + b1_ref[...], 0.0)                # (tb, 2048) + (1, 2048)
    # Fused heads: one Linear(2048 -> 1024) MXU pass, then lane-aligned slice.
    out = jnp.dot(h.astype(jnp.bfloat16), wh_ref[...],
                  preferred_element_type=jnp.float32)
    out = out + bh_ref[...]                               # (tb, 1024) + (1, 1024)
    mean_ref[...] = out[:, :D_OUT].astype(mean_ref.dtype)
    logvar_ref[...] = out[:, D_OUT:].astype(logvar_ref.dtype)


def _round_up(n, m):
    return ((n + m - 1) // m) * m


@functools.partial(jax.jit, static_argnames=("tb",))
def encoder_forward(x, w1, b1, wm, bm, wv, bv, *, tb=None):
    B = x.shape[0]

    # Fuse the two heads into a single [2048, 1024] weight / [1, 1024] bias.
    w_heads = jnp.concatenate([wm, wv], axis=1)
    b_heads = jnp.concatenate([bm, bv], axis=1).astype(jnp.float32)

    # bf16 weights/activations; biases stay f32 (added post-accumulation).
    x_bf = x.astype(jnp.bfloat16)
    w1_bf = w1.astype(jnp.bfloat16)
    wh_bf = w_heads.astype(jnp.bfloat16)
    b1_f32 = b1.astype(jnp.float32)

    # Batch tile: one (8-aligned) step for small B; 256-row tiles for large B
    # so the MXU sees full tiles and grid steps can shard across TCs (v7x).
    if tb is None:
        tb = _round_up(B, 8) if B <= 256 else 256
    B_pad = _round_up(B, tb)
    if B_pad != B:
        x_bf = jnp.pad(x_bf, ((0, B_pad - B), (0, 0)))
    grid = (B_pad // tb,)

    # Whole-array resident VMEM (single buffer — no pipeline double-buffering).
    resident = pl.BlockSpec(memory_space=pltpu.MemorySpace.VMEM)

    mean, log_var = pl.pallas_call(
        encoder_kernel,
        out_shape=(
            jax.ShapeDtypeStruct((B_pad, D_OUT), jnp.float32),
            jax.ShapeDtypeStruct((B_pad, D_OUT), jnp.float32),
        ),
        grid_spec=pltpu.PrefetchScalarGridSpec(
            num_scalar_prefetch=0,
            grid=grid,
            in_specs=[
                pl.BlockSpec((tb, D_IN), lambda i: (i, 0)),   # x (pipelined)
                resident,                                      # w1      (bf16, 2 MiB)
                resident,                                      # b1      (f32)
                resident,                                      # w_heads (bf16, 4 MiB)
                resident,                                      # b_heads (f32)
            ],
            out_specs=[
                pl.BlockSpec((tb, D_OUT), lambda i: (i, 0)),  # mean
                pl.BlockSpec((tb, D_OUT), lambda i: (i, 0)),  # log_var
            ],
        ),
        compiler_params=pltpu.CompilerParams(
            dimension_semantics=("parallel",),
            # Fits v7x's 64 MiB VMEM; weights ~6 MiB bf16 + small batch tiles.
            vmem_limit_bytes=48 << 20,
        ),
    )(x_bf, w1_bf, b1_f32, wh_bf, b_heads)

    if B_pad != B:
        mean = mean[:B]
        log_var = log_var[:B]
    return mean, log_var


def init_params(key):
    # weights_init: Linear weights ~ N(0, 0.02), biases = 0.
    k1, k2, k3 = jax.random.split(key, 3)
    w1 = jax.random.normal(k1, (D_IN, D_HID), jnp.float32) * 0.02
    b1 = jnp.zeros((1, D_HID), jnp.float32)
    wm = jax.random.normal(k2, (D_HID, D_OUT), jnp.float32) * 0.02
    bm = jnp.zeros((1, D_OUT), jnp.float32)
    wv = jax.random.normal(k3, (D_HID, D_OUT), jnp.float32) * 0.02
    bv = jnp.zeros((1, D_OUT), jnp.float32)
    return w1, b1, wm, bm, wv, bv


if __name__ == "__main__":
    key = jax.random.PRNGKey(0)
    kx, kp = jax.random.split(key)

    B = 8  # small batch
    x = jax.random.normal(kx, (B, D_IN), jnp.float32)
    params = init_params(kp)

    mean, log_var = encoder_forward(x, *params)
    jax.block_until_ready((mean, log_var))

    # Reference check in plain JAX (f32).  Tolerance loosened for bf16
    # weights/activations inside the kernel.
    w1, b1, wm, bm, wv, bv = params
    h_ref = jnp.maximum(x @ w1 + b1, 0.0)
    mean_ref = h_ref @ wm + bm
    logv_ref = h_ref @ wv + bv
    assert mean.shape == (B, D_OUT) and log_var.shape == (B, D_OUT)
    assert jnp.allclose(mean, mean_ref, atol=2e-2, rtol=2e-2)
    assert jnp.allclose(log_var, logv_ref, atol=2e-2, rtol=2e-2)

    print("KERNEL_OK")
</pallas_src>

<mosaic_0001>
module attributes {stable_mosaic.version = 11 : i64} {
  func.func @encoder_kernel(%arg0: i32, %arg1: memref<8x512xbf16, #tpu.memory_space<vmem>>, %arg2: memref<512x2048xbf16, #tpu.memory_space<vmem>>, %arg3: memref<1x2048xf32, #tpu.memory_space<vmem>>, %arg4: memref<2048x1024xbf16, #tpu.memory_space<vmem>>, %arg5: memref<1x1024xf32, #tpu.memory_space<vmem>>, %arg6: memref<8x512xf32, #tpu.memory_space<vmem>>, %arg7: memref<8x512xf32, #tpu.memory_space<vmem>>) attributes {dimension_semantics = [#tpu.dimension_semantics<parallel>], iteration_bounds = array<i64: 1>, scalar_prefetch = 0 : i64, scratch_operands = 0 : i64, tpu.core_type = #tpu.core_type<tc>, window_params = [{transform_indices = @transform_0, window_bounds = array<i64: 8, 512>}, {pipeline_mode = #tpu.pipeline_mode<synchronous>, transform_indices = @transform_1, window_bounds = array<i64: 512, 2048>}, {pipeline_mode = #tpu.pipeline_mode<synchronous>, transform_indices = @transform_2, window_bounds = array<i64: 1, 2048>}, {pipeline_mode = #tpu.pipeline_mode<synchronous>, transform_indices = @transform_3, window_bounds = array<i64: 2048, 1024>}, {pipeline_mode = #tpu.pipeline_mode<synchronous>, transform_indices = @transform_4, window_bounds = array<i64: 1, 1024>}, {transform_indices = @transform_5, window_bounds = array<i64: 8, 512>}, {transform_indices = @transform_6, window_bounds = array<i64: 8, 512>}]} {
    %c0 = arith.constant 0 : index
    %c0_0 = arith.constant 0 : index
    %0 = vector.load %arg1[%c0, %c0_0] : memref<8x512xbf16, #tpu.memory_space<vmem>>, vector<8x512xbf16>
    %c0_1 = arith.constant 0 : index
    %c0_2 = arith.constant 0 : index
    %1 = vector.load %arg2[%c0_1, %c0_2] : memref<512x2048xbf16, #tpu.memory_space<vmem>>, vector<512x2048xbf16>
    %cst = arith.constant dense<0.000000e+00> : vector<8x2048xf32>
    %2 = tpu.matmul %0, %1, %cst {dimension_numbers = #tpu.dot_dimension_numbers<[1], [0], [0], [1], [0, 0, 1, 1], [], []>} : vector<8x512xbf16>, vector<512x2048xbf16>, vector<8x2048xf32> -> vector<8x2048xf32>
    %c0_3 = arith.constant 0 : index
    %c0_4 = arith.constant 0 : index
    %3 = vector.load %arg3[%c0_3, %c0_4] : memref<1x2048xf32, #tpu.memory_space<vmem>>, vector<1x2048xf32>
    %4 = vector.broadcast %3 : vector<1x2048xf32> to vector<8x2048xf32>
    %5 = arith.addf %2, %4 : vector<8x2048xf32>
    %cst_5 = arith.constant 0.000000e+00 : f32
    %6 = vector.broadcast %cst_5 : f32 to vector<8x2048xf32>
    %7 = arith.maximumf %5, %6 : vector<8x2048xf32>
    %8 = arith.truncf %7 : vector<8x2048xf32> to vector<8x2048xbf16>
    %c0_6 = arith.constant 0 : index
    %c0_7 = arith.constant 0 : index
    %9 = vector.load %arg4[%c0_6, %c0_7] : memref<2048x1024xbf16, #tpu.memory_space<vmem>>, vector<2048x1024xbf16>
    %cst_8 = arith.constant dense<0.000000e+00> : vector<8x1024xf32>
    %10 = tpu.matmul %8, %9, %cst_8 {dimension_numbers = #tpu.dot_dimension_numbers<[1], [0], [0], [1], [0, 0, 1, 1], [], []>} : vector<8x2048xbf16>, vector<2048x1024xbf16>, vector<8x1024xf32> -> vector<8x1024xf32>
    %c0_9 = arith.constant 0 : index
    %c0_10 = arith.constant 0 : index
    %11 = vector.load %arg5[%c0_9, %c0_10] : memref<1x1024xf32, #tpu.memory_space<vmem>>, vector<1x1024xf32>
    %12 = vector.broadcast %11 : vector<1x1024xf32> to vector<8x1024xf32>
    %13 = arith.addf %10, %12 : vector<8x1024xf32>
    %14 = vector.extract_strided_slice %13 {offsets = [0, 0], sizes = [8, 512], strides = [1, 1]} : vector<8x1024xf32> to vector<8x512xf32>
    %c0_11 = arith.constant 0 : index
    %c0_12 = arith.constant 0 : index
    %15 = vector.load %arg6[%c0_11, %c0_12] : memref<8x512xf32, #tpu.memory_space<vmem>>, vector<8x512xf32>
    tpu.vector_store %arg6[%c0_11, %c0_12], %14 {strides = array<i32>} : memref<8x512xf32, #tpu.memory_space<vmem>>, vector<8x512xf32>,
    %16 = vector.extract_strided_slice %13 {offsets = [0, 512], sizes = [8, 512], strides = [1, 1]} : vector<8x1024xf32> to vector<8x512xf32>
    %c0_13 = arith.constant 0 : index
    %c0_14 = arith.constant 0 : index
    %17 = vector.load %arg7[%c0_13, %c0_14] : memref<8x512xf32, #tpu.memory_space<vmem>>, vector<8x512xf32>
    tpu.vector_store %arg7[%c0_13, %c0_14], %16 {strides = array<i32>} : memref<8x512xf32, #tpu.memory_space<vmem>>, vector<8x512xf32>,
    return
  }
  func.func @transform_0(%arg0: i32) -> (i32, i32) {
    %c0_i32 = arith.constant 0 : i32
    %c0_i32_0 = arith.constant 0 : i32
    return %arg0, %c0_i32 : i32, i32
  }
  func.func @transform_1(%arg0: i32) -> (i32, i32) {
    %c0_i32 = arith.constant 0 : i32
    %c0_i32_0 = arith.constant 0 : i32
    %c0_i32_1 = arith.constant 0 : i32
    return %c0_i32, %c0_i32_0 : i32, i32
  }
  func.func @transform_2(%arg0: i32) -> (i32, i32) {
    %c0_i32 = arith.constant 0 : i32
    %c0_i32_0 = arith.constant 0 : i32
    %c0_i32_1 = arith.constant 0 : i32
    return %c0_i32, %c0_i32_0 : i32, i32
  }
  func.func @transform_3(%arg0: i32) -> (i32, i32) {
    %c0_i32 = arith.constant 0 : i32
    %c0_i32_0 = arith.constant 0 : i32
    %c0_i32_1 = arith.constant 0 : i32
    return %c0_i32, %c0_i32_0 : i32, i32
  }
  func.func @transform_4(%arg0: i32) -> (i32, i32) {
    %c0_i32 = arith.constant 0 : i32
    %c0_i32_0 = arith.constant 0 : i32
    %c0_i32_1 = arith.constant 0 : i32
    return %c0_i32, %c0_i32_0 : i32, i32
  }
  func.func @transform_5(%arg0: i32) -> (i32, i32) {
    %c0_i32 = arith.constant 0 : i32
    %c0_i32_0 = arith.constant 0 : i32
    return %arg0, %c0_i32 : i32, i32
  }
  func.func @transform_6(%arg0: i32) -> (i32, i32) {
    %c0_i32 = arith.constant 0 : i32
    %c0_i32_0 = arith.constant 0 : i32
    return %arg0, %c0_i32 : i32, i32
  }
}

</mosaic_0001>

<bundles_post_ra>
// kernel: encoder_forward.1
= control target key start
LH: loop header
LB: loop body
LE: loop exit
PB: predicated region body
PF: predicated region fallthrough
CT: control target
= control target key end

     0   :  { %12 = vsyncpa [#allocation3], 0  ;;  %s18146_s0 = inlined_call_operand.vmem [shape: bf16[8,512], index: 0, kind: input, shape index: {}]   ;;  %s18147_s1 = inlined_call_operand.vmem [shape: bf16[512,2048], index: 1, kind: input, shape index: {}]   ;;  %s18148_s2 = inlined_call_operand.vmem [shape: f32[1,2048], index: 2, kind: input, shape index: {}]   ;;  %s18149_s3 = inlined_call_operand.vmem [shape: bf16[2048,1024], index: 3, kind: input, shape index: {}]   ;;  %s18150_s4 = inlined_call_operand.vmem [shape: f32[1,1024], index: 4, kind: input, shape index: {}]   ;;  %s18151_s5 = inlined_call_operand.hbm [shape: f32[8,512], index: 5, kind: output, shape index: {0}]   ;;  %s18152_s6 = inlined_call_operand.hbm [shape: f32[8,512], index: 6, kind: output, shape index: {1}]  }
   0x1   :  { %v26_v0 = vld [vmem:[%s18147_s1] sm:$0xff]  ;;  %v27_v2 = vld [vmem:[%s18147_s1 + $0x8] sm:$0xff] }
   0x2   :  { %v34_v1 = vld [vmem:[%s18147_s1 + $0x40] sm:$0xff]  ;;  %v35_v4 = vld [vmem:[%s18147_s1 + $0x48] sm:$0xff] }
   0x3   :  { %v11423_v3 = vcombine.high %v26_v0, %v34_v1  ;;  %v11422_v5 = vcombine.low %v26_v0, %v34_v1  ;;  %v42_v6 = vld [vmem:[%s18147_s1 + $0x80] sm:$0xff]  ;;  %v11425_v8 = vcombine.high %v27_v2, %v35_v4  ;;  %v11424_v9 = vcombine.low %v27_v2, %v35_v4  ;;  %v43_v11 = vld [vmem:[%s18147_s1 + $0x88] sm:$0xff] }
   0x4   :  { %v50_v7 = vld [vmem:[%s18147_s1 + $0xc0] sm:$0xff]  ;;  %v51_v12 = vld [vmem:[%s18147_s1 + $0xc8] sm:$0xff] }
   0x5   :  { %v11439_v10 = vcombine.high %v42_v6, %v50_v7  ;;  %v58_v13 = vld [vmem:[%s18147_s1 + $0x100] sm:$0xff]  ;;  %3196 = vmatprep.subr.bf16.mxu0 %v11423_v3  ;;  %v11441_v14 = vcombine.high %v43_v11, %v51_v12  ;;  %v59_v16 = vld [vmem:[%s18147_s1 + $0x108] sm:$0xff]  ;;  %3278 = vmatprep.subr.bf16.mxu1 %v11425_v8  ;;  %v11438_v18 = vcombine.low %v42_v6, %v50_v7 }
   0x6   :  { %v66_v15 = vld [vmem:[%s18147_s1 + $0x140] sm:$0xff]  ;;  %v67_v17 = vld [vmem:[%s18147_s1 + $0x148] sm:$0xff]  ;;  %3197 = vmatpush1.bf16.msra.mxu0 %v11422_v5  ;;  %3279 = vmatpush1.bf16.msra.mxu1 %v11424_v9  ;;  %v11440_v19 = vcombine.low %v43_v11, %v51_v12 }
   0x7   :  { %3198 = vmatprep.subr.bf16.mxu0 %v11439_v10  ;;  %v11455_v20 = vcombine.high %v58_v13, %v66_v15  ;;  %3280 = vmatprep.subr.bf16.mxu1 %v11441_v14  ;;  %v11457_v21 = vcombine.high %v59_v16, %v67_v17  ;;  %v74_v22 = vld [vmem:[%s18147_s1 + $0x180] sm:$0xff]  ;;  %v75_v24 = vld [vmem:[%s18147_s1 + $0x188] sm:$0xff]  ;;  %v11454_v26 = vcombine.low %v58_v13, %v66_v15 }
   0x8   :  { %v82_v23 = vld [vmem:[%s18147_s1 + $0x1c0] sm:$0xff]  ;;  %v83_v25 = vld [vmem:[%s18147_s1 + $0x1c8] sm:$0xff]  ;;  %v11456_v27 = vcombine.low %v59_v16, %v67_v17 }
   0x9   :  { %v11471_v28 = vcombine.high %v74_v22, %v82_v23  ;;  %v11473_v29 = vcombine.high %v75_v24, %v83_v25  ;;  %v90_v30 = vld [vmem:[%s18147_s1 + $0x200] sm:$0xff]  ;;  %v91_v32 = vld [vmem:[%s18147_s1 + $0x208] sm:$0xff]  ;;  %v11470_v34 = vcombine.low %v74_v22, %v82_v23  ;;  %v11472_v35 = vcombine.low %v75_v24, %v83_v25 }
   0xa   :  { %3199 = vmatpush1.bf16.msra.mxu0 %v11438_v18  ;;  %3281 = vmatpush1.bf16.msra.mxu1 %v11440_v19  ;;  %v98_v31 = vld [vmem:[%s18147_s1 + $0x240] sm:$0xff]  ;;  %v99_v33 = vld [vmem:[%s18147_s1 + $0x248] sm:$0xff] }
   0xb   :  { %3200 = vmatprep.subr.bf16.mxu0 %v11455_v20  ;;  %3282 = vmatprep.subr.bf16.mxu1 %v11457_v21  ;;  %v11487_v36 = vcombine.high %v90_v30, %v98_v31  ;;  %v11489_v37 = vcombine.high %v91_v32, %v99_v33  ;;  %v106_v38 = vld [vmem:[%s18147_s1 + $0x280] sm:$0xff]  ;;  %v107_v40 = vld [vmem:[%s18147_s1 + $0x288] sm:$0xff]  ;;  %v11486_v42 = vcombine.low %v90_v30, %v98_v31 }
   0xc   :  { %v114_v39 = vld [vmem:[%s18147_s1 + $0x2c0] sm:$0xff]  ;;  %v115_v41 = vld [vmem:[%s18147_s1 + $0x2c8] sm:$0xff]  ;;  %v11488_v43 = vcombine.low %v91_v32, %v99_v33 }
   0xd   :  { %v11503_v44 = vcombine.high %v106_v38, %v114_v39  ;;  %v11505_v45 = vcombine.high %v107_v40, %v115_v41  ;;  %v122_v46 = vld [vmem:[%s18147_s1 + $0x300] sm:$0xff]  ;;  %v123_v48 = vld [vmem:[%s18147_s1 + $0x308] sm:$0xff]  ;;  %v11502_v50 = vcombine.low %v106_v38, %v114_v39  ;;  %v11504_v51 = vcombine.low %v107_v40, %v115_v41 }
   0xe   :  { %3201 = vmatpush1.bf16.msra.mxu0 %v11454_v26  ;;  %3283 = vmatpush1.bf16.msra.mxu1 %v11456_v27  ;;  %v130_v47 = vld [vmem:[%s18147_s1 + $0x340] sm:$0xff]  ;;  %v131_v49 = vld [vmem:[%s18147_s1 + $0x348] sm:$0xff] }
   0xf   :  { %3202 = vmatprep.subr.bf16.mxu0 %v11471_v28  ;;  %3284 = vmatprep.subr.bf16.mxu1 %v11473_v29  ;;  %v11519_v52 = vcombine.high %v122_v46, %v130_v47  ;;  %v13307_v53 = vld [vmem:[%s18146_s0] sm:$0xff]  ;;  %v11521_v54 = vcombine.high %v123_v48, %v131_v49  ;;  %v139_v58 = vld [vmem:[%s18147_s1 + $0x388] sm:$0xff]  ;;  %v11518_v60 = vcombine.low %v122_v46, %v130_v47 }
  0x10   :  { %v138_v55 = vld [vmem:[%s18147_s1 + $0x380] sm:$0xff]  ;;  %v13317_v57 = vcombine.high %v13307_v53, %v13307_v53  ;;  %v147_v59 = vld [vmem:[%s18147_s1 + $0x3c8] sm:$0xff]  ;;  %v11520_v61 = vcombine.low %v123_v48, %v131_v49 }
  0x11   :  { %v146_v56 = vld [vmem:[%s18147_s1 + $0x3c0] sm:$0xff]  ;;  %v11537_v63 = vcombine.high %v139_v58, %v147_v59  ;;  %v155_v2 = vld [vmem:[%s18147_s1 + $0x408] sm:$0xff]  ;;  %v11536_v5 = vcombine.low %v139_v58, %v147_v59 }
  0x12   :  { %3203 = vmatpush1.bf16.msra.mxu0 %v11470_v34  ;;  %3285 = vmatpush1.bf16.msra.mxu1 %v11472_v35  ;;  %v11535_v62 = vcombine.high %v138_v55, %v146_v56  ;;  %v154_v0 = vld [vmem:[%s18147_s1 + $0x400] sm:$0xff]  ;;  %v163_v3 = vld [vmem:[%s18147_s1 + $0x448] sm:$0xff]  ;;  %v11534_v4 = vcombine.low %v138_v55, %v146_v56 }
  0x13   :  { %3204 = vmatprep.subr.bf16.mxu0 %v11487_v36  ;;  %3286 = vmatprep.subr.bf16.mxu1 %v11489_v37  ;;  %v162_v1 = vld [vmem:[%s18147_s1 + $0x440] sm:$0xff]  ;;  %v11553_v7 = vcombine.high %v155_v2, %v163_v3  ;;  %v171_v10 = vld [vmem:[%s18147_s1 + $0x488] sm:$0xff]  ;;  %v11552_v13 = vcombine.low %v155_v2, %v163_v3 }
  0x14   :  { %3228 = vmatprep.mubr.bf16.mxu0 %v13317_v57  ;;  %3310 = vmatprep.mubr.bf16.mxu1 %v13317_v57  ;;  %v11551_v6 = vcombine.high %v154_v0, %v162_v1  ;;  %v170_v8 = vld [vmem:[%s18147_s1 + $0x480] sm:$0xff]  ;;  %v179_v11 = vld [vmem:[%s18147_s1 + $0x4c8] sm:$0xff]  ;;  %v11550_v12 = vcombine.low %v154_v0, %v162_v1 }
  0x15   :  { %v178_v9 = vld [vmem:[%s18147_s1 + $0x4c0] sm:$0xff]  ;;  %v11569_v15 = vcombine.high %v171_v10, %v179_v11  ;;  %v187_v18 = vld [vmem:[%s18147_s1 + $0x508] sm:$0xff]  ;;  %v11568_v21 = vcombine.low %v171_v10, %v179_v11 }
  0x16   :  { %3205 = vmatpush1.bf16.msra.mxu0 %v11486_v42  ;;  %3287 = vmatpush1.bf16.msra.mxu1 %v11488_v43  ;;  %v11567_v14 = vcombine.high %v170_v8, %v178_v9  ;;  %v186_v16 = vld [vmem:[%s18147_s1 + $0x500] sm:$0xff]  ;;  %v195_v19 = vld [vmem:[%s18147_s1 + $0x548] sm:$0xff]  ;;  %v11566_v20 = vcombine.low %v170_v8, %v178_v9 }
  0x17   :  { %3206 = vmatprep.subr.bf16.mxu0 %v11503_v44  ;;  %3288 = vmatprep.subr.bf16.mxu1 %v11505_v45  ;;  %v194_v17 = vld [vmem:[%s18147_s1 + $0x540] sm:$0xff]  ;;  %v11585_v23 = vcombine.high %v187_v18, %v195_v19  ;;  %v203_v26 = vld [vmem:[%s18147_s1 + $0x588] sm:$0xff]  ;;  %v11584_v29 = vcombine.low %v187_v18, %v195_v19 }
  0x18   :  { %v11583_v22 = vcombine.high %v186_v16, %v194_v17  ;;  %v202_v24 = vld [vmem:[%s18147_s1 + $0x580] sm:$0xff]  ;;  %v211_v27 = vld [vmem:[%s18147_s1 + $0x5c8] sm:$0xff]  ;;  %v11582_v28 = vcombine.low %v186_v16, %v194_v17 }
  0x19   :  { %v210_v25 = vld [vmem:[%s18147_s1 + $0x5c0] sm:$0xff]  ;;  %v11601_v31 = vcombine.high %v203_v26, %v211_v27  ;;  %v219_v34 = vld [vmem:[%s18147_s1 + $0x608] sm:$0xff]  ;;  %v11600_v37 = vcombine.low %v203_v26, %v211_v27 }
  0x1a   :  { %3207 = vmatpush1.bf16.msra.mxu0 %v11502_v50  ;;  %3289 = vmatpush1.bf16.msra.mxu1 %v11504_v51  ;;  %v11599_v30 = vcombine.high %v202_v24, %v210_v25  ;;  %v218_v32 = vld [vmem:[%s18147_s1 + $0x600] sm:$0xff]  ;;  %v227_v35 = vld [vmem:[%s18147_s1 + $0x648] sm:$0xff]  ;;  %v11598_v36 = vcombine.low %v202_v24, %v210_v25 }
  0x1b   :  { %3208 = vmatprep.subr.bf16.mxu0 %v11519_v52  ;;  %3290 = vmatprep.subr.bf16.mxu1 %v11521_v54  ;;  %v226_v33 = vld [vmem:[%s18147_s1 + $0x640] sm:$0xff]  ;;  %v11617_v39 = vcombine.high %v219_v34, %v227_v35  ;;  %v235_v42 = vld [vmem:[%s18147_s1 + $0x688] sm:$0xff]  ;;  %v11616_v45 = vcombine.low %v219_v34, %v227_v35 }
  0x1c   :  { %v11615_v38 = vcombine.high %v218_v32, %v226_v33  ;;  %v234_v40 = vld [vmem:[%s18147_s1 + $0x680] sm:$0xff]  ;;  %v243_v43 = vld [vmem:[%s18147_s1 + $0x6c8] sm:$0xff]  ;;  %v11614_v44 = vcombine.low %v218_v32, %v226_v33 }
  0x1d   :  { %v242_v41 = vld [vmem:[%s18147_s1 + $0x6c0] sm:$0xff]  ;;  %v11633_v47 = vcombine.high %v235_v42, %v243_v43  ;;  %v251_v50 = vld [vmem:[%s18147_s1 + $0x708] sm:$0xff]  ;;  %v11632_v54 = vcombine.low %v235_v42, %v243_v43 }
  0x1e   :  { %3209 = vmatpush1.bf16.msra.mxu0 %v11518_v60  ;;  %3291 = vmatpush1.bf16.msra.mxu1 %v11520_v61  ;;  %v11631_v46 = vcombine.high %v234_v40, %v242_v41  ;;  %v250_v48 = vld [vmem:[%s18147_s1 + $0x700] sm:$0xff]  ;;  %v259_v51 = vld [vmem:[%s18147_s1 + $0x748] sm:$0xff]  ;;  %v11630_v52 = vcombine.low %v234_v40, %v242_v41 }
  0x1f   :  { %3210 = vmatprep.subr.bf16.mxu0 %v11535_v62  ;;  %3292 = vmatprep.subr.bf16.mxu1 %v11537_v63  ;;  %v258_v49 = vld [vmem:[%s18147_s1 + $0x740] sm:$0xff]  ;;  %v11649_v56 = vcombine.high %v251_v50, %v259_v51  ;;  %v267_v60 = vld [vmem:[%s18147_s1 + $0x788] sm:$0xff]  ;;  %v11648_v63 = vcombine.low %v251_v50, %v259_v51 }
  0x20   :  { %v11647_v55 = vcombine.high %v250_v48, %v258_v49  ;;  %v266_v58 = vld [vmem:[%s18147_s1 + $0x780] sm:$0xff]  ;;  %v275_v61 = vld [vmem:[%s18147_s1 + $0x7c8] sm:$0xff]  ;;  %v11646_v62 = vcombine.low %v250_v48, %v258_v49 }
  0x21   :  { %v274_v59 = vld [vmem:[%s18147_s1 + $0x7c0] sm:$0xff]  ;;  %v11665_v1 = vcombine.high %v267_v60, %v275_v61 }
  0x22   :  { %3211 = vmatpush1.bf16.msra.mxu0 %v11534_v4  ;;  %3293 = vmatpush1.bf16.msra.mxu1 %v11536_v5  ;;  %v11663_v0 = vcombine.high %v266_v58, %v274_v59  ;;  %v282_v2 = vld [vmem:[%s18147_s1 + $0x800] sm:$0xff]  ;;  %v283_v4 = vld [vmem:[%s18147_s1 + $0x808] sm:$0xff] }
  0x23   :  { %3212 = vmatprep.subr.bf16.mxu0 %v11551_v6  ;;  %3294 = vmatprep.subr.bf16.mxu1 %v11553_v7  ;;  %v290_v3 = vld [vmem:[%s18147_s1 + $0x840] sm:$0xff]  ;;  %v291_v5 = vld [vmem:[%s18147_s1 + $0x848] sm:$0xff]  ;;  %v11662_v6 = vcombine.low %v266_v58, %v274_v59  ;;  %v11664_v7 = vcombine.low %v267_v60, %v275_v61 }
  0x24   :  { %v11679_v8 = vcombine.high %v282_v2, %v290_v3  ;;  %v11681_v9 = vcombine.high %v283_v4, %v291_v5  ;;  %v298_v10 = vld [vmem:[%s18147_s1 + $0x880] sm:$0xff]  ;;  %v11678_v16 = vcombine.low %v282_v2, %v290_v3 }
  0x25   :  { %v306_v11 = vld [vmem:[%s18147_s1 + $0x8c0] sm:$0xff] }
  0x26   :  { %3213 = vmatpush1.bf16.msra.mxu0 %v11550_v12  ;;  %3295 = vmatpush1.bf16.msra.mxu1 %v11552_v13  ;;  %v13443_v12 = vcombine.low %v13307_v53, %v13307_v53  ;;  %v299_v13 = vld [vmem:[%s18147_s1 + $0x888] sm:$0xff] }
  0x27   :  { %3214 = vmatprep.subr.bf16.mxu0 %v11567_v14  ;;  %3296 = vmatprep.subr.bf16.mxu1 %v11569_v15  ;;  %v307_v14 = vld [vmem:[%s18147_s1 + $0x8c8] sm:$0xff] }
  0x28   :  { %v13454_v15 = vld [vmem:[%s18146_s0 + $0x8] sm:$0xff] }
  0x2a   :  { %3215 = vmatpush1.bf16.msra.mxu0 %v11566_v20  ;;  %3297 = vmatpush1.bf16.msra.mxu1 %v11568_v21 }
  0x2b   :  { %3216 = vmatprep.subr.bf16.mxu0 %v11583_v22  ;;  %3298 = vmatprep.subr.bf16.mxu1 %v11585_v23 }
  0x2e   :  { %3217 = vmatpush1.bf16.msra.mxu0 %v11582_v28  ;;  %3299 = vmatpush1.bf16.msra.mxu1 %v11584_v29 }
  0x2f   :  { %3218 = vmatprep.subr.bf16.mxu0 %v11599_v30  ;;  %3300 = vmatprep.subr.bf16.mxu1 %v11601_v31 }
  0x32   :  { %3219 = vmatpush1.bf16.msra.mxu0 %v11598_v36  ;;  %3301 = vmatpush1.bf16.msra.mxu1 %v11600_v37 }
  0x33   :  { %3220 = vmatprep.subr.bf16.mxu0 %v11615_v38  ;;  %3302 = vmatprep.subr.bf16.mxu1 %v11617_v39 }
  0x36   :  { %3221 = vmatpush1.bf16.msra.mxu0 %v11614_v44  ;;  %3303 = vmatpush1.bf16.msra.mxu1 %v11616_v45 }
  0x37   :  { %3222 = vmatprep.subr.bf16.mxu0 %v11631_v46  ;;  %3304 = vmatprep.subr.bf16.mxu1 %v11633_v47 }
  0x3a   :  { %3223 = vmatpush1.bf16.msra.mxu0 %v11630_v52  ;;  %3305 = vmatpush1.bf16.msra.mxu1 %v11632_v54 }
  0x3b   :  { %3224 = vmatprep.subr.bf16.mxu0 %v11647_v55  ;;  %3306 = vmatprep.subr.bf16.mxu1 %v11649_v56 }
  0x3e   :  { %3225 = vmatpush1.bf16.msra.mxu0 %v11646_v62  ;;  %3307 = vmatpush1.bf16.msra.mxu1 %v11648_v63 }
  0x3f   :  { %3226 = vmatprep.subr.bf16.mxu0 %v11663_v0  ;;  %3308 = vmatprep.subr.bf16.mxu1 %v11665_v1 }
  0x42   :  { %3227 = vmatpush1.bf16.msra.mxu0 %v11662_v6 }
  0x43   :  { %13 = vsyncpa [#allocation5], 0  ;;  %3309 = vmatpush1.bf16.msra.mxu1 %v11664_v7  ;;  %3237 = vmatprep.subr.bf16.mxu0 %v11679_v8  ;;  %v11680_v53 = vcombine.low %v283_v4, %v291_v5  ;;  %v11695_v17 = vcombine.high %v298_v10, %v306_v11  ;;  %v11697_v18 = vcombine.high %v299_v13, %v307_v14  ;;  %v314_v19 = vld [vmem:[%s18147_s1 + $0x900] sm:$0xff]  ;;  %v315_v22 = vld [vmem:[%s18147_s1 + $0x908] sm:$0xff] }
  0x44   :  { %3319 = vmatprep.subr.bf16.mxu1 %v11681_v9  ;;  %v322_v20 = vld [vmem:[%s18147_s1 + $0x940] sm:$0xff]  ;;  %v13464_v21 = vcombine.high %v13454_v15, %v13454_v15  ;;  %v323_v23 = vld [vmem:[%s18147_s1 + $0x948] sm:$0xff]  ;;  %v11694_v24 = vcombine.low %v298_v10, %v306_v11  ;;  %v11696_v25 = vcombine.low %v299_v13, %v307_v14 }
  0x45   :  { %3229 = vmatmul.mubr.bf16.vlgmr.msra.gmra.mrb[0].mxu0 %v13443_v12  ;;  %v11711_v26 = vcombine.high %v314_v19, %v322_v20  ;;  %v11713_v27 = vcombine.high %v315_v22, %v323_v23  ;;  %v330_v28 = vld [vmem:[%s18147_s1 + $0x980] sm:$0xff]  ;;  %v331_v30 = vld [vmem:[%s18147_s1 + $0x988] sm:$0xff]  ;;  %v11710_v32 = vcombine.low %v314_v19, %v322_v20  ;;  %v11712_v33 = vcombine.low %v315_v22, %v323_v23 }
  0x46   :  { %3238 = vmatpush1.bf16.msra.mxu0 %v11678_v16  ;;  %3311 = vmatmul.mubr.bf16.vlgmr.msra.gmra.mrb[0].mxu1 %v13443_v12  ;;  %v338_v29 = vld [vmem:[%s18147_s1 + $0x9c0] sm:$0xff]  ;;  %v339_v31 = vld [vmem:[%s18147_s1 + $0x9c8] sm:$0xff] }
  0x47   :  { %3320 = vmatpush1.bf16.msra.mxu1 %v11680_v53  ;;  %3239 = vmatprep.subr.bf16.mxu0 %v11695_v17  ;;  %v11727_v34 = vcombine.high %v330_v28, %v338_v29  ;;  %v11729_v35 = vcombine.high %v331_v30, %v339_v31  ;;  %v346_v36 = vld [vmem:[%s18147_s1 + $0xa00] sm:$0xff]  ;;  %v347_v38 = vld [vmem:[%s18147_s1 + $0xa08] sm:$0xff]  ;;  %v11726_v40 = vcombine.low %v330_v28, %v338_v29 }
  0x48   :  { %3321 = vmatprep.subr.bf16.mxu1 %v11697_v18  ;;  %3269 = vmatprep.mubr.bf16.mxu0 %v13464_v21  ;;  %v354_v37 = vld [vmem:[%s18147_s1 + $0xa40] sm:$0xff]  ;;  %v355_v39 = vld [vmem:[%s18147_s1 + $0xa48] sm:$0xff]  ;;  %v11728_v41 = vcombine.low %v331_v30, %v339_v31 }
  0x49   :  { %3351 = vmatprep.mubr.bf16.mxu1 %v13464_v21  ;;  %v11743_v42 = vcombine.high %v346_v36, %v354_v37  ;;  %v11745_v43 = vcombine.high %v347_v38, %v355_v39  ;;  %v362_v44 = vld [vmem:[%s18147_s1 + $0xa80] sm:$0xff]  ;;  %v363_v46 = vld [vmem:[%s18147_s1 + $0xa88] sm:$0xff]  ;;  %v11742_v48 = vcombine.low %v346_v36, %v354_v37  ;;  %v11744_v49 = vcombine.low %v347_v38, %v355_v39 }
  0x4a   :  { %3240 = vmatpush1.bf16.msra.mxu0 %v11694_v24  ;;  %v370_v45 = vld [vmem:[%s18147_s1 + $0xac0] sm:$0xff]  ;;  %v371_v47 = vld [vmem:[%s18147_s1 + $0xac8] sm:$0xff] }
  0x4b   :  { %3322 = vmatpush1.bf16.msra.mxu1 %v11696_v25  ;;  %3241 = vmatprep.subr.bf16.mxu0 %v11711_v26  ;;  %v11759_v50 = vcombine.high %v362_v44, %v370_v45  ;;  %v11761_v51 = vcombine.high %v363_v46, %v371_v47  ;;  %v378_v52 = vld [vmem:[%s18147_s1 + $0xb00] sm:$0xff]  ;;  %v379_v55 = vld [vmem:[%s18147_s1 + $0xb08] sm:$0xff]  ;;  %v11758_v58 = vcombine.low %v362_v44, %v370_v45 }
  0x4c   :  { %3323 = vmatprep.subr.bf16.mxu1 %v11713_v27  ;;  %v386_v54 = vld [vmem:[%s18147_s1 + $0xb40] sm:$0xff]  ;;  %v387_v56 = vld [vmem:[%s18147_s1 + $0xb48] sm:$0xff]  ;;  %v11760_v59 = vcombine.low %v363_v46, %v371_v47 }
  0x4d   :  { %v11775_v60 = vcombine.high %v378_v52, %v386_v54  ;;  %v11777_v61 = vcombine.high %v379_v55, %v387_v56  ;;  %v394_v62 = vld [vmem:[%s18147_s1 + $0xb80] sm:$0xff]  ;;  %v395_v0 = vld [vmem:[%s18147_s1 + $0xb88] sm:$0xff]  ;;  %v11774_v2 = vcombine.low %v378_v52, %v386_v54  ;;  %v11776_v3 = vcombine.low %v379_v55, %v387_v56 }
  0x4e   :  { %3242 = vmatpush1.bf16.msra.mxu0 %v11710_v32  ;;  %v402_v63 = vld [vmem:[%s18147_s1 + $0xbc0] sm:$0xff]  ;;  %v403_v1 = vld [vmem:[%s18147_s1 + $0xbc8] sm:$0xff] }
  0x4f   :  { %3324 = vmatpush1.bf16.msra.mxu1 %v11712_v33  ;;  %3243 = vmatprep.subr.bf16.mxu0 %v11727_v34  ;;  %v11791_v4 = vcombine.high %v394_v62, %v402_v63  ;;  %v11793_v5 = vcombine.high %v395_v0, %v403_v1  ;;  %v410_v6 = vld [vmem:[%s18147_s1 + $0xc00] sm:$0xff]  ;;  %v411_v8 = vld [vmem:[%s18147_s1 + $0xc08] sm:$0xff]  ;;  %v11790_v10 = vcombine.low %v394_v62, %v402_v63 }
  0x50   :  { %3325 = vmatprep.subr.bf16.mxu1 %v11729_v35  ;;  %v418_v7 = vld [vmem:[%s18147_s1 + $0xc40] sm:$0xff]  ;;  %v419_v9 = vld [vmem:[%s18147_s1 + $0xc48] sm:$0xff]  ;;  %v11792_v11 = vcombine.low %v395_v0, %v403_v1 }
  0x51   :  { %v11807_v13 = vcombine.high %v410_v6, %v418_v7  ;;  %v11809_v14 = vcombine.high %v411_v8, %v419_v9  ;;  %v426_v16 = vld [vmem:[%s18147_s1 + $0xc80] sm:$0xff]  ;;  %v427_v17 = vld [vmem:[%s18147_s1 + $0xc88] sm:$0xff]  ;;  %v11806_v19 = vcombine.low %v410_v6, %v418_v7  ;;  %v11808_v20 = vcombine.low %v411_v8, %v419_v9 }
  0x52   :  { %3244 = vmatpush1.bf16.msra.mxu0 %v11726_v40  ;;  %v434_v53 = vld [vmem:[%s18147_s1 + $0xcc0] sm:$0xff]  ;;  %v435_v18 = vld [vmem:[%s18147_s1 + $0xcc8] sm:$0xff] }
  0x53   :  { %3326 = vmatpush1.bf16.msra.mxu1 %v11728_v41  ;;  %3245 = vmatprep.subr.bf16.mxu0 %v11743_v42  ;;  %v11823_v22 = vcombine.high %v426_v16, %v434_v53  ;;  %v11825_v23 = vcombine.high %v427_v17, %v435_v18  ;;  %v442_v24 = vld [vmem:[%s18147_s1 + $0xd00] sm:$0xff]  ;;  %v443_v26 = vld [vmem:[%s18147_s1 + $0xd08] sm:$0xff]  ;;  %v11822_v28 = vcombine.low %v426_v16, %v434_v53 }
  0x54   :  { %3327 = vmatprep.subr.bf16.mxu1 %v11745_v43  ;;  %v450_v25 = vld [vmem:[%s18147_s1 + $0xd40] sm:$0xff]  ;;  %v451_v27 = vld [vmem:[%s18147_s1 + $0xd48] sm:$0xff]  ;;  %v11824_v29 = vcombine.low %v427_v17, %v435_v18 }
  0x55   :  { %v11839_v30 = vcombine.high %v442_v24, %v450_v25  ;;  %v11841_v31 = vcombine.high %v443_v26, %v451_v27  ;;  %v458_v32 = vld [vmem:[%s18147_s1 + $0xd80] sm:$0xff]  ;;  %v459_v34 = vld [vmem:[%s18147_s1 + $0xd88] sm:$0xff]  ;;  %v11838_v36 = vcombine.low %v442_v24, %v450_v25  ;;  %v11840_v37 = vcombine.low %v443_v26, %v451_v27  ;;  %v53_v24 = vld [vmem:[%s18147_s1 + $0xd8] sm:$0xff] }
  0x56   :  { %3246 = vmatpush1.bf16.msra.mxu0 %v11742_v48  ;;  %v466_v33 = vld [vmem:[%s18147_s1 + $0xdc0] sm:$0xff]  ;;  %v467_v35 = vld [vmem:[%s18147_s1 + $0xdc8] sm:$0xff] }
  0x57   :  { %3328 = vmatpush1.bf16.msra.mxu1 %v11744_v49  ;;  %3247 = vmatprep.subr.bf16.mxu0 %v11759_v50  ;;  %v11855_v38 = vcombine.high %v458_v32, %v466_v33  ;;  %v11857_v39 = vcombine.high %v459_v34, %v467_v35  ;;  %v474_v40 = vld [vmem:[%s18147_s1 + $0xe00] sm:$0xff]  ;;  %v475_v42 = vld [vmem:[%s18147_s1 + $0xe08] sm:$0xff]  ;;  %v11854_v44 = vcombine.low %v458_v32, %v466_v33 }
  0x58   :  { %3329 = vmatprep.subr.bf16.mxu1 %v11761_v51  ;;  %v482_v41 = vld [vmem:[%s18147_s1 + $0xe40] sm:$0xff]  ;;  %v483_v43 = vld [vmem:[%s18147_s1 + $0xe48] sm:$0xff]  ;;  %v11856_v45 = vcombine.low %v459_v34, %v467_v35 }
  0x59   :  { %v11871_v46 = vcombine.high %v474_v40, %v482_v41  ;;  %v11873_v47 = vcombine.high %v475_v42, %v483_v43  ;;  %v490_v48 = vld [vmem:[%s18147_s1 + $0xe80] sm:$0xff]  ;;  %v491_v50 = vld [vmem:[%s18147_s1 + $0xe88] sm:$0xff]  ;;  %v11870_v52 = vcombine.low %v474_v40, %v482_v41  ;;  %v11872_v54 = vcombine.low %v475_v42, %v483_v43 }
  0x5a   :  { %3248 = vmatpush1.bf16.msra.mxu0 %v11758_v58  ;;  %v498_v49 = vld [vmem:[%s18147_s1 + $0xec0] sm:$0xff]  ;;  %v499_v51 = vld [vmem:[%s18147_s1 + $0xec8] sm:$0xff] }
  0x5b   :  { %3330 = vmatpush1.bf16.msra.mxu1 %v11760_v59  ;;  %3249 = vmatprep.subr.bf16.mxu0 %v11775_v60  ;;  %v11887_v55 = vcombine.high %v490_v48, %v498_v49  ;;  %v11889_v56 = vcombine.high %v491_v50, %v499_v51  ;;  %v506_v58 = vld [vmem:[%s18147_s1 + $0xf00] sm:$0xff]  ;;  %v507_v60 = vld [vmem:[%s18147_s1 + $0xf08] sm:$0xff]  ;;  %v11886_v62 = vcombine.low %v490_v48, %v498_v49 }
  0x5c   :  { %3331 = vmatprep.subr.bf16.mxu1 %v11777_v61  ;;  %v514_v59 = vld [vmem:[%s18147_s1 + $0xf40] sm:$0xff]  ;;  %v515_v61 = vld [vmem:[%s18147_s1 + $0xf48] sm:$0xff]  ;;  %v11888_v63 = vcombine.low %v491_v50, %v499_v51 }
  0x5d   :  { %v11903_v0 = vcombine.high %v506_v58, %v514_v59  ;;  %v11905_v1 = vcombine.high %v507_v60, %v515_v61  ;;  %v11902_v6 = vcombine.low %v506_v58, %v514_v59  ;;  %v11904_v7 = vcombine.low %v507_v60, %v515_v61 }
  0x5e   :  { %3250 = vmatpush1.bf16.msra.mxu0 %v11774_v2  ;;  %v522_v2 = vld [vmem:[%s18147_s1 + $0xf80] sm:$0xff] }
  0x5f   :  { %3332 = vmatpush1.bf16.msra.mxu1 %v11776_v3  ;;  %3251 = vmatprep.subr.bf16.mxu0 %v11791_v4  ;;  %v530_v3 = vld [vmem:[%s18147_s1 + $0xfc0] sm:$0xff]  ;;  %v523_v4 = vld [vmem:[%s18147_s1 + $0xf88] sm:$0xff] }
  0x60   :  { %3333 = vmatprep.subr.bf16.mxu1 %v11793_v5  ;;  %v531_v5 = vld [vmem:[%s18147_s1 + $0xfc8] sm:$0xff]  ;;  %v11919_v8 = vcombine.high %v522_v2, %v530_v3  ;;  %v11918_v16 = vcombine.low %v522_v2, %v530_v3 }
  0x61   :  { %v11921_v9 = vcombine.high %v523_v4, %v531_v5  ;;  %v11920_v53 = vcombine.low %v523_v4, %v531_v5 }
  0x62   :  { %3252 = vmatpush1.bf16.msra.mxu0 %v11790_v10  ;;  %v28_v10 = vld [vmem:[%s18147_s1 + $0x10] sm:$0xff] }
  0x63   :  { %3334 = vmatpush1.bf16.msra.mxu1 %v11792_v11  ;;  %3253 = vmatprep.subr.bf16.mxu0 %v11807_v13  ;;  %v36_v11 = vld [vmem:[%s18147_s1 + $0x50] sm:$0xff]  ;;  %v29_v13 = vld [vmem:[%s18147_s1 + $0x18] sm:$0xff] }
  0x64   :  { %3335 = vmatprep.subr.bf16.mxu1 %v11809_v14  ;;  %v37_v14 = vld [vmem:[%s18147_s1 + $0x58] sm:$0xff]  ;;  %v11427_v17 = vcombine.high %v28_v10, %v36_v11  ;;  %v11426_v25 = vcombine.low %v28_v10, %v36_v11 }
  0x65   :  { %v11429_v18 = vcombine.high %v29_v13, %v37_v14  ;;  %v11428_v26 = vcombine.low %v29_v13, %v37_v14 }
  0x66   :  { %3254 = vmatpush1.bf16.msra.mxu0 %v11806_v19  ;;  %v44_v19 = vld [vmem:[%s18147_s1 + $0x90] sm:$0xff] }
  0x67   :  { %3336 = vmatpush1.bf16.msra.mxu1 %v11808_v20  ;;  %3255 = vmatprep.subr.bf16.mxu0 %v11823_v22  ;;  %v52_v20 = vld [vmem:[%s18147_s1 + $0xd0] sm:$0xff]  ;;  %v13652_v22 = vcombine.low %v13454_v15, %v13454_v15 }
  0x68   :  { %3337 = vmatprep.subr.bf16.mxu1 %v11825_v23  ;;  %v45_v23 = vld [vmem:[%s18147_s1 + $0x98] sm:$0xff]  ;;  %v11443_v27 = vcombine.high %v44_v19, %v52_v20  ;;  %v60_v15 = vld [vmem:[%s18147_s1 + $0x110] sm:$0xff]  ;;  %v11442_v32 = vcombine.low %v44_v19, %v52_v20 }
  0x69   :  { %v11444_v33 = vcombine.low %v45_v23, %v53_v24 }
  0x6a   :  { %3256 = vmatpush1.bf16.msra.mxu0 %v11822_v28  ;;  %v11445_v28 = vcombine.high %v45_v23, %v53_v24 }
  0x6b   :  { %3338 = vmatpush1.bf16.msra.mxu1 %v11824_v29  ;;  %3257 = vmatprep.subr.bf16.mxu0 %v11839_v30  ;;  %v68_v29 = vld [vmem:[%s18147_s1 + $0x150] sm:$0xff]  ;;  %v61_v30 = vld [vmem:[%s18147_s1 + $0x118] sm:$0xff] }
  0x6c   :  { %3339 = vmatprep.subr.bf16.mxu1 %v11841_v31  ;;  %v69_v31 = vld [vmem:[%s18147_s1 + $0x158] sm:$0xff]  ;;  %v11459_v34 = vcombine.high %v60_v15, %v68_v29  ;;  %v11458_v40 = vcombine.low %v60_v15, %v68_v29 }
  0x6d   :  { %v11461_v35 = vcombine.high %v61_v30, %v69_v31  ;;  %v11460_v41 = vcombine.low %v61_v30, %v69_v31 }
  0x6e   :  { %3258 = vmatpush1.bf16.msra.mxu0 %v11838_v36  ;;  %v76_v36 = vld [vmem:[%s18147_s1 + $0x190] sm:$0xff] }
  0x6f   :  { %3340 = vmatpush1.bf16.msra.mxu1 %v11840_v37  ;;  %3259 = vmatprep.subr.bf16.mxu0 %v11855_v38  ;;  %v84_v37 = vld [vmem:[%s18147_s1 + $0x1d0] sm:$0xff]  ;;  %v77_v38 = vld [vmem:[%s18147_s1 + $0x198] sm:$0xff] }
  0x70   :  { %3341 = vmatprep.subr.bf16.mxu1 %v11857_v39  ;;  %v85_v39 = vld [vmem:[%s18147_s1 + $0x1d8] sm:$0xff]  ;;  %v11475_v42 = vcombine.high %v76_v36, %v84_v37  ;;  %v11474_v48 = vcombine.low %v76_v36, %v84_v37 }
  0x71   :  { %v11477_v43 = vcombine.high %v77_v38, %v85_v39  ;;  %v11476_v49 = vcombine.low %v77_v38, %v85_v39 }
  0x72   :  { %3260 = vmatpush1.bf16.msra.mxu0 %v11854_v44  ;;  %v92_v44 = vld [vmem:[%s18147_s1 + $0x210] sm:$0xff] }
  0x73   :  { %3342 = vmatpush1.bf16.msra.mxu1 %v11856_v45  ;;  %3261 = vmatprep.subr.bf16.mxu0 %v11871_v46  ;;  %v100_v45 = vld [vmem:[%s18147_s1 + $0x250] sm:$0xff]  ;;  %v93_v46 = vld [vmem:[%s18147_s1 + $0x218] sm:$0xff] }
  0x74   :  { %3343 = vmatprep.subr.bf16.mxu1 %v11873_v47  ;;  %v101_v47 = vld [vmem:[%s18147_s1 + $0x258] sm:$0xff]  ;;  %v11491_v50 = vcombine.high %v92_v44, %v100_v45  ;;  %v11490_v58 = vcombine.low %v92_v44, %v100_v45 }
  0x75   :  { %v11493_v51 = vcombine.high %v93_v46, %v101_v47  ;;  %v11492_v59 = vcombine.low %v93_v46, %v101_v47 }
  0x76   :  { %3262 = vmatpush1.bf16.msra.mxu0 %v11870_v52  ;;  %v108_v52 = vld [vmem:[%s18147_s1 + $0x290] sm:$0xff] }
  0x77   :  { %3344 = vmatpush1.bf16.msra.mxu1 %v11872_v54  ;;  %3263 = vmatprep.subr.bf16.mxu0 %v11887_v55  ;;  %v116_v54 = vld [vmem:[%s18147_s1 + $0x2d0] sm:$0xff]  ;;  %v109_v55 = vld [vmem:[%s18147_s1 + $0x298] sm:$0xff] }
  0x78   :  { %3345 = vmatprep.subr.bf16.mxu1 %v11889_v56  ;;  %v117_v56 = vld [vmem:[%s18147_s1 + $0x2d8] sm:$0xff]  ;;  %v11507_v60 = vcombine.high %v108_v52, %v116_v54  ;;  %v11506_v2 = vcombine.low %v108_v52, %v116_v54 }
  0x79   :  { %v11509_v61 = vcombine.high %v109_v55, %v117_v56  ;;  %v11508_v3 = vcombine.low %v109_v55, %v117_v56 }
  0x7a   :  { %3264 = vmatpush1.bf16.msra.mxu0 %v11886_v62  ;;  %v124_v62 = vld [vmem:[%s18147_s1 + $0x310] sm:$0xff] }
  0x7b   :  { %3346 = vmatpush1.bf16.msra.mxu1 %v11888_v63  ;;  %3265 = vmatprep.subr.bf16.mxu0 %v11903_v0  ;;  %v132_v63 = vld [vmem:[%s18147_s1 + $0x350] sm:$0xff]  ;;  %v125_v0 = vld [vmem:[%s18147_s1 + $0x318] sm:$0xff] }
  0x7c   :  { %3347 = vmatprep.subr.bf16.mxu1 %v11905_v1  ;;  %v133_v1 = vld [vmem:[%s18147_s1 + $0x358] sm:$0xff]  ;;  %v11523_v4 = vcombine.high %v124_v62, %v132_v63  ;;  %v11522_v10 = vcombine.low %v124_v62, %v132_v63 }
  0x7d   :  { %v11525_v5 = vcombine.high %v125_v0, %v133_v1  ;;  %v11524_v11 = vcombine.low %v125_v0, %v133_v1 }
  0x7e   :  { %3266 = vmatpush1.bf16.msra.mxu0 %v11902_v6  ;;  %v140_v6 = vld [vmem:[%s18147_s1 + $0x390] sm:$0xff] }
  0x7f   :  { %3348 = vmatpush1.bf16.msra.mxu1 %v11904_v7  ;;  %3267 = vmatprep.subr.bf16.mxu0 %v11919_v8  ;;  %v148_v7 = vld [vmem:[%s18147_s1 + $0x3d0] sm:$0xff]  ;;  %v141_v8 = vld [vmem:[%s18147_s1 + $0x398] sm:$0xff] }
  0x80   :  { %3349 = vmatprep.subr.bf16.mxu1 %v11921_v9  ;;  %v149_v9 = vld [vmem:[%s18147_s1 + $0x3d8] sm:$0xff]  ;;  %v11539_v13 = vcombine.high %v140_v6, %v148_v7  ;;  %v11538_v19 = vcombine.low %v140_v6, %v148_v7 }
  0x81   :  { %v11541_v14 = vcombine.high %v141_v8, %v149_v9  ;;  %v11540_v20 = vcombine.low %v141_v8, %v149_v9 }
  0x82   :  { %3268 = vmatpush1.bf16.msra.mxu0 %v11918_v16  ;;  %v156_v16 = vld [vmem:[%s18147_s1 + $0x410] sm:$0xff] }
  0x83   :  { %3350 = vmatpush1.bf16.msra.mxu1 %v11920_v53  ;;  %3360 = vmatprep.subr.bf16.mxu0 %v11427_v17  ;;  %v164_v53 = vld [vmem:[%s18147_s1 + $0x450] sm:$0xff]  ;;  %v157_v17 = vld [vmem:[%s18147_s1 + $0x418] sm:$0xff] }
  0x84   :  { %3442 = vmatprep.subr.bf16.mxu1 %v11429_v18  ;;  %v165_v18 = vld [vmem:[%s18147_s1 + $0x458] sm:$0xff]  ;;  %v11555_v23 = vcombine.high %v156_v16, %v164_v53  ;;  %v11554_v15 = vcombine.low %v156_v16, %v164_v53 }
  0x85   :  { %3270 = vmatmul.mubr.bf16.vlgmr.msra.gmra.mrb[0].mxu0 %v13652_v22  ;;  %v11557_v24 = vcombine.high %v157_v17, %v165_v18  ;;  %v11556_v29 = vcombine.low %v157_v17, %v165_v18 }
  0x86   :  { %3352 = vmatmul.mubr.bf16.vlgmr.msra.gmra.mrb[0].mxu1 %v13652_v22  ;;  %3361 = vmatpush1.bf16.msra.mxu0 %v11426_v25  ;;  %v172_v25 = vld [vmem:[%s18147_s1 + $0x490] sm:$0xff] }
  0x87   :  { %3443 = vmatpush1.bf16.msra.mxu1 %v11428_v26  ;;  %3362 = vmatprep.subr.bf16.mxu0 %v11443_v27  ;;  %v180_v26 = vld [vmem:[%s18147_s1 + $0x4d0] sm:$0xff]  ;;  %v173_v27 = vld [vmem:[%s18147_s1 + $0x498] sm:$0xff] }
  0x88   :  { %3444 = vmatprep.subr.bf16.mxu1 %v11445_v28  ;;  %3392 = vmatprep.mubr.bf16.mxu0 %v13317_v57  ;;  %v181_v28 = vld [vmem:[%s18147_s1 + $0x4d8] sm:$0xff]  ;;  %v11571_v30 = vcombine.high %v172_v25, %v180_v26  ;;  %v11570_v36 = vcombine.low %v172_v25, %v180_v26 }
  0x89   :  { %3474 = vmatprep.mubr.bf16.mxu1 %v13317_v57  ;;  %v11573_v31 = vcombine.high %v173_v27, %v181_v28  ;;  %v11572_v37 = vcombine.low %v173_v27, %v181_v28 }
  0x8a   :  { %3363 = vmatpush1.bf16.msra.mxu0 %v11442_v32  ;;  %v188_v32 = vld [vmem:[%s18147_s1 + $0x510] sm:$0xff] }
  0x8b   :  { %3445 = vmatpush1.bf16.msra.mxu1 %v11444_v33  ;;  %3364 = vmatprep.subr.bf16.mxu0 %v11459_v34  ;;  %v196_v33 = vld [vmem:[%s18147_s1 + $0x550] sm:$0xff]  ;;  %v189_v34 = vld [vmem:[%s18147_s1 + $0x518] sm:$0xff] }
  0x8c   :  { %3446 = vmatprep.subr.bf16.mxu1 %v11461_v35  ;;  %v197_v35 = vld [vmem:[%s18147_s1 + $0x558] sm:$0xff]  ;;  %v11587_v38 = vcombine.high %v188_v32, %v196_v33  ;;  %v11586_v44 = vcombine.low %v188_v32, %v196_v33 }
  0x8d   :  { %v11589_v39 = vcombine.high %v189_v34, %v197_v35  ;;  %v11588_v45 = vcombine.low %v189_v34, %v197_v35 }
  0x8e   :  { %3365 = vmatpush1.bf16.msra.mxu0 %v11458_v40  ;;  %v204_v40 = vld [vmem:[%s18147_s1 + $0x590] sm:$0xff] }
  0x8f   :  { %3447 = vmatpush1.bf16.msra.mxu1 %v11460_v41  ;;  %3366 = vmatprep.subr.bf16.mxu0 %v11475_v42  ;;  %v212_v41 = vld [vmem:[%s18147_s1 + $0x5d0] sm:$0xff]  ;;  %v205_v42 = vld [vmem:[%s18147_s1 + $0x598] sm:$0xff] }
  0x90   :  { %3448 = vmatprep.subr.bf16.mxu1 %v11477_v43  ;;  %v213_v43 = vld [vmem:[%s18147_s1 + $0x5d8] sm:$0xff]  ;;  %v11603_v46 = vcombine.high %v204_v40, %v212_v41  ;;  %v11602_v52 = vcombine.low %v204_v40, %v212_v41 }
  0x91   :  { %v11605_v47 = vcombine.high %v205_v42, %v213_v43  ;;  %v11604_v54 = vcombine.low %v205_v42, %v213_v43 }
  0x92   :  { %3367 = vmatpush1.bf16.msra.mxu0 %v11474_v48  ;;  %v220_v48 = vld [vmem:[%s18147_s1 + $0x610] sm:$0xff] }
  0x93   :  { %3449 = vmatpush1.bf16.msra.mxu1 %v11476_v49  ;;  %3368 = vmatprep.subr.bf16.mxu0 %v11491_v50  ;;  %v228_v49 = vld [vmem:[%s18147_s1 + $0x650] sm:$0xff]  ;;  %v221_v50 = vld [vmem:[%s18147_s1 + $0x618] sm:$0xff] }
  0x94   :  { %3450 = vmatprep.subr.bf16.mxu1 %v11493_v51  ;;  %v229_v51 = vld [vmem:[%s18147_s1 + $0x658] sm:$0xff]  ;;  %v11619_v55 = vcombine.high %v220_v48, %v228_v49  ;;  %v11618_v62 = vcombine.low %v220_v48, %v228_v49 }
  0x95   :  { %v11621_v56 = vcombine.high %v221_v50, %v229_v51  ;;  %v11620_v63 = vcombine.low %v221_v50, %v229_v51 }
  0x96   :  { %3369 = vmatpush1.bf16.msra.mxu0 %v11490_v58  ;;  %v236_v58 = vld [vmem:[%s18147_s1 + $0x690] sm:$0xff] }
  0x97   :  { %3451 = vmatpush1.bf16.msra.mxu1 %v11492_v59  ;;  %3370 = vmatprep.subr.bf16.mxu0 %v11507_v60  ;;  %v244_v59 = vld [vmem:[%s18147_s1 + $0x6d0] sm:$0xff]  ;;  %v237_v60 = vld [vmem:[%s18147_s1 + $0x698] sm:$0xff] }
  0x98   :  { %3452 = vmatprep.subr.bf16.mxu1 %v11509_v61  ;;  %v245_v61 = vld [vmem:[%s18147_s1 + $0x6d8] sm:$0xff]  ;;  %v11635_v0 = vcombine.high %v236_v58, %v244_v59  ;;  %v11634_v6 = vcombine.low %v236_v58, %v244_v59 }
  0x99   :  { %v11637_v1 = vcombine.high %v237_v60, %v245_v61  ;;  %v11636_v7 = vcombine.low %v237_v60, %v245_v61 }
  0x9a   :  { %3371 = vmatpush1.bf16.msra.mxu0 %v11506_v2  ;;  %v252_v2 = vld [vmem:[%s18147_s1 + $0x710] sm:$0xff] }
  0x9b   :  { %3453 = vmatpush1.bf16.msra.mxu1 %v11508_v3  ;;  %3372 = vmatprep.subr.bf16.mxu0 %v11523_v4  ;;  %v260_v3 = vld [vmem:[%s18147_s1 + $0x750] sm:$0xff]  ;;  %v253_v4 = vld [vmem:[%s18147_s1 + $0x718] sm:$0xff] }
  0x9c   :  { %3454 = vmatprep.subr.bf16.mxu1 %v11525_v5  ;;  %v261_v5 = vld [vmem:[%s18147_s1 + $0x758] sm:$0xff]  ;;  %v11651_v8 = vcombine.high %v252_v2, %v260_v3  ;;  %v11650_v16 = vcombine.low %v252_v2, %v260_v3 }
  0x9d   :  { %v11653_v9 = vcombine.high %v253_v4, %v261_v5  ;;  %v11652_v53 = vcombine.low %v253_v4, %v261_v5 }
  0x9e   :  { %3373 = vmatpush1.bf16.msra.mxu0 %v11522_v10  ;;  %v268_v10 = vld [vmem:[%s18147_s1 + $0x790] sm:$0xff] }
  0x9f   :  { %3455 = vmatpush1.bf16.msra.mxu1 %v11524_v11  ;;  %3374 = vmatprep.subr.bf16.mxu0 %v11539_v13  ;;  %v276_v11 = vld [vmem:[%s18147_s1 + $0x7d0] sm:$0xff]  ;;  %v269_v13 = vld [vmem:[%s18147_s1 + $0x798] sm:$0xff] }
  0xa0   :  { %3456 = vmatprep.subr.bf16.mxu1 %v11541_v14  ;;  %v277_v14 = vld [vmem:[%s18147_s1 + $0x7d8] sm:$0xff]  ;;  %v11667_v17 = vcombine.high %v268_v10, %v276_v11  ;;  %v11666_v25 = vcombine.low %v268_v10, %v276_v11 }
  0xa1   :  { %v11669_v18 = vcombine.high %v269_v13, %v277_v14  ;;  %v11668_v26 = vcombine.low %v269_v13, %v277_v14 }
  0xa2   :  { %3375 = vmatpush1.bf16.msra.mxu0 %v11538_v19  ;;  %v284_v19 = vld [vmem:[%s18147_s1 + $0x810] sm:$0xff] }
  0xa3   :  { %3457 = vmatpush1.bf16.msra.mxu1 %v11540_v20  ;;  %3376 = vmatprep.subr.bf16.mxu0 %v11555_v23  ;;  %v292_v20 = vld [vmem:[%s18147_s1 + $0x850] sm:$0xff]  ;;  %v285_v23 = vld [vmem:[%s18147_s1 + $0x818] sm:$0xff] }
  0xa4   :  { %3458 = vmatprep.subr.bf16.mxu1 %v11557_v24  ;;  %v293_v24 = vld [vmem:[%s18147_s1 + $0x858] sm:$0xff]  ;;  %v11683_v27 = vcombine.high %v284_v19, %v292_v20  ;;  %v11682_v32 = vcombine.low %v284_v19, %v292_v20 }
  0xa5   :  { %v11685_v28 = vcombine.high %v285_v23, %v293_v24  ;;  %v11684_v33 = vcombine.low %v285_v23, %v293_v24 }
  0xa6   :  { %3377 = vmatpush1.bf16.msra.mxu0 %v11554_v15  ;;  %v300_v15 = vld [vmem:[%s18147_s1 + $0x890] sm:$0xff] }
  0xa7   :  { %3459 = vmatpush1.bf16.msra.mxu1 %v11556_v29  ;;  %3378 = vmatprep.subr.bf16.mxu0 %v11571_v30  ;;  %v308_v29 = vld [vmem:[%s18147_s1 + $0x8d0] sm:$0xff]  ;;  %v301_v30 = vld [vmem:[%s18147_s1 + $0x898] sm:$0xff] }
  0xa8   :  { %3460 = vmatprep.subr.bf16.mxu1 %v11573_v31  ;;  %v309_v31 = vld [vmem:[%s18147_s1 + $0x8d8] sm:$0xff]  ;;  %v11699_v34 = vcombine.high %v300_v15, %v308_v29  ;;  %v11698_v40 = vcombine.low %v300_v15, %v308_v29 }
  0xa9   :  { %v11701_v35 = vcombine.high %v301_v30, %v309_v31  ;;  %v11700_v41 = vcombine.low %v301_v30, %v309_v31 }
  0xaa   :  { %3379 = vmatpush1.bf16.msra.mxu0 %v11570_v36  ;;  %v316_v36 = vld [vmem:[%s18147_s1 + $0x910] sm:$0xff] }
  0xab   :  { %3461 = vmatpush1.bf16.msra.mxu1 %v11572_v37  ;;  %3380 = vmatprep.subr.bf16.mxu0 %v11587_v38  ;;  %v324_v37 = vld [vmem:[%s18147_s1 + $0x950] sm:$0xff]  ;;  %v317_v38 = vld [vmem:[%s18147_s1 + $0x918] sm:$0xff] }
  0xac   :  { %3462 = vmatprep.subr.bf16.mxu1 %v11589_v39  ;;  %v325_v39 = vld [vmem:[%s18147_s1 + $0x958] sm:$0xff]  ;;  %v11715_v42 = vcombine.high %v316_v36, %v324_v37  ;;  %v11714_v48 = vcombine.low %v316_v36, %v324_v37 }
  0xad   :  { %v11717_v43 = vcombine.high %v317_v38, %v325_v39  ;;  %v11716_v49 = vcombine.low %v317_v38, %v325_v39 }
  0xae   :  { %3381 = vmatpush1.bf16.msra.mxu0 %v11586_v44  ;;  %v332_v44 = vld [vmem:[%s18147_s1 + $0x990] sm:$0xff] }
  0xaf   :  { %3463 = vmatpush1.bf16.msra.mxu1 %v11588_v45  ;;  %3382 = vmatprep.subr.bf16.mxu0 %v11603_v46  ;;  %v340_v45 = vld [vmem:[%s18147_s1 + $0x9d0] sm:$0xff]  ;;  %v333_v46 = vld [vmem:[%s18147_s1 + $0x998] sm:$0xff] }
  0xb0   :  { %3464 = vmatprep.subr.bf16.mxu1 %v11605_v47  ;;  %v341_v47 = vld [vmem:[%s18147_s1 + $0x9d8] sm:$0xff]  ;;  %v11731_v50 = vcombine.high %v332_v44, %v340_v45  ;;  %v11730_v58 = vcombine.low %v332_v44, %v340_v45 }
  0xb1   :  { %v11733_v51 = vcombine.high %v333_v46, %v341_v47  ;;  %v11732_v59 = vcombine.low %v333_v46, %v341_v47 }
  0xb2   :  { %3383 = vmatpush1.bf16.msra.mxu0 %v11602_v52  ;;  %v348_v52 = vld [vmem:[%s18147_s1 + $0xa10] sm:$0xff] }
  0xb3   :  { %3465 = vmatpush1.bf16.msra.mxu1 %v11604_v54  ;;  %3384 = vmatprep.subr.bf16.mxu0 %v11619_v55  ;;  %v356_v54 = vld [vmem:[%s18147_s1 + $0xa50] sm:$0xff]  ;;  %v349_v55 = vld [vmem:[%s18147_s1 + $0xa18] sm:$0xff] }
  0xb4   :  { %3466 = vmatprep.subr.bf16.mxu1 %v11621_v56  ;;  %v357_v56 = vld [vmem:[%s18147_s1 + $0xa58] sm:$0xff]  ;;  %v11747_v60 = vcombine.high %v348_v52, %v356_v54  ;;  %v11746_v2 = vcombine.low %v348_v52, %v356_v54 }
  0xb5   :  { %v11749_v61 = vcombine.high %v349_v55, %v357_v56  ;;  %v11748_v3 = vcombine.low %v349_v55, %v357_v56 }
  0xb6   :  { %3385 = vmatpush1.bf16.msra.mxu0 %v11618_v62  ;;  %v364_v62 = vld [vmem:[%s18147_s1 + $0xa90] sm:$0xff] }
  0xb7   :  { %3467 = vmatpush1.bf16.msra.mxu1 %v11620_v63  ;;  %3386 = vmatprep.subr.bf16.mxu0 %v11635_v0  ;;  %v372_v63 = vld [vmem:[%s18147_s1 + $0xad0] sm:$0xff]  ;;  %v365_v0 = vld [vmem:[%s18147_s1 + $0xa98] sm:$0xff] }
  0xb8   :  { %3468 = vmatprep.subr.bf16.mxu1 %v11637_v1  ;;  %v373_v1 = vld [vmem:[%s18147_s1 + $0xad8] sm:$0xff]  ;;  %v11763_v4 = vcombine.high %v364_v62, %v372_v63  ;;  %v11762_v10 = vcombine.low %v364_v62, %v372_v63 }
  0xb9   :  { %v11765_v5 = vcombine.high %v365_v0, %v373_v1  ;;  %v11764_v11 = vcombine.low %v365_v0, %v373_v1 }
  0xba   :  { %3387 = vmatpush1.bf16.msra.mxu0 %v11634_v6  ;;  %v380_v6 = vld [vmem:[%s18147_s1 + $0xb10] sm:$0xff] }
  0xbb   :  { %3469 = vmatpush1.bf16.msra.mxu1 %v11636_v7  ;;  %3388 = vmatprep.subr.bf16.mxu0 %v11651_v8  ;;  %v388_v7 = vld [vmem:[%s18147_s1 + $0xb50] sm:$0xff]  ;;  %v381_v8 = vld [vmem:[%s18147_s1 + $0xb18] sm:$0xff] }
  0xbc   :  { %3470 = vmatprep.subr.bf16.mxu1 %v11653_v9  ;;  %v389_v9 = vld [vmem:[%s18147_s1 + $0xb58] sm:$0xff]  ;;  %v11779_v13 = vcombine.high %v380_v6, %v388_v7  ;;  %v11778_v19 = vcombine.low %v380_v6, %v388_v7 }
  0xbd   :  { %v11781_v14 = vcombine.high %v381_v8, %v389_v9  ;;  %v11780_v20 = vcombine.low %v381_v8, %v389_v9 }
  0xbe   :  { %3389 = vmatpush1.bf16.msra.mxu0 %v11650_v16  ;;  %v396_v16 = vld [vmem:[%s18147_s1 + $0xb90] sm:$0xff] }
  0xbf   :  { %3471 = vmatpush1.bf16.msra.mxu1 %v11652_v53  ;;  %3390 = vmatprep.subr.bf16.mxu0 %v11667_v17  ;;  %v404_v53 = vld [vmem:[%s18147_s1 + $0xbd0] sm:$0xff]  ;;  %v397_v17 = vld [vmem:[%s18147_s1 + $0xb98] sm:$0xff] }
  0xc0   :  { %3472 = vmatprep.subr.bf16.mxu1 %v11669_v18  ;;  %v405_v18 = vld [vmem:[%s18147_s1 + $0xbd8] sm:$0xff]  ;;  %v11795_v23 = vcombine.high %v396_v16, %v404_v53  ;;  %v11794_v15 = vcombine.low %v396_v16, %v404_v53 }
  0xc1   :  { %v11797_v24 = vcombine.high %v397_v17, %v405_v18  ;;  %v11796_v29 = vcombine.low %v397_v17, %v405_v18 }
  0xc2   :  { %3391 = vmatpush1.bf16.msra.mxu0 %v11666_v25  ;;  %v412_v25 = vld [vmem:[%s18147_s1 + $0xc10] sm:$0xff] }
  0xc3   :  { %3473 = vmatpush1.bf16.msra.mxu1 %v11668_v26  ;;  %3401 = vmatprep.subr.bf16.mxu0 %v11683_v27  ;;  %v420_v26 = vld [vmem:[%s18147_s1 + $0xc50] sm:$0xff]  ;;  %v413_v27 = vld [vmem:[%s18147_s1 + $0xc18] sm:$0xff] }
  0xc4   :  { %3483 = vmatprep.subr.bf16.mxu1 %v11685_v28  ;;  %v421_v28 = vld [vmem:[%s18147_s1 + $0xc58] sm:$0xff]  ;;  %v11811_v30 = vcombine.high %v412_v25, %v420_v26  ;;  %v11810_v36 = vcombine.low %v412_v25, %v420_v26 }
  0xc5   :  { %3393 = vmatmul.mubr.bf16.vlgmr.msra.gmra.mrb[4].mxu0 %v13443_v12  ;;  %v11813_v31 = vcombine.high %v413_v27, %v421_v28  ;;  %v11812_v37 = vcombine.low %v413_v27, %v421_v28 }
  0xc6   :  { %3402 = vmatpush1.bf16.msra.mxu0 %v11682_v32  ;;  %3475 = vmatmul.mubr.bf16.vlgmr.msra.gmra.mrb[4].mxu1 %v13443_v12  ;;  %v428_v32 = vld [vmem:[%s18147_s1 + $0xc90] sm:$0xff] }
  0xc7   :  { %3484 = vmatpush1.bf16.msra.mxu1 %v11684_v33  ;;  %3403 = vmatprep.subr.bf16.mxu0 %v11699_v34  ;;  %v436_v33 = vld [vmem:[%s18147_s1 + $0xcd0] sm:$0xff]  ;;  %v429_v34 = vld [vmem:[%s18147_s1 + $0xc98] sm:$0xff] }
  0xc8   :  { %3485 = vmatprep.subr.bf16.mxu1 %v11701_v35  ;;  %3433 = vmatprep.mubr.bf16.mxu0 %v13464_v21  ;;  %v437_v35 = vld [vmem:[%s18147_s1 + $0xcd8] sm:$0xff]  ;;  %v11827_v38 = vcombine.high %v428_v32, %v436_v33  ;;  %v11826_v44 = vcombine.low %v428_v32, %v436_v33 }
  0xc9   :  { %3515 = vmatprep.mubr.bf16.mxu1 %v13464_v21  ;;  %v11829_v39 = vcombine.high %v429_v34, %v437_v35  ;;  %v11828_v45 = vcombine.low %v429_v34, %v437_v35 }
  0xca   :  { %3404 = vmatpush1.bf16.msra.mxu0 %v11698_v40  ;;  %v444_v40 = vld [vmem:[%s18147_s1 + $0xd10] sm:$0xff] }
  0xcb   :  { %3486 = vmatpush1.bf16.msra.mxu1 %v11700_v41  ;;  %3405 = vmatprep.subr.bf16.mxu0 %v11715_v42  ;;  %v452_v41 = vld [vmem:[%s18147_s1 + $0xd50] sm:$0xff]  ;;  %v445_v42 = vld [vmem:[%s18147_s1 + $0xd18] sm:$0xff] }
  0xcc   :  { %3487 = vmatprep.subr.bf16.mxu1 %v11717_v43  ;;  %v453_v43 = vld [vmem:[%s18147_s1 + $0xd58] sm:$0xff]  ;;  %v11843_v46 = vcombine.high %v444_v40, %v452_v41  ;;  %v11842_v52 = vcombine.low %v444_v40, %v452_v41 }
  0xcd   :  { %v11845_v47 = vcombine.high %v445_v42, %v453_v43  ;;  %v11844_v54 = vcombine.low %v445_v42, %v453_v43 }
  0xce   :  { %3406 = vmatpush1.bf16.msra.mxu0 %v11714_v48  ;;  %v460_v48 = vld [vmem:[%s18147_s1 + $0xd90] sm:$0xff] }
  0xcf   :  { %3488 = vmatpush1.bf16.msra.mxu1 %v11716_v49  ;;  %3407 = vmatprep.subr.bf16.mxu0 %v11731_v50  ;;  %v468_v49 = vld [vmem:[%s18147_s1 + $0xdd0] sm:$0xff]  ;;  %v461_v50 = vld [vmem:[%s18147_s1 + $0xd98] sm:$0xff] }
  0xd0   :  { %3489 = vmatprep.subr.bf16.mxu1 %v11733_v51  ;;  %v469_v51 = vld [vmem:[%s18147_s1 + $0xdd8] sm:$0xff]  ;;  %v11859_v55 = vcombine.high %v460_v48, %v468_v49  ;;  %v11858_v62 = vcombine.low %v460_v48, %v468_v49 }
  0xd1   :  { %v11861_v56 = vcombine.high %v461_v50, %v469_v51  ;;  %v11860_v63 = vcombine.low %v461_v50, %v469_v51 }
  0xd2   :  { %3408 = vmatpush1.bf16.msra.mxu0 %v11730_v58  ;;  %v476_v58 = vld [vmem:[%s18147_s1 + $0xe10] sm:$0xff] }
  0xd3   :  { %3490 = vmatpush1.bf16.msra.mxu1 %v11732_v59  ;;  %3409 = vmatprep.subr.bf16.mxu0 %v11747_v60  ;;  %v484_v59 = vld [vmem:[%s18147_s1 + $0xe50] sm:$0xff]  ;;  %v477_v60 = vld [vmem:[%s18147_s1 + $0xe18] sm:$0xff] }
  0xd4   :  { %3491 = vmatprep.subr.bf16.mxu1 %v11749_v61  ;;  %v485_v61 = vld [vmem:[%s18147_s1 + $0xe58] sm:$0xff]  ;;  %v11875_v0 = vcombine.high %v476_v58, %v484_v59  ;;  %v11874_v6 = vcombine.low %v476_v58, %v484_v59 }
  0xd5   :  { %v11877_v1 = vcombine.high %v477_v60, %v485_v61  ;;  %v11876_v7 = vcombine.low %v477_v60, %v485_v61 }
  0xd6   :  { %3410 = vmatpush1.bf16.msra.mxu0 %v11746_v2  ;;  %v492_v2 = vld [vmem:[%s18147_s1 + $0xe90] sm:$0xff] }
  0xd7   :  { %3492 = vmatpush1.bf16.msra.mxu1 %v11748_v3  ;;  %3411 = vmatprep.subr.bf16.mxu0 %v11763_v4  ;;  %v500_v3 = vld [vmem:[%s18147_s1 + $0xed0] sm:$0xff]  ;;  %v493_v4 = vld [vmem:[%s18147_s1 + $0xe98] sm:$0xff] }
  0xd8   :  { %3493 = vmatprep.subr.bf16.mxu1 %v11765_v5  ;;  %v501_v5 = vld [vmem:[%s18147_s1 + $0xed8] sm:$0xff]  ;;  %v11891_v8 = vcombine.high %v492_v2, %v500_v3  ;;  %v11890_v16 = vcombine.low %v492_v2, %v500_v3 }
  0xd9   :  { %v11893_v9 = vcombine.high %v493_v4, %v501_v5  ;;  %v11892_v53 = vcombine.low %v493_v4, %v501_v5 }
  0xda   :  { %3412 = vmatpush1.bf16.msra.mxu0 %v11762_v10  ;;  %v508_v10 = vld [vmem:[%s18147_s1 + $0xf10] sm:$0xff] }
  0xdb   :  { %3494 = vmatpush1.bf16.msra.mxu1 %v11764_v11  ;;  %3413 = vmatprep.subr.bf16.mxu0 %v11779_v13  ;;  %v516_v11 = vld [vmem:[%s18147_s1 + $0xf50] sm:$0xff]  ;;  %v509_v13 = vld [vmem:[%s18147_s1 + $0xf18] sm:$0xff] }
  0xdc   :  { %3495 = vmatprep.subr.bf16.mxu1 %v11781_v14  ;;  %v517_v14 = vld [vmem:[%s18147_s1 + $0xf58] sm:$0xff]  ;;  %v11907_v17 = vcombine.high %v508_v10, %v516_v11  ;;  %v11906_v25 = vcombine.low %v508_v10, %v516_v11 }
  0xdd   :  { %v11909_v18 = vcombine.high %v509_v13, %v517_v14  ;;  %v11908_v26 = vcombine.low %v509_v13, %v517_v14 }
  0xde   :  { %3414 = vmatpush1.bf16.msra.mxu0 %v11778_v19  ;;  %v524_v19 = vld [vmem:[%s18147_s1 + $0xf90] sm:$0xff] }
  0xdf   :  { %3496 = vmatpush1.bf16.msra.mxu1 %v11780_v20  ;;  %3415 = vmatprep.subr.bf16.mxu0 %v11795_v23  ;;  %v532_v20 = vld [vmem:[%s18147_s1 + $0xfd0] sm:$0xff]  ;;  %v525_v23 = vld [vmem:[%s18147_s1 + $0xf98] sm:$0xff] }
  0xe0   :  { %3497 = vmatprep.subr.bf16.mxu1 %v11797_v24  ;;  %v533_v24 = vld [vmem:[%s18147_s1 + $0xfd8] sm:$0xff]  ;;  %v11923_v27 = vcombine.high %v524_v19, %v532_v20  ;;  %v11922_v32 = vcombine.low %v524_v19, %v532_v20 }
  0xe1   :  { %v11925_v28 = vcombine.high %v525_v23, %v533_v24  ;;  %v11924_v33 = vcombine.low %v525_v23, %v533_v24 }
  0xe2   :  { %3416 = vmatpush1.bf16.msra.mxu0 %v11794_v15  ;;  %v30_v15 = vld [vmem:[%s18147_s1 + $0x20] sm:$0xff] }
  0xe3   :  { %3498 = vmatpush1.bf16.msra.mxu1 %v11796_v29  ;;  %3417 = vmatprep.subr.bf16.mxu0 %v11811_v30  ;;  %v38_v29 = vld [vmem:[%s18147_s1 + $0x60] sm:$0xff]  ;;  %v31_v30 = vld [vmem:[%s18147_s1 + $0x28] sm:$0xff] }
  0xe4   :  { %3499 = vmatprep.subr.bf16.mxu1 %v11813_v31  ;;  %v39_v31 = vld [vmem:[%s18147_s1 + $0x68] sm:$0xff]  ;;  %v11431_v34 = vcombine.high %v30_v15, %v38_v29  ;;  %v11430_v40 = vcombine.low %v30_v15, %v38_v29 }
  0xe5   :  { %v11433_v35 = vcombine.high %v31_v30, %v39_v31  ;;  %v11432_v41 = vcombine.low %v31_v30, %v39_v31 }
  0xe6   :  { %3418 = vmatpush1.bf16.msra.mxu0 %v11810_v36  ;;  %v46_v36 = vld [vmem:[%s18147_s1 + $0xa0] sm:$0xff] }
  0xe7   :  { %3500 = vmatpush1.bf16.msra.mxu1 %v11812_v37  ;;  %3419 = vmatprep.subr.bf16.mxu0 %v11827_v38  ;;  %v54_v37 = vld [vmem:[%s18147_s1 + $0xe0] sm:$0xff]  ;;  %v47_v38 = vld [vmem:[%s18147_s1 + $0xa8] sm:$0xff] }
  0xe8   :  { %3501 = vmatprep.subr.bf16.mxu1 %v11829_v39  ;;  %v55_v39 = vld [vmem:[%s18147_s1 + $0xe8] sm:$0xff]  ;;  %v11447_v42 = vcombine.high %v46_v36, %v54_v37  ;;  %v11446_v48 = vcombine.low %v46_v36, %v54_v37 }
  0xe9   :  { %v11449_v43 = vcombine.high %v47_v38, %v55_v39  ;;  %v11448_v49 = vcombine.low %v47_v38, %v55_v39 }
  0xea   :  { %3420 = vmatpush1.bf16.msra.mxu0 %v11826_v44  ;;  %v62_v44 = vld [vmem:[%s18147_s1 + $0x120] sm:$0xff] }
  0xeb   :  { %3502 = vmatpush1.bf16.msra.mxu1 %v11828_v45  ;;  %3421 = vmatprep.subr.bf16.mxu0 %v11843_v46  ;;  %v70_v45 = vld [vmem:[%s18147_s1 + $0x160] sm:$0xff]  ;;  %v63_v46 = vld [vmem:[%s18147_s1 + $0x128] sm:$0xff] }
  0xec   :  { %3503 = vmatprep.subr.bf16.mxu1 %v11845_v47  ;;  %v71_v47 = vld [vmem:[%s18147_s1 + $0x168] sm:$0xff]  ;;  %v11463_v50 = vcombine.high %v62_v44, %v70_v45  ;;  %v11462_v58 = vcombine.low %v62_v44, %v70_v45 }
  0xed   :  { %v11465_v51 = vcombine.high %v63_v46, %v71_v47  ;;  %v11464_v59 = vcombine.low %v63_v46, %v71_v47 }
  0xee   :  { %3422 = vmatpush1.bf16.msra.mxu0 %v11842_v52  ;;  %v78_v52 = vld [vmem:[%s18147_s1 + $0x1a0] sm:$0xff] }
  0xef   :  { %3504 = vmatpush1.bf16.msra.mxu1 %v11844_v54  ;;  %3423 = vmatprep.subr.bf16.mxu0 %v11859_v55  ;;  %v86_v54 = vld [vmem:[%s18147_s1 + $0x1e0] sm:$0xff]  ;;  %v79_v55 = vld [vmem:[%s18147_s1 + $0x1a8] sm:$0xff] }
  0xf0   :  { %3505 = vmatprep.subr.bf16.mxu1 %v11861_v56  ;;  %v87_v56 = vld [vmem:[%s18147_s1 + $0x1e8] sm:$0xff]  ;;  %v11479_v60 = vcombine.high %v78_v52, %v86_v54  ;;  %v11478_v2 = vcombine.low %v78_v52, %v86_v54 }
  0xf1   :  { %v11481_v61 = vcombine.high %v79_v55, %v87_v56  ;;  %v11480_v3 = vcombine.low %v79_v55, %v87_v56 }
  0xf2   :  { %3424 = vmatpush1.bf16.msra.mxu0 %v11858_v62  ;;  %v94_v62 = vld [vmem:[%s18147_s1 + $0x220] sm:$0xff] }
  0xf3   :  { %3506 = vmatpush1.bf16.msra.mxu1 %v11860_v63  ;;  %3425 = vmatprep.subr.bf16.mxu0 %v11875_v0  ;;  %v102_v63 = vld [vmem:[%s18147_s1 + $0x260] sm:$0xff]  ;;  %v95_v0 = vld [vmem:[%s18147_s1 + $0x228] sm:$0xff] }
  0xf4   :  { %3507 = vmatprep.subr.bf16.mxu1 %v11877_v1  ;;  %v103_v1 = vld [vmem:[%s18147_s1 + $0x268] sm:$0xff]  ;;  %v11495_v4 = vcombine.high %v94_v62, %v102_v63  ;;  %v11494_v10 = vcombine.low %v94_v62, %v102_v63 }
  0xf5   :  { %v11497_v5 = vcombine.high %v95_v0, %v103_v1  ;;  %v11496_v11 = vcombine.low %v95_v0, %v103_v1 }
  0xf6   :  { %3426 = vmatpush1.bf16.msra.mxu0 %v11874_v6  ;;  %v110_v6 = vld [vmem:[%s18147_s1 + $0x2a0] sm:$0xff] }
  0xf7   :  { %3508 = vmatpush1.bf16.msra.mxu1 %v11876_v7  ;;  %3427 = vmatprep.subr.bf16.mxu0 %v11891_v8  ;;  %v118_v7 = vld [vmem:[%s18147_s1 + $0x2e0] sm:$0xff]  ;;  %v111_v8 = vld [vmem:[%s18147_s1 + $0x2a8] sm:$0xff] }
  0xf8   :  { %3509 = vmatprep.subr.bf16.mxu1 %v11893_v9  ;;  %v119_v9 = vld [vmem:[%s18147_s1 + $0x2e8] sm:$0xff]  ;;  %v11511_v13 = vcombine.high %v110_v6, %v118_v7  ;;  %v11510_v19 = vcombine.low %v110_v6, %v118_v7 }
  0xf9   :  { %v11513_v14 = vcombine.high %v111_v8, %v119_v9  ;;  %v11512_v20 = vcombine.low %v111_v8, %v119_v9 }
  0xfa   :  { %3428 = vmatpush1.bf16.msra.mxu0 %v11890_v16  ;;  %v126_v16 = vld [vmem:[%s18147_s1 + $0x320] sm:$0xff] }
  0xfb   :  { %3510 = vmatpush1.bf16.msra.mxu1 %v11892_v53  ;;  %3429 = vmatprep.subr.bf16.mxu0 %v11907_v17  ;;  %v134_v53 = vld [vmem:[%s18147_s1 + $0x360] sm:$0xff]  ;;  %v127_v17 = vld [vmem:[%s18147_s1 + $0x328] sm:$0xff] }
  0xfc   :  { %3511 = vmatprep.subr.bf16.mxu1 %v11909_v18  ;;  %v135_v18 = vld [vmem:[%s18147_s1 + $0x368] sm:$0xff]  ;;  %v11527_v23 = vcombine.high %v126_v16, %v134_v53  ;;  %v11526_v15 = vcombine.low %v126_v16, %v134_v53 }
  0xfd   :  { %v11529_v24 = vcombine.high %v127_v17, %v135_v18  ;;  %v11528_v29 = vcombine.low %v127_v17, %v135_v18 }
  0xfe   :  { %3430 = vmatpush1.bf16.msra.mxu0 %v11906_v25  ;;  %v142_v25 = vld [vmem:[%s18147_s1 + $0x3a0] sm:$0xff] }
  0xff   :  { %3512 = vmatpush1.bf16.msra.mxu1 %v11908_v26  ;;  %3431 = vmatprep.subr.bf16.mxu0 %v11923_v27  ;;  %v150_v26 = vld [vmem:[%s18147_s1 + $0x3e0] sm:$0xff]  ;;  %v143_v27 = vld [vmem:[%s18147_s1 + $0x3a8] sm:$0xff] }
 0x100   :  { %3513 = vmatprep.subr.bf16.mxu1 %v11925_v28  ;;  %v151_v28 = vld [vmem:[%s18147_s1 + $0x3e8] sm:$0xff]  ;;  %v11543_v30 = vcombine.high %v142_v25, %v150_v26  ;;  %v11542_v36 = vcombine.low %v142_v25, %v150_v26 }
 0x101   :  { %v11545_v31 = vcombine.high %v143_v27, %v151_v28  ;;  %v11544_v37 = vcombine.low %v143_v27, %v151_v28 }
 0x102   :  { %3432 = vmatpush1.bf16.msra.mxu0 %v11922_v32  ;;  %v158_v32 = vld [vmem:[%s18147_s1 + $0x420] sm:$0xff] }
 0x103   :  { %3514 = vmatpush1.bf16.msra.mxu1 %v11924_v33  ;;  %3524 = vmatprep.subr.bf16.mxu0 %v11431_v34  ;;  %v166_v33 = vld [vmem:[%s18147_s1 + $0x460] sm:$0xff]  ;;  %v159_v34 = vld [vmem:[%s18147_s1 + $0x428] sm:$0xff] }
 0x104   :  { %3606 = vmatprep.subr.bf16.mxu1 %v11433_v35  ;;  %v167_v35 = vld [vmem:[%s18147_s1 + $0x468] sm:$0xff]  ;;  %v11559_v38 = vcombine.high %v158_v32, %v166_v33  ;;  %v11558_v44 = vcombine.low %v158_v32, %v166_v33 }
 0x105   :  { %3434 = vmatmul.mubr.bf16.vlgmr.msra.gmra.mrb[4].mxu0 %v13652_v22  ;;  %v11561_v39 = vcombine.high %v159_v34, %v167_v35  ;;  %v11560_v45 = vcombine.low %v159_v34, %v167_v35 }
 0x106   :  { %3516 = vmatmul.mubr.bf16.vlgmr.msra.gmra.mrb[4].mxu1 %v13652_v22  ;;  %3525 = vmatpush1.bf16.msra.mxu0 %v11430_v40  ;;  %v174_v40 = vld [vmem:[%s18147_s1 + $0x4a0] sm:$0xff] }
 0x107   :  { %3607 = vmatpush1.bf16.msra.mxu1 %v11432_v41  ;;  %3526 = vmatprep.subr.bf16.mxu0 %v11447_v42  ;;  %v182_v41 = vld [vmem:[%s18147_s1 + $0x4e0] sm:$0xff]  ;;  %v175_v42 = vld [vmem:[%s18147_s1 + $0x4a8] sm:$0xff] }
 0x108   :  { %3608 = vmatprep.subr.bf16.mxu1 %v11449_v43  ;;  %3556 = vmatprep.mubr.bf16.mxu0 %v13317_v57  ;;  %v183_v43 = vld [vmem:[%s18147_s1 + $0x4e8] sm:$0xff]  ;;  %v11575_v46 = vcombine.high %v174_v40, %v182_v41  ;;  %v11574_v52 = vcombine.low %v174_v40, %v182_v41 }
 0x109   :  { %3638 = vmatprep.mubr.bf16.mxu1 %v13317_v57  ;;  %v11577_v47 = vcombine.high %v175_v42, %v183_v43  ;;  %v11576_v54 = vcombine.low %v175_v42, %v183_v43 }
 0x10a   :  { %3527 = vmatpush1.bf16.msra.mxu0 %v11446_v48  ;;  %v190_v48 = vld [vmem:[%s18147_s1 + $0x520] sm:$0xff] }
 0x10b   :  { %3609 = vmatpush1.bf16.msra.mxu1 %v11448_v49  ;;  %3528 = vmatprep.subr.bf16.mxu0 %v11463_v50  ;;  %v198_v49 = vld [vmem:[%s18147_s1 + $0x560] sm:$0xff]  ;;  %v191_v50 = vld [vmem:[%s18147_s1 + $0x528] sm:$0xff] }
 0x10c   :  { %3610 = vmatprep.subr.bf16.mxu1 %v11465_v51  ;;  %v199_v51 = vld [vmem:[%s18147_s1 + $0x568] sm:$0xff]  ;;  %v11591_v55 = vcombine.high %v190_v48, %v198_v49  ;;  %v11590_v62 = vcombine.low %v190_v48, %v198_v49 }
 0x10d   :  { %v11593_v56 = vcombine.high %v191_v50, %v199_v51  ;;  %v11592_v63 = vcombine.low %v191_v50, %v199_v51 }
 0x10e   :  { %3529 = vmatpush1.bf16.msra.mxu0 %v11462_v58  ;;  %v206_v58 = vld [vmem:[%s18147_s1 + $0x5a0] sm:$0xff] }
 0x10f   :  { %3611 = vmatpush1.bf16.msra.mxu1 %v11464_v59  ;;  %3530 = vmatprep.subr.bf16.mxu0 %v11479_v60  ;;  %v214_v59 = vld [vmem:[%s18147_s1 + $0x5e0] sm:$0xff]  ;;  %v207_v60 = vld [vmem:[%s18147_s1 + $0x5a8] sm:$0xff] }
 0x110   :  { %3612 = vmatprep.subr.bf16.mxu1 %v11481_v61  ;;  %v215_v61 = vld [vmem:[%s18147_s1 + $0x5e8] sm:$0xff]  ;;  %v11607_v0 = vcombine.high %v206_v58, %v214_v59  ;;  %v11606_v6 = vcombine.low %v206_v58, %v214_v59 }
 0x111   :  { %v11609_v1 = vcombine.high %v207_v60, %v215_v61  ;;  %v11608_v7 = vcombine.low %v207_v60, %v215_v61 }
 0x112   :  { %3531 = vmatpush1.bf16.msra.mxu0 %v11478_v2  ;;  %v222_v2 = vld [vmem:[%s18147_s1 + $0x620] sm:$0xff] }
 0x113   :  { %3613 = vmatpush1.bf16.msra.mxu1 %v11480_v3  ;;  %3532 = vmatprep.subr.bf16.mxu0 %v11495_v4  ;;  %v230_v3 = vld [vmem:[%s18147_s1 + $0x660] sm:$0xff]  ;;  %v223_v4 = vld [vmem:[%s18147_s1 + $0x628] sm:$0xff] }
 0x114   :  { %3614 = vmatprep.subr.bf16.mxu1 %v11497_v5  ;;  %v231_v5 = vld [vmem:[%s18147_s1 + $0x668] sm:$0xff]  ;;  %v11623_v8 = vcombine.high %v222_v2, %v230_v3  ;;  %v11622_v16 = vcombine.low %v222_v2, %v230_v3 }
 0x115   :  { %v11625_v9 = vcombine.high %v223_v4, %v231_v5  ;;  %v11624_v53 = vcombine.low %v223_v4, %v231_v5 }
 0x116   :  { %3533 = vmatpush1.bf16.msra.mxu0 %v11494_v10  ;;  %v238_v10 = vld [vmem:[%s18147_s1 + $0x6a0] sm:$0xff] }
 0x117   :  { %3615 = vmatpush1.bf16.msra.mxu1 %v11496_v11  ;;  %3534 = vmatprep.subr.bf16.mxu0 %v11511_v13  ;;  %v246_v11 = vld [vmem:[%s18147_s1 + $0x6e0] sm:$0xff]  ;;  %v239_v13 = vld [vmem:[%s18147_s1 + $0x6a8] sm:$0xff] }
 0x118   :  { %3616 = vmatprep.subr.bf16.mxu1 %v11513_v14  ;;  %v247_v14 = vld [vmem:[%s18147_s1 + $0x6e8] sm:$0xff]  ;;  %v11639_v17 = vcombine.high %v238_v10, %v246_v11  ;;  %v11638_v25 = vcombine.low %v238_v10, %v246_v11 }
 0x119   :  { %v11641_v18 = vcombine.high %v239_v13, %v247_v14  ;;  %v11640_v26 = vcombine.low %v239_v13, %v247_v14 }
 0x11a   :  { %3535 = vmatpush1.bf16.msra.mxu0 %v11510_v19  ;;  %v254_v19 = vld [vmem:[%s18147_s1 + $0x720] sm:$0xff] }
 0x11b   :  { %3617 = vmatpush1.bf16.msra.mxu1 %v11512_v20  ;;  %3536 = vmatprep.subr.bf16.mxu0 %v11527_v23  ;;  %v262_v20 = vld [vmem:[%s18147_s1 + $0x760] sm:$0xff]  ;;  %v255_v23 = vld [vmem:[%s18147_s1 + $0x728] sm:$0xff] }
 0x11c   :  { %3618 = vmatprep.subr.bf16.mxu1 %v11529_v24  ;;  %v263_v24 = vld [vmem:[%s18147_s1 + $0x768] sm:$0xff]  ;;  %v11655_v27 = vcombine.high %v254_v19, %v262_v20  ;;  %v11654_v32 = vcombine.low %v254_v19, %v262_v20 }
 0x11d   :  { %v11657_v28 = vcombine.high %v255_v23, %v263_v24  ;;  %v11656_v33 = vcombine.low %v255_v23, %v263_v24 }
 0x11e   :  { %3537 = vmatpush1.bf16.msra.mxu0 %v11526_v15  ;;  %v270_v15 = vld [vmem:[%s18147_s1 + $0x7a0] sm:$0xff] }
 0x11f   :  { %3619 = vmatpush1.bf16.msra.mxu1 %v11528_v29  ;;  %3538 = vmatprep.subr.bf16.mxu0 %v11543_v30  ;;  %v278_v29 = vld [vmem:[%s18147_s1 + $0x7e0] sm:$0xff]  ;;  %v271_v30 = vld [vmem:[%s18147_s1 + $0x7a8] sm:$0xff] }
 0x120   :  { %3620 = vmatprep.subr.bf16.mxu1 %v11545_v31  ;;  %v279_v31 = vld [vmem:[%s18147_s1 + $0x7e8] sm:$0xff]  ;;  %v11671_v34 = vcombine.high %v270_v15, %v278_v29  ;;  %v11670_v40 = vcombine.low %v270_v15, %v278_v29 }
 0x121   :  { %v11673_v35 = vcombine.high %v271_v30, %v279_v31  ;;  %v11672_v41 = vcombine.low %v271_v30, %v279_v31 }
 0x122   :  { %3539 = vmatpush1.bf16.msra.mxu0 %v11542_v36  ;;  %v286_v36 = vld [vmem:[%s18147_s1 + $0x820] sm:$0xff] }
 0x123   :  { %3621 = vmatpush1.bf16.msra.mxu1 %v11544_v37  ;;  %3540 = vmatprep.subr.bf16.mxu0 %v11559_v38  ;;  %v294_v37 = vld [vmem:[%s18147_s1 + $0x860] sm:$0xff]  ;;  %v287_v38 = vld [vmem:[%s18147_s1 + $0x828] sm:$0xff] }
 0x124   :  { %3622 = vmatprep.subr.bf16.mxu1 %v11561_v39  ;;  %v295_v39 = vld [vmem:[%s18147_s1 + $0x868] sm:$0xff]  ;;  %v11687_v42 = vcombine.high %v286_v36, %v294_v37  ;;  %v11686_v48 = vcombine.low %v286_v36, %v294_v37 }
 0x125   :  { %v11689_v43 = vcombine.high %v287_v38, %v295_v39  ;;  %v11688_v49 = vcombine.low %v287_v38, %v295_v39  ;;  %v399_v37 = vld [vmem:[%s18147_s1 + $0xba8] sm:$0xff] }
 0x126   :  { %3541 = vmatpush1.bf16.msra.mxu0 %v11558_v44  ;;  %v302_v44 = vld [vmem:[%s18147_s1 + $0x8a0] sm:$0xff]  ;;  %v407_v38 = vld [vmem:[%s18147_s1 + $0xbe8] sm:$0xff] }
 0x127   :  { %3623 = vmatpush1.bf16.msra.mxu1 %v11560_v45  ;;  %3542 = vmatprep.subr.bf16.mxu0 %v11575_v46  ;;  %v310_v45 = vld [vmem:[%s18147_s1 + $0x8e0] sm:$0xff]  ;;  %v303_v46 = vld [vmem:[%s18147_s1 + $0x8a8] sm:$0xff] }
 0x128   :  { %3624 = vmatprep.subr.bf16.mxu1 %v11577_v47  ;;  %v311_v47 = vld [vmem:[%s18147_s1 + $0x8e8] sm:$0xff]  ;;  %v11703_v50 = vcombine.high %v302_v44, %v310_v45  ;;  %v11702_v58 = vcombine.low %v302_v44, %v310_v45 }
 0x129   :  { %v11705_v51 = vcombine.high %v303_v46, %v311_v47  ;;  %v11704_v59 = vcombine.low %v303_v46, %v311_v47  ;;  %v11801_v47 = vcombine.high %v399_v37, %v407_v38 }
 0x12a   :  { %3543 = vmatpush1.bf16.msra.mxu0 %v11574_v52  ;;  %v318_v52 = vld [vmem:[%s18147_s1 + $0x920] sm:$0xff] }
 0x12b   :  { %3625 = vmatpush1.bf16.msra.mxu1 %v11576_v54  ;;  %3544 = vmatprep.subr.bf16.mxu0 %v11591_v55  ;;  %v326_v54 = vld [vmem:[%s18147_s1 + $0x960] sm:$0xff]  ;;  %v319_v55 = vld [vmem:[%s18147_s1 + $0x928] sm:$0xff] }
 0x12c   :  { %3626 = vmatprep.subr.bf16.mxu1 %v11593_v56  ;;  %v327_v56 = vld [vmem:[%s18147_s1 + $0x968] sm:$0xff]  ;;  %v11719_v60 = vcombine.high %v318_v52, %v326_v54  ;;  %v11718_v2 = vcombine.low %v318_v52, %v326_v54  ;;  %v11800_v54 = vcombine.low %v399_v37, %v407_v38 }
 0x12d   :  { %v11721_v61 = vcombine.high %v319_v55, %v327_v56  ;;  %v11720_v3 = vcombine.low %v319_v55, %v327_v56 }
 0x12e   :  { %3545 = vmatpush1.bf16.msra.mxu0 %v11590_v62  ;;  %v334_v62 = vld [vmem:[%s18147_s1 + $0x9a0] sm:$0xff] }
 0x12f   :  { %3627 = vmatpush1.bf16.msra.mxu1 %v11592_v63  ;;  %3546 = vmatprep.subr.bf16.mxu0 %v11607_v0  ;;  %v342_v63 = vld [vmem:[%s18147_s1 + $0x9e0] sm:$0xff]  ;;  %v335_v0 = vld [vmem:[%s18147_s1 + $0x9a8] sm:$0xff] }
 0x130   :  { %3628 = vmatprep.subr.bf16.mxu1 %v11609_v1  ;;  %v343_v1 = vld [vmem:[%s18147_s1 + $0x9e8] sm:$0xff]  ;;  %v11735_v4 = vcombine.high %v334_v62, %v342_v63  ;;  %v11734_v10 = vcombine.low %v334_v62, %v342_v63 }
 0x131   :  { %v11737_v5 = vcombine.high %v335_v0, %v343_v1  ;;  %v11736_v11 = vcombine.low %v335_v0, %v343_v1 }
 0x132   :  { %3547 = vmatpush1.bf16.msra.mxu0 %v11606_v6  ;;  %v350_v6 = vld [vmem:[%s18147_s1 + $0xa20] sm:$0xff] }
 0x133   :  { %3629 = vmatpush1.bf16.msra.mxu1 %v11608_v7  ;;  %3548 = vmatprep.subr.bf16.mxu0 %v11623_v8  ;;  %v358_v7 = vld [vmem:[%s18147_s1 + $0xa60] sm:$0xff]  ;;  %v351_v8 = vld [vmem:[%s18147_s1 + $0xa28] sm:$0xff] }
 0x134   :  { %3630 = vmatprep.subr.bf16.mxu1 %v11625_v9  ;;  %v359_v9 = vld [vmem:[%s18147_s1 + $0xa68] sm:$0xff]  ;;  %v11751_v13 = vcombine.high %v350_v6, %v358_v7  ;;  %v11750_v19 = vcombine.low %v350_v6, %v358_v7 }
 0x135   :  { %v11753_v14 = vcombine.high %v351_v8, %v359_v9  ;;  %v11752_v20 = vcombine.low %v351_v8, %v359_v9 }
 0x136   :  { %3549 = vmatpush1.bf16.msra.mxu0 %v11622_v16  ;;  %v366_v16 = vld [vmem:[%s18147_s1 + $0xaa0] sm:$0xff] }
 0x137   :  { %3631 = vmatpush1.bf16.msra.mxu1 %v11624_v53  ;;  %3550 = vmatprep.subr.bf16.mxu0 %v11639_v17  ;;  %v374_v53 = vld [vmem:[%s18147_s1 + $0xae0] sm:$0xff]  ;;  %v367_v17 = vld [vmem:[%s18147_s1 + $0xaa8] sm:$0xff] }
 0x138   :  { %3632 = vmatprep.subr.bf16.mxu1 %v11641_v18  ;;  %v375_v18 = vld [vmem:[%s18147_s1 + $0xae8] sm:$0xff]  ;;  %v11767_v23 = vcombine.high %v366_v16, %v374_v53  ;;  %v11766_v15 = vcombine.low %v366_v16, %v374_v53 }
 0x139   :  { %v11769_v24 = vcombine.high %v367_v17, %v375_v18  ;;  %v11768_v29 = vcombine.low %v367_v17, %v375_v18 }
 0x13a   :  { %3551 = vmatpush1.bf16.msra.mxu0 %v11638_v25  ;;  %v382_v25 = vld [vmem:[%s18147_s1 + $0xb20] sm:$0xff] }
 0x13b   :  { %3633 = vmatpush1.bf16.msra.mxu1 %v11640_v26  ;;  %3552 = vmatprep.subr.bf16.mxu0 %v11655_v27  ;;  %v390_v26 = vld [vmem:[%s18147_s1 + $0xb60] sm:$0xff]  ;;  %v383_v27 = vld [vmem:[%s18147_s1 + $0xb28] sm:$0xff] }
 0x13c   :  { %3634 = vmatprep.subr.bf16.mxu1 %v11657_v28  ;;  %v391_v28 = vld [vmem:[%s18147_s1 + $0xb68] sm:$0xff]  ;;  %v11783_v30 = vcombine.high %v382_v25, %v390_v26 }
 0x13d   :  { %v11784_v44 = vcombine.low %v383_v27, %v391_v28 }
 0x13e   :  { %3553 = vmatpush1.bf16.msra.mxu0 %v11654_v32  ;;  %v11785_v32 = vcombine.high %v383_v27, %v391_v28 }
 0x13f   :  { %3635 = vmatpush1.bf16.msra.mxu1 %v11656_v33  ;;  %3554 = vmatprep.subr.bf16.mxu0 %v11671_v34  ;;  %v398_v33 = vld [vmem:[%s18147_s1 + $0xba0] sm:$0xff] }
 0x140   :  { %3636 = vmatprep.subr.bf16.mxu1 %v11673_v35  ;;  %v406_v34 = vld [vmem:[%s18147_s1 + $0xbe0] sm:$0xff] }
 0x141   :  { %v11799_v45 = vcombine.high %v398_v33, %v406_v34  ;;  %v11798_v52 = vcombine.low %v398_v33, %v406_v34 }
 0x142   :  { %3555 = vmatpush1.bf16.msra.mxu0 %v11670_v40 }
 0x143   :  { %3637 = vmatpush1.bf16.msra.mxu1 %v11672_v41  ;;  %3565 = vmatprep.subr.bf16.mxu0 %v11687_v42  ;;  %v11782_v41 = vcombine.low %v382_v25, %v390_v26 }
 0x144   :  { %3647 = vmatprep.subr.bf16.mxu1 %v11689_v43 }
 0x145   :  { %3557 = vmatmul.mubr.bf16.vlgmr.msra.gmra.mrb[8].mxu0 %v13443_v12 }
 0x146   :  { %3566 = vmatpush1.bf16.msra.mxu0 %v11686_v48  ;;  %3639 = vmatmul.mubr.bf16.vlgmr.msra.gmra.mrb[8].mxu1 %v13443_v12  ;;  %v414_v48 = vld [vmem:[%s18147_s1 + $0xc20] sm:$0xff] }
 0x147   :  { %3648 = vmatpush1.bf16.msra.mxu1 %v11688_v49  ;;  %3567 = vmatprep.subr.bf16.mxu0 %v11703_v50  ;;  %v422_v49 = vld [vmem:[%s18147_s1 + $0xc60] sm:$0xff]  ;;  %v415_v50 = vld [vmem:[%s18147_s1 + $0xc28] sm:$0xff] }
 0x148   :  { %3649 = vmatprep.subr.bf16.mxu1 %v11705_v51  ;;  %3597 = vmatprep.mubr.bf16.mxu0 %v13464_v21  ;;  %v423_v51 = vld [vmem:[%s18147_s1 + $0xc68] sm:$0xff]  ;;  %v11815_v55 = vcombine.high %v414_v48, %v422_v49  ;;  %v11814_v62 = vcombine.low %v414_v48, %v422_v49  ;;  %v526_v48 = vld [vmem:[%s18147_s1 + $0xfa0] sm:$0xff] }
 0x149   :  { %3679 = vmatprep.mubr.bf16.mxu1 %v13464_v21  ;;  %v11817_v56 = vcombine.high %v415_v50, %v423_v51  ;;  %v11816_v63 = vcombine.low %v415_v50, %v423_v51  ;;  %v534_v49 = vld [vmem:[%s18147_s1 + $0xfe0] sm:$0xff]  ;;  %v527_v50 = vld [vmem:[%s18147_s1 + $0xfa8] sm:$0xff] }
 0x14a   :  { %3568 = vmatpush1.bf16.msra.mxu0 %v11702_v58  ;;  %v430_v58 = vld [vmem:[%s18147_s1 + $0xca0] sm:$0xff]  ;;  %v535_v51 = vld [vmem:[%s18147_s1 + $0xfe8] sm:$0xff] }
 0x14b   :  { %3650 = vmatpush1.bf16.msra.mxu1 %v11704_v59  ;;  %3569 = vmatprep.subr.bf16.mxu0 %v11719_v60  ;;  %v438_v59 = vld [vmem:[%s18147_s1 + $0xce0] sm:$0xff]  ;;  %v431_v60 = vld [vmem:[%s18147_s1 + $0xca8] sm:$0xff] }
 0x14c   :  { %3651 = vmatprep.subr.bf16.mxu1 %v11721_v61  ;;  %v439_v61 = vld [vmem:[%s18147_s1 + $0xce8] sm:$0xff]  ;;  %v11831_v0 = vcombine.high %v430_v58, %v438_v59  ;;  %v11830_v6 = vcombine.low %v430_v58, %v438_v59  ;;  %v32_v58 = vld [vmem:[%s18147_s1 + $0x30] sm:$0xff] }
 0x14d   :  { %v11833_v1 = vcombine.high %v431_v60, %v439_v61  ;;  %v11832_v7 = vcombine.low %v431_v60, %v439_v61  ;;  %v40_v59 = vld [vmem:[%s18147_s1 + $0x70] sm:$0xff]  ;;  %v33_v60 = vld [vmem:[%s18147_s1 + $0x38] sm:$0xff] }
 0x14e   :  { %3570 = vmatpush1.bf16.msra.mxu0 %v11718_v2  ;;  %v446_v2 = vld [vmem:[%s18147_s1 + $0xd20] sm:$0xff]  ;;  %v41_v61 = vld [vmem:[%s18147_s1 + $0x78] sm:$0xff] }
 0x14f   :  { %3652 = vmatpush1.bf16.msra.mxu1 %v11720_v3  ;;  %3571 = vmatprep.subr.bf16.mxu0 %v11735_v4  ;;  %v454_v3 = vld [vmem:[%s18147_s1 + $0xd60] sm:$0xff]  ;;  %v447_v4 = vld [vmem:[%s18147_s1 + $0xd28] sm:$0xff] }
 0x150   :  { %3653 = vmatprep.subr.bf16.mxu1 %v11737_v5  ;;  %v455_v5 = vld [vmem:[%s18147_s1 + $0xd68] sm:$0xff]  ;;  %v11847_v8 = vcombine.high %v446_v2, %v454_v3  ;;  %v11846_v16 = vcombine.low %v446_v2, %v454_v3  ;;  %v48_v2 = vld [vmem:[%s18147_s1 + $0xb0] sm:$0xff] }
 0x151   :  { %v11849_v9 = vcombine.high %v447_v4, %v455_v5  ;;  %v11848_v53 = vcombine.low %v447_v4, %v455_v5  ;;  %v56_v3 = vld [vmem:[%s18147_s1 + $0xf0] sm:$0xff]  ;;  %v49_v4 = vld [vmem:[%s18147_s1 + $0xb8] sm:$0xff] }
 0x152   :  { %3572 = vmatpush1.bf16.msra.mxu0 %v11734_v10  ;;  %v462_v10 = vld [vmem:[%s18147_s1 + $0xda0] sm:$0xff]  ;;  %v57_v5 = vld [vmem:[%s18147_s1 + $0xf8] sm:$0xff] }
 0x153   :  { %3654 = vmatpush1.bf16.msra.mxu1 %v11736_v11  ;;  %3573 = vmatprep.subr.bf16.mxu0 %v11751_v13  ;;  %v470_v11 = vld [vmem:[%s18147_s1 + $0xde0] sm:$0xff]  ;;  %v463_v13 = vld [vmem:[%s18147_s1 + $0xda8] sm:$0xff] }
 0x154   :  { %3655 = vmatprep.subr.bf16.mxu1 %v11753_v14  ;;  %v471_v14 = vld [vmem:[%s18147_s1 + $0xde8] sm:$0xff]  ;;  %v11863_v17 = vcombine.high %v462_v10, %v470_v11  ;;  %v11862_v25 = vcombine.low %v462_v10, %v470_v11  ;;  %v64_v10 = vld [vmem:[%s18147_s1 + $0x130] sm:$0xff] }
 0x155   :  { %v11865_v18 = vcombine.high %v463_v13, %v471_v14  ;;  %v11864_v26 = vcombine.low %v463_v13, %v471_v14  ;;  %v72_v11 = vld [vmem:[%s18147_s1 + $0x170] sm:$0xff]  ;;  %v65_v13 = vld [vmem:[%s18147_s1 + $0x138] sm:$0xff] }
 0x156   :  { %3574 = vmatpush1.bf16.msra.mxu0 %v11750_v19  ;;  %v478_v19 = vld [vmem:[%s18147_s1 + $0xe20] sm:$0xff]  ;;  %v73_v14 = vld [vmem:[%s18147_s1 + $0x178] sm:$0xff] }
 0x157   :  { %3656 = vmatpush1.bf16.msra.mxu1 %v11752_v20  ;;  %3575 = vmatprep.subr.bf16.mxu0 %v11767_v23  ;;  %v486_v20 = vld [vmem:[%s18147_s1 + $0xe60] sm:$0xff]  ;;  %v479_v23 = vld [vmem:[%s18147_s1 + $0xe28] sm:$0xff] }
 0x158   :  { %v14312_v31 = vpop.f32.mrb[0].mxu0  ;;  %3657 = vmatprep.subr.bf16.mxu1 %v11769_v24  ;;  %v487_v24 = vld [vmem:[%s18147_s1 + $0xe68] sm:$0xff]  ;;  %v11879_v27 = vcombine.high %v478_v19, %v486_v20  ;;  %v11878_v33 = vcombine.low %v478_v19, %v486_v20  ;;  %v80_v19 = vld [vmem:[%s18147_s1 + $0x1b0] sm:$0xff] }
 0x159   :  { %v14320_v35 = vpop.f32.mrb[0].mxu1  ;;  %v14322_v36 = vpop.f32.mrb[1].mxu0  ;;  %v11881_v28 = vcombine.high %v479_v23, %v487_v24  ;;  %v11880_v34 = vcombine.low %v479_v23, %v487_v24  ;;  %v88_v20 = vld [vmem:[%s18147_s1 + $0x1f0] sm:$0xff]  ;;  %v81_v23 = vld [vmem:[%s18147_s1 + $0x1b8] sm:$0xff] }
 0x15a   :  { %v14330_v39 = vpop.f32.mrb[1].mxu1  ;;  %v3275_v40 = vpop.f32.mrb[2].mxu0  ;;  %3576 = vmatpush1.bf16.msra.mxu0 %v11766_v15  ;;  %v494_v15 = vld [vmem:[%s18147_s1 + $0xea0] sm:$0xff]  ;;  %v89_v24 = vld [vmem:[%s18147_s1 + $0x1f8] sm:$0xff] }
 0x15b   :  { %v3357_v42 = vpop.f32.mrb[2].mxu1  ;;  %3658 = vmatpush1.bf16.msra.mxu1 %v11768_v29  ;;  %v3276_v43 = vpop.f32.mrb[3].mxu0  ;;  %3577 = vmatprep.subr.bf16.mxu0 %v11783_v30  ;;  %v502_v29 = vld [vmem:[%s18147_s1 + $0xee0] sm:$0xff]  ;;  %v495_v30 = vld [vmem:[%s18147_s1 + $0xea8] sm:$0xff] }
 0x15c   :  { %v3358_v46 = vpop.f32.mrb[3].mxu1  ;;  %3659 = vmatprep.subr.bf16.mxu1 %v11785_v32  ;;  %v503_v32 = vld [vmem:[%s18147_s1 + $0xee8] sm:$0xff]  ;;  %v11895_v37 = vcombine.high %v494_v15, %v502_v29  ;;  %v510_v40 = vld [vmem:[%s18147_s1 + $0xf20] sm:$0xff] }
 0x15d   :  { %v11897_v38 = vcombine.high %v495_v30, %v503_v32  ;;  %v511_v42 = vld [vmem:[%s18147_s1 + $0xf28] sm:$0xff] }
 0x15e   :  { %3578 = vmatpush1.bf16.msra.mxu0 %v11782_v41  ;;  %v518_v41 = vld [vmem:[%s18147_s1 + $0xf60] sm:$0xff]  ;;  %v519_v43 = vld [vmem:[%s18147_s1 + $0xf68] sm:$0xff] }
 0x15f   :  { %3660 = vmatpush1.bf16.msra.mxu1 %v11784_v44  ;;  %3579 = vmatprep.subr.bf16.mxu0 %v11799_v45  ;;  %v11894_v44 = vcombine.low %v494_v15, %v502_v29  ;;  %v11896_v45 = vcombine.low %v495_v30, %v503_v32  ;;  %v11911_v46 = vcombine.high %v510_v40, %v518_v41  ;;  %v96_v15 = vld [vmem:[%s18147_s1 + $0x230] sm:$0xff]  ;;  %v105_v30 = vld [vmem:[%s18147_s1 + $0x278] sm:$0xff] }
 0x160   :  { %3661 = vmatprep.subr.bf16.mxu1 %v11801_v47  ;;  %v11913_v47 = vcombine.high %v511_v42, %v519_v43  ;;  %v104_v29 = vld [vmem:[%s18147_s1 + $0x270] sm:$0xff]  ;;  %v11482_v32 = vcombine.low %v80_v19, %v88_v20 }
 0x162   :  { %3580 = vmatpush1.bf16.msra.mxu0 %v11798_v52  ;;  %v11910_v52 = vcombine.low %v510_v40, %v518_v41  ;;  %v120_v40 = vld [vmem:[%s18147_s1 + $0x2f0] sm:$0xff]  ;;  %v113_v41 = vld [vmem:[%s18147_s1 + $0x2b8] sm:$0xff] }
 0x163   :  { %3662 = vmatpush1.bf16.msra.mxu1 %v11800_v54  ;;  %3581 = vmatprep.subr.bf16.mxu0 %v11815_v55  ;;  %v11912_v54 = vcombine.low %v511_v42, %v519_v43  ;;  %v11927_v55 = vcombine.high %v526_v48, %v534_v49  ;;  %v121_v42 = vld [vmem:[%s18147_s1 + $0x2f8] sm:$0xff]  ;;  %v11498_v43 = vcombine.low %v96_v15, %v104_v29 }
 0x164   :  { %3663 = vmatprep.subr.bf16.mxu1 %v11817_v56  ;;  %v11929_v56 = vcombine.high %v527_v50, %v535_v51 }
 0x166   :  { %3582 = vmatpush1.bf16.msra.mxu0 %v11814_v62  ;;  %v11926_v62 = vcombine.low %v526_v48, %v534_v49  ;;  %v136_v48 = vld [vmem:[%s18147_s1 + $0x370] sm:$0xff]  ;;  %v129_v49 = vld [vmem:[%s18147_s1 + $0x338] sm:$0xff] }
 0x167   :  { %3664 = vmatpush1.bf16.msra.mxu1 %v11816_v63  ;;  %3583 = vmatprep.subr.bf16.mxu0 %v11831_v0  ;;  %v11928_v63 = vcombine.low %v527_v50, %v535_v51  ;;  %v11435_v0 = vcombine.high %v32_v58, %v40_v59  ;;  %v137_v50 = vld [vmem:[%s18147_s1 + $0x378] sm:$0xff] }
 0x168   :  { %3665 = vmatprep.subr.bf16.mxu1 %v11833_v1  ;;  %v11437_v1 = vcombine.high %v33_v60, %v41_v61 }
 0x16a   :  { %3584 = vmatpush1.bf16.msra.mxu0 %v11830_v6  ;;  %v11434_v6 = vcombine.low %v32_v58, %v40_v59  ;;  %v152_v58 = vld [vmem:[%s18147_s1 + $0x3f0] sm:$0xff]  ;;  %v145_v59 = vld [vmem:[%s18147_s1 + $0x3b8] sm:$0xff] }
 0x16b   :  { %3666 = vmatpush1.bf16.msra.mxu1 %v11832_v7  ;;  %3585 = vmatprep.subr.bf16.mxu0 %v11847_v8  ;;  %v11436_v7 = vcombine.low %v33_v60, %v41_v61  ;;  %v11451_v8 = vcombine.high %v48_v2, %v56_v3  ;;  %v153_v60 = vld [vmem:[%s18147_s1 + $0x3f8] sm:$0xff] }
 0x16c   :  { %3667 = vmatprep.subr.bf16.mxu1 %v11849_v9  ;;  %v11453_v9 = vcombine.high %v49_v4, %v57_v5 }
 0x16e   :  { %3586 = vmatpush1.bf16.msra.mxu0 %v11846_v16  ;;  %v11450_v16 = vcombine.low %v48_v2, %v56_v3  ;;  %v168_v2 = vld [vmem:[%s18147_s1 + $0x470] sm:$0xff]  ;;  %v161_v3 = vld [vmem:[%s18147_s1 + $0x438] sm:$0xff] }
 0x16f   :  { %3668 = vmatpush1.bf16.msra.mxu1 %v11848_v53  ;;  %3587 = vmatprep.subr.bf16.mxu0 %v11863_v17  ;;  %v11452_v53 = vcombine.low %v49_v4, %v57_v5  ;;  %v11467_v17 = vcombine.high %v64_v10, %v72_v11  ;;  %v169_v4 = vld [vmem:[%s18147_s1 + $0x478] sm:$0xff] }
 0x170   :  { %3669 = vmatprep.subr.bf16.mxu1 %v11865_v18  ;;  %v11469_v18 = vcombine.high %v65_v13, %v73_v14 }
 0x172   :  { %3588 = vmatpush1.bf16.msra.mxu0 %v11862_v25  ;;  %v11466_v25 = vcombine.low %v64_v10, %v72_v11  ;;  %v184_v10 = vld [vmem:[%s18147_s1 + $0x4f0] sm:$0xff]  ;;  %v177_v11 = vld [vmem:[%s18147_s1 + $0x4b8] sm:$0xff] }
 0x173   :  { %3670 = vmatpush1.bf16.msra.mxu1 %v11864_v26  ;;  %3589 = vmatprep.subr.bf16.mxu0 %v11879_v27  ;;  %v11468_v26 = vcombine.low %v65_v13, %v73_v14  ;;  %v11483_v27 = vcombine.high %v80_v19, %v88_v20  ;;  %v185_v13 = vld [vmem:[%s18147_s1 + $0x4f8] sm:$0xff]  ;;  %v200_v19 = vld [vmem:[%s18147_s1 + $0x570] sm:$0xff] }
 0x174   :  { %3671 = vmatprep.subr.bf16.mxu1 %v11881_v28  ;;  %v11485_v28 = vcombine.high %v81_v23, %v89_v24  ;;  %v193_v20 = vld [vmem:[%s18147_s1 + $0x538] sm:$0xff] }
 0x176   :  { %3590 = vmatpush1.bf16.msra.mxu0 %v11878_v33  ;;  %v11484_v33 = vcombine.low %v81_v23, %v89_v24  ;;  %v201_v23 = vld [vmem:[%s18147_s1 + $0x578] sm:$0xff] }
 0x177   :  { %3672 = vmatpush1.bf16.msra.mxu1 %v11880_v34  ;;  %3591 = vmatprep.subr.bf16.mxu0 %v11895_v37  ;;  %v11499_v34 = vcombine.high %v96_v15, %v104_v29  ;;  %v216_v15 = vld [vmem:[%s18147_s1 + $0x5f0] sm:$0xff]  ;;  %v209_v29 = vld [vmem:[%s18147_s1 + $0x5b8] sm:$0xff] }
 0x178   :  { %3673 = vmatprep.subr.bf16.mxu1 %v11897_v38  ;;  %v112_v38 = vld [vmem:[%s18147_s1 + $0x2b0] sm:$0xff] }
 0x179   :  { %v11514_v51 = vcombine.low %v112_v38, %v120_v40 }
 0x17a   :  { %3592 = vmatpush1.bf16.msra.mxu0 %v11894_v44 }
 0x17b   :  { %3674 = vmatpush1.bf16.msra.mxu1 %v11896_v45  ;;  %3593 = vmatprep.subr.bf16.mxu0 %v11911_v46  ;;  %v11515_v45 = vcombine.high %v112_v38, %v120_v40  ;;  %v11517_v46 = vcombine.high %v113_v41, %v121_v42  ;;  %v232_v38 = vld [vmem:[%s18147_s1 + $0x670] sm:$0xff]  ;;  %v225_v40 = vld [vmem:[%s18147_s1 + $0x638] sm:$0xff] }
 0x17c   :  { %3675 = vmatprep.subr.bf16.mxu1 %v11913_v47  ;;  %v128_v47 = vld [vmem:[%s18147_s1 + $0x330] sm:$0xff] }
 0x17d   :  { %v11530_v61 = vcombine.low %v128_v47, %v136_v48 }
 0x17e   :  { %3594 = vmatpush1.bf16.msra.mxu0 %v11910_v52  ;;  %v11516_v52 = vcombine.low %v113_v41, %v121_v42  ;;  %v233_v41 = vld [vmem:[%s18147_s1 + $0x678] sm:$0xff] }
 0x17f   :  { %3676 = vmatpush1.bf16.msra.mxu1 %v11912_v54  ;;  %3595 = vmatprep.subr.bf16.mxu0 %v11927_v55  ;;  %v11531_v54 = vcombine.high %v128_v47, %v136_v48  ;;  %v11533_v55 = vcombine.high %v129_v49, %v137_v50  ;;  %v248_v47 = vld [vmem:[%s18147_s1 + $0x6f0] sm:$0xff]  ;;  %v241_v48 = vld [vmem:[%s18147_s1 + $0x6b8] sm:$0xff] }
 0x180   :  { %3677 = vmatprep.subr.bf16.mxu1 %v11929_v56  ;;  %v144_v56 = vld [vmem:[%s18147_s1 + $0x3b0] sm:$0xff] }
 0x181   :  { %v11546_v5 = vcombine.low %v144_v56, %v152_v58 }
 0x182   :  { %3596 = vmatpush1.bf16.msra.mxu0 %v11926_v62  ;;  %v11532_v62 = vcombine.low %v129_v49, %v137_v50  ;;  %v249_v49 = vld [vmem:[%s18147_s1 + $0x6f8] sm:$0xff] }
 0x183   :  { %3678 = vmatpush1.bf16.msra.mxu1 %v11928_v63  ;;  %3688 = vmatprep.subr.bf16.mxu0 %v11435_v0  ;;  %v11547_v63 = vcombine.high %v144_v56, %v152_v58  ;;  %v11549_v0 = vcombine.high %v145_v59, %v153_v60  ;;  %v264_v56 = vld [vmem:[%s18147_s1 + $0x770] sm:$0xff]  ;;  %v257_v58 = vld [vmem:[%s18147_s1 + $0x738] sm:$0xff] }
 0x184   :  { %3770 = vmatprep.subr.bf16.mxu1 %v11437_v1  ;;  %v160_v1 = vld [vmem:[%s18147_s1 + $0x430] sm:$0xff] }
 0x185   :  { %3598 = vmatmul.mubr.bf16.vlgmr.msra.gmra.mrb[8].mxu0 %v13652_v22  ;;  %v11562_v14 = vcombine.low %v160_v1, %v168_v2 }
 0x186   :  { %3680 = vmatmul.mubr.bf16.vlgmr.msra.gmra.mrb[8].mxu1 %v13652_v22  ;;  %3689 = vmatpush1.bf16.msra.mxu0 %v11434_v6  ;;  %v11548_v6 = vcombine.low %v145_v59, %v153_v60  ;;  %v265_v59 = vld [vmem:[%s18147_s1 + $0x778] sm:$0xff] }
 0x187   :  { %3771 = vmatpush1.bf16.msra.mxu1 %v11436_v7  ;;  %3690 = vmatprep.subr.bf16.mxu0 %v11451_v8  ;;  %v11563_v7 = vcombine.high %v160_v1, %v168_v2  ;;  %v11565_v8 = vcombine.high %v161_v3, %v169_v4  ;;  %v280_v1 = vld [vmem:[%s18147_s1 + $0x7f0] sm:$0xff]  ;;  %v273_v2 = vld [vmem:[%s18147_s1 + $0x7b8] sm:$0xff] }
 0x188   :  { %3772 = vmatprep.subr.bf16.mxu1 %v11453_v9  ;;  %3720 = vmatprep.mubr.bf16.mxu0 %v13317_v57  ;;  %v176_v9 = vld [vmem:[%s18147_s1 + $0x4b0] sm:$0xff] }
 0x189   :  { %3802 = vmatprep.mubr.bf16.mxu1 %v13317_v57  ;;  %v97_v57 = vld [vmem:[%s18147_s1 + $0x238] sm:$0xff]  ;;  %v11578_v24 = vcombine.low %v176_v9, %v184_v10 }
 0x18a   :  { %3691 = vmatpush1.bf16.msra.mxu0 %v11450_v16  ;;  %v11501_v37 = vcombine.high %v97_v57, %v105_v30  ;;  %v11500_v44 = vcombine.low %v97_v57, %v105_v30  ;;  %v11564_v16 = vcombine.low %v161_v3, %v169_v4  ;;  %v217_v57 = vld [vmem:[%s18147_s1 + $0x5f8] sm:$0xff] }
 0x18b   :  { %3773 = vmatpush1.bf16.msra.mxu1 %v11452_v53  ;;  %3692 = vmatprep.subr.bf16.mxu0 %v11467_v17  ;;  %v11579_v53 = vcombine.high %v176_v9, %v184_v10  ;;  %v11581_v17 = vcombine.high %v177_v11, %v185_v13  ;;  %v281_v3 = vld [vmem:[%s18147_s1 + $0x7f8] sm:$0xff]  ;;  %v296_v9 = vld [vmem:[%s18147_s1 + $0x870] sm:$0xff] }
 0x18c   :  { %3774 = vmatprep.subr.bf16.mxu1 %v11469_v18  ;;  %v192_v18 = vld [vmem:[%s18147_s1 + $0x530] sm:$0xff]  ;;  %v289_v10 = vld [vmem:[%s18147_s1 + $0x838] sm:$0xff] }
 0x18d   :  { %v11594_v30 = vcombine.low %v192_v18, %v200_v19 }
 0x18e   :  { %3693 = vmatpush1.bf16.msra.mxu0 %v11466_v25  ;;  %v11580_v25 = vcombine.low %v177_v11, %v185_v13  ;;  %v297_v11 = vld [vmem:[%s18147_s1 + $0x878] sm:$0xff] }
 0x18f   :  { %3775 = vmatpush1.bf16.msra.mxu1 %v11468_v26  ;;  %3694 = vmatprep.subr.bf16.mxu0 %v11483_v27  ;;  %v11595_v26 = vcombine.high %v192_v18, %v200_v19  ;;  %v11597_v27 = vcombine.high %v193_v20, %v201_v23  ;;  %v312_v18 = vld [vmem:[%s18147_s1 + $0x8f0] sm:$0xff]  ;;  %v305_v19 = vld [vmem:[%s18147_s1 + $0x8b8] sm:$0xff] }
 0x190   :  { %3776 = vmatprep.subr.bf16.mxu1 %v11485_v28  ;;  %v208_v28 = vld [vmem:[%s18147_s1 + $0x5b0] sm:$0xff] }
 0x191   :  { %v11610_v42 = vcombine.low %v208_v28, %v216_v15 }
 0x192   :  { %3695 = vmatpush1.bf16.msra.mxu0 %v11482_v32  ;;  %v11596_v32 = vcombine.low %v193_v20, %v201_v23  ;;  %v313_v20 = vld [vmem:[%s18147_s1 + $0x8f8] sm:$0xff] }
 0x193   :  { %3777 = vmatpush1.bf16.msra.mxu1 %v11484_v33  ;;  %3696 = vmatprep.subr.bf16.mxu0 %v11499_v34  ;;  %v11611_v33 = vcombine.high %v208_v28, %v216_v15  ;;  %v11613_v34 = vcombine.high %v209_v29, %v217_v57  ;;  %v328_v28 = vld [vmem:[%s18147_s1 + $0x970] sm:$0xff]  ;;  %v321_v15 = vld [vmem:[%s18147_s1 + $0x938] sm:$0xff] }
 0x194   :  { %3778 = vmatprep.subr.bf16.mxu1 %v11501_v37  ;;  %v224_v37 = vld [vmem:[%s18147_s1 + $0x630] sm:$0xff] }
 0x195   :  { %v11626_v50 = vcombine.low %v224_v37, %v232_v38 }
 0x196   :  { %3697 = vmatpush1.bf16.msra.mxu0 %v11498_v43  ;;  %v11612_v43 = vcombine.low %v209_v29, %v217_v57  ;;  %v329_v29 = vld [vmem:[%s18147_s1 + $0x978] sm:$0xff] }
 0x197   :  { %3779 = vmatpush1.bf16.msra.mxu1 %v11500_v44  ;;  %3698 = vmatprep.subr.bf16.mxu0 %v11515_v45  ;;  %v11627_v44 = vcombine.high %v224_v37, %v232_v38  ;;  %v11629_v45 = vcombine.high %v225_v40, %v233_v41  ;;  %v344_v37 = vld [vmem:[%s18147_s1 + $0x9f0] sm:$0xff]  ;;  %v345_v38 = vld [vmem:[%s18147_s1 + $0x9f8] sm:$0xff] }
 0x198   :  { %3780 = vmatprep.subr.bf16.mxu1 %v11517_v46  ;;  %v240_v46 = vld [vmem:[%s18147_s1 + $0x6b0] sm:$0xff] }
 0x199   :  { %v11642_v60 = vcombine.low %v240_v46, %v248_v47 }
 0x19a   :  { %3699 = vmatpush1.bf16.msra.mxu0 %v11514_v51  ;;  %v11628_v51 = vcombine.low %v225_v40, %v233_v41  ;;  %v11724_v41 = vcombine.low %v321_v15, %v329_v29 }
 0x19b   :  { %3781 = vmatpush1.bf16.msra.mxu1 %v11516_v52  ;;  %3700 = vmatprep.subr.bf16.mxu0 %v11531_v54  ;;  %v11643_v52 = vcombine.high %v240_v46, %v248_v47  ;;  %v11645_v54 = vcombine.high %v241_v48, %v249_v49  ;;  %v361_v46 = vld [vmem:[%s18147_s1 + $0xa78] sm:$0xff] }
 0x19c   :  { %3782 = vmatprep.subr.bf16.mxu1 %v11533_v55  ;;  %v256_v55 = vld [vmem:[%s18147_s1 + $0x730] sm:$0xff] }
 0x19d   :  { %v11658_v4 = vcombine.low %v256_v55, %v264_v56 }
 0x19e   :  { %3701 = vmatpush1.bf16.msra.mxu0 %v11530_v61  ;;  %v11644_v61 = vcombine.low %v241_v48, %v249_v49 }
 0x19f   :  { %3783 = vmatpush1.bf16.msra.mxu1 %v11532_v62  ;;  %3702 = vmatprep.subr.bf16.mxu0 %v11547_v63  ;;  %v11659_v62 = vcombine.high %v256_v55, %v264_v56  ;;  %v11661_v63 = vcombine.high %v257_v58, %v265_v59  ;;  %v377_v55 = vld [vmem:[%s18147_s1 + $0xaf8] sm:$0xff] }
 0x1a0   :  { %3784 = vmatprep.subr.bf16.mxu1 %v11549_v0  ;;  %v272_v0 = vld [vmem:[%s18147_s1 + $0x7b0] sm:$0xff] }
 0x1a1   :  { %v11674_v13 = vcombine.low %v272_v0, %v280_v1 }
 0x1a2   :  { %3703 = vmatpush1.bf16.msra.mxu0 %v11546_v5  ;;  %v11660_v5 = vcombine.low %v257_v58, %v265_v59 }
 0x1a3   :  { %3785 = vmatpush1.bf16.msra.mxu1 %v11548_v6  ;;  %3704 = vmatprep.subr.bf16.mxu0 %v11563_v7  ;;  %v11675_v6 = vcombine.high %v272_v0, %v280_v1  ;;  %v11677_v7 = vcombine.high %v273_v2, %v281_v3  ;;  %v393_v0 = vld [vmem:[%s18147_s1 + $0xb78] sm:$0xff] }
 0x1a4   :  { %3786 = vmatprep.subr.bf16.mxu1 %v11565_v8  ;;  %v288_v8 = vld [vmem:[%s18147_s1 + $0x830] sm:$0xff] }
 0x1a5   :  { %v11690_v23 = vcombine.low %v288_v8, %v296_v9 }
 0x1a6   :  { %3705 = vmatpush1.bf16.msra.mxu0 %v11562_v14  ;;  %v11676_v14 = vcombine.low %v273_v2, %v281_v3 }
 0x1a7   :  { %3787 = vmatpush1.bf16.msra.mxu1 %v11564_v16  ;;  %3706 = vmatprep.subr.bf16.mxu0 %v11579_v53  ;;  %v11691_v16 = vcombine.high %v288_v8, %v296_v9  ;;  %v11693_v53 = vcombine.high %v289_v10, %v297_v11 }
 0x1a8   :  { %3788 = vmatprep.subr.bf16.mxu1 %v11581_v17  ;;  %v304_v17 = vld [vmem:[%s18147_s1 + $0x8b0] sm:$0xff] }
 0x1a9   :  { %v11706_v57 = vcombine.low %v304_v17, %v312_v18 }
 0x1aa   :  { %3707 = vmatpush1.bf16.msra.mxu0 %v11578_v24  ;;  %v11692_v24 = vcombine.low %v289_v10, %v297_v11  ;;  %v401_v10 = vld [vmem:[%s18147_s1 + $0xbb8] sm:$0xff] }
 0x1ab   :  { %3789 = vmatpush1.bf16.msra.mxu1 %v11580_v25  ;;  %3708 = vmatprep.subr.bf16.mxu0 %v11595_v26  ;;  %v11707_v25 = vcombine.high %v304_v17, %v312_v18  ;;  %v11709_v26 = vcombine.high %v305_v19, %v313_v20  ;;  %v409_v11 = vld [vmem:[%s18147_s1 + $0xbf8] sm:$0xff] }
 0x1ac   :  { %3790 = vmatprep.subr.bf16.mxu1 %v11597_v27  ;;  %v320_v27 = vld [vmem:[%s18147_s1 + $0x930] sm:$0xff] }
 0x1ad   :  { %v11722_v40 = vcombine.low %v320_v27, %v328_v28 }
 0x1ae   :  { %3709 = vmatpush1.bf16.msra.mxu0 %v11594_v30  ;;  %v11708_v30 = vcombine.low %v305_v19, %v313_v20 }
 0x1af   :  { %3791 = vmatpush1.bf16.msra.mxu1 %v11596_v32  ;;  %3710 = vmatprep.subr.bf16.mxu0 %v11611_v33  ;;  %v11723_v32 = vcombine.high %v320_v27, %v328_v28  ;;  %v11725_v33 = vcombine.high %v321_v15, %v329_v29  ;;  %v425_v27 = vld [vmem:[%s18147_s1 + $0xc78] sm:$0xff]  ;;  %v11804_v15 = vcombine.low %v401_v10, %v409_v11 }
 0x1b0   :  { %3792 = vmatprep.subr.bf16.mxu1 %v11613_v34  ;;  %v336_v34 = vld [vmem:[%s18147_s1 + $0x9b0] sm:$0xff] }
 0x1b1   :  { %v11738_v47 = vcombine.low %v336_v34, %v344_v37 }
 0x1b2   :  { %3711 = vmatpush1.bf16.msra.mxu0 %v11610_v42  ;;  %v11739_v42 = vcombine.high %v336_v34, %v344_v37  ;;  %v441_v34 = vld [vmem:[%s18147_s1 + $0xcf8] sm:$0xff] }
 0x1b3   :  { %3793 = vmatpush1.bf16.msra.mxu1 %v11612_v43  ;;  %3712 = vmatprep.subr.bf16.mxu0 %v11627_v44  ;;  %v352_v44 = vld [vmem:[%s18147_s1 + $0xa30] sm:$0xff] }
 0x1b4   :  { %3794 = vmatprep.subr.bf16.mxu1 %v11629_v45  ;;  %v360_v45 = vld [vmem:[%s18147_s1 + $0xa70] sm:$0xff] }
 0x1b5   :  { %v11755_v49 = vcombine.high %v352_v44, %v360_v45  ;;  %v11754_v56 = vcombine.low %v352_v44, %v360_v45  ;;  %v457_v44 = vld [vmem:[%s18147_s1 + $0xd78] sm:$0xff] }
 0x1b6   :  { %3713 = vmatpush1.bf16.msra.mxu0 %v11626_v50 }
 0x1b7   :  { %3795 = vmatpush1.bf16.msra.mxu1 %v11628_v51  ;;  %3714 = vmatprep.subr.bf16.mxu0 %v11643_v52  ;;  %v368_v51 = vld [vmem:[%s18147_s1 + $0xab0] sm:$0xff] }
 0x1b8   :  { %3796 = vmatprep.subr.bf16.mxu1 %v11645_v54  ;;  %v376_v52 = vld [vmem:[%s18147_s1 + $0xaf0] sm:$0xff]  ;;  %v369_v54 = vld [vmem:[%s18147_s1 + $0xab8] sm:$0xff] }
 0x1b9   :  { %v11771_v59 = vcombine.high %v368_v51, %v376_v52  ;;  %v11770_v1 = vcombine.low %v368_v51, %v376_v52  ;;  %v11772_v2 = vcombine.low %v369_v54, %v377_v55  ;;  %v473_v51 = vld [vmem:[%s18147_s1 + $0xdf8] sm:$0xff] }
 0x1ba   :  { %3715 = vmatpush1.bf16.msra.mxu0 %v11642_v60  ;;  %v11773_v60 = vcombine.high %v369_v54, %v377_v55 }
 0x1bb   :  { %3797 = vmatpush1.bf16.msra.mxu1 %v11644_v61  ;;  %3716 = vmatprep.subr.bf16.mxu0 %v11659_v62  ;;  %v384_v61 = vld [vmem:[%s18147_s1 + $0xb30] sm:$0xff] }
 0x1bc   :  { %3798 = vmatprep.subr.bf16.mxu1 %v11661_v63  ;;  %v392_v62 = vld [vmem:[%s18147_s1 + $0xb70] sm:$0xff]  ;;  %v385_v63 = vld [vmem:[%s18147_s1 + $0xb38] sm:$0xff] }
 0x1bd   :  { %v11787_v3 = vcombine.high %v384_v61, %v392_v62  ;;  %v11788_v18 = vcombine.low %v385_v63, %v393_v0 }
 0x1be   :  { %3717 = vmatpush1.bf16.msra.mxu0 %v11658_v4 }
 0x1bf   :  { %3799 = vmatpush1.bf16.msra.mxu1 %v11660_v5  ;;  %3718 = vmatprep.subr.bf16.mxu0 %v11675_v6  ;;  %v11789_v5 = vcombine.high %v385_v63, %v393_v0  ;;  %v400_v6 = vld [vmem:[%s18147_s1 + $0xbb0] sm:$0xff] }
 0x1c0   :  { %3800 = vmatprep.subr.bf16.mxu1 %v11677_v7  ;;  %v408_v7 = vld [vmem:[%s18147_s1 + $0xbf0] sm:$0xff] }
 0x1c1   :  { %v11803_v19 = vcombine.high %v400_v6, %v408_v7  ;;  %v11802_v28 = vcombine.low %v400_v6, %v408_v7  ;;  %v497_v7 = vld [vmem:[%s18147_s1 + $0xeb8] sm:$0xff] }
 0x1c2   :  { %3719 = vmatpush1.bf16.msra.mxu0 %v11674_v13 }
 0x1c3   :  { %3801 = vmatpush1.bf16.msra.mxu1 %v11676_v14  ;;  %3729 = vmatprep.subr.bf16.mxu0 %v11691_v16  ;;  %v11786_v16 = vcombine.low %v384_v61, %v392_v62  ;;  %v481_v61 = vld [vmem:[%s18147_s1 + $0xe38] sm:$0xff] }
 0x1c4   :  { %3811 = vmatprep.subr.bf16.mxu1 %v11693_v53  ;;  %v489_v62 = vld [vmem:[%s18147_s1 + $0xe78] sm:$0xff] }
 0x1c5   :  { %3721 = vmatmul.mubr.bf16.vlgmr.msra.gmra.mrb[12].mxu0 %v13443_v12 }
 0x1c6   :  { %3730 = vmatpush1.bf16.msra.mxu0 %v11690_v23  ;;  %3803 = vmatmul.mubr.bf16.vlgmr.msra.gmra.mrb[12].mxu1 %v13443_v12  ;;  %v337_v12 = vld [vmem:[%s18147_s1 + $0x9b8] sm:$0xff]  ;;  %v11805_v23 = vcombine.high %v401_v10, %v409_v11 }
 0x1c7   :  { %3812 = vmatpush1.bf16.msra.mxu1 %v11692_v24  ;;  %3731 = vmatprep.subr.bf16.mxu0 %v11707_v25  ;;  %v11741_v43 = vcombine.high %v337_v12, %v345_v38  ;;  %v11740_v48 = vcombine.low %v337_v12, %v345_v38  ;;  %v416_v24 = vld [vmem:[%s18147_s1 + $0xc30] sm:$0xff]  ;;  %v505_v10 = vld [vmem:[%s18147_s1 + $0xef8] sm:$0xff] }
 0x1c8   :  { %3813 = vmatprep.subr.bf16.mxu1 %v11709_v26  ;;  %3761 = vmatprep.mubr.bf16.mxu0 %v13464_v21  ;;  %v424_v25 = vld [vmem:[%s18147_s1 + $0xc70] sm:$0xff]  ;;  %v417_v26 = vld [vmem:[%s18147_s1 + $0xc38] sm:$0xff] }
 0x1c9   :  { %3843 = vmatprep.mubr.bf16.mxu1 %v13464_v21  ;;  %v353_v21 = vld [vmem:[%s18147_s1 + $0xa38] sm:$0xff]  ;;  %v11819_v29 = vcombine.high %v416_v24, %v424_v25  ;;  %v11818_v37 = vcombine.low %v416_v24, %v424_v25  ;;  %v11820_v12 = vcombine.low %v417_v26, %v425_v27  ;;  %v14824_v24 = vld [vmem:[%s18148_s2] sm:$0xff] }
 0x1ca   :  { %3732 = vmatpush1.bf16.msra.mxu0 %v11706_v57  ;;  %v11757_v50 = vcombine.high %v353_v21, %v361_v46  ;;  %v11756_v58 = vcombine.low %v353_v21, %v361_v46  ;;  %v11821_v57 = vcombine.high %v417_v26, %v425_v27  ;;  %v11900_v26 = vcombine.low %v497_v7, %v505_v10 }
 0x1cb   :  { %3814 = vmatpush1.bf16.msra.mxu1 %v11708_v30  ;;  %3733 = vmatprep.subr.bf16.mxu0 %v11723_v32  ;;  %v432_v30 = vld [vmem:[%s18147_s1 + $0xcb0] sm:$0xff] }
 0x1cc   :  { %3815 = vmatprep.subr.bf16.mxu1 %v11725_v33  ;;  %v440_v32 = vld [vmem:[%s18147_s1 + $0xcf0] sm:$0xff]  ;;  %v433_v33 = vld [vmem:[%s18147_s1 + $0xcb8] sm:$0xff] }
 0x1cd   :  { %v11835_v38 = vcombine.high %v432_v30, %v440_v32  ;;  %v11834_v45 = vcombine.low %v432_v30, %v440_v32  ;;  %v11836_v21 = vcombine.low %v433_v33, %v441_v34  ;;  %v529_v30 = vld [vmem:[%s18147_s1 + $0xfb8] sm:$0xff] }
 0x1ce   :  { %3734 = vmatpush1.bf16.msra.mxu0 %v11722_v40  ;;  %v11837_v40 = vcombine.high %v433_v33, %v441_v34  ;;  %v537_v32 = vld [vmem:[%s18147_s1 + $0xff8] sm:$0xff] }
 0x1cf   :  { %3816 = vmatpush1.bf16.msra.mxu1 %v11724_v41  ;;  %3735 = vmatprep.subr.bf16.mxu0 %v11739_v42  ;;  %v448_v41 = vld [vmem:[%s18147_s1 + $0xd30] sm:$0xff] }
 0x1d0   :  { %3817 = vmatprep.subr.bf16.mxu1 %v11741_v43  ;;  %v456_v42 = vld [vmem:[%s18147_s1 + $0xd70] sm:$0xff]  ;;  %v449_v43 = vld [vmem:[%s18147_s1 + $0xd38] sm:$0xff] }
 0x1d1   :  { %v11851_v46 = vcombine.high %v448_v41, %v456_v42  ;;  %v11850_v52 = vcombine.low %v448_v41, %v456_v42  ;;  %v11852_v54 = vcombine.low %v449_v43, %v457_v44  ;;  %v3885_v42 = vld [vmem:[%s18149_s3 + $0x8] sm:$0xff] }
 0x1d2   :  { %3736 = vmatpush1.bf16.msra.mxu0 %v11738_v47  ;;  %v11853_v47 = vcombine.high %v449_v43, %v457_v44  ;;  %v3889_v43 = vld [vmem:[%s18149_s3 + $0x28] sm:$0xff] }
 0x1d3   :  { %3818 = vmatpush1.bf16.msra.mxu1 %v11740_v48  ;;  %3737 = vmatprep.subr.bf16.mxu0 %v11755_v49  ;;  %v464_v48 = vld [vmem:[%s18147_s1 + $0xdb0] sm:$0xff] }
 0x1d4   :  { %3819 = vmatprep.subr.bf16.mxu1 %v11757_v50  ;;  %v472_v49 = vld [vmem:[%s18147_s1 + $0xdf0] sm:$0xff]  ;;  %v465_v50 = vld [vmem:[%s18147_s1 + $0xdb8] sm:$0xff] }
 0x1d5   :  { %v11867_v55 = vcombine.high %v464_v48, %v472_v49  ;;  %v11866_v63 = vcombine.low %v464_v48, %v472_v49  ;;  %v11868_v0 = vcombine.low %v465_v50, %v473_v51  ;;  %v3896_v48 = vld [vmem:[%s18149_s3 + $0x60] sm:$0xff] }
 0x1d6   :  { %3738 = vmatpush1.bf16.msra.mxu0 %v11754_v56  ;;  %v11869_v56 = vcombine.high %v465_v50, %v473_v51  ;;  %v3893_v50 = vld [vmem:[%s18149_s3 + $0x48] sm:$0xff] }
 0x1d7   :  { %3820 = vmatpush1.bf16.msra.mxu1 %v11756_v58  ;;  %3739 = vmatprep.subr.bf16.mxu0 %v11771_v59  ;;  %v480_v58 = vld [vmem:[%s18147_s1 + $0xe30] sm:$0xff]  ;;  %v3897_v51 = vld [vmem:[%s18149_s3 + $0x68] sm:$0xff] }
 0x1d8   :  { %v14712_v4 = vpop.f32.mrb[4].mxu0  ;;  %3821 = vmatprep.subr.bf16.mxu1 %v11773_v60  ;;  %v488_v59 = vld [vmem:[%s18147_s1 + $0xe70] sm:$0xff]  ;;  %v542_v60 = vlaneseq }
 0x1d9   :  { %v14720_v8 = vpop.f32.mrb[4].mxu1  ;;  %v14722_v9 = vpop.f32.mrb[5].mxu0  ;;  %v11882_v11 = vcombine.low %v480_v58, %v488_v59 }
 0x1da   :  { %v14730_v13 = vpop.f32.mrb[5].mxu1  ;;  %v3439_v14 = vpop.f32.mrb[6].mxu0  ;;  %3740 = vmatpush1.bf16.msra.mxu0 %v11770_v1  ;;  %v11883_v1 = vcombine.high %v480_v58, %v488_v59  ;;  %v14798_v6 = vshrl.u32 %v542_v60, 7  ;;  %v11945_v59 = vcombine.high %v3893_v50, %v3897_v51  ;;  %v3901_v60 = vld [vmem:[%s18149_s3 + $0x88] sm:$0xff] }
 0x1db   :  { %v3521_v53 = vpop.f32.mrb[6].mxu1  ;;  %3822 = vmatpush1.bf16.msra.mxu1 %v11772_v2  ;;  %v3440_v17 = vpop.f32.mrb[7].mxu0  ;;  %3741 = vmatprep.subr.bf16.mxu0 %v11787_v3  ;;  %v11885_v2 = vcombine.high %v481_v61, %v489_v62  ;;  %v496_v3 = vld [vmem:[%s18147_s1 + $0xeb0] sm:$0xff]  ;;  %v11884_v14 = vcombine.low %v481_v61, %v489_v62  ;;  %v3905_v61 = vld [vmem:[%s18149_s3 + $0xa8] sm:$0xff] }
 0x1dc   :  { %v3522_v20 = vpop.f32.mrb[7].mxu1  ;;  %3823 = vmatprep.subr.bf16.mxu1 %v11789_v5  ;;  %v504_v5 = vld [vmem:[%s18147_s1 + $0xef0] sm:$0xff]  ;;  %v11901_v53 = vcombine.high %v497_v7, %v505_v10  ;;  %v11952_v10 = vcombine.low %v3901_v60, %v3905_v61 }
 0x1dd   :  { %v512_v17 = vld [vmem:[%s18147_s1 + $0xf30] sm:$0xff]  ;;  %v513_v20 = vld [vmem:[%s18147_s1 + $0xf38] sm:$0xff]  ;;  %v11898_v25 = vcombine.low %v496_v3, %v504_v5 }
 0x1de   :  { %3742 = vmatpush1.bf16.msra.mxu0 %v11786_v16  ;;  %v11899_v16 = vcombine.high %v496_v3, %v504_v5  ;;  %v3912_v3 = vld [vmem:[%s18149_s3 + $0xe0] sm:$0xff]  ;;  %v3913_v5 = vld [vmem:[%s18149_s3 + $0xe8] sm:$0xff] }
 0x1df   :  { %3824 = vmatpush1.bf16.msra.mxu1 %v11788_v18  ;;  %3743 = vmatprep.subr.bf16.mxu0 %v11803_v19  ;;  %v520_v18 = vld [vmem:[%s18147_s1 + $0xf70] sm:$0xff]  ;;  %v14813_v19 = vsub.s32 1, %v14798_v6 }
 0x1e0   :  { %3825 = vmatprep.subr.bf16.mxu1 %v11805_v23  ;;  %v521_v23 = vld [vmem:[%s18147_s1 + $0xf78] sm:$0xff]  ;;  %v11915_v27 = vcombine.high %v512_v17, %v520_v18  ;;  %v11914_v33 = vcombine.low %v512_v17, %v520_v18  ;;  %v3917_v17 = vld [vmem:[%s18149_s3 + $0x108] sm:$0xff] }
 0x1e1   :  { %v11916_v34 = vcombine.low %v513_v20, %v521_v23  ;;  %v3921_v18 = vld [vmem:[%s18149_s3 + $0x128] sm:$0xff] }
 0x1e2   :  { %3744 = vmatpush1.bf16.msra.mxu0 %v11802_v28  ;;  %v11917_v28 = vcombine.high %v513_v20, %v521_v23 }
 0x1e3   :  { %3826 = vmatpush1.bf16.msra.mxu1 %v11804_v15  ;;  %3745 = vmatprep.subr.bf16.mxu0 %v11819_v29  ;;  %v528_v15 = vld [vmem:[%s18147_s1 + $0xfb0] sm:$0xff] }
 0x1e4   :  { %3827 = vmatprep.subr.bf16.mxu1 %v11821_v57  ;;  %v536_v29 = vld [vmem:[%s18147_s1 + $0xff0] sm:$0xff]  ;;  %v549_v57 = vrot.slane %v14824_v24, %v14813_v19 }
 0x1e5   :  { %v11930_v44 = vcombine.low %v528_v15, %v536_v29 }
 0x1e6   :  { %3746 = vmatpush1.bf16.msra.mxu0 %v11818_v37  ;;  %v11931_v37 = vcombine.high %v528_v15, %v536_v29  ;;  %v12959_v41 = vadd.f32 %v14322_v36, %v549_v57  ;;  %v3892_v36 = vld [vmem:[%s18149_s3 + $0x40] sm:$0xff]  ;;  %v3925_v15 = vld [vmem:[%s18149_s3 + $0x148] sm:$0xff] }
 0x1e7   :  { %3828 = vmatpush1.bf16.msra.mxu1 %v11820_v12  ;;  %3747 = vmatprep.subr.bf16.mxu0 %v11835_v38  ;;  %v11933_v12 = vcombine.high %v529_v30, %v537_v32  ;;  %v3884_v38 = vld [vmem:[%s18149_s3] sm:$0xff]  ;;  %v11942_v62 = vcombine.low %v3892_v36, %v3896_v48  ;;  %v3929_v29 = vld [vmem:[%s18149_s3 + $0x168] sm:$0xff] }
 0x1e8   :  { %3829 = vmatprep.subr.bf16.mxu1 %v11837_v40  ;;  %v3888_v40 = vld [vmem:[%s18149_s3 + $0x20] sm:$0xff] }
 0x1e9   :  { %v11934_v49 = vcombine.low %v3884_v38, %v3888_v40 }
 0x1ea   :  { %3748 = vmatpush1.bf16.msra.mxu0 %v11834_v45  ;;  %v11932_v45 = vcombine.low %v529_v30, %v537_v32  ;;  %v11968_v30 = vcombine.low %v3917_v17, %v3921_v18 }
 0x1eb   :  { %3830 = vmatpush1.bf16.msra.mxu1 %v11836_v21  ;;  %3749 = vmatprep.subr.bf16.mxu0 %v11851_v46  ;;  %v11935_v21 = vcombine.high %v3884_v38, %v3888_v40  ;;  %v11937_v46 = vcombine.high %v3885_v42, %v3889_v43  ;;  %v3937_v38 = vld [vmem:[%s18149_s3 + $0x1a8] sm:$0xff] }
 0x1ec   :  { %3831 = vmatprep.subr.bf16.mxu1 %v11853_v47  ;;  %v3853_v47 = vmax.f32 %v12959_v41, 0.0  ;;  %v11976_v41 = vcombine.low %v3925_v15, %v3929_v29 }
 0x1ee   :  { %3750 = vmatpush1.bf16.msra.mxu0 %v11850_v52  ;;  %v11936_v52 = vcombine.low %v3885_v42, %v3889_v43  ;;  %v14871_v58 = vpack.c.bf16 %v3853_v47, %v3853_v47 }
 0x1ef   :  { %3832 = vmatpush1.bf16.msra.mxu1 %v11852_v54  ;;  %3751 = vmatprep.subr.bf16.mxu0 %v11867_v55  ;;  %v11943_v54 = vcombine.high %v3892_v36, %v3896_v48  ;;  %v3900_v55 = vld [vmem:[%s18149_s3 + $0x80] sm:$0xff] }
 0x1f0   :  { %3833 = vmatprep.subr.bf16.mxu1 %v11869_v56  ;;  %v3904_v56 = vld [vmem:[%s18149_s3 + $0xa0] sm:$0xff] }
 0x1f1   :  { %v11950_v7 = vcombine.low %v3900_v55, %v3904_v56 }
 0x1f2   :  { %3752 = vmatpush1.bf16.msra.mxu0 %v11866_v63  ;;  %v11944_v63 = vcombine.low %v3893_v50, %v3897_v51  ;;  %v3948_v50 = vld [vmem:[%s18149_s3 + $0x200] sm:$0xff] }
 0x1f3   :  { %3834 = vmatpush1.bf16.msra.mxu1 %v11868_v0  ;;  %3753 = vmatprep.subr.bf16.mxu0 %v11883_v1  ;;  %v11951_v0 = vcombine.high %v3900_v55, %v3904_v56  ;;  %v11953_v1 = vcombine.high %v3901_v60, %v3905_v61  ;;  %v3952_v51 = vld [vmem:[%s18149_s3 + $0x220] sm:$0xff] }
 0x1f4   :  { %3835 = vmatprep.subr.bf16.mxu1 %v11885_v2  ;;  %v3908_v2 = vld [vmem:[%s18149_s3 + $0xc0] sm:$0xff] }
 0x1f5   :  { %v11958_v20 = vcombine.low %v3908_v2, %v3912_v3  ;;  %v3956_v61 = vld [vmem:[%s18149_s3 + $0x240] sm:$0xff] }
 0x1f6   :  { %3754 = vmatpush1.bf16.msra.mxu0 %v11882_v11  ;;  %v11959_v11 = vcombine.high %v3908_v2, %v3912_v3 }
 0x1f7   :  { %3836 = vmatpush1.bf16.msra.mxu1 %v11884_v14  ;;  %3755 = vmatprep.subr.bf16.mxu0 %v11899_v16  ;;  %v3916_v16 = vld [vmem:[%s18149_s3 + $0x100] sm:$0xff] }
 0x1f8   :  { %3837 = vmatprep.subr.bf16.mxu1 %v11901_v53  ;;  %v3920_v53 = vld [vmem:[%s18149_s3 + $0x120] sm:$0xff] }
 0x1f9   :  { %v11966_v57 = vcombine.low %v3916_v16, %v3920_v53 }
 0x1fa   :  { %3756 = vmatpush1.bf16.msra.mxu0 %v11898_v25  ;;  %v11967_v25 = vcombine.high %v3916_v16, %v3920_v53 }
 0x1fb   :  { %3838 = vmatpush1.bf16.msra.mxu1 %v11900_v26  ;;  %3757 = vmatprep.subr.bf16.mxu0 %v11915_v27  ;;  %v11969_v26 = vcombine.high %v3917_v17, %v3921_v18  ;;  %v3924_v27 = vld [vmem:[%s18149_s3 + $0x140] sm:$0xff] }
 0x1fc   :  { %3839 = vmatprep.subr.bf16.mxu1 %v11917_v28  ;;  %v3928_v28 = vld [vmem:[%s18149_s3 + $0x160] sm:$0xff] }
 0x1fd   :  { %v11975_v32 = vcombine.high %v3924_v27, %v3928_v28  ;;  %v11974_v40 = vcombine.low %v3924_v27, %v3928_v28  ;;  %v3972_v18 = vld [vmem:[%s18149_s3 + $0x2c0] sm:$0xff] }
 0x1fe   :  { %3758 = vmatpush1.bf16.msra.mxu0 %v11914_v33  ;;  %v11977_v33 = vcombine.high %v3925_v15, %v3929_v29  ;;  %v3980_v29 = vld [vmem:[%s18149_s3 + $0x300] sm:$0xff] }
 0x1ff   :  { %3840 = vmatpush1.bf16.msra.mxu1 %v11916_v34  ;;  %3759 = vmatprep.subr.bf16.mxu0 %v11931_v37  ;;  %v3932_v34 = vld [vmem:[%s18149_s3 + $0x180] sm:$0xff] }
 0x200   :  { %3841 = vmatprep.subr.bf16.mxu1 %v11933_v12  ;;  %v3936_v37 = vld [vmem:[%s18149_s3 + $0x1a0] sm:$0xff]  ;;  %v3933_v12 = vld [vmem:[%s18149_s3 + $0x188] sm:$0xff] }
 0x201   :  { %v11983_v42 = vcombine.high %v3932_v34, %v3936_v37  ;;  %v11985_v43 = vcombine.high %v3933_v12, %v3937_v38  ;;  %v11982_v47 = vcombine.low %v3932_v34, %v3936_v37  ;;  %v11984_v36 = vcombine.low %v3933_v12, %v3937_v38  ;;  %v3988_v38 = vld [vmem:[%s18149_s3 + $0x340] sm:$0xff] }
 0x202   :  { %3760 = vmatpush1.bf16.msra.mxu0 %v11930_v44  ;;  %v3940_v44 = vld [vmem:[%s18149_s3 + $0x1c0] sm:$0xff] }
 0x203   :  { %3842 = vmatpush1.bf16.msra.mxu1 %v11932_v45  ;;  %10070 = vmatprep.subr.bf16.mxu0 %v11935_v21  ;;  %v3944_v45 = vld [vmem:[%s18149_s3 + $0x1e0] sm:$0xff]  ;;  %v3941_v21 = vld [vmem:[%s18149_s3 + $0x1c8] sm:$0xff] }
 0x204   :  { %10398 = vmatprep.subr.bf16.mxu1 %v11937_v46  ;;  %v3945_v46 = vld [vmem:[%s18149_s3 + $0x1e8] sm:$0xff]  ;;  %v11991_v48 = vcombine.high %v3940_v44, %v3944_v45  ;;  %v11990_v55 = vcombine.low %v3940_v44, %v3944_v45  ;;  %v15016_v44 = vsub.s32 0, %v14798_v6 }
 0x205   :  { %3762 = vmatmul.mubr.bf16.vlgmr.msra.gmra.mrb[12].mxu0 %v13652_v22  ;;  %v11992_v56 = vcombine.low %v3941_v21, %v3945_v46 }
 0x206   :  { %3844 = vmatmul.mubr.bf16.vlgmr.msra.gmra.mrb[12].mxu1 %v13652_v22  ;;  %10071 = vmatpush1.bf16.msra.mxu0 %v11934_v49  ;;  %v3909_v22 = vld [vmem:[%s18149_s3 + $0xc8] sm:$0xff]  ;;  %v11993_v49 = vcombine.high %v3941_v21, %v3945_v46 }
 0x207   :  { %10102 = vmatprep.mubr.bf16.mxu0 %v14871_v58  ;;  %10399 = vmatpush1.bf16.msra.mxu1 %v11936_v52  ;;  %v11961_v14 = vcombine.high %v3909_v22, %v3913_v5  ;;  %v11960_v23 = vcombine.low %v3909_v22, %v3913_v5  ;;  %v3949_v52 = vld [vmem:[%s18149_s3 + $0x208] sm:$0xff]  ;;  %v3964_v5 = vld [vmem:[%s18149_s3 + $0x280] sm:$0xff] }
 0x208   :  { %10430 = vmatprep.mubr.bf16.mxu1 %v14871_v58  ;;  %10072 = vmatprep.subr.bf16.mxu0 %v11943_v54  ;;  %v3953_v54 = vld [vmem:[%s18149_s3 + $0x228] sm:$0xff] }
 0x209   :  { %10400 = vmatprep.subr.bf16.mxu1 %v11945_v59  ;;  %v11999_v59 = vcombine.high %v3948_v50, %v3952_v51  ;;  %v12001_v60 = vcombine.high %v3949_v52, %v3953_v54  ;;  %v12000_v2 = vcombine.low %v3949_v52, %v3953_v54  ;;  %v545_v52 = vrot.slane %v14824_v24, %v15016_v44 }
 0x20a   :  { %10073 = vmatpush1.bf16.msra.mxu0 %v11942_v62  ;;  %v3960_v62 = vld [vmem:[%s18149_s3 + $0x260] sm:$0xff] }
 0x20b   :  { %10401 = vmatpush1.bf16.msra.mxu1 %v11944_v63  ;;  %10074 = vmatprep.subr.bf16.mxu0 %v11951_v0  ;;  %v3957_v63 = vld [vmem:[%s18149_s3 + $0x248] sm:$0xff]  ;;  %v12007_v3 = vcombine.high %v3956_v61, %v3960_v62 }
 0x20c   :  { %10402 = vmatprep.subr.bf16.mxu1 %v11953_v1  ;;  %v3961_v0 = vld [vmem:[%s18149_s3 + $0x268] sm:$0xff]  ;;  %v11998_v1 = vcombine.low %v3948_v50, %v3952_v51 }
 0x20d   :  { %v12009_v22 = vcombine.high %v3957_v63, %v3961_v0  ;;  %v12008_v16 = vcombine.low %v3957_v63, %v3961_v0  ;;  %v4001_v50 = vld [vmem:[%s18149_s3 + $0x3a8] sm:$0xff] }
 0x20e   :  { %10075 = vmatpush1.bf16.msra.mxu0 %v11950_v7  ;;  %v3968_v7 = vld [vmem:[%s18149_s3 + $0x2a0] sm:$0xff]  ;;  %v4009_v63 = vld [vmem:[%s18149_s3 + $0x3e8] sm:$0xff] }
 0x20f   :  { %10403 = vmatpush1.bf16.msra.mxu1 %v11952_v10  ;;  %10076 = vmatprep.subr.bf16.mxu0 %v11959_v11  ;;  %v3965_v10 = vld [vmem:[%s18149_s3 + $0x288] sm:$0xff]  ;;  %v12015_v53 = vcombine.high %v3964_v5, %v3968_v7 }
 0x210   :  { %10404 = vmatprep.subr.bf16.mxu1 %v11961_v14  ;;  %v3969_v11 = vld [vmem:[%s18149_s3 + $0x2a8] sm:$0xff]  ;;  %v12006_v14 = vcombine.low %v3956_v61, %v3960_v62 }
 0x211   :  { %v12017_v17 = vcombine.high %v3965_v10, %v3969_v11  ;;  %v12016_v27 = vcombine.low %v3965_v10, %v3969_v11  ;;  %v4005_v62 = vld [vmem:[%s18149_s3 + $0x3c8] sm:$0xff] }
 0x212   :  { %10077 = vmatpush1.bf16.msra.mxu0 %v11958_v20  ;;  %v3976_v20 = vld [vmem:[%s18149_s3 + $0x2e0] sm:$0xff]  ;;  %v4017_v11 = vld [vmem:[%s18149_s3 + $0x428] sm:$0xff] }
 0x213   :  { %10405 = vmatpush1.bf16.msra.mxu1 %v11960_v23  ;;  %10078 = vmatprep.subr.bf16.mxu0 %v11967_v25  ;;  %v3973_v23 = vld [vmem:[%s18149_s3 + $0x2c8] sm:$0xff]  ;;  %v12023_v28 = vcombine.high %v3972_v18, %v3976_v20 }
 0x214   :  { %10406 = vmatprep.subr.bf16.mxu1 %v11969_v26  ;;  %v3977_v25 = vld [vmem:[%s18149_s3 + $0x2e8] sm:$0xff]  ;;  %v12014_v26 = vcombine.low %v3964_v5, %v3968_v7  ;;  %v4012_v5 = vld [vmem:[%s18149_s3 + $0x400] sm:$0xff] }
 0x215   :  { %v12025_v15 = vcombine.high %v3973_v23, %v3977_v25  ;;  %v12024_v34 = vcombine.low %v3973_v23, %v3977_v25  ;;  %v4016_v7 = vld [vmem:[%s18149_s3 + $0x420] sm:$0xff] }
 0x216   :  { %10079 = vmatpush1.bf16.msra.mxu0 %v11966_v57  ;;  %v3984_v57 = vld [vmem:[%s18149_s3 + $0x320] sm:$0xff]  ;;  %v12062_v25 = vcombine.low %v4012_v5, %v4016_v7 }
 0x217   :  { %10407 = vmatpush1.bf16.msra.mxu1 %v11968_v30  ;;  %10080 = vmatprep.subr.bf16.mxu0 %v11975_v32  ;;  %v3981_v30 = vld [vmem:[%s18149_s3 + $0x308] sm:$0xff]  ;;  %v12031_v37 = vcombine.high %v3980_v29, %v3984_v57  ;;  %v4024_v23 = vld [vmem:[%s18149_s3 + $0x460] sm:$0xff] }
 0x218   :  { %10408 = vmatprep.subr.bf16.mxu1 %v11977_v33  ;;  %v3985_v32 = vld [vmem:[%s18149_s3 + $0x328] sm:$0xff]  ;;  %v12022_v33 = vcombine.low %v3972_v18, %v3976_v20 }
 0x219   :  { %v12033_v12 = vcombine.high %v3981_v30, %v3985_v32  ;;  %v12032_v45 = vcombine.low %v3981_v30, %v3985_v32  ;;  %v4032_v30 = vld [vmem:[%s18149_s3 + $0x4a0] sm:$0xff] }
 0x21a   :  { %10081 = vmatpush1.bf16.msra.mxu0 %v11974_v40  ;;  %v3992_v40 = vld [vmem:[%s18149_s3 + $0x360] sm:$0xff] }
 0x21b   :  { %10409 = vmatpush1.bf16.msra.mxu1 %v11976_v41  ;;  %10082 = vmatprep.subr.bf16.mxu0 %v11983_v42  ;;  %v3989_v41 = vld [vmem:[%s18149_s3 + $0x348] sm:$0xff]  ;;  %v12039_v21 = vcombine.high %v3988_v38, %v3992_v40  ;;  %v12038_v51 = vcombine.low %v3988_v38, %v3992_v40 }
 0x21c   :  { %10410 = vmatprep.subr.bf16.mxu1 %v11985_v43  ;;  %v3993_v42 = vld [vmem:[%s18149_s3 + $0x368] sm:$0xff]  ;;  %v12030_v43 = vcombine.low %v3980_v29, %v3984_v57  ;;  %v4028_v57 = vld [vmem:[%s18149_s3 + $0x480] sm:$0xff] }
 0x21d   :  { %v12041_v46 = vcombine.high %v3989_v41, %v3993_v42  ;;  %v12040_v54 = vcombine.low %v3989_v41, %v3993_v42  ;;  %v12079_v40 = vcombine.high %v4028_v57, %v4032_v30  ;;  %v4036_v42 = vld [vmem:[%s18149_s3 + $0x4c0] sm:$0xff] }
 0x21e   :  { %10083 = vmatpush1.bf16.msra.mxu0 %v11982_v47  ;;  %v3996_v47 = vld [vmem:[%s18149_s3 + $0x380] sm:$0xff] }
 0x21f   :  { %10411 = vmatpush1.bf16.msra.mxu1 %v11984_v36  ;;  %10084 = vmatprep.subr.bf16.mxu0 %v11991_v48  ;;  %v4000_v36 = vld [vmem:[%s18149_s3 + $0x3a0] sm:$0xff]  ;;  %v15025_v48 = vsub.s32 3, %v14798_v6 }
 0x220   :  { %10412 = vmatprep.subr.bf16.mxu1 %v11993_v49  ;;  %v3997_v49 = vld [vmem:[%s18149_s3 + $0x388] sm:$0xff]  ;;  %v12046_v0 = vcombine.low %v3996_v47, %v4000_v36 }
 0x221   :  { %v557_v61 = vrot.slane %v14824_v24, %v15025_v48 }
 0x222   :  { %10085 = vmatpush1.bf16.msra.mxu0 %v11990_v55  ;;  %v12047_v55 = vcombine.high %v3996_v47, %v4000_v36 }
 0x223   :  { %10413 = vmatpush1.bf16.msra.mxu1 %v11992_v56  ;;  %10086 = vmatprep.subr.bf16.mxu0 %v11999_v59  ;;  %v12049_v56 = vcombine.high %v3997_v49, %v4001_v50  ;;  %v4004_v59 = vld [vmem:[%s18149_s3 + $0x3c0] sm:$0xff]  ;;  %v12961_v10 = vadd.f32 %v14330_v39, %v557_v61 }
 0x224   :  { %10414 = vmatprep.subr.bf16.mxu1 %v12001_v60  ;;  %v4008_v60 = vld [vmem:[%s18149_s3 + $0x3e0] sm:$0xff] }
 0x225   :  { %v3855_v20 = vmax.f32 %v12961_v10, 0.0  ;;  %v4020_v39 = vld [vmem:[%s18149_s3 + $0x440] sm:$0xff]  ;;  %v4061_v10 = vld [vmem:[%s18149_s3 + $0x588] sm:$0xff] }
 0x226   :  { %10087 = vmatpush1.bf16.msra.mxu0 %v11998_v1  ;;  %v12958_v1 = vadd.f32 %v14312_v31, %v545_v52  ;;  %v4013_v31 = vld [vmem:[%s18149_s3 + $0x408] sm:$0xff]  ;;  %v12071_v29 = vcombine.high %v4020_v39, %v4024_v23  ;;  %v4052_v61 = vld [vmem:[%s18149_s3 + $0x540] sm:$0xff] }
 0x227   :  { %10415 = vmatpush1.bf16.msra.mxu1 %v12000_v2  ;;  %10088 = vmatprep.subr.bf16.mxu0 %v12007_v3  ;;  %v12048_v2 = vcombine.low %v3997_v49, %v4001_v50  ;;  %v12055_v3 = vcombine.high %v4004_v59, %v4008_v60  ;;  %v12065_v18 = vcombine.high %v4013_v31, %v4017_v11  ;;  %v4044_v50 = vld [vmem:[%s18149_s3 + $0x500] sm:$0xff]  ;;  %v4045_v52 = vld [vmem:[%s18149_s3 + $0x508] sm:$0xff] }
 0x228   :  { %10416 = vmatprep.subr.bf16.mxu1 %v12009_v22  ;;  %v12057_v22 = vcombine.high %v4005_v62, %v4009_v63  ;;  %v15083_v32 = vpack.c.bf16 %v3855_v20, %v3855_v20  ;;  %v4072_v20 = vld [vmem:[%s18149_s3 + $0x5e0] sm:$0xff] }
 0x22a   :  { %10089 = vmatpush1.bf16.msra.mxu0 %v12006_v14  ;;  %v12054_v14 = vcombine.low %v4004_v59, %v4008_v60 }
 0x22b   :  { %10417 = vmatpush1.bf16.msra.mxu1 %v12008_v16  ;;  %10090 = vmatprep.subr.bf16.mxu0 %v12015_v53  ;;  %v3852_v16 = vmax.f32 %v12958_v1, 0.0  ;;  %v12056_v53 = vcombine.low %v4005_v62, %v4009_v63  ;;  %v4056_v62 = vld [vmem:[%s18149_s3 + $0x560] sm:$0xff]  ;;  %v4053_v63 = vld [vmem:[%s18149_s3 + $0x548] sm:$0xff] }
 0x22c   :  { %10418 = vmatprep.subr.bf16.mxu1 %v12017_v17  ;;  %v12063_v17 = vcombine.high %v4012_v5, %v4016_v7  ;;  %v4060_v5 = vld [vmem:[%s18149_s3 + $0x580] sm:$0xff] }
 0x22d   :  { %v4064_v7 = vld [vmem:[%s18149_s3 + $0x5a0] sm:$0xff] }
 0x22e   :  { %10091 = vmatpush1.bf16.msra.mxu0 %v12014_v26  ;;  %v4021_v26 = vld [vmem:[%s18149_s3 + $0x448] sm:$0xff] }
 0x22f   :  { %10419 = vmatpush1.bf16.msra.mxu1 %v12016_v27  ;;  %10092 = vmatprep.subr.bf16.mxu0 %v12023_v28  ;;  %v4025_v27 = vld [vmem:[%s18149_s3 + $0x468] sm:$0xff]  ;;  %v15075_v28 = vpack.c.bf16 %v3852_v16, %v3852_v16  ;;  %v12111_v16 = vcombine.high %v4060_v5, %v4064_v7 }
 0x230   :  { %10420 = vmatprep.subr.bf16.mxu1 %v12025_v15  ;;  %v12064_v15 = vcombine.low %v4013_v31, %v4017_v11  ;;  %v12072_v38 = vcombine.low %v4021_v26, %v4025_v27  ;;  %v4065_v31 = vld [vmem:[%s18149_s3 + $0x5a8] sm:$0xff]  ;;  %v12102_v11 = vcombine.low %v4052_v61, %v4056_v62 }
 0x232   :  { %10093 = vmatpush1.bf16.msra.mxu0 %v12022_v33  ;;  %v12073_v33 = vcombine.high %v4021_v26, %v4025_v27  ;;  %v4073_v26 = vld [vmem:[%s18149_s3 + $0x5e8] sm:$0xff] }
 0x233   :  { %10421 = vmatpush1.bf16.msra.mxu1 %v12024_v34  ;;  %10094 = vmatprep.subr.bf16.mxu0 %v12031_v37  ;;  %v4029_v34 = vld [vmem:[%s18149_s3 + $0x488] sm:$0xff] }
 0x234   :  { %10422 = vmatprep.subr.bf16.mxu1 %v12033_v12  ;;  %v4033_v37 = vld [vmem:[%s18149_s3 + $0x4a8] sm:$0xff]  ;;  %v12070_v12 = vcombine.low %v4020_v39, %v4024_v23 }
 0x235   :  { %v12081_v41 = vcombine.high %v4029_v34, %v4033_v37  ;;  %v12080_v47 = vcombine.low %v4029_v34, %v4033_v37 }
 0x236   :  { %10095 = vmatpush1.bf16.msra.mxu0 %v12030_v43  ;;  %v4040_v43 = vld [vmem:[%s18149_s3 + $0x4e0] sm:$0xff] }
 0x237   :  { %10423 = vmatpush1.bf16.msra.mxu1 %v12032_v45  ;;  %10096 = vmatprep.subr.bf16.mxu0 %v12039_v21  ;;  %v4037_v45 = vld [vmem:[%s18149_s3 + $0x4c8] sm:$0xff]  ;;  %v12087_v36 = vcombine.high %v4036_v42, %v4040_v43 }
 0x238   :  { %10424 = vmatprep.subr.bf16.mxu1 %v12041_v46  ;;  %v4041_v21 = vld [vmem:[%s18149_s3 + $0x4e8] sm:$0xff]  ;;  %v12078_v46 = vcombine.low %v4028_v57, %v4032_v30 }
 0x239   :  { %v12089_v49 = vcombine.high %v4037_v45, %v4041_v21 }
 0x23a   :  { %10097 = vmatpush1.bf16.msra.mxu0 %v12038_v51  ;;  %v4048_v51 = vld [vmem:[%s18149_s3 + $0x520] sm:$0xff] }
 0x23b   :  { %10425 = vmatpush1.bf16.msra.mxu1 %v12040_v54  ;;  %10098 = vmatprep.subr.bf16.mxu0 %v12047_v55  ;;  %v4049_v54 = vld [vmem:[%s18149_s3 + $0x528] sm:$0xff]  ;;  %v12086_v55 = vcombine.low %v4036_v42, %v4040_v43  ;;  %v12095_v59 = vcombine.high %v4044_v50, %v4048_v51  ;;  %v12094_v1 = vcombine.low %v4044_v50, %v4048_v51 }
 0x23c   :  { %10426 = vmatprep.subr.bf16.mxu1 %v12049_v56  ;;  %v12088_v56 = vcombine.low %v4037_v45, %v4041_v21  ;;  %v12097_v60 = vcombine.high %v4045_v52, %v4049_v54  ;;  %v4081_v42 = vld [vmem:[%s18149_s3 + $0x628] sm:$0xff] }
 0x23d   :  { %v4089_v50 = vld [vmem:[%s18149_s3 + $0x668] sm:$0xff] }
 0x23e   :  { %10099 = vmatpush1.bf16.msra.mxu0 %v12046_v0  ;;  %v4057_v0 = vld [vmem:[%s18149_s3 + $0x568] sm:$0xff] }
 0x23f   :  { %10427 = vmatpush1.bf16.msra.mxu1 %v12048_v2  ;;  %10100 = vmatprep.subr.bf16.mxu0 %v12055_v3  ;;  %v12096_v2 = vcombine.low %v4045_v52, %v4049_v54  ;;  %v12103_v3 = vcombine.high %v4052_v61, %v4056_v62  ;;  %v4097_v61 = vld [vmem:[%s18149_s3 + $0x6a8] sm:$0xff] }
 0x240   :  { %10428 = vmatprep.subr.bf16.mxu1 %v12057_v22  ;;  %v12105_v22 = vcombine.high %v4053_v63, %v4057_v0 }
 0x242   :  { %10101 = vmatpush1.bf16.msra.mxu0 %v12054_v14  ;;  %v12104_v14 = vcombine.low %v4053_v63, %v4057_v0 }
 0x243   :  { %10429 = vmatpush1.bf16.msra.mxu1 %v12056_v53  ;;  %10111 = vmatprep.subr.bf16.mxu0 %v12063_v17  ;;  %v12113_v17 = vcombine.high %v4061_v10, %v4065_v31 }
 0x244   :  { %10439 = vmatprep.subr.bf16.mxu1 %v12065_v18  ;;  %v4068_v18 = vld [vmem:[%s18149_s3 + $0x5c0] sm:$0xff] }
 0x245   :  { %10103 = vmatmul.mubr.bf16.vlgmr.msra.gmra.mrb[16].mxu0 %v15075_v28  ;;  %v12119_v34 = vcombine.high %v4068_v18, %v4072_v20  ;;  %v12118_v43 = vcombine.low %v4068_v18, %v4072_v20  ;;  %v4113_v18 = vld [vmem:[%s18149_s3 + $0x728] sm:$0xff] }
 0x246   :  { %10431 = vmatmul.mubr.bf16.vlgmr.msra.gmra.mrb[16].mxu1 %v15075_v28  ;;  %10112 = vmatpush1.bf16.msra.mxu0 %v12062_v25  ;;  %v4069_v25 = vld [vmem:[%s18149_s3 + $0x5c8] sm:$0xff] }
 0x247   :  { %10143 = vmatprep.mubr.bf16.mxu0 %v15083_v32  ;;  %10440 = vmatpush1.bf16.msra.mxu1 %v12064_v15  ;;  %v12120_v45 = vcombine.low %v4069_v25, %v4073_v26 }
 0x248   :  { %10471 = vmatprep.mubr.bf16.mxu1 %v15083_v32  ;;  %10113 = vmatprep.subr.bf16.mxu0 %v12071_v29  ;;  %v12110_v29 = vcombine.low %v4060_v5, %v4064_v7  ;;  %v4105_v5 = vld [vmem:[%s18149_s3 + $0x6e8] sm:$0xff] }
 0x249   :  { %10441 = vmatprep.subr.bf16.mxu1 %v12073_v33  ;;  %v12112_v33 = vcombine.low %v4061_v10, %v4065_v31 }
 0x24a   :  { %10114 = vmatpush1.bf16.msra.mxu0 %v12070_v12  ;;  %v12121_v12 = vcombine.high %v4069_v25, %v4073_v26 }
 0x24b   :  { %10442 = vmatpush1.bf16.msra.mxu1 %v12072_v38  ;;  %10115 = vmatprep.subr.bf16.mxu0 %v12079_v40  ;;  %v4076_v38 = vld [vmem:[%s18149_s3 + $0x600] sm:$0xff] }
 0x24c   :  { %10443 = vmatprep.subr.bf16.mxu1 %v12081_v41  ;;  %v4080_v40 = vld [vmem:[%s18149_s3 + $0x620] sm:$0xff]  ;;  %v4077_v41 = vld [vmem:[%s18149_s3 + $0x608] sm:$0xff] }
 0x24d   :  { %v12127_v21 = vcombine.high %v4076_v38, %v4080_v40  ;;  %v12126_v51 = vcombine.low %v4076_v38, %v4080_v40  ;;  %v12128_v52 = vcombine.low %v4077_v41, %v4081_v42 }
 0x24e   :  { %10116 = vmatpush1.bf16.msra.mxu0 %v12078_v46  ;;  %v12129_v46 = vcombine.high %v4077_v41, %v4081_v42  ;;  %v4124_v41 = vld [vmem:[%s18149_s3 + $0x780] sm:$0xff] }
 0x24f   :  { %10444 = vmatpush1.bf16.msra.mxu1 %v12080_v47  ;;  %10117 = vmatprep.subr.bf16.mxu0 %v12087_v36  ;;  %v4084_v47 = vld [vmem:[%s18149_s3 + $0x640] sm:$0xff] }
 0x250   :  { %10445 = vmatprep.subr.bf16.mxu1 %v12089_v49  ;;  %v4088_v36 = vld [vmem:[%s18149_s3 + $0x660] sm:$0xff]  ;;  %v4085_v49 = vld [vmem:[%s18149_s3 + $0x648] sm:$0xff] }
 0x251   :  { %v12135_v54 = vcombine.high %v4084_v47, %v4088_v36  ;;  %v12134_v62 = vcombine.low %v4084_v47, %v4088_v36  ;;  %v12136_v63 = vcombine.low %v4085_v49, %v4089_v50  ;;  %v4128_v42 = vld [vmem:[%s18149_s3 + $0x7a0] sm:$0xff] }
 0x252   :  { %10118 = vmatpush1.bf16.msra.mxu0 %v12086_v55  ;;  %v12137_v55 = vcombine.high %v4085_v49, %v4089_v50  ;;  %v12175_v49 = vcombine.high %v4124_v41, %v4128_v42 }
 0x253   :  { %10446 = vmatpush1.bf16.msra.mxu1 %v12088_v56  ;;  %10119 = vmatprep.subr.bf16.mxu0 %v12095_v59  ;;  %v4092_v56 = vld [vmem:[%s18149_s3 + $0x680] sm:$0xff] }
 0x254   :  { %10447 = vmatprep.subr.bf16.mxu1 %v12097_v60  ;;  %v4096_v59 = vld [vmem:[%s18149_s3 + $0x6a0] sm:$0xff]  ;;  %v4093_v60 = vld [vmem:[%s18149_s3 + $0x688] sm:$0xff] }
 0x255   :  { %v12143_v0 = vcombine.high %v4092_v56, %v4096_v59  ;;  %v12142_v7 = vcombine.low %v4092_v56, %v4096_v59  ;;  %v12144_v10 = vcombine.low %v4093_v60, %v4097_v61  ;;  %v4137_v56 = vld [vmem:[%s18149_s3 + $0x7e8] sm:$0xff]  ;;  %v12174_v59 = vcombine.low %v4124_v41, %v4128_v42  ;;  %v4164_v41 = vld [vmem:[%s18149_s3 + $0x8c0] sm:$0xff] }
 0x256   :  { %10120 = vmatpush1.bf16.msra.mxu0 %v12094_v1  ;;  %v12145_v1 = vcombine.high %v4093_v60, %v4097_v61  ;;  %v4168_v42 = vld [vmem:[%s18149_s3 + $0x8e0] sm:$0xff] }
 0x257   :  { %10448 = vmatpush1.bf16.msra.mxu1 %v12096_v2  ;;  %10121 = vmatprep.subr.bf16.mxu0 %v12103_v3  ;;  %v4100_v2 = vld [vmem:[%s18149_s3 + $0x6c0] sm:$0xff] }
 0x258   :  { %v15143_v53 = vpop.f32.mrb[8].mxu0  ;;  %10449 = vmatprep.subr.bf16.mxu1 %v12105_v22  ;;  %v4104_v3 = vld [vmem:[%s18149_s3 + $0x6e0] sm:$0xff]  ;;  %v4101_v22 = vld [vmem:[%s18149_s3 + $0x6c8] sm:$0xff] }
 0x259   :  { %v15151_v39 = vpop.f32.mrb[8].mxu1  ;;  %v15153_v23 = vpop.f32.mrb[9].mxu0  ;;  %v12151_v31 = vcombine.high %v4100_v2, %v4104_v3  ;;  %v12150_v20 = vcombine.low %v4100_v2, %v4104_v3  ;;  %v12152_v25 = vcombine.low %v4101_v22, %v4105_v5  ;;  %v4145_v2 = vld [vmem:[%s18149_s3 + $0x828] sm:$0xff] }
 0x25a   :  { %v15161_v27 = vpop.f32.mrb[9].mxu1  ;;  %v3603_v15 = vpop.f32.mrb[10].mxu0  ;;  %10122 = vmatpush1.bf16.msra.mxu0 %v12102_v11  ;;  %v12153_v11 = vcombine.high %v4101_v22, %v4105_v5 }
 0x25b   :  { %v3685_v57 = vpop.f32.mrb[10].mxu1  ;;  %10450 = vmatpush1.bf16.msra.mxu1 %v12104_v14  ;;  %v3604_v30 = vpop.f32.mrb[11].mxu0  ;;  %10123 = vmatprep.subr.bf16.mxu0 %v12111_v16  ;;  %v4108_v14 = vld [vmem:[%s18149_s3 + $0x700] sm:$0xff] }
 0x25c   :  { %v3686_v37 = vpop.f32.mrb[11].mxu1  ;;  %10451 = vmatprep.subr.bf16.mxu1 %v12113_v17  ;;  %v4112_v16 = vld [vmem:[%s18149_s3 + $0x720] sm:$0xff]  ;;  %v4109_v17 = vld [vmem:[%s18149_s3 + $0x708] sm:$0xff] }
 0x25d   :  { %v12159_v26 = vcombine.high %v4108_v14, %v4112_v16  ;;  %v12161_v15 = vcombine.high %v4109_v17, %v4113_v18  ;;  %v4120_v57 = vld [vmem:[%s18149_s3 + $0x760] sm:$0xff]  ;;  %v4117_v30 = vld [vmem:[%s18149_s3 + $0x748] sm:$0xff]  ;;  %v15236_v37 = vsub.s32 2, %v14798_v6 }
 0x25e   :  { %10124 = vmatpush1.bf16.msra.mxu0 %v12110_v29  ;;  %v4116_v29 = vld [vmem:[%s18149_s3 + $0x740] sm:$0xff] }
 0x25f   :  { %10452 = vmatpush1.bf16.msra.mxu1 %v12112_v33  ;;  %10125 = vmatprep.subr.bf16.mxu0 %v12119_v34  ;;  %v4121_v33 = vld [vmem:[%s18149_s3 + $0x768] sm:$0xff]  ;;  %v12158_v34 = vcombine.low %v4108_v14, %v4112_v16  ;;  %v12167_v38 = vcombine.high %v4116_v29, %v4120_v57  ;;  %v553_v47 = vrot.slane %v14824_v24, %v15236_v37 }
 0x260   :  { %10453 = vmatprep.subr.bf16.mxu1 %v12121_v12  ;;  %v12160_v12 = vcombine.low %v4109_v17, %v4113_v18  ;;  %v12169_v40 = vcombine.high %v4117_v30, %v4121_v33  ;;  %v12168_v36 = vcombine.low %v4117_v30, %v4121_v33  ;;  %v4149_v16 = vld [vmem:[%s18149_s3 + $0x848] sm:$0xff] }
 0x261   :  { %v12960_v60 = vadd.f32 %v14320_v35, %v553_v47  ;;  %v4141_v35 = vld [vmem:[%s18149_s3 + $0x808] sm:$0xff] }
 0x262   :  { %10126 = vmatpush1.bf16.msra.mxu0 %v12118_v43  ;;  %v15245_v43 = vsub.s32 5, %v14798_v6  ;;  %v4153_v17 = vld [vmem:[%s18149_s3 + $0x868] sm:$0xff] }
 0x263   :  { %10454 = vmatpush1.bf16.msra.mxu1 %v12120_v45  ;;  %10127 = vmatprep.subr.bf16.mxu0 %v12127_v21  ;;  %v4125_v45 = vld [vmem:[%s18149_s3 + $0x788] sm:$0xff]  ;;  %v3854_v22 = vmax.f32 %v12960_v60, 0.0 }
 0x264   :  { %10455 = vmatprep.subr.bf16.mxu1 %v12129_v46  ;;  %v4129_v21 = vld [vmem:[%s18149_s3 + $0x7a8] sm:$0xff]  ;;  %v12166_v46 = vcombine.low %v4116_v29, %v4120_v57  ;;  %v12201_v57 = vcombine.high %v4149_v16, %v4153_v17 }
 0x265   :  { %v12177_v50 = vcombine.high %v4125_v45, %v4129_v21  ;;  %v12176_v61 = vcombine.low %v4125_v45, %v4129_v21  ;;  %v15295_v18 = vpack.c.bf16 %v3854_v22, %v3854_v22  ;;  %v4157_v30 = vld [vmem:[%s18149_s3 + $0x888] sm:$0xff]  ;;  %v4192_v22 = vld [vmem:[%s18149_s3 + $0x9a0] sm:$0xff] }
 0x266   :  { %10128 = vmatpush1.bf16.msra.mxu0 %v12126_v51  ;;  %v4132_v51 = vld [vmem:[%s18149_s3 + $0x7c0] sm:$0xff]  ;;  %v4161_v33 = vld [vmem:[%s18149_s3 + $0x8a8] sm:$0xff] }
 0x267   :  { %10456 = vmatpush1.bf16.msra.mxu1 %v12128_v52  ;;  %10129 = vmatprep.subr.bf16.mxu0 %v12135_v54  ;;  %v4136_v52 = vld [vmem:[%s18149_s3 + $0x7e0] sm:$0xff]  ;;  %v565_v54 = vrot.slane %v14824_v24, %v15245_v43  ;;  %v4165_v45 = vld [vmem:[%s18149_s3 + $0x8c8] sm:$0xff]  ;;  %v12208_v47 = vcombine.low %v4157_v30, %v4161_v33 }
 0x268   :  { %10457 = vmatprep.subr.bf16.mxu1 %v12137_v55  ;;  %v4133_v55 = vld [vmem:[%s18149_s3 + $0x7c8] sm:$0xff]  ;;  %v4140_v24 = vld [vmem:[%s18149_s3 + $0x800] sm:$0xff]  ;;  %v12182_v3 = vcombine.low %v4132_v51, %v4136_v52 }
 0x269   :  { %v12184_v5 = vcombine.low %v4133_v55, %v4137_v56  ;;  %v4169_v21 = vld [vmem:[%s18149_s3 + $0x8e8] sm:$0xff] }
 0x26a   :  { %10130 = vmatpush1.bf16.msra.mxu0 %v12134_v62  ;;  %v12183_v62 = vcombine.high %v4132_v51, %v4136_v52  ;;  %v4176_v51 = vld [vmem:[%s18149_s3 + $0x920] sm:$0xff]  ;;  %v4173_v52 = vld [vmem:[%s18149_s3 + $0x908] sm:$0xff] }
 0x26b   :  { %10458 = vmatpush1.bf16.msra.mxu1 %v12136_v63  ;;  %10131 = vmatprep.subr.bf16.mxu0 %v12143_v0  ;;  %v12185_v63 = vcombine.high %v4133_v55, %v4137_v56  ;;  %v4144_v0 = vld [vmem:[%s18149_s3 + $0x820] sm:$0xff]  ;;  %v12214_v55 = vcombine.low %v4164_v41, %v4168_v42  ;;  %v12216_v56 = vcombine.low %v4165_v45, %v4169_v21 }
 0x26c   :  { %10459 = vmatprep.subr.bf16.mxu1 %v12145_v1  ;;  %v12963_v1 = vadd.f32 %v14722_v9, %v565_v54  ;;  %v4148_v9 = vld [vmem:[%s18149_s3 + $0x840] sm:$0xff]  ;;  %v12190_v14 = vcombine.low %v4140_v24, %v4144_v0  ;;  %v4177_v54 = vld [vmem:[%s18149_s3 + $0x928] sm:$0xff] }
 0x26d   :  { %v12225_v60 = vcombine.high %v4173_v52, %v4177_v54 }
 0x26e   :  { %10132 = vmatpush1.bf16.msra.mxu0 %v12142_v7  ;;  %v12191_v7 = vcombine.high %v4140_v24, %v4144_v0  ;;  %v4185_v24 = vld [vmem:[%s18149_s3 + $0x968] sm:$0xff] }
 0x26f   :  { %10460 = vmatpush1.bf16.msra.mxu1 %v12144_v10  ;;  %10133 = vmatprep.subr.bf16.mxu0 %v12151_v31  ;;  %v12193_v10 = vcombine.high %v4141_v35, %v4145_v2  ;;  %v3857_v31 = vmax.f32 %v12963_v1, 0.0  ;;  %v12224_v1 = vcombine.low %v4173_v52, %v4177_v54  ;;  %v4220_v52 = vld [vmem:[%s18149_s3 + $0xa80] sm:$0xff] }
 0x270   :  { %10461 = vmatprep.subr.bf16.mxu1 %v12153_v11  ;;  %v4152_v11 = vld [vmem:[%s18149_s3 + $0x860] sm:$0xff] }
 0x271   :  { %v15303_v29 = vpack.c.bf16 %v3857_v31, %v3857_v31  ;;  %v4224_v54 = vld [vmem:[%s18149_s3 + $0xaa0] sm:$0xff] }
 0x272   :  { %10134 = vmatpush1.bf16.msra.mxu0 %v12150_v20  ;;  %v12192_v20 = vcombine.low %v4141_v35, %v4145_v2 }
 0x273   :  { %10462 = vmatpush1.bf16.msra.mxu1 %v12152_v25  ;;  %10135 = vmatprep.subr.bf16.mxu0 %v12159_v26  ;;  %v12199_v25 = vcombine.high %v4148_v9, %v4152_v11  ;;  %v4156_v26 = vld [vmem:[%s18149_s3 + $0x880] sm:$0xff] }
 0x274   :  { %10463 = vmatprep.subr.bf16.mxu1 %v12161_v15  ;;  %v4160_v15 = vld [vmem:[%s18149_s3 + $0x8a0] sm:$0xff] }
 0x276   :  { %10136 = vmatpush1.bf16.msra.mxu0 %v12158_v34  ;;  %v12198_v34 = vcombine.low %v4148_v9, %v4152_v11 }
 0x277   :  { %10464 = vmatpush1.bf16.msra.mxu1 %v12160_v12  ;;  %10137 = vmatprep.subr.bf16.mxu0 %v12167_v38  ;;  %v12200_v12 = vcombine.low %v4149_v16, %v4153_v17  ;;  %v12207_v38 = vcombine.high %v4156_v26, %v4160_v15  ;;  %v4200_v16 = vld [vmem:[%s18149_s3 + $0x9e0] sm:$0xff]  ;;  %v4197_v17 = vld [vmem:[%s18149_s3 + $0x9c8] sm:$0xff] }
 0x278   :  { %10465 = vmatprep.subr.bf16.mxu1 %v12169_v40  ;;  %v12209_v40 = vcombine.high %v4157_v30, %v4161_v33  ;;  %v4204_v30 = vld [vmem:[%s18149_s3 + $0xa00] sm:$0xff] }
 0x279   :  { %v4208_v33 = vld [vmem:[%s18149_s3 + $0xa20] sm:$0xff] }
 0x27a   :  { %10138 = vmatpush1.bf16.msra.mxu0 %v12166_v46  ;;  %v12206_v46 = vcombine.low %v4156_v26, %v4160_v15 }
 0x27b   :  { %10466 = vmatpush1.bf16.msra.mxu1 %v12168_v36  ;;  %10139 = vmatprep.subr.bf16.mxu0 %v12175_v49  ;;  %v12215_v36 = vcombine.high %v4164_v41, %v4168_v42  ;;  %v12217_v49 = vcombine.high %v4165_v45, %v4169_v21  ;;  %v12255_v41 = vcombine.high %v4204_v30, %v4208_v33  ;;  %v4212_v45 = vld [vmem:[%s18149_s3 + $0xa40] sm:$0xff] }
 0x27c   :  { %10467 = vmatprep.subr.bf16.mxu1 %v12177_v50  ;;  %v4172_v50 = vld [vmem:[%s18149_s3 + $0x900] sm:$0xff] }
 0x27d   :  { %v12222_v0 = vcombine.low %v4172_v50, %v4176_v51  ;;  %v4216_v21 = vld [vmem:[%s18149_s3 + $0xa60] sm:$0xff] }
 0x27e   :  { %10140 = vmatpush1.bf16.msra.mxu0 %v12174_v59  ;;  %v12223_v59 = vcombine.high %v4172_v50, %v4176_v51  ;;  %v12263_v50 = vcombine.high %v4212_v45, %v4216_v21 }
 0x27f   :  { %10468 = vmatpush1.bf16.msra.mxu1 %v12176_v61  ;;  %10141 = vmatprep.subr.bf16.mxu0 %v12183_v62  ;;  %v4180_v61 = vld [vmem:[%s18149_s3 + $0x940] sm:$0xff] }
 0x280   :  { %10469 = vmatprep.subr.bf16.mxu1 %v12185_v63  ;;  %v4184_v62 = vld [vmem:[%s18149_s3 + $0x960] sm:$0xff]  ;;  %v4181_v63 = vld [vmem:[%s18149_s3 + $0x948] sm:$0xff] }
 0x281   :  { %v12231_v35 = vcombine.high %v4180_v61, %v4184_v62  ;;  %v12233_v2 = vcombine.high %v4181_v63, %v4185_v24  ;;  %v12232_v31 = vcombine.low %v4181_v63, %v4185_v24  ;;  %v4228_v63 = vld [vmem:[%s18149_s3 + $0xac0] sm:$0xff] }
 0x282   :  { %10142 = vmatpush1.bf16.msra.mxu0 %v12182_v3  ;;  %v4188_v3 = vld [vmem:[%s18149_s3 + $0x980] sm:$0xff] }
 0x283   :  { %10470 = vmatpush1.bf16.msra.mxu1 %v12184_v5  ;;  %10152 = vmatprep.subr.bf16.mxu0 %v12191_v7  ;;  %v4189_v5 = vld [vmem:[%s18149_s3 + $0x988] sm:$0xff]  ;;  %v12239_v9 = vcombine.high %v4188_v3, %v4192_v22  ;;  %v4232_v24 = vld [vmem:[%s18149_s3 + $0xae0] sm:$0xff] }
 0x284   :  { %10480 = vmatprep.subr.bf16.mxu1 %v12193_v10  ;;  %v4193_v7 = vld [vmem:[%s18149_s3 + $0x9a8] sm:$0xff]  ;;  %v12230_v10 = vcombine.low %v4180_v61, %v4184_v62  ;;  %v12271_v61 = vcombine.high %v4220_v52, %v4224_v54 }
 0x285   :  { %10144 = vmatmul.mubr.bf16.vlgmr.msra.gmra.mrb[16].mxu0 %v15295_v18  ;;  %v12241_v11 = vcombine.high %v4189_v5, %v4193_v7  ;;  %v12240_v26 = vcombine.low %v4189_v5, %v4193_v7  ;;  %v4236_v5 = vld [vmem:[%s18149_s3 + $0xb00] sm:$0xff] }
 0x286   :  { %10472 = vmatmul.mubr.bf16.vlgmr.msra.gmra.mrb[16].mxu1 %v15295_v18  ;;  %10153 = vmatpush1.bf16.msra.mxu0 %v12190_v14  ;;  %v4196_v14 = vld [vmem:[%s18149_s3 + $0x9c0] sm:$0xff] }
 0x287   :  { %10184 = vmatprep.mubr.bf16.mxu0 %v15303_v29  ;;  %10481 = vmatpush1.bf16.msra.mxu1 %v12192_v20  ;;  %v4201_v20 = vld [vmem:[%s18149_s3 + $0x9e8] sm:$0xff]  ;;  %v12247_v15 = vcombine.high %v4196_v14, %v4200_v16  ;;  %v4240_v7 = vld [vmem:[%s18149_s3 + $0xb20] sm:$0xff] }
 0x288   :  { %10512 = vmatprep.mubr.bf16.mxu1 %v15303_v29  ;;  %10154 = vmatprep.subr.bf16.mxu0 %v12199_v25  ;;  %v12238_v25 = vcombine.low %v4188_v3, %v4192_v22  ;;  %v12279_v3 = vcombine.high %v4228_v63, %v4232_v24 }
 0x289   :  { %10482 = vmatprep.subr.bf16.mxu1 %v12201_v57  ;;  %v12249_v57 = vcombine.high %v4197_v17, %v4201_v20 }
 0x28a   :  { %10155 = vmatpush1.bf16.msra.mxu0 %v12198_v34  ;;  %v4205_v34 = vld [vmem:[%s18149_s3 + $0xa08] sm:$0xff] }
 0x28b   :  { %10483 = vmatpush1.bf16.msra.mxu1 %v12200_v12  ;;  %10156 = vmatprep.subr.bf16.mxu0 %v12207_v38  ;;  %v4209_v12 = vld [vmem:[%s18149_s3 + $0xa28] sm:$0xff]  ;;  %v12246_v38 = vcombine.low %v4196_v14, %v4200_v16  ;;  %v12287_v14 = vcombine.high %v4236_v5, %v4240_v7 }
 0x28c   :  { %10484 = vmatprep.subr.bf16.mxu1 %v12209_v40  ;;  %v12248_v40 = vcombine.low %v4197_v17, %v4201_v20  ;;  %v12257_v42 = vcombine.high %v4205_v34, %v4209_v12  ;;  %v4244_v17 = vld [vmem:[%s18149_s3 + $0xb40] sm:$0xff] }
 0x28d   :  { %v4248_v20 = vld [vmem:[%s18149_s3 + $0xb60] sm:$0xff] }
 0x28e   :  { %10157 = vmatpush1.bf16.msra.mxu0 %v12206_v46  ;;  %v4213_v46 = vld [vmem:[%s18149_s3 + $0xa48] sm:$0xff] }
 0x28f   :  { %10485 = vmatpush1.bf16.msra.mxu1 %v12208_v47  ;;  %10158 = vmatprep.subr.bf16.mxu0 %v12215_v36  ;;  %v4217_v47 = vld [vmem:[%s18149_s3 + $0xa68] sm:$0xff]  ;;  %v12254_v36 = vcombine.low %v4204_v30, %v4208_v33  ;;  %v12295_v33 = vcombine.high %v4244_v17, %v4248_v20 }
 0x290   :  { %10486 = vmatprep.subr.bf16.mxu1 %v12217_v49  ;;  %v12256_v49 = vcombine.low %v4205_v34, %v4209_v12  ;;  %v12265_v51 = vcombine.high %v4213_v46, %v4217_v47  ;;  %v4252_v12 = vld [vmem:[%s18149_s3 + $0xb80] sm:$0xff] }
 0x292   :  { %10159 = vmatpush1.bf16.msra.mxu0 %v12214_v55  ;;  %v4221_v55 = vld [vmem:[%s18149_s3 + $0xa88] sm:$0xff] }
 0x293   :  { %10487 = vmatpush1.bf16.msra.mxu1 %v12216_v56  ;;  %10160 = vmatprep.subr.bf16.mxu0 %v12223_v59  ;;  %v4225_v56 = vld [vmem:[%s18149_s3 + $0xaa8] sm:$0xff]  ;;  %v12262_v59 = vcombine.low %v4212_v45, %v4216_v21  ;;  %v12294_v45 = vcombine.low %v4244_v17, %v4248_v20  ;;  %v15468_v21 = vld [vmem:[%s18148_s2] sm:$0xff] }
 0x294   :  { %10488 = vmatprep.subr.bf16.mxu1 %v12225_v60  ;;  %v12264_v60 = vcombine.low %v4213_v46, %v4217_v47  ;;  %v12273_v62 = vcombine.high %v4221_v55, %v4225_v56  ;;  %v4284_v20 = vld [vmem:[%s18149_s3 + $0xc80] sm:$0xff] }
 0x296   :  { %10161 = vmatpush1.bf16.msra.mxu0 %v12222_v0  ;;  %v4229_v0 = vld [vmem:[%s18149_s3 + $0xac8] sm:$0xff] }
 0x297   :  { %10489 = vmatpush1.bf16.msra.mxu1 %v12224_v1  ;;  %10162 = vmatprep.subr.bf16.mxu0 %v12231_v35  ;;  %v4233_v1 = vld [vmem:[%s18149_s3 + $0xae8] sm:$0xff]  ;;  %v12270_v35 = vcombine.low %v4220_v52, %v4224_v54 }
 0x298   :  { %10490 = vmatprep.subr.bf16.mxu1 %v12233_v2  ;;  %v12272_v2 = vcombine.low %v4221_v55, %v4225_v56  ;;  %v12281_v22 = vcombine.high %v4229_v0, %v4233_v1  ;;  %v4261_v54 = vld [vmem:[%s18149_s3 + $0xbc8] sm:$0xff] }
 0x299   :  { %v4265_v55 = vld [vmem:[%s18149_s3 + $0xbe8] sm:$0xff] }
 0x29a   :  { %10163 = vmatpush1.bf16.msra.mxu0 %v12230_v10  ;;  %v4237_v10 = vld [vmem:[%s18149_s3 + $0xb08] sm:$0xff] }
 0x29b   :  { %10491 = vmatpush1.bf16.msra.mxu1 %v12232_v31  ;;  %10164 = vmatprep.subr.bf16.mxu0 %v12239_v9  ;;  %v4241_v31 = vld [vmem:[%s18149_s3 + $0xb28] sm:$0xff]  ;;  %v12278_v9 = vcombine.low %v4228_v63, %v4232_v24  ;;  %v4268_v63 = vld [vmem:[%s18149_s3 + $0xc00] sm:$0xff] }
 0x29c   :  { %10492 = vmatprep.subr.bf16.mxu1 %v12241_v11  ;;  %v12280_v11 = vcombine.low %v4229_v0, %v4233_v1  ;;  %v12289_v16 = vcombine.high %v4237_v10, %v4241_v31  ;;  %v12288_v30 = vcombine.low %v4237_v10, %v4241_v31  ;;  %v4272_v24 = vld [vmem:[%s18149_s3 + $0xc20] sm:$0xff]  ;;  %v4273_v1 = vld [vmem:[%s18149_s3 + $0xc28] sm:$0xff] }
 0x29d   :  { %v4280_v10 = vld [vmem:[%s18149_s3 + $0xc60] sm:$0xff]  ;;  %v12318_v31 = vcombine.low %v4268_v63, %v4272_v24 }
 0x29e   :  { %10165 = vmatpush1.bf16.msra.mxu0 %v12238_v25  ;;  %v4245_v25 = vld [vmem:[%s18149_s3 + $0xb48] sm:$0xff] }
 0x29f   :  { %10493 = vmatpush1.bf16.msra.mxu1 %v12240_v26  ;;  %10166 = vmatprep.subr.bf16.mxu0 %v12247_v15  ;;  %v4249_v26 = vld [vmem:[%s18149_s3 + $0xb68] sm:$0xff]  ;;  %v12286_v15 = vcombine.low %v4236_v5, %v4240_v7 }
 0x2a0   :  { %10494 = vmatprep.subr.bf16.mxu1 %v12249_v57  ;;  %v15448_v57 = vsub.s32 4, %v14798_v6  ;;  %v12297_v34 = vcombine.high %v4245_v25, %v4249_v26  ;;  %v12296_v47 = vcombine.low %v4245_v25, %v4249_v26  ;;  %v4288_v25 = vld [vmem:[%s18149_s3 + $0xca0] sm:$0xff] }
 0x2a2   :  { %10167 = vmatpush1.bf16.msra.mxu0 %v12246_v38  ;;  %v4256_v38 = vld [vmem:[%s18149_s3 + $0xba0] sm:$0xff]  ;;  %v561_v46 = vrot.slane %v15468_v21, %v15448_v57 }
 0x2a3   :  { %10495 = vmatpush1.bf16.msra.mxu1 %v12248_v40  ;;  %10168 = vmatprep.subr.bf16.mxu0 %v12255_v41  ;;  %v15457_v40 = vsub.s32 7, %v14798_v6  ;;  %v4253_v41 = vld [vmem:[%s18149_s3 + $0xb88] sm:$0xff]  ;;  %v12302_v56 = vcombine.low %v4252_v12, %v4256_v38 }
 0x2a4   :  { %10496 = vmatprep.subr.bf16.mxu1 %v12257_v42  ;;  %v4257_v42 = vld [vmem:[%s18149_s3 + $0xba8] sm:$0xff] }
 0x2a5   :  { %v573_v52 = vrot.slane %v15468_v21, %v15457_v40 }
 0x2a6   :  { %10169 = vmatpush1.bf16.msra.mxu0 %v12254_v36  ;;  %v12303_v36 = vcombine.high %v4252_v12, %v4256_v38  ;;  %v12335_v38 = vcombine.high %v4284_v20, %v4288_v25 }
 0x2a7   :  { %10497 = vmatpush1.bf16.msra.mxu1 %v12256_v49  ;;  %10170 = vmatprep.subr.bf16.mxu0 %v12263_v50  ;;  %v12305_v49 = vcombine.high %v4253_v41, %v4257_v42  ;;  %v4260_v50 = vld [vmem:[%s18149_s3 + $0xbc0] sm:$0xff]  ;;  %v12965_v0 = vadd.f32 %v14730_v13, %v573_v52 }
 0x2a8   :  { %10498 = vmatprep.subr.bf16.mxu1 %v12265_v51  ;;  %v4264_v51 = vld [vmem:[%s18149_s3 + $0xbe0] sm:$0xff] }
 0x2a9   :  { %v3859_v7 = vmax.f32 %v12965_v0, 0.0  ;;  %v4276_v13 = vld [vmem:[%s18149_s3 + $0xc40] sm:$0xff]  ;;  %v4309_v0 = vld [vmem:[%s18149_s3 + $0xd48] sm:$0xff] }
 0x2aa   :  { %10171 = vmatpush1.bf16.msra.mxu0 %v12262_v59  ;;  %v12962_v59 = vadd.f32 %v14712_v4, %v561_v46  ;;  %v4269_v4 = vld [vmem:[%s18149_s3 + $0xc08] sm:$0xff]  ;;  %v12327_v17 = vcombine.high %v4276_v13, %v4280_v10  ;;  %v4300_v52 = vld [vmem:[%s18149_s3 + $0xd00] sm:$0xff] }
 0x2ab   :  { %10499 = vmatpush1.bf16.msra.mxu1 %v12264_v60  ;;  %10172 = vmatprep.subr.bf16.mxu0 %v12271_v61  ;;  %v12304_v60 = vcombine.low %v4253_v41, %v4257_v42  ;;  %v12311_v61 = vcombine.high %v4260_v50, %v4264_v51  ;;  %v12321_v5 = vcombine.high %v4269_v4, %v4273_v1  ;;  %v4292_v42 = vld [vmem:[%s18149_s3 + $0xcc0] sm:$0xff]  ;;  %v4293_v46 = vld [vmem:[%s18149_s3 + $0xcc8] sm:$0xff] }
 0x2ac   :  { %10500 = vmatprep.subr.bf16.mxu1 %v12273_v62  ;;  %v12313_v62 = vcombine.high %v4261_v54, %v4265_v55  ;;  %v15520_v26 = vpack.c.bf16 %v3859_v7, %v3859_v7  ;;  %v4317_v7 = vld [vmem:[%s18149_s3 + $0xd88] sm:$0xff] }
 0x2ae   :  { %10173 = vmatpush1.bf16.msra.mxu0 %v12270_v35  ;;  %v12310_v35 = vcombine.low %v4260_v50, %v4264_v51 }
 0x2af   :  { %10501 = vmatpush1.bf16.msra.mxu1 %v12272_v2  ;;  %10174 = vmatprep.subr.bf16.mxu0 %v12279_v3  ;;  %v3856_v2 = vmax.f32 %v12962_v59, 0.0  ;;  %v12312_v3 = vcombine.low %v4261_v54, %v4265_v55  ;;  %v4304_v54 = vld [vmem:[%s18149_s3 + $0xd20] sm:$0xff]  ;;  %v4301_v55 = vld [vmem:[%s18149_s3 + $0xd08] sm:$0xff] }
 0x2b0   :  { %10502 = vmatprep.subr.bf16.mxu1 %v12281_v22  ;;  %v12319_v22 = vcombine.high %v4268_v63, %v4272_v24  ;;  %v4308_v63 = vld [vmem:[%s18149_s3 + $0xd40] sm:$0xff] }
 0x2b1   :  { %v4312_v24 = vld [vmem:[%s18149_s3 + $0xd60] sm:$0xff] }
 0x2b2   :  { %10175 = vmatpush1.bf16.msra.mxu0 %v12278_v9  ;;  %v4277_v9 = vld [vmem:[%s18149_s3 + $0xc48] sm:$0xff] }
 0x2b3   :  { %10503 = vmatpush1.bf16.msra.mxu1 %v12280_v11  ;;  %10176 = vmatprep.subr.bf16.mxu0 %v12287_v14  ;;  %v4281_v11 = vld [vmem:[%s18149_s3 + $0xc68] sm:$0xff]  ;;  %v15512_v14 = vpack.c.bf16 %v3856_v2, %v3856_v2  ;;  %v12359_v2 = vcombine.high %v4308_v63, %v4312_v24 }
 0x2b4   :  { %10504 = vmatprep.subr.bf16.mxu1 %v12289_v16  ;;  %v12320_v16 = vcombine.low %v4269_v4, %v4273_v1  ;;  %v12328_v12 = vcombine.low %v4277_v9, %v4281_v11  ;;  %v4313_v4 = vld [vmem:[%s18149_s3 + $0xd68] sm:$0xff]  ;;  %v12350_v1 = vcombine.low %v4300_v52, %v4304_v54 }
 0x2b6   :  { %10177 = vmatpush1.bf16.msra.mxu0 %v12286_v15  ;;  %v12329_v15 = vcombine.high %v4277_v9, %v4281_v11 }
 0x2b7   :  { %10505 = vmatpush1.bf16.msra.mxu1 %v12288_v30  ;;  %10178 = vmatprep.subr.bf16.mxu0 %v12295_v33  ;;  %v4285_v30 = vld [vmem:[%s18149_s3 + $0xc88] sm:$0xff] }
 0x2b8   :  { %10506 = vmatprep.subr.bf16.mxu1 %v12297_v34  ;;  %v4289_v33 = vld [vmem:[%s18149_s3 + $0xca8] sm:$0xff]  ;;  %v12326_v34 = vcombine.low %v4276_v13, %v4280_v10  ;;  %v12358_v10 = vcombine.low %v4308_v63, %v4312_v24 }
 0x2b9   :  { %v12337_v41 = vcombine.high %v4285_v30, %v4289_v33  ;;  %v4321_v13 = vld [vmem:[%s18149_s3 + $0xda8] sm:$0xff] }
 0x2ba   :  { %10179 = vmatpush1.bf16.msra.mxu0 %v12294_v45  ;;  %v4296_v45 = vld [vmem:[%s18149_s3 + $0xce0] sm:$0xff]  ;;  %v4345_v63 = vld [vmem:[%s18149_s3 + $0xe68] sm:$0xff] }
 0x2bb   :  { %10507 = vmatpush1.bf16.msra.mxu1 %v12296_v47  ;;  %10180 = vmatprep.subr.bf16.mxu0 %v12303_v36  ;;  %v4297_v47 = vld [vmem:[%s18149_s3 + $0xce8] sm:$0xff]  ;;  %v12334_v36 = vcombine.low %v4284_v20, %v4288_v25  ;;  %v12343_v50 = vcombine.high %v4292_v42, %v4296_v45  ;;  %v12342_v59 = vcombine.low %v4292_v42, %v4296_v45  ;;  %v4328_v20 = vld [vmem:[%s18149_s3 + $0xde0] sm:$0xff] }
 0x2bc   :  { %10508 = vmatprep.subr.bf16.mxu1 %v12305_v49  ;;  %v12336_v49 = vcombine.low %v4285_v30, %v4289_v33  ;;  %v12345_v51 = vcombine.high %v4293_v46, %v4297_v47  ;;  %v4325_v30 = vld [vmem:[%s18149_s3 + $0xdc8] sm:$0xff]  ;;  %v12368_v45 = vcombine.low %v4317_v7, %v4321_v13 }
 0x2bd   :  { %v4329_v33 = vld [vmem:[%s18149_s3 + $0xde8] sm:$0xff] }
 0x2be   :  { %10181 = vmatpush1.bf16.msra.mxu0 %v12302_v56  ;;  %v4305_v56 = vld [vmem:[%s18149_s3 + $0xd28] sm:$0xff] }
 0x2bf   :  { %10509 = vmatpush1.bf16.msra.mxu1 %v12304_v60  ;;  %10182 = vmatprep.subr.bf16.mxu0 %v12311_v61  ;;  %v12344_v60 = vcombine.low %v4293_v46, %v4297_v47  ;;  %v12351_v61 = vcombine.high %v4300_v52, %v4304_v54  ;;  %v4337_v52 = vld [vmem:[%s18149_s3 + $0xe28] sm:$0xff] }
 0x2c0   :  { %10510 = vmatprep.subr.bf16.mxu1 %v12313_v62  ;;  %v12353_v62 = vcombine.high %v4301_v55, %v4305_v56 }
 0x2c2   :  { %10183 = vmatpush1.bf16.msra.mxu0 %v12310_v35  ;;  %v12352_v35 = vcombine.low %v4301_v55, %v4305_v56  ;;  %v12376_v55 = vcombine.low %v4325_v30, %v4329_v33 }
 0x2c3   :  { %10511 = vmatpush1.bf16.msra.mxu1 %v12312_v3  ;;  %10193 = vmatprep.subr.bf16.mxu0 %v12319_v22  ;;  %v12361_v3 = vcombine.high %v4309_v0, %v4313_v4  ;;  %v4316_v22 = vld [vmem:[%s18149_s3 + $0xd80] sm:$0xff] }
 0x2c4   :  { %10521 = vmatprep.subr.bf16.mxu1 %v12321_v5  ;;  %v4320_v5 = vld [vmem:[%s18149_s3 + $0xda0] sm:$0xff] }
 0x2c5   :  { %10185 = vmatmul.mubr.bf16.vlgmr.msra.gmra.mrb[16].mxu0 %v15512_v14  ;;  %v12367_v9 = vcombine.high %v4316_v22, %v4320_v5 }
 0x2c6   :  { %10513 = vmatmul.mubr.bf16.vlgmr.msra.gmra.mrb[16].mxu1 %v15512_v14  ;;  %10194 = vmatpush1.bf16.msra.mxu0 %v12318_v31  ;;  %v12360_v31 = vcombine.low %v4309_v0, %v4313_v4 }
 0x2c7   :  { %10225 = vmatprep.mubr.bf16.mxu0 %v15520_v26  ;;  %10522 = vmatpush1.bf16.msra.mxu1 %v12320_v16  ;;  %v12369_v16 = vcombine.high %v4317_v7, %v4321_v13 }
 0x2c8   :  { %10553 = vmatprep.mubr.bf16.mxu1 %v15520_v26  ;;  %10195 = vmatprep.subr.bf16.mxu0 %v12327_v17  ;;  %v4324_v17 = vld [vmem:[%s18149_s3 + $0xdc0] sm:$0xff] }
 0x2c9   :  { %10523 = vmatprep.subr.bf16.mxu1 %v12329_v15  ;;  %v12375_v46 = vcombine.high %v4324_v17, %v4328_v20  ;;  %v12374_v54 = vcombine.low %v4324_v17, %v4328_v20  ;;  %v4361_v17 = vld [vmem:[%s18149_s3 + $0xee8] sm:$0xff] }
 0x2ca   :  { %10196 = vmatpush1.bf16.msra.mxu0 %v12326_v34 }
 0x2cb   :  { %10524 = vmatpush1.bf16.msra.mxu1 %v12328_v12  ;;  %10197 = vmatprep.subr.bf16.mxu0 %v12335_v38  ;;  %v12366_v38 = vcombine.low %v4316_v22, %v4320_v5  ;;  %v4353_v22 = vld [vmem:[%s18149_s3 + $0xea8] sm:$0xff] }
 0x2cc   :  { %10525 = vmatprep.subr.bf16.mxu1 %v12337_v41 }
 0x2ce   :  { %10198 = vmatpush1.bf16.msra.mxu0 %v12334_v36  ;;  %v12377_v36 = vcombine.high %v4325_v30, %v4329_v33 }
 0x2cf   :  { %10526 = vmatpush1.bf16.msra.mxu1 %v12336_v49  ;;  %10199 = vmatprep.subr.bf16.mxu0 %v12343_v50  ;;  %v4332_v49 = vld [vmem:[%s18149_s3 + $0xe00] sm:$0xff] }
 0x2d0   :  { %10527 = vmatprep.subr.bf16.mxu1 %v12345_v51  ;;  %v4336_v50 = vld [vmem:[%s18149_s3 + $0xe20] sm:$0xff]  ;;  %v4333_v51 = vld [vmem:[%s18149_s3 + $0xe08] sm:$0xff] }
 0x2d1   :  { %v12383_v56 = vcombine.high %v4332_v49, %v4336_v50  ;;  %v12382_v24 = vcombine.low %v4332_v49, %v4336_v50  ;;  %v12384_v0 = vcombine.low %v4333_v51, %v4337_v52  ;;  %v4372_v50 = vld [vmem:[%s18149_s3 + $0xf40] sm:$0xff] }
 0x2d2   :  { %10200 = vmatpush1.bf16.msra.mxu0 %v12342_v59  ;;  %v12385_v59 = vcombine.high %v4333_v51, %v4337_v52  ;;  %v4376_v51 = vld [vmem:[%s18149_s3 + $0xf60] sm:$0xff]  ;;  %v4373_v52 = vld [vmem:[%s18149_s3 + $0xf48] sm:$0xff] }
 0x2d3   :  { %10528 = vmatpush1.bf16.msra.mxu1 %v12344_v60  ;;  %10201 = vmatprep.subr.bf16.mxu0 %v12351_v61  ;;  %v4340_v60 = vld [vmem:[%s18149_s3 + $0xe40] sm:$0xff] }
 0x2d4   :  { %10529 = vmatprep.subr.bf16.mxu1 %v12353_v62  ;;  %v4344_v61 = vld [vmem:[%s18149_s3 + $0xe60] sm:$0xff]  ;;  %v4341_v62 = vld [vmem:[%s18149_s3 + $0xe48] sm:$0xff] }
 0x2d5   :  { %v12391_v4 = vcombine.high %v4340_v60, %v4344_v61  ;;  %v12390_v5 = vcombine.low %v4340_v60, %v4344_v61  ;;  %v12392_v7 = vcombine.low %v4341_v62, %v4345_v63  ;;  %v12423_v60 = vcombine.high %v4372_v50, %v4376_v51 }
 0x2d6   :  { %10202 = vmatpush1.bf16.msra.mxu0 %v12350_v1  ;;  %v12393_v1 = vcombine.high %v4341_v62, %v4345_v63  ;;  %v4380_v62 = vld [vmem:[%s18149_s3 + $0xf80] sm:$0xff] }
 0x2d7   :  { %10530 = vmatpush1.bf16.msra.mxu1 %v12352_v35  ;;  %10203 = vmatprep.subr.bf16.mxu0 %v12359_v2  ;;  %v4348_v35 = vld [vmem:[%s18149_s3 + $0xe80] sm:$0xff] }
 0x2d8   :  { %v15580_v11 = vpop.f32.mrb[12].mxu0  ;;  %10531 = vmatprep.subr.bf16.mxu1 %v12361_v3  ;;  %v4352_v2 = vld [vmem:[%s18149_s3 + $0xea0] sm:$0xff]  ;;  %v4349_v3 = vld [vmem:[%s18149_s3 + $0xe88] sm:$0xff] }
 0x2d9   :  { %v15588_v25 = vpop.f32.mrb[12].mxu1  ;;  %v15590_v15 = vpop.f32.mrb[13].mxu0  ;;  %v12399_v13 = vcombine.high %v4348_v35, %v4352_v2  ;;  %v12398_v20 = vcombine.low %v4348_v35, %v4352_v2  ;;  %v12400_v30 = vcombine.low %v4349_v3, %v4353_v22  ;;  %v4384_v63 = vld [vmem:[%s18149_s3 + $0xfa0] sm:$0xff] }
 0x2da   :  { %v15598_v34 = vpop.f32.mrb[13].mxu1  ;;  %v3767_v12 = vpop.f32.mrb[14].mxu0  ;;  %10204 = vmatpush1.bf16.msra.mxu0 %v12358_v10  ;;  %v12401_v10 = vcombine.high %v4349_v3, %v4353_v22  ;;  %v12431_v2 = vcombine.high %v4380_v62, %v4384_v63  ;;  %v4388_v22 = vld [vmem:[%s18149_s3 + $0xfc0] sm:$0xff] }
 0x2db   :  { %v3849_v41 = vpop.f32.mrb[14].mxu1  ;;  %10532 = vmatpush1.bf16.msra.mxu1 %v12360_v31  ;;  %v3768_v42 = vpop.f32.mrb[15].mxu0  ;;  %10205 = vmatprep.subr.bf16.mxu0 %v12367_v9  ;;  %v4356_v31 = vld [vmem:[%s18149_s3 + $0xec0] sm:$0xff] }
 0x2dc   :  { %v3850_v47 = vpop.f32.mrb[15].mxu1  ;;  %10533 = vmatprep.subr.bf16.mxu1 %v12369_v16  ;;  %v4360_v9 = vld [vmem:[%s18149_s3 + $0xee0] sm:$0xff]  ;;  %v4357_v16 = vld [vmem:[%s18149_s3 + $0xec8] sm:$0xff] }
 0x2dd   :  { %v12407_v33 = vcombine.high %v4356_v31, %v4360_v9  ;;  %v12409_v12 = vcombine.high %v4357_v16, %v4361_v17  ;;  %v4368_v41 = vld [vmem:[%s18149_s3 + $0xf20] sm:$0xff]  ;;  %v4365_v42 = vld [vmem:[%s18149_s3 + $0xf08] sm:$0xff]  ;;  %v12408_v47 = vcombine.low %v4357_v16, %v4361_v17 }
 0x2de   :  { %10206 = vmatpush1.bf16.msra.mxu0 %v12366_v38  ;;  %v4364_v38 = vld [vmem:[%s18149_s3 + $0xf00] sm:$0xff] }
 0x2df   :  { %10534 = vmatpush1.bf16.msra.mxu1 %v12368_v45  ;;  %10207 = vmatprep.subr.bf16.mxu0 %v12375_v46  ;;  %v4369_v45 = vld [vmem:[%s18149_s3 + $0xf28] sm:$0xff]  ;;  %v12406_v46 = vcombine.low %v4356_v31, %v4360_v9 }
 0x2e0   :  { %10535 = vmatprep.subr.bf16.mxu1 %v12377_v36  ;;  %v12415_v36 = vcombine.high %v4364_v38, %v4368_v41  ;;  %v12417_v49 = vcombine.high %v4365_v42, %v4369_v45 }
 0x2e2   :  { %10208 = vmatpush1.bf16.msra.mxu0 %v12374_v54  ;;  %v4377_v54 = vld [vmem:[%s18149_s3 + $0xf68] sm:$0xff] }
 0x2e3   :  { %10536 = vmatpush1.bf16.msra.mxu1 %v12376_v55  ;;  %10209 = vmatprep.subr.bf16.mxu0 %v12383_v56  ;;  %v12414_v55 = vcombine.low %v4364_v38, %v4368_v41  ;;  %v15673_v56 = vsub.s32 6, %v14798_v6  ;;  %v12425_v61 = vcombine.high %v4373_v52, %v4377_v54  ;;  %v4385_v6 = vld [vmem:[%s18149_s3 + $0xfa8] sm:$0xff]  ;;  %v12424_v35 = vcombine.low %v4373_v52, %v4377_v54 }
 0x2e4   :  { %10537 = vmatprep.subr.bf16.mxu1 %v12385_v59  ;;  %v12416_v59 = vcombine.low %v4365_v42, %v4369_v45 }
 0x2e6   :  { %10210 = vmatpush1.bf16.msra.mxu0 %v12382_v24  ;;  %v4381_v24 = vld [vmem:[%s18149_s3 + $0xf88] sm:$0xff] }
 0x2e7   :  { %10538 = vmatpush1.bf16.msra.mxu1 %v12384_v0  ;;  %10211 = vmatprep.subr.bf16.mxu0 %v12391_v4  ;;  %v15690_v0 = vld [vmem:[%s18148_s2 + $0x8] sm:$0xff]  ;;  %v12422_v4 = vcombine.low %v4372_v50, %v4376_v51  ;;  %v12433_v3 = vcombine.high %v4381_v24, %v4385_v6  ;;  %v12432_v9 = vcombine.low %v4381_v24, %v4385_v6 }
 0x2e8   :  { %10539 = vmatprep.subr.bf16.mxu1 %v12393_v1  ;;  %v569_v1 = vrot.slane %v15468_v21, %v15673_v56  ;;  %v4389_v21 = vld [vmem:[%s18149_s3 + $0xfc8] sm:$0xff] }
 0x2e9   :  { %v4405_v50 = vld [vmem:[%s18149_s3 + $0x1048] sm:$0xff] }
 0x2ea   :  { %10212 = vmatpush1.bf16.msra.mxu0 %v12390_v5  ;;  %v4392_v5 = vld [vmem:[%s18149_s3 + $0xfe0] sm:$0xff]  ;;  %v12964_v31 = vadd.f32 %v14720_v8, %v569_v1  ;;  %v4397_v8 = vld [vmem:[%s18149_s3 + $0x1008] sm:$0xff] }
 0x2eb   :  { %10540 = vmatpush1.bf16.msra.mxu1 %v12392_v7  ;;  %10213 = vmatprep.subr.bf16.mxu0 %v12399_v13  ;;  %v581_v7 = vrot.slane %v15690_v0, %v14813_v19  ;;  %v4393_v13 = vld [vmem:[%s18149_s3 + $0xfe8] sm:$0xff]  ;;  %v12439_v16 = vcombine.high %v4388_v22, %v4392_v5  ;;  %v12438_v38 = vcombine.low %v4388_v22, %v4392_v5 }
 0x2ec   :  { %10541 = vmatprep.subr.bf16.mxu1 %v12401_v10  ;;  %v12430_v10 = vcombine.low %v4380_v62, %v4384_v63  ;;  %v12441_v17 = vcombine.high %v4389_v21, %v4393_v13  ;;  %v3858_v41 = vmax.f32 %v12964_v31, 0.0  ;;  %v12440_v42 = vcombine.low %v4389_v21, %v4393_v13  ;;  %v4409_v51 = vld [vmem:[%s18149_s3 + $0x1068] sm:$0xff]  ;;  %v4428_v31 = vld [vmem:[%s18149_s3 + $0x1100] sm:$0xff] }
 0x2ed   :  { %v12457_v62 = vcombine.high %v4405_v50, %v4409_v51  ;;  %v4413_v63 = vld [vmem:[%s18149_s3 + $0x1088] sm:$0xff] }
 0x2ee   :  { %10214 = vmatpush1.bf16.msra.mxu0 %v12398_v20  ;;  %v4396_v20 = vld [vmem:[%s18149_s3 + $0x1000] sm:$0xff]  ;;  %v15734_v52 = vpack.c.bf16 %v3858_v41, %v3858_v41  ;;  %v4417_v24 = vld [vmem:[%s18149_s3 + $0x10a8] sm:$0xff] }
 0x2ef   :  { %10542 = vmatpush1.bf16.msra.mxu1 %v12400_v30  ;;  %10215 = vmatprep.subr.bf16.mxu0 %v12407_v33  ;;  %v4400_v30 = vld [vmem:[%s18149_s3 + $0x1020] sm:$0xff]  ;;  %v12967_v33 = vadd.f32 %v15153_v23, %v581_v7  ;;  %v4421_v22 = vld [vmem:[%s18149_s3 + $0x10c8] sm:$0xff]  ;;  %v12464_v21 = vcombine.low %v4413_v63, %v4417_v24 }
 0x2f0   :  { %10543 = vmatprep.subr.bf16.mxu1 %v12409_v12  ;;  %v4401_v12 = vld [vmem:[%s18149_s3 + $0x1028] sm:$0xff]  ;;  %v12447_v45 = vcombine.high %v4396_v20, %v4400_v30  ;;  %v4404_v23 = vld [vmem:[%s18149_s3 + $0x1040] sm:$0xff] }
 0x2f1   :  { %v12448_v54 = vcombine.low %v4397_v8, %v4401_v12  ;;  %v4425_v5 = vld [vmem:[%s18149_s3 + $0x10e8] sm:$0xff] }
 0x2f2   :  { %10216 = vmatpush1.bf16.msra.mxu0 %v12406_v46  ;;  %v12449_v46 = vcombine.high %v4397_v8, %v4401_v12  ;;  %v4436_v12 = vld [vmem:[%s18149_s3 + $0x1140] sm:$0xff]  ;;  %v4437_v41 = vld [vmem:[%s18149_s3 + $0x1148] sm:$0xff] }
 0x2f3   :  { %10544 = vmatpush1.bf16.msra.mxu1 %v12408_v47  ;;  %10217 = vmatprep.subr.bf16.mxu0 %v12415_v36  ;;  %v3861_v47 = vmax.f32 %v12967_v33, 0.0  ;;  %v4408_v36 = vld [vmem:[%s18149_s3 + $0x1060] sm:$0xff] }
 0x2f4   :  { %10545 = vmatprep.subr.bf16.mxu1 %v12417_v49  ;;  %v12446_v49 = vcombine.low %v4396_v20, %v4400_v30  ;;  %v12454_v6 = vcombine.low %v4404_v23, %v4408_v36  ;;  %v12472_v30 = vcombine.low %v4421_v22, %v4425_v5 }
 0x2f6   :  { %10218 = vmatpush1.bf16.msra.mxu0 %v12414_v55  ;;  %v12455_v55 = vcombine.high %v4404_v23, %v4408_v36  ;;  %v4444_v36 = vld [vmem:[%s18149_s3 + $0x1180] sm:$0xff] }
 0x2f7   :  { %10546 = vmatpush1.bf16.msra.mxu1 %v12416_v59  ;;  %10219 = vmatprep.subr.bf16.mxu0 %v12423_v60  ;;  %v4412_v59 = vld [vmem:[%s18149_s3 + $0x1080] sm:$0xff] }
 0x2f8   :  { %10547 = vmatprep.subr.bf16.mxu1 %v12425_v61  ;;  %v4416_v60 = vld [vmem:[%s18149_s3 + $0x10a0] sm:$0xff]  ;;  %v15742_v61 = vpack.c.bf16 %v3861_v47, %v3861_v47 }
 0x2f9   :  { %v12463_v1 = vcombine.high %v4412_v59, %v4416_v60  ;;  %v12462_v7 = vcombine.low %v4412_v59, %v4416_v60 }
 0x2fa   :  { %10220 = vmatpush1.bf16.msra.mxu0 %v12422_v4  ;;  %v12456_v4 = vcombine.low %v4405_v50, %v4409_v51  ;;  %v4445_v50 = vld [vmem:[%s18149_s3 + $0x1188] sm:$0xff] }
 0x2fb   :  { %10548 = vmatpush1.bf16.msra.mxu1 %v12424_v35  ;;  %10221 = vmatprep.subr.bf16.mxu0 %v12431_v2  ;;  %v12465_v35 = vcombine.high %v4413_v63, %v4417_v24  ;;  %v4420_v2 = vld [vmem:[%s18149_s3 + $0x10c0] sm:$0xff]  ;;  %v4449_v51 = vld [vmem:[%s18149_s3 + $0x11a8] sm:$0xff] }
 0x2fc   :  { %10549 = vmatprep.subr.bf16.mxu1 %v12433_v3  ;;  %v4424_v3 = vld [vmem:[%s18149_s3 + $0x10e0] sm:$0xff]  ;;  %v12497_v60 = vcombine.high %v4445_v50, %v4449_v51  ;;  %v4453_v24 = vld [vmem:[%s18149_s3 + $0x11c8] sm:$0xff] }
 0x2fd   :  { %v12471_v13 = vcombine.high %v4420_v2, %v4424_v3  ;;  %v12470_v20 = vcombine.low %v4420_v2, %v4424_v3  ;;  %v4456_v63 = vld [vmem:[%s18149_s3 + $0x11e0] sm:$0xff] }
 0x2fe   :  { %10222 = vmatpush1.bf16.msra.mxu0 %v12430_v10  ;;  %v12473_v10 = vcombine.high %v4421_v22, %v4425_v5  ;;  %v4460_v3 = vld [vmem:[%s18149_s3 + $0x1200] sm:$0xff]  ;;  %v4461_v5 = vld [vmem:[%s18149_s3 + $0x1208] sm:$0xff] }
 0x2ff   :  { %10550 = vmatpush1.bf16.msra.mxu1 %v12432_v9  ;;  %10223 = vmatprep.subr.bf16.mxu0 %v12439_v16  ;;  %v4432_v9 = vld [vmem:[%s18149_s3 + $0x1120] sm:$0xff]  ;;  %v4429_v16 = vld [vmem:[%s18149_s3 + $0x1108] sm:$0xff] }
 0x300   :  { %10551 = vmatprep.subr.bf16.mxu1 %v12441_v17  ;;  %v4433_v17 = vld [vmem:[%s18149_s3 + $0x1128] sm:$0xff]  ;;  %v12479_v33 = vcombine.high %v4428_v31, %v4432_v9  ;;  %v4464_v22 = vld [vmem:[%s18149_s3 + $0x1220] sm:$0xff] }
 0x301   :  { %v12481_v8 = vcombine.high %v4429_v16, %v4433_v17 }
 0x302   :  { %10224 = vmatpush1.bf16.msra.mxu0 %v12438_v38  ;;  %v4440_v38 = vld [vmem:[%s18149_s3 + $0x1160] sm:$0xff] }
 0x303   :  { %10552 = vmatpush1.bf16.msra.mxu1 %v12440_v42  ;;  %10234 = vmatprep.subr.bf16.mxu0 %v12447_v45  ;;  %v4441_v42 = vld [vmem:[%s18149_s3 + $0x1168] sm:$0xff]  ;;  %v12478_v45 = vcombine.low %v4428_v31, %v4432_v9  ;;  %v12487_v47 = vcombine.high %v4436_v12, %v4440_v38  ;;  %v4468_v9 = vld [vmem:[%s18149_s3 + $0x1240] sm:$0xff] }
 0x304   :  { %10562 = vmatprep.subr.bf16.mxu1 %v12449_v46  ;;  %v12480_v46 = vcombine.low %v4429_v16, %v4433_v17  ;;  %v12489_v23 = vcombine.high %v4437_v41, %v4441_v42  ;;  %v4472_v16 = vld [vmem:[%s18149_s3 + $0x1260] sm:$0xff]  ;;  %v4469_v17 = vld [vmem:[%s18149_s3 + $0x1248] sm:$0xff] }
 0x305   :  { %10226 = vmatmul.mubr.bf16.vlgmr.msra.gmra.mrb[16].mxu0 %v15734_v52 }
 0x306   :  { %10554 = vmatmul.mubr.bf16.vlgmr.msra.gmra.mrb[16].mxu1 %v15734_v52  ;;  %10235 = vmatpush1.bf16.msra.mxu0 %v12446_v49  ;;  %v4448_v49 = vld [vmem:[%s18149_s3 + $0x11a0] sm:$0xff] }
 0x307   :  { %10266 = vmatprep.mubr.bf16.mxu0 %v15742_v61  ;;  %10563 = vmatpush1.bf16.msra.mxu1 %v12448_v54  ;;  %v12486_v54 = vcombine.low %v4436_v12, %v4440_v38  ;;  %v12495_v59 = vcombine.high %v4444_v36, %v4448_v49  ;;  %v4476_v38 = vld [vmem:[%s18149_s3 + $0x1280] sm:$0xff] }
 0x308   :  { %10594 = vmatprep.mubr.bf16.mxu1 %v15742_v61  ;;  %10236 = vmatprep.subr.bf16.mxu0 %v12455_v55  ;;  %v12488_v55 = vcombine.low %v4437_v41, %v4441_v42  ;;  %v4480_v41 = vld [vmem:[%s18149_s3 + $0x12a0] sm:$0xff]  ;;  %v4477_v42 = vld [vmem:[%s18149_s3 + $0x1288] sm:$0xff] }
 0x309   :  { %10564 = vmatprep.subr.bf16.mxu1 %v12457_v62  ;;  %v4452_v62 = vld [vmem:[%s18149_s3 + $0x11c0] sm:$0xff] }
 0x30a   :  { %10237 = vmatpush1.bf16.msra.mxu0 %v12454_v6  ;;  %v4457_v6 = vld [vmem:[%s18149_s3 + $0x11e8] sm:$0xff] }
 0x30b   :  { %10565 = vmatpush1.bf16.msra.mxu1 %v12456_v4  ;;  %10238 = vmatprep.subr.bf16.mxu0 %v12463_v1  ;;  %v12494_v4 = vcombine.low %v4444_v36, %v4448_v49  ;;  %v12496_v1 = vcombine.low %v4445_v50, %v4449_v51  ;;  %v12505_v2 = vcombine.high %v4453_v24, %v4457_v6  ;;  %v4484_v49 = vld [vmem:[%s18149_s3 + $0x12c0] sm:$0xff]  ;;  %v4485_v51 = vld [vmem:[%s18149_s3 + $0x12c8] sm:$0xff] }
 0x30c   :  { %10566 = vmatprep.subr.bf16.mxu1 %v12465_v35  ;;  %v12503_v35 = vcombine.high %v4452_v62, %v4456_v63  ;;  %v4488_v50 = vld [vmem:[%s18149_s3 + $0x12e0] sm:$0xff] }
 0x30e   :  { %10239 = vmatpush1.bf16.msra.mxu0 %v12462_v7  ;;  %v4465_v7 = vld [vmem:[%s18149_s3 + $0x1228] sm:$0xff] }
 0x30f   :  { %10567 = vmatpush1.bf16.msra.mxu1 %v12464_v21  ;;  %10240 = vmatprep.subr.bf16.mxu0 %v12471_v13  ;;  %v12502_v21 = vcombine.low %v4452_v62, %v4456_v63  ;;  %v12504_v13 = vcombine.low %v4453_v24, %v4457_v6  ;;  %v12513_v31 = vcombine.high %v4461_v5, %v4465_v7  ;;  %v4492_v63 = vld [vmem:[%s18149_s3 + $0x1300] sm:$0xff]  ;;  %v4493_v6 = vld [vmem:[%s18149_s3 + $0x1308] sm:$0xff] }
 0x310   :  { %10568 = vmatprep.subr.bf16.mxu1 %v12473_v10  ;;  %v12511_v10 = vcombine.high %v4460_v3, %v4464_v22  ;;  %v4496_v24 = vld [vmem:[%s18149_s3 + $0x1320] sm:$0xff] }
 0x312   :  { %10241 = vmatpush1.bf16.msra.mxu0 %v12470_v20  ;;  %v4473_v20 = vld [vmem:[%s18149_s3 + $0x1268] sm:$0xff] }
 0x313   :  { %10569 = vmatpush1.bf16.msra.mxu1 %v12472_v30  ;;  %10242 = vmatprep.subr.bf16.mxu0 %v12479_v33  ;;  %v12510_v30 = vcombine.low %v4460_v3, %v4464_v22  ;;  %v12512_v33 = vcombine.low %v4461_v5, %v4465_v7  ;;  %v12521_v12 = vcombine.high %v4469_v17, %v4473_v20  ;;  %v4500_v22 = vld [vmem:[%s18149_s3 + $0x1340] sm:$0xff]  ;;  %v4501_v7 = vld [vmem:[%s18149_s3 + $0x1348] sm:$0xff] }
 0x314   :  { %10570 = vmatprep.subr.bf16.mxu1 %v12481_v8  ;;  %v12519_v8 = vcombine.high %v4468_v9, %v4472_v16  ;;  %v4504_v5 = vld [vmem:[%s18149_s3 + $0x1360] sm:$0xff] }
 0x316   :  { %10243 = vmatpush1.bf16.msra.mxu0 %v12478_v45  ;;  %v4481_v45 = vld [vmem:[%s18149_s3 + $0x12a8] sm:$0xff] }
 0x317   :  { %10571 = vmatpush1.bf16.msra.mxu1 %v12480_v46  ;;  %10244 = vmatprep.subr.bf16.mxu0 %v12487_v47  ;;  %v12518_v46 = vcombine.low %v4468_v9, %v4472_v16  ;;  %v12520_v47 = vcombine.low %v4469_v17, %v4473_v20  ;;  %v12529_v36 = vcombine.high %v4477_v42, %v4481_v45  ;;  %v4508_v16 = vld [vmem:[%s18149_s3 + $0x1380] sm:$0xff]  ;;  %v4509_v20 = vld [vmem:[%s18149_s3 + $0x1388] sm:$0xff] }
 0x318   :  { %10572 = vmatprep.subr.bf16.mxu1 %v12489_v23  ;;  %v12527_v23 = vcombine.high %v4476_v38, %v4480_v41  ;;  %v4512_v17 = vld [vmem:[%s18149_s3 + $0x13a0] sm:$0xff] }
 0x31a   :  { %10245 = vmatpush1.bf16.msra.mxu0 %v12486_v54  ;;  %v4489_v54 = vld [vmem:[%s18149_s3 + $0x12e8] sm:$0xff] }
 0x31b   :  { %10573 = vmatpush1.bf16.msra.mxu1 %v12488_v55  ;;  %10246 = vmatprep.subr.bf16.mxu0 %v12495_v59  ;;  %v12526_v55 = vcombine.low %v4476_v38, %v4480_v41  ;;  %v12528_v59 = vcombine.low %v4477_v42, %v4481_v45  ;;  %v12537_v62 = vcombine.high %v4485_v51, %v4489_v54  ;;  %v4516_v42 = vld [vmem:[%s18149_s3 + $0x13c0] sm:$0xff] }
 0x31c   :  { %10574 = vmatprep.subr.bf16.mxu1 %v12497_v60  ;;  %v12535_v60 = vcombine.high %v4484_v49, %v4488_v50  ;;  %v12559_v38 = vcombine.high %v4508_v16, %v4512_v17  ;;  %v4520_v45 = vld [vmem:[%s18149_s3 + $0x13e0] sm:$0xff] }
 0x31e   :  { %10247 = vmatpush1.bf16.msra.mxu0 %v12494_v4  ;;  %v4497_v4 = vld [vmem:[%s18149_s3 + $0x1328] sm:$0xff] }
 0x31f   :  { %10575 = vmatpush1.bf16.msra.mxu1 %v12496_v1  ;;  %10248 = vmatprep.subr.bf16.mxu0 %v12503_v35  ;;  %v12534_v1 = vcombine.low %v4484_v49, %v4488_v50  ;;  %v12536_v35 = vcombine.low %v4485_v51, %v4489_v54  ;;  %v12545_v3 = vcombine.high %v4493_v6, %v4497_v4 }
 0x320   :  { %10576 = vmatprep.subr.bf16.mxu1 %v12505_v2  ;;  %v12543_v2 = vcombine.high %v4492_v63, %v4496_v24  ;;  %v12567_v51 = vcombine.high %v4516_v42, %v4520_v45 }
 0x322   :  { %10249 = vmatpush1.bf16.msra.mxu0 %v12502_v21  ;;  %v4505_v21 = vld [vmem:[%s18149_s3 + $0x1368] sm:$0xff] }
 0x323   :  { %10577 = vmatpush1.bf16.msra.mxu1 %v12504_v13  ;;  %10250 = vmatprep.subr.bf16.mxu0 %v12511_v10  ;;  %v12542_v13 = vcombine.low %v4492_v63, %v4496_v24  ;;  %v12544_v10 = vcombine.low %v4493_v6, %v4497_v4  ;;  %v12553_v9 = vcombine.high %v4501_v7, %v4505_v21 }
 0x324   :  { %10578 = vmatprep.subr.bf16.mxu1 %v12513_v31  ;;  %v12551_v31 = vcombine.high %v4500_v22, %v4504_v5  ;;  %v12566_v63 = vcombine.low %v4516_v42, %v4520_v45  ;;  %v4549_v42 = vld [vmem:[%s18149_s3 + $0x14c8] sm:$0xff] }
 0x325   :  { %v4553_v45 = vld [vmem:[%s18149_s3 + $0x14e8] sm:$0xff] }
 0x326   :  { %10251 = vmatpush1.bf16.msra.mxu0 %v12510_v30  ;;  %v4513_v30 = vld [vmem:[%s18149_s3 + $0x13a8] sm:$0xff] }
 0x327   :  { %10579 = vmatpush1.bf16.msra.mxu1 %v12512_v33  ;;  %10252 = vmatprep.subr.bf16.mxu0 %v12519_v8  ;;  %v12550_v33 = vcombine.low %v4500_v22, %v4504_v5  ;;  %v577_v8 = vrot.slane %v15690_v0, %v15016_v44  ;;  %v12561_v41 = vcombine.high %v4509_v20, %v4513_v30  ;;  %v4533_v22 = vld [vmem:[%s18149_s3 + $0x1448] sm:$0xff] }
 0x328   :  { %10580 = vmatprep.subr.bf16.mxu1 %v12521_v12  ;;  %v12552_v12 = vcombine.low %v4501_v7, %v4505_v21  ;;  %v12560_v50 = vcombine.low %v4509_v20, %v4513_v30  ;;  %v4537_v5 = vld [vmem:[%s18149_s3 + $0x1468] sm:$0xff] }
 0x329   :  { %v12966_v49 = vadd.f32 %v15143_v53, %v577_v8  ;;  %v4525_v53 = vld [vmem:[%s18149_s3 + $0x1408] sm:$0xff] }
 0x32a   :  { %10253 = vmatpush1.bf16.msra.mxu0 %v12518_v46  ;;  %v589_v46 = vrot.slane %v15690_v0, %v15025_v48  ;;  %v4545_v20 = vld [vmem:[%s18149_s3 + $0x14a8] sm:$0xff] }
 0x32b   :  { %10581 = vmatpush1.bf16.msra.mxu1 %v12520_v47  ;;  %10254 = vmatprep.subr.bf16.mxu0 %v12527_v23  ;;  %v4517_v47 = vld [vmem:[%s18149_s3 + $0x13c8] sm:$0xff]  ;;  %v3860_v24 = vmax.f32 %v12966_v49, 0.0  ;;  %v4556_v49 = vld [vmem:[%s18149_s3 + $0x1500] sm:$0xff] }
 0x32c   :  { %10582 = vmatprep.subr.bf16.mxu1 %v12529_v36  ;;  %v4521_v23 = vld [vmem:[%s18149_s3 + $0x13e8] sm:$0xff]  ;;  %v12558_v36 = vcombine.low %v4508_v16, %v4512_v17  ;;  %v12585_v16 = vcombine.high %v4533_v22, %v4537_v5 }
 0x32d   :  { %v12569_v54 = vcombine.high %v4517_v47, %v4521_v23  ;;  %v12568_v6 = vcombine.low %v4517_v47, %v4521_v23  ;;  %v15940_v7 = vpack.c.bf16 %v3860_v24, %v3860_v24  ;;  %v4541_v17 = vld [vmem:[%s18149_s3 + $0x1488] sm:$0xff] }
 0x32e   :  { %10255 = vmatpush1.bf16.msra.mxu0 %v12526_v55  ;;  %v4524_v55 = vld [vmem:[%s18149_s3 + $0x1400] sm:$0xff]  ;;  %v12592_v47 = vcombine.low %v4541_v17, %v4545_v20  ;;  %v4565_v24 = vld [vmem:[%s18149_s3 + $0x1548] sm:$0xff] }
 0x32f   :  { %10583 = vmatpush1.bf16.msra.mxu1 %v12528_v59  ;;  %10256 = vmatprep.subr.bf16.mxu0 %v12535_v60  ;;  %v4528_v59 = vld [vmem:[%s18149_s3 + $0x1420] sm:$0xff]  ;;  %v12969_v60 = vadd.f32 %v15161_v27, %v589_v46 }
 0x330   :  { %10584 = vmatprep.subr.bf16.mxu1 %v12537_v62  ;;  %v4529_v62 = vld [vmem:[%s18149_s3 + $0x1428] sm:$0xff]  ;;  %v12575_v4 = vcombine.high %v4524_v55, %v4528_v59  ;;  %v4532_v27 = vld [vmem:[%s18149_s3 + $0x1440] sm:$0xff] }
 0x331   :  { %v12576_v21 = vcombine.low %v4525_v53, %v4529_v62 }
 0x332   :  { %10257 = vmatpush1.bf16.msra.mxu0 %v12534_v1  ;;  %v12577_v1 = vcombine.high %v4525_v53, %v4529_v62  ;;  %v4564_v62 = vld [vmem:[%s18149_s3 + $0x1540] sm:$0xff] }
 0x333   :  { %10585 = vmatpush1.bf16.msra.mxu1 %v12536_v35  ;;  %10258 = vmatprep.subr.bf16.mxu0 %v12543_v2  ;;  %v3863_v35 = vmax.f32 %v12969_v60, 0.0  ;;  %v4536_v2 = vld [vmem:[%s18149_s3 + $0x1460] sm:$0xff] }
 0x334   :  { %10586 = vmatprep.subr.bf16.mxu1 %v12545_v3  ;;  %v12574_v3 = vcombine.low %v4524_v55, %v4528_v59  ;;  %v12582_v30 = vcombine.low %v4532_v27, %v4536_v2  ;;  %v12600_v59 = vcombine.low %v4549_v42, %v4553_v45 }
 0x336   :  { %10259 = vmatpush1.bf16.msra.mxu0 %v12542_v13  ;;  %v12583_v13 = vcombine.high %v4532_v27, %v4536_v2  ;;  %v4572_v2 = vld [vmem:[%s18149_s3 + $0x1580] sm:$0xff] }
 0x337   :  { %10587 = vmatpush1.bf16.msra.mxu1 %v12544_v10  ;;  %10260 = vmatprep.subr.bf16.mxu0 %v12551_v31  ;;  %v4540_v10 = vld [vmem:[%s18149_s3 + $0x1480] sm:$0xff] }
 0x338   :  { %10588 = vmatprep.subr.bf16.mxu1 %v12553_v9  ;;  %v4544_v31 = vld [vmem:[%s18149_s3 + $0x14a0] sm:$0xff]  ;;  %v15948_v9 = vpack.c.bf16 %v3863_v35, %v3863_v35 }
 0x339   :  { %v12591_v8 = vcombine.high %v4540_v10, %v4544_v31  ;;  %v12590_v46 = vcombine.low %v4540_v10, %v4544_v31 }
 0x33a   :  { %10261 = vmatpush1.bf16.msra.mxu0 %v12550_v33  ;;  %v12584_v33 = vcombine.low %v4533_v22, %v4537_v5  ;;  %v4573_v22 = vld [vmem:[%s18149_s3 + $0x1588] sm:$0xff] }
 0x33b   :  { %10589 = vmatpush1.bf16.msra.mxu1 %v12552_v12  ;;  %10262 = vmatprep.subr.bf16.mxu0 %v12559_v38  ;;  %v12593_v12 = vcombine.high %v4541_v17, %v4545_v20  ;;  %v4548_v38 = vld [vmem:[%s18149_s3 + $0x14c0] sm:$0xff]  ;;  %v4577_v5 = vld [vmem:[%s18149_s3 + $0x15a8] sm:$0xff] }
 0x33c   :  { %10590 = vmatprep.subr.bf16.mxu1 %v12561_v41  ;;  %v4552_v41 = vld [vmem:[%s18149_s3 + $0x14e0] sm:$0xff]  ;;  %v12625_v31 = vcombine.high %v4573_v22, %v4577_v5  ;;  %v4581_v20 = vld [vmem:[%s18149_s3 + $0x15c8] sm:$0xff] }
 0x33d   :  { %v12599_v23 = vcombine.high %v4548_v38, %v4552_v41  ;;  %v12598_v55 = vcombine.low %v4548_v38, %v4552_v41  ;;  %v4584_v17 = vld [vmem:[%s18149_s3 + $0x15e0] sm:$0xff] }
 0x33e   :  { %10263 = vmatpush1.bf16.msra.mxu0 %v12558_v36  ;;  %v12601_v36 = vcombine.high %v4549_v42, %v4553_v45  ;;  %v4588_v41 = vld [vmem:[%s18149_s3 + $0x1600] sm:$0xff]  ;;  %v4589_v45 = vld [vmem:[%s18149_s3 + $0x1608] sm:$0xff] }
 0x33f   :  { %10591 = vmatpush1.bf16.msra.mxu1 %v12560_v50  ;;  %10264 = vmatprep.subr.bf16.mxu0 %v12567_v51  ;;  %v4560_v50 = vld [vmem:[%s18149_s3 + $0x1520] sm:$0xff]  ;;  %v4557_v51 = vld [vmem:[%s18149_s3 + $0x1508] sm:$0xff] }
 0x340   :  { %10592 = vmatprep.subr.bf16.mxu1 %v12569_v54  ;;  %v4561_v54 = vld [vmem:[%s18149_s3 + $0x1528] sm:$0xff]  ;;  %v12607_v60 = vcombine.high %v4556_v49, %v4560_v50  ;;  %v4592_v42 = vld [vmem:[%s18149_s3 + $0x1620] sm:$0xff] }
 0x341   :  { %v12609_v53 = vcombine.high %v4557_v51, %v4561_v54 }
 0x342   :  { %10265 = vmatpush1.bf16.msra.mxu0 %v12566_v63  ;;  %v4568_v63 = vld [vmem:[%s18149_s3 + $0x1560] sm:$0xff] }
 0x343   :  { %10593 = vmatpush1.bf16.msra.mxu1 %v12568_v6  ;;  %10275 = vmatprep.subr.bf16.mxu0 %v12575_v4  ;;  %v4569_v6 = vld [vmem:[%s18149_s3 + $0x1568] sm:$0xff]  ;;  %v12606_v4 = vcombine.low %v4556_v49, %v4560_v50  ;;  %v12615_v35 = vcombine.high %v4564_v62, %v4568_v63  ;;  %v4596_v50 = vld [vmem:[%s18149_s3 + $0x1640] sm:$0xff] }
 0x344   :  { %10603 = vmatprep.subr.bf16.mxu1 %v12577_v1  ;;  %v12608_v1 = vcombine.low %v4557_v51, %v4561_v54  ;;  %v12617_v27 = vcombine.high %v4565_v24, %v4569_v6  ;;  %v4600_v51 = vld [vmem:[%s18149_s3 + $0x1660] sm:$0xff]  ;;  %v4597_v54 = vld [vmem:[%s18149_s3 + $0x1648] sm:$0xff] }
 0x345   :  { %10267 = vmatmul.mubr.bf16.vlgmr.msra.gmra.mrb[16].mxu0 %v15940_v7 }
 0x346   :  { %10595 = vmatmul.mubr.bf16.vlgmr.msra.gmra.mrb[16].mxu1 %v15940_v7  ;;  %10276 = vmatpush1.bf16.msra.mxu0 %v12574_v3  ;;  %v4576_v3 = vld [vmem:[%s18149_s3 + $0x15a0] sm:$0xff] }
 0x347   :  { %10307 = vmatprep.mubr.bf16.mxu0 %v15948_v9  ;;  %10604 = vmatpush1.bf16.msra.mxu1 %v12576_v21  ;;  %v12614_v21 = vcombine.low %v4564_v62, %v4568_v63  ;;  %v12623_v10 = vcombine.high %v4572_v2, %v4576_v3  ;;  %v4604_v63 = vld [vmem:[%s18149_s3 + $0x1680] sm:$0xff] }
 0x348   :  { %10635 = vmatprep.mubr.bf16.mxu1 %v15948_v9  ;;  %10277 = vmatprep.subr.bf16.mxu0 %v12583_v13  ;;  %v12616_v13 = vcombine.low %v4565_v24, %v4569_v6  ;;  %v4608_v24 = vld [vmem:[%s18149_s3 + $0x16a0] sm:$0xff]  ;;  %v4605_v6 = vld [vmem:[%s18149_s3 + $0x1688] sm:$0xff] }
 0x349   :  { %10605 = vmatprep.subr.bf16.mxu1 %v12585_v16  ;;  %v4580_v16 = vld [vmem:[%s18149_s3 + $0x15c0] sm:$0xff] }
 0x34a   :  { %10278 = vmatpush1.bf16.msra.mxu0 %v12582_v30  ;;  %v4585_v30 = vld [vmem:[%s18149_s3 + $0x15e8] sm:$0xff] }
 0x34b   :  { %10606 = vmatpush1.bf16.msra.mxu1 %v12584_v33  ;;  %10279 = vmatprep.subr.bf16.mxu0 %v12591_v8  ;;  %v12622_v33 = vcombine.low %v4572_v2, %v4576_v3  ;;  %v12624_v8 = vcombine.low %v4573_v22, %v4577_v5  ;;  %v12633_v38 = vcombine.high %v4581_v20, %v4585_v30  ;;  %v4612_v3 = vld [vmem:[%s18149_s3 + $0x16c0] sm:$0xff]  ;;  %v4613_v5 = vld [vmem:[%s18149_s3 + $0x16c8] sm:$0xff] }
 0x34c   :  { %10607 = vmatprep.subr.bf16.mxu1 %v12593_v12  ;;  %v12631_v12 = vcombine.high %v4580_v16, %v4584_v17  ;;  %v4616_v22 = vld [vmem:[%s18149_s3 + $0x16e0] sm:$0xff] }
 0x34e   :  { %10280 = vmatpush1.bf16.msra.mxu0 %v12590_v46  ;;  %v4593_v46 = vld [vmem:[%s18149_s3 + $0x1628] sm:$0xff] }
 0x34f   :  { %10608 = vmatpush1.bf16.msra.mxu1 %v12592_v47  ;;  %10281 = vmatprep.subr.bf16.mxu0 %v12599_v23  ;;  %v12630_v47 = vcombine.low %v4580_v16, %v4584_v17  ;;  %v12632_v23 = vcombine.low %v4581_v20, %v4585_v30  ;;  %v12641_v49 = vcombine.high %v4589_v45, %v4593_v46  ;;  %v4620_v17 = vld [vmem:[%s18149_s3 + $0x1700] sm:$0xff]  ;;  %v4621_v30 = vld [vmem:[%s18149_s3 + $0x1708] sm:$0xff] }
 0x350   :  { %10609 = vmatprep.subr.bf16.mxu1 %v12601_v36  ;;  %v12639_v36 = vcombine.high %v4588_v41, %v4592_v42  ;;  %v4624_v20 = vld [vmem:[%s18149_s3 + $0x1720] sm:$0xff] }
 0x352   :  { %10282 = vmatpush1.bf16.msra.mxu0 %v12598_v55  ;;  %v4601_v55 = vld [vmem:[%s18149_s3 + $0x1668] sm:$0xff] }
 0x353   :  { %10610 = vmatpush1.bf16.msra.mxu1 %v12600_v59  ;;  %10283 = vmatprep.subr.bf16.mxu0 %v12607_v60  ;;  %v12638_v59 = vcombine.low %v4588_v41, %v4592_v42  ;;  %v12640_v60 = vcombine.low %v4589_v45, %v4593_v46  ;;  %v12649_v62 = vcombine.high %v4597_v54, %v4601_v55  ;;  %v4628_v42 = vld [vmem:[%s18149_s3 + $0x1740] sm:$0xff]  ;;  %v4629_v46 = vld [vmem:[%s18149_s3 + $0x1748] sm:$0xff] }
 0x354   :  { %10611 = vmatprep.subr.bf16.mxu1 %v12609_v53  ;;  %v12647_v53 = vcombine.high %v4596_v50, %v4600_v51  ;;  %v4632_v45 = vld [vmem:[%s18149_s3 + $0x1760] sm:$0xff] }
 0x356   :  { %10284 = vmatpush1.bf16.msra.mxu0 %v12606_v4  ;;  %v4609_v4 = vld [vmem:[%s18149_s3 + $0x16a8] sm:$0xff] }
 0x357   :  { %10612 = vmatpush1.bf16.msra.mxu1 %v12608_v1  ;;  %10285 = vmatprep.subr.bf16.mxu0 %v12615_v35  ;;  %v12646_v1 = vcombine.low %v4596_v50, %v4600_v51  ;;  %v12648_v35 = vcombine.low %v4597_v54, %v4601_v55  ;;  %v12657_v2 = vcombine.high %v4605_v6, %v4609_v4  ;;  %v4636_v51 = vld [vmem:[%s18149_s3 + $0x1780] sm:$0xff]  ;;  %v4637_v55 = vld [vmem:[%s18149_s3 + $0x1788] sm:$0xff] }
 0x358   :  { %10613 = vmatprep.subr.bf16.mxu1 %v12617_v27  ;;  %v12655_v27 = vcombine.high %v4604_v63, %v4608_v24  ;;  %v4640_v54 = vld [vmem:[%s18149_s3 + $0x17a0] sm:$0xff] }
 0x35a   :  { %10286 = vmatpush1.bf16.msra.mxu0 %v12614_v21  ;;  %v4617_v21 = vld [vmem:[%s18149_s3 + $0x16e8] sm:$0xff] }
 0x35b   :  { %10614 = vmatpush1.bf16.msra.mxu1 %v12616_v13  ;;  %10287 = vmatprep.subr.bf16.mxu0 %v12623_v10  ;;  %v12654_v13 = vcombine.low %v4604_v63, %v4608_v24  ;;  %v12656_v10 = vcombine.low %v4605_v6, %v4609_v4  ;;  %v12665_v16 = vcombine.high %v4613_v5, %v4617_v21  ;;  %v4644_v6 = vld [vmem:[%s18149_s3 + $0x17c0] sm:$0xff] }
 0x35c   :  { %10615 = vmatprep.subr.bf16.mxu1 %v12625_v31  ;;  %v12663_v31 = vcombine.high %v4612_v3, %v4616_v22  ;;  %v12687_v63 = vcombine.high %v4636_v51, %v4640_v54  ;;  %v4648_v4 = vld [vmem:[%s18149_s3 + $0x17e0] sm:$0xff] }
 0x35e   :  { %10288 = vmatpush1.bf16.msra.mxu0 %v12622_v33  ;;  %v4625_v33 = vld [vmem:[%s18149_s3 + $0x1728] sm:$0xff] }
 0x35f   :  { %10616 = vmatpush1.bf16.msra.mxu1 %v12624_v8  ;;  %10289 = vmatprep.subr.bf16.mxu0 %v12631_v12  ;;  %v12662_v8 = vcombine.low %v4612_v3, %v4616_v22  ;;  %v12664_v12 = vcombine.low %v4613_v5, %v4617_v21  ;;  %v12673_v41 = vcombine.high %v4621_v30, %v4625_v33 }
 0x360   :  { %10617 = vmatprep.subr.bf16.mxu1 %v12633_v38  ;;  %v12671_v38 = vcombine.high %v4620_v17, %v4624_v20  ;;  %v12695_v5 = vcombine.high %v4644_v6, %v4648_v4 }
 0x362   :  { %10290 = vmatpush1.bf16.msra.mxu0 %v12630_v47  ;;  %v4633_v47 = vld [vmem:[%s18149_s3 + $0x1768] sm:$0xff] }
 0x363   :  { %10618 = vmatpush1.bf16.msra.mxu1 %v12632_v23  ;;  %10291 = vmatprep.subr.bf16.mxu0 %v12639_v36  ;;  %v12670_v23 = vcombine.low %v4620_v17, %v4624_v20  ;;  %v12672_v36 = vcombine.low %v4621_v30, %v4625_v33  ;;  %v12681_v50 = vcombine.high %v4629_v46, %v4633_v47 }
 0x364   :  { %10619 = vmatprep.subr.bf16.mxu1 %v12641_v49  ;;  %v12679_v49 = vcombine.high %v4628_v42, %v4632_v45 }
 0x366   :  { %10292 = vmatpush1.bf16.msra.mxu0 %v12638_v59  ;;  %v4641_v59 = vld [vmem:[%s18149_s3 + $0x17a8] sm:$0xff] }
 0x367   :  { %10620 = vmatpush1.bf16.msra.mxu1 %v12640_v60  ;;  %10293 = vmatprep.subr.bf16.mxu0 %v12647_v53  ;;  %v12678_v60 = vcombine.low %v4628_v42, %v4632_v45  ;;  %v585_v53 = vrot.slane %v15690_v0, %v15236_v37  ;;  %v12689_v24 = vcombine.high %v4637_v55, %v4641_v59  ;;  %v4665_v42 = vld [vmem:[%s18149_s3 + $0x1868] sm:$0xff] }
 0x368   :  { %10621 = vmatprep.subr.bf16.mxu1 %v12649_v62  ;;  %v12680_v62 = vcombine.low %v4629_v46, %v4633_v47  ;;  %v12688_v22 = vcombine.low %v4637_v55, %v4641_v59 }
 0x369   :  { %v12968_v3 = vadd.f32 %v15151_v39, %v585_v53  ;;  %v4653_v39 = vld [vmem:[%s18149_s3 + $0x1808] sm:$0xff] }
 0x36a   :  { %10294 = vmatpush1.bf16.msra.mxu0 %v12646_v1  ;;  %v597_v1 = vrot.slane %v15690_v0, %v15245_v43  ;;  %v4652_v0 = vld [vmem:[%s18149_s3 + $0x1800] sm:$0xff] }
 0x36b   :  { %10622 = vmatpush1.bf16.msra.mxu1 %v12648_v35  ;;  %10295 = vmatprep.subr.bf16.mxu0 %v12655_v27  ;;  %v4645_v35 = vld [vmem:[%s18149_s3 + $0x17c8] sm:$0xff]  ;;  %v3862_v17 = vmax.f32 %v12968_v3, 0.0  ;;  %v4688_v3 = vld [vmem:[%s18149_s3 + $0x1920] sm:$0xff] }
 0x36c   :  { %10623 = vmatprep.subr.bf16.mxu1 %v12657_v2  ;;  %v4649_v27 = vld [vmem:[%s18149_s3 + $0x17e8] sm:$0xff]  ;;  %v12686_v2 = vcombine.low %v4636_v51, %v4640_v54 }
 0x36d   :  { %v12697_v21 = vcombine.high %v4645_v35, %v4649_v27  ;;  %v12696_v20 = vcombine.low %v4645_v35, %v4649_v27  ;;  %v16146_v45 = vpack.c.bf16 %v3862_v17, %v3862_v17  ;;  %v4669_v51 = vld [vmem:[%s18149_s3 + $0x1888] sm:$0xff] }
 0x36e   :  { %10296 = vmatpush1.bf16.msra.mxu0 %v12654_v13  ;;  %v4656_v13 = vld [vmem:[%s18149_s3 + $0x1820] sm:$0xff]  ;;  %v4673_v54 = vld [vmem:[%s18149_s3 + $0x18a8] sm:$0xff] }
 0x36f   :  { %10624 = vmatpush1.bf16.msra.mxu1 %v12656_v10  ;;  %10297 = vmatprep.subr.bf16.mxu0 %v12663_v31  ;;  %v12971_v10 = vadd.f32 %v15590_v15, %v597_v1  ;;  %v4657_v31 = vld [vmem:[%s18149_s3 + $0x1828] sm:$0xff]  ;;  %v12703_v30 = vcombine.high %v4652_v0, %v4656_v13  ;;  %v4660_v15 = vld [vmem:[%s18149_s3 + $0x1840] sm:$0xff]  ;;  %v12721_v53 = vcombine.high %v4669_v51, %v4673_v54 }
 0x370   :  { %10625 = vmatprep.subr.bf16.mxu1 %v12665_v16  ;;  %v12694_v16 = vcombine.low %v4644_v6, %v4648_v4  ;;  %v12705_v33 = vcombine.high %v4653_v39, %v4657_v31  ;;  %v12704_v46 = vcombine.low %v4653_v39, %v4657_v31  ;;  %v4681_v6 = vld [vmem:[%s18149_s3 + $0x18e8] sm:$0xff]  ;;  %v12720_v1 = vcombine.low %v4669_v51, %v4673_v54  ;;  %v4692_v39 = vld [vmem:[%s18149_s3 + $0x1940] sm:$0xff] }
 0x371   :  { %v4696_v31 = vld [vmem:[%s18149_s3 + $0x1960] sm:$0xff]  ;;  %v4697_v17 = vld [vmem:[%s18149_s3 + $0x1968] sm:$0xff] }
 0x372   :  { %10298 = vmatpush1.bf16.msra.mxu0 %v12662_v8  ;;  %v3865_v8 = vmax.f32 %v12971_v10, 0.0  ;;  %v4709_v51 = vld [vmem:[%s18149_s3 + $0x19c8] sm:$0xff] }
 0x373   :  { %10626 = vmatpush1.bf16.msra.mxu1 %v12664_v12  ;;  %10299 = vmatprep.subr.bf16.mxu0 %v12671_v38  ;;  %v4664_v12 = vld [vmem:[%s18149_s3 + $0x1860] sm:$0xff]  ;;  %v12702_v38 = vcombine.low %v4652_v0, %v4656_v13  ;;  %v4713_v54 = vld [vmem:[%s18149_s3 + $0x19e8] sm:$0xff] }
 0x374   :  { %10627 = vmatprep.subr.bf16.mxu1 %v12673_v41  ;;  %v4661_v41 = vld [vmem:[%s18149_s3 + $0x1848] sm:$0xff]  ;;  %v12711_v47 = vcombine.high %v4660_v15, %v4664_v12  ;;  %v12710_v55 = vcombine.low %v4660_v15, %v4664_v12  ;;  %v4700_v15 = vld [vmem:[%s18149_s3 + $0x1980] sm:$0xff] }
 0x375   :  { %v12712_v59 = vcombine.low %v4661_v41, %v4665_v42  ;;  %v4704_v12 = vld [vmem:[%s18149_s3 + $0x19a0] sm:$0xff] }
 0x376   :  { %10300 = vmatpush1.bf16.msra.mxu0 %v12670_v23  ;;  %v4668_v23 = vld [vmem:[%s18149_s3 + $0x1880] sm:$0xff] }
 0x377   :  { %10628 = vmatpush1.bf16.msra.mxu1 %v12672_v36  ;;  %10301 = vmatprep.subr.bf16.mxu0 %v12679_v49  ;;  %v4672_v36 = vld [vmem:[%s18149_s3 + $0x18a0] sm:$0xff]  ;;  %v16154_v49 = vpack.c.bf16 %v3865_v8, %v3865_v8 }
 0x378   :  { %10629 = vmatprep.subr.bf16.mxu1 %v12681_v50  ;;  %v12713_v50 = vcombine.high %v4661_v41, %v4665_v42  ;;  %v12718_v4 = vcombine.low %v4668_v23, %v4672_v36  ;;  %v4705_v41 = vld [vmem:[%s18149_s3 + $0x19a8] sm:$0xff]  ;;  %v12742_v42 = vcombine.low %v4692_v39, %v4696_v31 }
 0x37a   :  { %10302 = vmatpush1.bf16.msra.mxu0 %v12678_v60  ;;  %v12719_v60 = vcombine.high %v4668_v23, %v4672_v36  ;;  %v4708_v36 = vld [vmem:[%s18149_s3 + $0x19c0] sm:$0xff] }
 0x37b   :  { %10630 = vmatpush1.bf16.msra.mxu1 %v12680_v62  ;;  %10303 = vmatprep.subr.bf16.mxu0 %v12687_v63  ;;  %v4676_v62 = vld [vmem:[%s18149_s3 + $0x18c0] sm:$0xff] }
 0x37c   :  { %10631 = vmatprep.subr.bf16.mxu1 %v12689_v24  ;;  %v4680_v63 = vld [vmem:[%s18149_s3 + $0x18e0] sm:$0xff]  ;;  %v4677_v24 = vld [vmem:[%s18149_s3 + $0x18c8] sm:$0xff] }
 0x37d   :  { %v12727_v35 = vcombine.high %v4676_v62, %v4680_v63  ;;  %v12729_v27 = vcombine.high %v4677_v24, %v4681_v6  ;;  %v12728_v0 = vcombine.low %v4677_v24, %v4681_v6  ;;  %v4717_v24 = vld [vmem:[%s18149_s3 + $0x1a08] sm:$0xff] }
 0x37e   :  { %10304 = vmatpush1.bf16.msra.mxu0 %v12686_v2  ;;  %v4684_v2 = vld [vmem:[%s18149_s3 + $0x1900] sm:$0xff]  ;;  %v4721_v6 = vld [vmem:[%s18149_s3 + $0x1a28] sm:$0xff] }
 0x37f   :  { %10632 = vmatpush1.bf16.msra.mxu1 %v12688_v22  ;;  %10305 = vmatprep.subr.bf16.mxu0 %v12695_v5  ;;  %v4685_v22 = vld [vmem:[%s18149_s3 + $0x1908] sm:$0xff]  ;;  %v12735_v13 = vcombine.high %v4684_v2, %v4688_v3 }
 0x380   :  { %10633 = vmatprep.subr.bf16.mxu1 %v12697_v21  ;;  %v4689_v5 = vld [vmem:[%s18149_s3 + $0x1928] sm:$0xff]  ;;  %v12726_v21 = vcombine.low %v4676_v62, %v4680_v63  ;;  %v4716_v62 = vld [vmem:[%s18149_s3 + $0x1a00] sm:$0xff] }
 0x381   :  { %v12737_v10 = vcombine.high %v4685_v22, %v4689_v5  ;;  %v4720_v63 = vld [vmem:[%s18149_s3 + $0x1a20] sm:$0xff] }
 0x382   :  { %10306 = vmatpush1.bf16.msra.mxu0 %v12694_v16  ;;  %v4693_v16 = vld [vmem:[%s18149_s3 + $0x1948] sm:$0xff] }
 0x383   :  { %10634 = vmatpush1.bf16.msra.mxu1 %v12696_v20  ;;  %10316 = vmatprep.subr.bf16.mxu0 %v12703_v30  ;;  %v12734_v20 = vcombine.low %v4684_v2, %v4688_v3  ;;  %v12736_v30 = vcombine.low %v4685_v22, %v4689_v5  ;;  %v12745_v8 = vcombine.high %v4693_v16, %v4697_v17  ;;  %v4724_v2 = vld [vmem:[%s18149_s3 + $0x1a40] sm:$0xff]  ;;  %v4725_v22 = vld [vmem:[%s18149_s3 + $0x1a48] sm:$0xff] }
 0x384   :  { %10644 = vmatprep.subr.bf16.mxu1 %v12705_v33  ;;  %v12743_v33 = vcombine.high %v4692_v39, %v4696_v31  ;;  %v4728_v3 = vld [vmem:[%s18149_s3 + $0x1a60] sm:$0xff]  ;;  %v4729_v5 = vld [vmem:[%s18149_s3 + $0x1a68] sm:$0xff] }
 0x385   :  { %10308 = vmatmul.mubr.bf16.vlgmr.msra.gmra.mrb[16].mxu0 %v16146_v45  ;;  %v4732_v39 = vld [vmem:[%s18149_s3 + $0x1a80] sm:$0xff] }
 0x386   :  { %10636 = vmatmul.mubr.bf16.vlgmr.msra.gmra.mrb[16].mxu1 %v16146_v45  ;;  %10317 = vmatpush1.bf16.msra.mxu0 %v12702_v38  ;;  %v4701_v38 = vld [vmem:[%s18149_s3 + $0x1988] sm:$0xff]  ;;  %v4736_v31 = vld [vmem:[%s18149_s3 + $0x1aa0] sm:$0xff] }
 0x387   :  { %10348 = vmatprep.mubr.bf16.mxu0 %v16154_v49  ;;  %10645 = vmatpush1.bf16.msra.mxu1 %v12704_v46  ;;  %v12744_v46 = vcombine.low %v4693_v16, %v4697_v17  ;;  %v12753_v23 = vcombine.high %v4701_v38, %v4705_v41  ;;  %v4733_v16 = vld [vmem:[%s18149_s3 + $0x1a88] sm:$0xff] }
 0x388   :  { %10676 = vmatprep.mubr.bf16.mxu1 %v16154_v49  ;;  %10318 = vmatprep.subr.bf16.mxu0 %v12711_v47  ;;  %v12751_v47 = vcombine.high %v4700_v15, %v4704_v12  ;;  %v4737_v17 = vld [vmem:[%s18149_s3 + $0x1aa8] sm:$0xff] }
 0x389   :  { %10646 = vmatprep.subr.bf16.mxu1 %v12713_v50  ;;  %v4712_v50 = vld [vmem:[%s18149_s3 + $0x19e0] sm:$0xff] }
 0x38a   :  { %10319 = vmatpush1.bf16.msra.mxu0 %v12710_v55  ;;  %v12750_v55 = vcombine.low %v4700_v15, %v4704_v12  ;;  %v4740_v15 = vld [vmem:[%s18149_s3 + $0x1ac0] sm:$0xff] }
 0x38b   :  { %10647 = vmatpush1.bf16.msra.mxu1 %v12712_v59  ;;  %10320 = vmatprep.subr.bf16.mxu0 %v12719_v60  ;;  %v12752_v59 = vcombine.low %v4701_v38, %v4705_v41  ;;  %v12759_v60 = vcombine.high %v4708_v36, %v4712_v50  ;;  %v4744_v12 = vld [vmem:[%s18149_s3 + $0x1ae0] sm:$0xff]  ;;  %v4741_v38 = vld [vmem:[%s18149_s3 + $0x1ac8] sm:$0xff] }
 0x38c   :  { %10648 = vmatprep.subr.bf16.mxu1 %v12721_v53  ;;  %v12761_v53 = vcombine.high %v4709_v51, %v4713_v54  ;;  %v4745_v41 = vld [vmem:[%s18149_s3 + $0x1ae8] sm:$0xff] }
 0x38e   :  { %10321 = vmatpush1.bf16.msra.mxu0 %v12718_v4  ;;  %v12758_v4 = vcombine.low %v4708_v36, %v4712_v50  ;;  %v4748_v36 = vld [vmem:[%s18149_s3 + $0x1b00] sm:$0xff] }
 0x38f   :  { %10649 = vmatpush1.bf16.msra.mxu1 %v12720_v1  ;;  %10322 = vmatprep.subr.bf16.mxu0 %v12727_v35  ;;  %v12760_v1 = vcombine.low %v4709_v51, %v4713_v54  ;;  %v12767_v35 = vcombine.high %v4716_v62, %v4720_v63  ;;  %v4752_v50 = vld [vmem:[%s18149_s3 + $0x1b20] sm:$0xff]  ;;  %v4749_v51 = vld [vmem:[%s18149_s3 + $0x1b08] sm:$0xff] }
 0x390   :  { %10650 = vmatprep.subr.bf16.mxu1 %v12729_v27  ;;  %v12769_v27 = vcombine.high %v4717_v24, %v4721_v6  ;;  %v4753_v54 = vld [vmem:[%s18149_s3 + $0x1b28] sm:$0xff] }
 0x392   :  { %10323 = vmatpush1.bf16.msra.mxu0 %v12726_v21  ;;  %v12766_v21 = vcombine.low %v4716_v62, %v4720_v63  ;;  %v4756_v62 = vld [vmem:[%s18149_s3 + $0x1b40] sm:$0xff] }
 0x393   :  { %10651 = vmatpush1.bf16.msra.mxu1 %v12728_v0  ;;  %10324 = vmatprep.subr.bf16.mxu0 %v12735_v13  ;;  %v12768_v0 = vcombine.low %v4717_v24, %v4721_v6  ;;  %v12775_v13 = vcombine.high %v4724_v2, %v4728_v3  ;;  %v4760_v63 = vld [vmem:[%s18149_s3 + $0x1b60] sm:$0xff]  ;;  %v4757_v24 = vld [vmem:[%s18149_s3 + $0x1b48] sm:$0xff] }
 0x394   :  { %10652 = vmatprep.subr.bf16.mxu1 %v12737_v10  ;;  %v12777_v10 = vcombine.high %v4725_v22, %v4729_v5  ;;  %v4761_v6 = vld [vmem:[%s18149_s3 + $0x1b68] sm:$0xff] }
 0x396   :  { %10325 = vmatpush1.bf16.msra.mxu0 %v12734_v20  ;;  %v12774_v20 = vcombine.low %v4724_v2, %v4728_v3  ;;  %v4764_v2 = vld [vmem:[%s18149_s3 + $0x1b80] sm:$0xff] }
 0x397   :  { %10653 = vmatpush1.bf16.msra.mxu1 %v12736_v30  ;;  %10326 = vmatprep.subr.bf16.mxu0 %v12743_v33  ;;  %v12776_v30 = vcombine.low %v4725_v22, %v4729_v5  ;;  %v12783_v33 = vcombine.high %v4732_v39, %v4736_v31  ;;  %v4768_v3 = vld [vmem:[%s18149_s3 + $0x1ba0] sm:$0xff]  ;;  %v4765_v22 = vld [vmem:[%s18149_s3 + $0x1b88] sm:$0xff] }
 0x398   :  { %10654 = vmatprep.subr.bf16.mxu1 %v12745_v8  ;;  %v12785_v8 = vcombine.high %v4733_v16, %v4737_v17  ;;  %v4769_v5 = vld [vmem:[%s18149_s3 + $0x1ba8] sm:$0xff] }
 0x39a   :  { %10327 = vmatpush1.bf16.msra.mxu0 %v12742_v42  ;;  %v12782_v42 = vcombine.low %v4732_v39, %v4736_v31  ;;  %v12815_v39 = vcombine.high %v4764_v2, %v4768_v3  ;;  %v12817_v31 = vcombine.high %v4765_v22, %v4769_v5 }
 0x39b   :  { %10655 = vmatpush1.bf16.msra.mxu1 %v12744_v46  ;;  %10328 = vmatprep.subr.bf16.mxu0 %v12751_v47  ;;  %v12784_v46 = vcombine.low %v4733_v16, %v4737_v17  ;;  %v12791_v47 = vcombine.high %v4740_v15, %v4744_v12  ;;  %v4772_v16 = vld [vmem:[%s18149_s3 + $0x1bc0] sm:$0xff] }
 0x39c   :  { %10656 = vmatprep.subr.bf16.mxu1 %v12753_v23  ;;  %v12793_v23 = vcombine.high %v4741_v38, %v4745_v41  ;;  %v4776_v17 = vld [vmem:[%s18149_s3 + $0x1be0] sm:$0xff] }
 0x39e   :  { %10329 = vmatpush1.bf16.msra.mxu0 %v12750_v55  ;;  %v12790_v55 = vcombine.low %v4740_v15, %v4744_v12  ;;  %v12816_v12 = vcombine.low %v4765_v22, %v4769_v5  ;;  %v4801_v22 = vld [vmem:[%s18149_s3 + $0x1ca8] sm:$0xff] }
 0x39f   :  { %10657 = vmatpush1.bf16.msra.mxu1 %v12752_v59  ;;  %10330 = vmatprep.subr.bf16.mxu0 %v12759_v60  ;;  %v12792_v59 = vcombine.low %v4741_v38, %v4745_v41  ;;  %v12799_v60 = vcombine.high %v4748_v36, %v4752_v50  ;;  %v12823_v38 = vcombine.high %v4772_v16, %v4776_v17 }
 0x3a0   :  { %10658 = vmatprep.subr.bf16.mxu1 %v12761_v53  ;;  %v12801_v53 = vcombine.high %v4749_v51, %v4753_v54 }
 0x3a2   :  { %10331 = vmatpush1.bf16.msra.mxu0 %v12758_v4  ;;  %v12798_v4 = vcombine.low %v4748_v36, %v4752_v50  ;;  %v12822_v36 = vcombine.low %v4772_v16, %v4776_v17  ;;  %v4805_v16 = vld [vmem:[%s18149_s3 + $0x1cc8] sm:$0xff] }
 0x3a3   :  { %10659 = vmatpush1.bf16.msra.mxu1 %v12760_v1  ;;  %10332 = vmatprep.subr.bf16.mxu0 %v12767_v35  ;;  %v12800_v1 = vcombine.low %v4749_v51, %v4753_v54  ;;  %v12807_v35 = vcombine.high %v4756_v62, %v4760_v63  ;;  %v4809_v17 = vld [vmem:[%s18149_s3 + $0x1ce8] sm:$0xff] }
 0x3a4   :  { %10660 = vmatprep.subr.bf16.mxu1 %v12769_v27  ;;  %v12809_v27 = vcombine.high %v4757_v24, %v4761_v6 }
 0x3a6   :  { %10333 = vmatpush1.bf16.msra.mxu0 %v12766_v21  ;;  %v12806_v21 = vcombine.low %v4756_v62, %v4760_v63  ;;  %v4789_v62 = vld [vmem:[%s18149_s3 + $0x1c48] sm:$0xff] }
 0x3a7   :  { %10661 = vmatpush1.bf16.msra.mxu1 %v12768_v0  ;;  %10334 = vmatprep.subr.bf16.mxu0 %v12775_v13  ;;  %v16313_v0 = vld [vmem:[%s18148_s2 + $0x8] sm:$0xff] }
 0x3a8   :  { %10662 = vmatprep.subr.bf16.mxu1 %v12777_v10  ;;  %v593_v13 = vrot.slane %v16313_v0, %v15448_v57  ;;  %v12808_v10 = vcombine.low %v4757_v24, %v4761_v6  ;;  %v4793_v63 = vld [vmem:[%s18149_s3 + $0x1c68] sm:$0xff] }
 0x3aa   :  { %10335 = vmatpush1.bf16.msra.mxu0 %v12774_v20  ;;  %v605_v20 = vrot.slane %v16313_v0, %v15457_v40  ;;  %v12970_v15 = vadd.f32 %v15580_v11, %v593_v13  ;;  %v4781_v11 = vld [vmem:[%s18149_s3 + $0x1c08] sm:$0xff] }
 0x3ab   :  { %10663 = vmatpush1.bf16.msra.mxu1 %v12776_v30  ;;  %10336 = vmatprep.subr.bf16.mxu0 %v12783_v33  ;;  %v4773_v30 = vld [vmem:[%s18149_s3 + $0x1bc8] sm:$0xff] }
 0x3ac   :  { %10664 = vmatprep.subr.bf16.mxu1 %v12785_v8  ;;  %v4777_v33 = vld [vmem:[%s18149_s3 + $0x1be8] sm:$0xff]  ;;  %v12814_v8 = vcombine.low %v4764_v2, %v4768_v3  ;;  %v3864_v50 = vmax.f32 %v12970_v15, 0.0  ;;  %v12841_v2 = vcombine.high %v4789_v62, %v4793_v63  ;;  %v4812_v15 = vld [vmem:[%s18149_s3 + $0x1d00] sm:$0xff] }
 0x3ad   :  { %v12825_v41 = vcombine.high %v4773_v30, %v4777_v33  ;;  %v12824_v51 = vcombine.low %v4773_v30, %v4777_v33  ;;  %v4797_v3 = vld [vmem:[%s18149_s3 + $0x1c88] sm:$0xff] }
 0x3ae   :  { %10337 = vmatpush1.bf16.msra.mxu0 %v12782_v42  ;;  %v4780_v42 = vld [vmem:[%s18149_s3 + $0x1c00] sm:$0xff]  ;;  %v16357_v24 = vpack.c.bf16 %v3864_v50, %v3864_v50  ;;  %v12848_v30 = vcombine.low %v4797_v3, %v4801_v22  ;;  %v4821_v50 = vld [vmem:[%s18149_s3 + $0x1d48] sm:$0xff] }
 0x3af   :  { %10665 = vmatpush1.bf16.msra.mxu1 %v12784_v46  ;;  %10338 = vmatprep.subr.bf16.mxu0 %v12791_v47  ;;  %v4784_v46 = vld [vmem:[%s18149_s3 + $0x1c20] sm:$0xff]  ;;  %v12973_v47 = vadd.f32 %v15598_v34, %v605_v20 }
 0x3b0   :  { %10666 = vmatprep.subr.bf16.mxu1 %v12793_v23  ;;  %v4785_v23 = vld [vmem:[%s18149_s3 + $0x1c28] sm:$0xff]  ;;  %v12831_v54 = vcombine.high %v4780_v42, %v4784_v46  ;;  %v4788_v34 = vld [vmem:[%s18149_s3 + $0x1c40] sm:$0xff] }
 0x3b1   :  { %v12832_v6 = vcombine.low %v4781_v11, %v4785_v23 }
 0x3b2   :  { %10339 = vmatpush1.bf16.msra.mxu0 %v12790_v55  ;;  %v12833_v55 = vcombine.high %v4781_v11, %v4785_v23  ;;  %v4820_v23 = vld [vmem:[%s18149_s3 + $0x1d40] sm:$0xff] }
 0x3b3   :  { %10667 = vmatpush1.bf16.msra.mxu1 %v12792_v59  ;;  %10340 = vmatprep.subr.bf16.mxu0 %v12799_v60  ;;  %v3867_v59 = vmax.f32 %v12973_v47, 0.0  ;;  %v4792_v60 = vld [vmem:[%s18149_s3 + $0x1c60] sm:$0xff] }
 0x3b4   :  { %10668 = vmatprep.subr.bf16.mxu1 %v12801_v53  ;;  %v12830_v53 = vcombine.low %v4780_v42, %v4784_v46  ;;  %v12838_v5 = vcombine.low %v4788_v34, %v4792_v60  ;;  %v12856_v46 = vcombine.low %v4805_v16, %v4809_v17 }
 0x3b6   :  { %10341 = vmatpush1.bf16.msra.mxu0 %v12798_v4  ;;  %v12839_v4 = vcombine.high %v4788_v34, %v4792_v60  ;;  %v4828_v60 = vld [vmem:[%s18149_s3 + $0x1d80] sm:$0xff] }
 0x3b7   :  { %10669 = vmatpush1.bf16.msra.mxu1 %v12800_v1  ;;  %10342 = vmatprep.subr.bf16.mxu0 %v12807_v35  ;;  %v4796_v1 = vld [vmem:[%s18149_s3 + $0x1c80] sm:$0xff] }
 0x3b8   :  { %10670 = vmatprep.subr.bf16.mxu1 %v12809_v27  ;;  %v4800_v35 = vld [vmem:[%s18149_s3 + $0x1ca0] sm:$0xff]  ;;  %v16365_v27 = vpack.c.bf16 %v3867_v59, %v3867_v59 }
 0x3b9   :  { %v12847_v13 = vcombine.high %v4796_v1, %v4800_v35  ;;  %v12846_v20 = vcombine.low %v4796_v1, %v4800_v35 }
 0x3ba   :  { %10343 = vmatpush1.bf16.msra.mxu0 %v12806_v21  ;;  %v12840_v21 = vcombine.low %v4789_v62, %v4793_v63  ;;  %v4829_v62 = vld [vmem:[%s18149_s3 + $0x1d88] sm:$0xff] }
 0x3bb   :  { %10671 = vmatpush1.bf16.msra.mxu1 %v12808_v10  ;;  %10344 = vmatprep.subr.bf16.mxu0 %v12815_v39  ;;  %v12849_v10 = vcombine.high %v4797_v3, %v4801_v22  ;;  %v4804_v39 = vld [vmem:[%s18149_s3 + $0x1cc0] sm:$0xff]  ;;  %v4833_v63 = vld [vmem:[%s18149_s3 + $0x1da8] sm:$0xff] }
 0x3bc   :  { %10672 = vmatprep.subr.bf16.mxu1 %v12817_v31  ;;  %v4808_v31 = vld [vmem:[%s18149_s3 + $0x1ce0] sm:$0xff]  ;;  %v12881_v35 = vcombine.high %v4829_v62, %v4833_v63  ;;  %v4837_v22 = vld [vmem:[%s18149_s3 + $0x1dc8] sm:$0xff] }
 0x3bd   :  { %v12855_v33 = vcombine.high %v4804_v39, %v4808_v31  ;;  %v12854_v42 = vcombine.low %v4804_v39, %v4808_v31  ;;  %v4840_v3 = vld [vmem:[%s18149_s3 + $0x1de0] sm:$0xff] }
 0x3be   :  { %10345 = vmatpush1.bf16.msra.mxu0 %v12814_v8  ;;  %v12857_v8 = vcombine.high %v4805_v16, %v4809_v17  ;;  %v4844_v31 = vld [vmem:[%s18149_s3 + $0x1e00] sm:$0xff]  ;;  %v4845_v17 = vld [vmem:[%s18149_s3 + $0x1e08] sm:$0xff] }
 0x3bf   :  { %10673 = vmatpush1.bf16.msra.mxu1 %v12816_v12  ;;  %10346 = vmatprep.subr.bf16.mxu0 %v12823_v38  ;;  %v4816_v12 = vld [vmem:[%s18149_s3 + $0x1d20] sm:$0xff]  ;;  %v4813_v38 = vld [vmem:[%s18149_s3 + $0x1d08] sm:$0xff] }
 0x3c0   :  { %10674 = vmatprep.subr.bf16.mxu1 %v12825_v41  ;;  %v4817_v41 = vld [vmem:[%s18149_s3 + $0x1d28] sm:$0xff]  ;;  %v12863_v47 = vcombine.high %v4812_v15, %v4816_v12  ;;  %v4848_v16 = vld [vmem:[%s18149_s3 + $0x1e20] sm:$0xff] }
 0x3c1   :  { %v12865_v11 = vcombine.high %v4813_v38, %v4817_v41 }
 0x3c2   :  { %10347 = vmatpush1.bf16.msra.mxu0 %v12822_v36  ;;  %v4824_v36 = vld [vmem:[%s18149_s3 + $0x1d60] sm:$0xff] }
 0x3c3   :  { %10675 = vmatpush1.bf16.msra.mxu1 %v12824_v51  ;;  %10357 = vmatprep.subr.bf16.mxu0 %v12831_v54  ;;  %v4825_v51 = vld [vmem:[%s18149_s3 + $0x1d68] sm:$0xff]  ;;  %v12862_v54 = vcombine.low %v4812_v15, %v4816_v12  ;;  %v12871_v59 = vcombine.high %v4820_v23, %v4824_v36  ;;  %v4852_v12 = vld [vmem:[%s18149_s3 + $0x1e40] sm:$0xff] }
 0x3c4   :  { %10685 = vmatprep.subr.bf16.mxu1 %v12833_v55  ;;  %v12864_v55 = vcombine.low %v4813_v38, %v4817_v41  ;;  %v12873_v34 = vcombine.high %v4821_v50, %v4825_v51  ;;  %v4856_v38 = vld [vmem:[%s18149_s3 + $0x1e60] sm:$0xff]  ;;  %v4853_v41 = vld [vmem:[%s18149_s3 + $0x1e48] sm:$0xff] }
 0x3c5   :  { %10349 = vmatmul.mubr.bf16.vlgmr.msra.gmra.mrb[16].mxu0 %v16357_v24 }
 0x3c6   :  { %10677 = vmatmul.mubr.bf16.vlgmr.msra.gmra.mrb[16].mxu1 %v16357_v24  ;;  %10358 = vmatpush1.bf16.msra.mxu0 %v12830_v53  ;;  %v4832_v53 = vld [vmem:[%s18149_s3 + $0x1da0] sm:$0xff] }
 0x3c7   :  { %10389 = vmatprep.mubr.bf16.mxu0 %v16365_v27  ;;  %10686 = vmatpush1.bf16.msra.mxu1 %v12832_v6  ;;  %v12870_v6 = vcombine.low %v4820_v23, %v4824_v36  ;;  %v12879_v1 = vcombine.high %v4828_v60, %v4832_v53  ;;  %v4860_v36 = vld [vmem:[%s18149_s3 + $0x1e80] sm:$0xff] }
 0x3c8   :  { %10717 = vmatprep.mubr.bf16.mxu1 %v16365_v27  ;;  %10359 = vmatprep.subr.bf16.mxu0 %v12839_v4  ;;  %v12872_v4 = vcombine.low %v4821_v50, %v4825_v51  ;;  %v4864_v50 = vld [vmem:[%s18149_s3 + $0x1ea0] sm:$0xff]  ;;  %v4861_v51 = vld [vmem:[%s18149_s3 + $0x1e88] sm:$0xff] }
 0x3c9   :  { %10687 = vmatprep.subr.bf16.mxu1 %v12841_v2  ;;  %v4836_v2 = vld [vmem:[%s18149_s3 + $0x1dc0] sm:$0xff] }
 0x3ca   :  { %10360 = vmatpush1.bf16.msra.mxu0 %v12838_v5  ;;  %v4841_v5 = vld [vmem:[%s18149_s3 + $0x1de8] sm:$0xff] }
 0x3cb   :  { %10688 = vmatpush1.bf16.msra.mxu1 %v12840_v21  ;;  %10361 = vmatprep.subr.bf16.mxu0 %v12847_v13  ;;  %v12878_v21 = vcombine.low %v4828_v60, %v4832_v53  ;;  %v12880_v13 = vcombine.low %v4829_v62, %v4833_v63  ;;  %v12889_v39 = vcombine.high %v4837_v22, %v4841_v5  ;;  %v4868_v53 = vld [vmem:[%s18149_s3 + $0x1ec0] sm:$0xff]  ;;  %v4869_v63 = vld [vmem:[%s18149_s3 + $0x1ec8] sm:$0xff] }
 0x3cc   :  { %10689 = vmatprep.subr.bf16.mxu1 %v12849_v10  ;;  %v12887_v10 = vcombine.high %v4836_v2, %v4840_v3  ;;  %v4872_v62 = vld [vmem:[%s18149_s3 + $0x1ee0] sm:$0xff] }
 0x3ce   :  { %10362 = vmatpush1.bf16.msra.mxu0 %v12846_v20  ;;  %v4849_v20 = vld [vmem:[%s18149_s3 + $0x1e28] sm:$0xff] }
 0x3cf   :  { %10690 = vmatpush1.bf16.msra.mxu1 %v12848_v30  ;;  %10363 = vmatprep.subr.bf16.mxu0 %v12855_v33  ;;  %v12886_v30 = vcombine.low %v4836_v2, %v4840_v3  ;;  %v12888_v33 = vcombine.low %v4837_v22, %v4841_v5  ;;  %v12897_v15 = vcombine.high %v4845_v17, %v4849_v20  ;;  %v4876_v3 = vld [vmem:[%s18149_s3 + $0x1f00] sm:$0xff]  ;;  %v4877_v5 = vld [vmem:[%s18149_s3 + $0x1f08] sm:$0xff] }
 0x3d0   :  { %10691 = vmatprep.subr.bf16.mxu1 %v12857_v8  ;;  %v12895_v8 = vcombine.high %v4844_v31, %v4848_v16  ;;  %v4880_v22 = vld [vmem:[%s18149_s3 + $0x1f20] sm:$0xff] }
 0x3d2   :  { %10364 = vmatpush1.bf16.msra.mxu0 %v12854_v42  ;;  %v4857_v42 = vld [vmem:[%s18149_s3 + $0x1e68] sm:$0xff] }
 0x3d3   :  { %10692 = vmatpush1.bf16.msra.mxu1 %v12856_v46  ;;  %10365 = vmatprep.subr.bf16.mxu0 %v12863_v47  ;;  %v12894_v46 = vcombine.low %v4844_v31, %v4848_v16  ;;  %v12896_v47 = vcombine.low %v4845_v17, %v4849_v20  ;;  %v12905_v23 = vcombine.high %v4853_v41, %v4857_v42  ;;  %v4884_v16 = vld [vmem:[%s18149_s3 + $0x1f40] sm:$0xff]  ;;  %v4885_v20 = vld [vmem:[%s18149_s3 + $0x1f48] sm:$0xff] }
 0x3d4   :  { %10693 = vmatprep.subr.bf16.mxu1 %v12865_v11  ;;  %v12903_v11 = vcombine.high %v4852_v12, %v4856_v38  ;;  %v4888_v17 = vld [vmem:[%s18149_s3 + $0x1f60] sm:$0xff] }
 0x3d6   :  { %10366 = vmatpush1.bf16.msra.mxu0 %v12862_v54  ;;  %v4865_v54 = vld [vmem:[%s18149_s3 + $0x1ea8] sm:$0xff] }
 0x3d7   :  { %10694 = vmatpush1.bf16.msra.mxu1 %v12864_v55  ;;  %10367 = vmatprep.subr.bf16.mxu0 %v12871_v59  ;;  %v12902_v55 = vcombine.low %v4852_v12, %v4856_v38  ;;  %v12904_v59 = vcombine.low %v4853_v41, %v4857_v42  ;;  %v12913_v60 = vcombine.high %v4861_v51, %v4865_v54  ;;  %v4892_v38 = vld [vmem:[%s18149_s3 + $0x1f80] sm:$0xff]  ;;  %v4893_v42 = vld [vmem:[%s18149_s3 + $0x1f88] sm:$0xff] }
 0x3d8   :  { %10695 = vmatprep.subr.bf16.mxu1 %v12873_v34  ;;  %v12911_v34 = vcombine.high %v4860_v36, %v4864_v50  ;;  %v4896_v41 = vld [vmem:[%s18149_s3 + $0x1fa0] sm:$0xff] }
 0x3da   :  { %10368 = vmatpush1.bf16.msra.mxu0 %v12870_v6  ;;  %v4873_v6 = vld [vmem:[%s18149_s3 + $0x1ee8] sm:$0xff] }
 0x3db   :  { %10696 = vmatpush1.bf16.msra.mxu1 %v12872_v4  ;;  %10369 = vmatprep.subr.bf16.mxu0 %v12879_v1  ;;  %v12910_v4 = vcombine.low %v4860_v36, %v4864_v50  ;;  %v12912_v1 = vcombine.low %v4861_v51, %v4865_v54  ;;  %v12921_v2 = vcombine.high %v4869_v63, %v4873_v6  ;;  %v4900_v51 = vld [vmem:[%s18149_s3 + $0x1fc0] sm:$0xff] }
 0x3dc   :  { %10697 = vmatprep.subr.bf16.mxu1 %v12881_v35  ;;  %v12919_v35 = vcombine.high %v4868_v53, %v4872_v62  ;;  %v12943_v36 = vcombine.high %v4892_v38, %v4896_v41  ;;  %v4904_v54 = vld [vmem:[%s18149_s3 + $0x1fe0] sm:$0xff] }
 0x3de   :  { %10370 = vmatpush1.bf16.msra.mxu0 %v12878_v21  ;;  %v4881_v21 = vld [vmem:[%s18149_s3 + $0x1f28] sm:$0xff] }
 0x3df   :  { %10698 = vmatpush1.bf16.msra.mxu1 %v12880_v13  ;;  %10371 = vmatprep.subr.bf16.mxu0 %v12887_v10  ;;  %v12918_v13 = vcombine.low %v4868_v53, %v4872_v62  ;;  %v12920_v10 = vcombine.low %v4869_v63, %v4873_v6  ;;  %v12929_v31 = vcombine.high %v4877_v5, %v4881_v21  ;;  %v3886_v63 = vld [vmem:[%s18149_s3 + $0x10] sm:$0xff] }
 0x3e0   :  { %10699 = vmatprep.subr.bf16.mxu1 %v12889_v39  ;;  %v12927_v39 = vcombine.high %v4876_v3, %v4880_v22  ;;  %v12951_v53 = vcombine.high %v4900_v51, %v4904_v54  ;;  %v3890_v6 = vld [vmem:[%s18149_s3 + $0x30] sm:$0xff] }
 0x3e2   :  { %10372 = vmatpush1.bf16.msra.mxu0 %v12886_v30  ;;  %v4889_v30 = vld [vmem:[%s18149_s3 + $0x1f68] sm:$0xff] }
 0x3e3   :  { %10700 = vmatpush1.bf16.msra.mxu1 %v12888_v33  ;;  %10373 = vmatprep.subr.bf16.mxu0 %v12895_v8  ;;  %v12926_v33 = vcombine.low %v4876_v3, %v4880_v22  ;;  %v12928_v8 = vcombine.low %v4877_v5, %v4881_v21  ;;  %v12937_v12 = vcombine.high %v4885_v20, %v4889_v30  ;;  %v3894_v5 = vld [vmem:[%s18149_s3 + $0x50] sm:$0xff] }
 0x3e4   :  { %10701 = vmatprep.subr.bf16.mxu1 %v12897_v15  ;;  %v12935_v15 = vcombine.high %v4884_v16, %v4888_v17  ;;  %v11939_v3 = vcombine.high %v3886_v63, %v3890_v6  ;;  %v3898_v21 = vld [vmem:[%s18149_s3 + $0x70] sm:$0xff] }
 0x3e6   :  { %10374 = vmatpush1.bf16.msra.mxu0 %v12894_v46  ;;  %v4897_v46 = vld [vmem:[%s18149_s3 + $0x1fa8] sm:$0xff] }
 0x3e7   :  { %10702 = vmatpush1.bf16.msra.mxu1 %v12896_v47  ;;  %10375 = vmatprep.subr.bf16.mxu0 %v12903_v11  ;;  %v12934_v47 = vcombine.low %v4884_v16, %v4888_v17  ;;  %v601_v11 = vrot.slane %v16313_v0, %v15673_v56  ;;  %v12945_v50 = vcombine.high %v4893_v42, %v4897_v46  ;;  %v4905_v0 = vld [vmem:[%s18149_s3 + $0x1fe8] sm:$0xff] }
 0x3e8   :  { %10703 = vmatprep.subr.bf16.mxu1 %v12905_v23  ;;  %v12936_v23 = vcombine.low %v4885_v20, %v4889_v30  ;;  %v11947_v17 = vcombine.high %v3894_v5, %v3898_v21  ;;  %v3902_v20 = vld [vmem:[%s18149_s3 + $0x90] sm:$0xff] }
 0x3e9   :  { %v3906_v30 = vld [vmem:[%s18149_s3 + $0xb0] sm:$0xff] }
 0x3ea   :  { %10376 = vmatpush1.bf16.msra.mxu0 %v12902_v55  ;;  %v4901_v55 = vld [vmem:[%s18149_s3 + $0x1fc8] sm:$0xff] }
 0x3eb   :  { %10704 = vmatpush1.bf16.msra.mxu1 %v12904_v59  ;;  %10377 = vmatprep.subr.bf16.mxu0 %v12911_v34  ;;  %v12942_v59 = vcombine.low %v4892_v38, %v4896_v41  ;;  %v12972_v34 = vadd.f32 %v15588_v25, %v601_v11  ;;  %v12953_v62 = vcombine.high %v4901_v55, %v4905_v0  ;;  %v3891_v25 = vld [vmem:[%s18149_s3 + $0x38] sm:$0xff] }
 0x3ec   :  { %10705 = vmatprep.subr.bf16.mxu1 %v12913_v60  ;;  %v12944_v60 = vcombine.low %v4893_v42, %v4897_v46  ;;  %v11955_v41 = vcombine.high %v3902_v20, %v3906_v30  ;;  %v3910_v46 = vld [vmem:[%s18149_s3 + $0xd0] sm:$0xff]  ;;  %v3911_v11 = vld [vmem:[%s18149_s3 + $0xd8] sm:$0xff] }
 0x3ee   :  { %10378 = vmatpush1.bf16.msra.mxu0 %v12910_v4  ;;  %v3887_v4 = vld [vmem:[%s18149_s3 + $0x18] sm:$0xff] }
 0x3ef   :  { %10706 = vmatpush1.bf16.msra.mxu1 %v12912_v1  ;;  %10379 = vmatprep.subr.bf16.mxu0 %v12919_v35  ;;  %v12950_v1 = vcombine.low %v4900_v51, %v4904_v54  ;;  %v3866_v35 = vmax.f32 %v12972_v34, 0.0  ;;  %v11941_v22 = vcombine.high %v3887_v4, %v3891_v25  ;;  %v11940_v16 = vcombine.low %v3887_v4, %v3891_v25  ;;  %v3918_v54 = vld [vmem:[%s18149_s3 + $0x110] sm:$0xff]  ;;  %v3927_v4 = vld [vmem:[%s18149_s3 + $0x158] sm:$0xff] }
 0x3f0   :  { %10707 = vmatprep.subr.bf16.mxu1 %v12921_v2  ;;  %v12952_v2 = vcombine.low %v4901_v55, %v4905_v0  ;;  %v3922_v55 = vld [vmem:[%s18149_s3 + $0x130] sm:$0xff]  ;;  %v3919_v0 = vld [vmem:[%s18149_s3 + $0x118] sm:$0xff] }
 0x3f1   :  { %v3931_v25 = vld [vmem:[%s18149_s3 + $0x178] sm:$0xff] }
 0x3f2   :  { %10380 = vmatpush1.bf16.msra.mxu0 %v12918_v13  ;;  %v11938_v13 = vcombine.low %v3886_v63, %v3890_v6  ;;  %v3926_v63 = vld [vmem:[%s18149_s3 + $0x150] sm:$0xff] }
 0x3f3   :  { %10708 = vmatpush1.bf16.msra.mxu1 %v12920_v10  ;;  %10381 = vmatprep.subr.bf16.mxu0 %v12927_v39  ;;  %v3895_v10 = vld [vmem:[%s18149_s3 + $0x58] sm:$0xff]  ;;  %v3930_v6 = vld [vmem:[%s18149_s3 + $0x170] sm:$0xff] }
 0x3f4   :  { %10709 = vmatprep.subr.bf16.mxu1 %v12929_v31  ;;  %v3899_v39 = vld [vmem:[%s18149_s3 + $0x78] sm:$0xff]  ;;  %v16560_v31 = vpack.c.bf16 %v3866_v35, %v3866_v35 }
 0x3f5   :  { %v11948_v38 = vcombine.low %v3895_v10, %v3899_v39 }
 0x3f6   :  { %10382 = vmatpush1.bf16.msra.mxu0 %v12926_v33  ;;  %v11949_v33 = vcombine.high %v3895_v10, %v3899_v39  ;;  %v11978_v10 = vcombine.low %v3926_v63, %v3930_v6  ;;  %v11980_v39 = vcombine.low %v3927_v4, %v3931_v25 }
 0x3f7   :  { %10710 = vmatpush1.bf16.msra.mxu1 %v12928_v8  ;;  %10383 = vmatprep.subr.bf16.mxu0 %v12935_v15  ;;  %v3903_v8 = vld [vmem:[%s18149_s3 + $0x98] sm:$0xff] }
 0x3f8   :  { %10711 = vmatprep.subr.bf16.mxu1 %v12937_v12  ;;  %v3907_v15 = vld [vmem:[%s18149_s3 + $0xb8] sm:$0xff]  ;;  %v11946_v12 = vcombine.low %v3894_v5, %v3898_v21  ;;  %v3938_v5 = vld [vmem:[%s18149_s3 + $0x1b0] sm:$0xff] }
 0x3f9   :  { %v11957_v42 = vcombine.high %v3903_v8, %v3907_v15  ;;  %v3935_v21 = vld [vmem:[%s18149_s3 + $0x198] sm:$0xff] }
 0x3fa   :  { %10384 = vmatpush1.bf16.msra.mxu0 %v12934_v47  ;;  %v3914_v47 = vld [vmem:[%s18149_s3 + $0xf0] sm:$0xff] }
 0x3fb   :  { %10712 = vmatpush1.bf16.msra.mxu1 %v12936_v23  ;;  %10385 = vmatprep.subr.bf16.mxu0 %v12943_v36  ;;  %v3915_v23 = vld [vmem:[%s18149_s3 + $0xf8] sm:$0xff]  ;;  %v11956_v36 = vcombine.low %v3903_v8, %v3907_v15  ;;  %v11962_v34 = vcombine.low %v3910_v46, %v3914_v47 }
 0x3fc   :  { %10713 = vmatprep.subr.bf16.mxu1 %v12945_v50  ;;  %v11963_v50 = vcombine.high %v3910_v46, %v3914_v47  ;;  %v11965_v51 = vcombine.high %v3911_v11, %v3915_v23  ;;  %v3947_v8 = vld [vmem:[%s18149_s3 + $0x1f8] sm:$0xff]  ;;  %v3954_v46 = vld [vmem:[%s18149_s3 + $0x230] sm:$0xff] }
 0x3fd   :  { %v3951_v47 = vld [vmem:[%s18149_s3 + $0x218] sm:$0xff] }
 0x3fe   :  { %10386 = vmatpush1.bf16.msra.mxu0 %v12942_v59  ;;  %v3923_v59 = vld [vmem:[%s18149_s3 + $0x138] sm:$0xff] }
 0x3ff   :  { %10714 = vmatpush1.bf16.msra.mxu1 %v12944_v60  ;;  %10387 = vmatprep.subr.bf16.mxu0 %v12951_v53  ;;  %v11964_v60 = vcombine.low %v3911_v11, %v3915_v23  ;;  %v11971_v53 = vcombine.high %v3918_v54, %v3922_v55  ;;  %v11972_v35 = vcombine.low %v3919_v0, %v3923_v59  ;;  %v3955_v11 = vld [vmem:[%s18149_s3 + $0x238] sm:$0xff] }
 0x400   :  { %10715 = vmatprep.subr.bf16.mxu1 %v12953_v62  ;;  %v11973_v62 = vcombine.high %v3919_v0, %v3923_v59  ;;  %v3963_v0 = vld [vmem:[%s18149_s3 + $0x278] sm:$0xff] }
 0x402   :  { %10388 = vmatpush1.bf16.msra.mxu0 %v12950_v1  ;;  %v11970_v1 = vcombine.low %v3918_v54, %v3922_v55  ;;  %v3962_v54 = vld [vmem:[%s18149_s3 + $0x270] sm:$0xff]  ;;  %v3959_v55 = vld [vmem:[%s18149_s3 + $0x258] sm:$0xff] }
 0x403   :  { %10716 = vmatpush1.bf16.msra.mxu1 %v12952_v2  ;;  %10726 = vmatprep.subr.bf16.mxu0 %v11939_v3  ;;  %v11979_v2 = vcombine.high %v3926_v63, %v3930_v6  ;;  %v11981_v3 = vcombine.high %v3927_v4, %v3931_v25  ;;  %v3970_v63 = vld [vmem:[%s18149_s3 + $0x2b0] sm:$0xff]  ;;  %v3967_v6 = vld [vmem:[%s18149_s3 + $0x298] sm:$0xff] }
 0x404   :  { %11054 = vmatprep.subr.bf16.mxu1 %v11941_v22  ;;  %v3934_v22 = vld [vmem:[%s18149_s3 + $0x190] sm:$0xff]  ;;  %v3971_v4 = vld [vmem:[%s18149_s3 + $0x2b8] sm:$0xff] }
 0x405   :  { %10390 = vmatmul.mubr.bf16.vlgmr.msra.gmra.mrb[16].mxu0 %v16560_v31  ;;  %v11986_v15 = vcombine.low %v3934_v22, %v3938_v5 }
 0x406   :  { %10718 = vmatmul.mubr.bf16.vlgmr.msra.gmra.mrb[16].mxu1 %v16560_v31  ;;  %10727 = vmatpush1.bf16.msra.mxu0 %v11938_v13  ;;  %v3939_v13 = vld [vmem:[%s18149_s3 + $0x1b8] sm:$0xff] }
 0x407   :  { %10758 = vmatprep.mubr.bf16.mxu0 %v14871_v58  ;;  %11055 = vmatpush1.bf16.msra.mxu1 %v11940_v16  ;;  %v11987_v16 = vcombine.high %v3934_v22, %v3938_v5  ;;  %v3978_v22 = vld [vmem:[%s18149_s3 + $0x2f0] sm:$0xff]  ;;  %v3975_v5 = vld [vmem:[%s18149_s3 + $0x2d8] sm:$0xff] }
 0x408   :  { %11086 = vmatprep.mubr.bf16.mxu1 %v14871_v58  ;;  %10728 = vmatprep.subr.bf16.mxu0 %v11947_v17  ;;  %v11954_v58 = vcombine.low %v3902_v20, %v3906_v30  ;;  %v11989_v17 = vcombine.high %v3935_v21, %v3939_v13  ;;  %v3942_v20 = vld [vmem:[%s18149_s3 + $0x1d0] sm:$0xff] }
 0x409   :  { %11056 = vmatprep.subr.bf16.mxu1 %v11949_v33  ;;  %v3946_v30 = vld [vmem:[%s18149_s3 + $0x1f0] sm:$0xff]  ;;  %v3943_v33 = vld [vmem:[%s18149_s3 + $0x1d8] sm:$0xff] }
 0x40a   :  { %10729 = vmatpush1.bf16.msra.mxu0 %v11946_v12  ;;  %v11988_v12 = vcombine.low %v3935_v21, %v3939_v13  ;;  %v11994_v23 = vcombine.low %v3942_v20, %v3946_v30  ;;  %v3979_v21 = vld [vmem:[%s18149_s3 + $0x2f8] sm:$0xff] }
 0x40b   :  { %11057 = vmatpush1.bf16.msra.mxu1 %v11948_v38  ;;  %10730 = vmatprep.subr.bf16.mxu0 %v11955_v41  ;;  %v11995_v38 = vcombine.high %v3942_v20, %v3946_v30  ;;  %v11997_v41 = vcombine.high %v3943_v33, %v3947_v8  ;;  %v3986_v20 = vld [vmem:[%s18149_s3 + $0x330] sm:$0xff]  ;;  %v3983_v30 = vld [vmem:[%s18149_s3 + $0x318] sm:$0xff] }
 0x40c   :  { %11058 = vmatprep.subr.bf16.mxu1 %v11957_v42  ;;  %v3950_v42 = vld [vmem:[%s18149_s3 + $0x210] sm:$0xff] }
 0x40d   :  { %v12002_v59 = vcombine.low %v3950_v42, %v3954_v46 }
 0x40e   :  { %10731 = vmatpush1.bf16.msra.mxu0 %v11954_v58  ;;  %v11996_v58 = vcombine.low %v3943_v33, %v3947_v8  ;;  %v3987_v33 = vld [vmem:[%s18149_s3 + $0x338] sm:$0xff] }
 0x40f   :  { %11059 = vmatpush1.bf16.msra.mxu1 %v11956_v36  ;;  %10732 = vmatprep.subr.bf16.mxu0 %v11963_v50  ;;  %v12003_v36 = vcombine.high %v3950_v42, %v3954_v46  ;;  %v12005_v50 = vcombine.high %v3951_v47, %v3955_v11  ;;  %v3994_v42 = vld [vmem:[%s18149_s3 + $0x370] sm:$0xff]  ;;  %v3991_v46 = vld [vmem:[%s18149_s3 + $0x358] sm:$0xff] }
 0x410   :  { %11060 = vmatprep.subr.bf16.mxu1 %v11965_v51  ;;  %v3958_v51 = vld [vmem:[%s18149_s3 + $0x250] sm:$0xff] }
 0x411   :  { %v12010_v25 = vcombine.low %v3958_v51, %v3962_v54 }
 0x412   :  { %10733 = vmatpush1.bf16.msra.mxu0 %v11962_v34  ;;  %v12004_v34 = vcombine.low %v3951_v47, %v3955_v11  ;;  %v3995_v47 = vld [vmem:[%s18149_s3 + $0x378] sm:$0xff] }
 0x413   :  { %11061 = vmatpush1.bf16.msra.mxu1 %v11964_v60  ;;  %10734 = vmatprep.subr.bf16.mxu0 %v11971_v53  ;;  %v12011_v60 = vcombine.high %v3958_v51, %v3962_v54  ;;  %v12013_v53 = vcombine.high %v3959_v55, %v3963_v0  ;;  %v4002_v51 = vld [vmem:[%s18149_s3 + $0x3b0] sm:$0xff]  ;;  %v3999_v54 = vld [vmem:[%s18149_s3 + $0x398] sm:$0xff] }
 0x414   :  { %11062 = vmatprep.subr.bf16.mxu1 %v11973_v62  ;;  %v3966_v62 = vld [vmem:[%s18149_s3 + $0x290] sm:$0xff] }
 0x415   :  { %v12018_v13 = vcombine.low %v3966_v62, %v3970_v63 }
 0x416   :  { %10735 = vmatpush1.bf16.msra.mxu0 %v11970_v1  ;;  %v12012_v1 = vcombine.low %v3959_v55, %v3963_v0  ;;  %v4003_v55 = vld [vmem:[%s18149_s3 + $0x3b8] sm:$0xff] }
 0x417   :  { %11063 = vmatpush1.bf16.msra.mxu1 %v11972_v35  ;;  %10736 = vmatprep.subr.bf16.mxu0 %v11979_v2  ;;  %v12019_v35 = vcombine.high %v3966_v62, %v3970_v63  ;;  %v12021_v2 = vcombine.high %v3967_v6, %v3971_v4  ;;  %v4010_v62 = vld [vmem:[%s18149_s3 + $0x3f0] sm:$0xff]  ;;  %v4007_v63 = vld [vmem:[%s18149_s3 + $0x3d8] sm:$0xff] }
 0x418   :  { %11064 = vmatprep.subr.bf16.mxu1 %v11981_v3  ;;  %v3974_v3 = vld [vmem:[%s18149_s3 + $0x2d0] sm:$0xff] }
 0x419   :  { %v12026_v8 = vcombine.low %v3974_v3, %v3978_v22 }
 0x41a   :  { %10737 = vmatpush1.bf16.msra.mxu0 %v11978_v10  ;;  %v12020_v10 = vcombine.low %v3967_v6, %v3971_v4  ;;  %v4011_v6 = vld [vmem:[%s18149_s3 + $0x3f8] sm:$0xff] }
 0x41b   :  { %11065 = vmatpush1.bf16.msra.mxu1 %v11980_v39  ;;  %10738 = vmatprep.subr.bf16.mxu0 %v11987_v16  ;;  %v12027_v39 = vcombine.high %v3974_v3, %v3978_v22  ;;  %v12029_v16 = vcombine.high %v3975_v5, %v3979_v21  ;;  %v4018_v3 = vld [vmem:[%s18149_s3 + $0x430] sm:$0xff]  ;;  %v4015_v22 = vld [vmem:[%s18149_s3 + $0x418] sm:$0xff] }
 0x41c   :  { %11066 = vmatprep.subr.bf16.mxu1 %v11989_v17  ;;  %v3982_v17 = vld [vmem:[%s18149_s3 + $0x310] sm:$0xff] }
 0x41d   :  { %v12034_v11 = vcombine.low %v3982_v17, %v3986_v20 }
 0x41e   :  { %10739 = vmatpush1.bf16.msra.mxu0 %v11986_v15  ;;  %v12028_v15 = vcombine.low %v3975_v5, %v3979_v21  ;;  %v4019_v5 = vld [vmem:[%s18149_s3 + $0x438] sm:$0xff] }
 0x41f   :  { %11067 = vmatpush1.bf16.msra.mxu1 %v11988_v12  ;;  %10740 = vmatprep.subr.bf16.mxu0 %v11995_v38  ;;  %v12035_v12 = vcombine.high %v3982_v17, %v3986_v20  ;;  %v12037_v38 = vcombine.high %v3983_v30, %v3987_v33  ;;  %v4026_v17 = vld [vmem:[%s18149_s3 + $0x470] sm:$0xff] }
 0x420   :  { %11068 = vmatprep.subr.bf16.mxu1 %v11997_v41  ;;  %v3990_v41 = vld [vmem:[%s18149_s3 + $0x350] sm:$0xff] }
 0x421   :  { %v12042_v0 = vcombine.low %v3990_v41, %v3994_v42 }
 0x422   :  { %10741 = vmatpush1.bf16.msra.mxu0 %v11994_v23  ;;  %v12036_v23 = vcombine.low %v3983_v30, %v3987_v33  ;;  %v4023_v30 = vld [vmem:[%s18149_s3 + $0x458] sm:$0xff] }
 0x423   :  { %11069 = vmatpush1.bf16.msra.mxu1 %v11996_v58  ;;  %10742 = vmatprep.subr.bf16.mxu0 %v12003_v36  ;;  %v12043_v58 = vcombine.high %v3990_v41, %v3994_v42  ;;  %v12045_v36 = vcombine.high %v3991_v46, %v3995_v47  ;;  %v4027_v33 = vld [vmem:[%s18149_s3 + $0x478] sm:$0xff] }
 0x424   :  { %11070 = vmatprep.subr.bf16.mxu1 %v12005_v50  ;;  %v3998_v50 = vld [vmem:[%s18149_s3 + $0x390] sm:$0xff]  ;;  %v12077_v41 = vcombine.high %v4023_v30, %v4027_v33  ;;  %v4031_v42 = vld [vmem:[%s18149_s3 + $0x498] sm:$0xff] }
 0x425   :  { %v12050_v4 = vcombine.low %v3998_v50, %v4002_v51 }
 0x426   :  { %10743 = vmatpush1.bf16.msra.mxu0 %v12002_v59  ;;  %v12044_v59 = vcombine.low %v3991_v46, %v3995_v47  ;;  %v4035_v46 = vld [vmem:[%s18149_s3 + $0x4b8] sm:$0xff] }
 0x427   :  { %11071 = vmatpush1.bf16.msra.mxu1 %v12004_v34  ;;  %10744 = vmatprep.subr.bf16.mxu0 %v12011_v60  ;;  %v12051_v34 = vcombine.high %v3998_v50, %v4002_v51  ;;  %v12053_v60 = vcombine.high %v3999_v54, %v4003_v55  ;;  %v4042_v50 = vld [vmem:[%s18149_s3 + $0x4f0] sm:$0xff]  ;;  %v4043_v51 = vld [vmem:[%s18149_s3 + $0x4f8] sm:$0xff] }
 0x428   :  { %11072 = vmatprep.subr.bf16.mxu1 %v12013_v53  ;;  %v4006_v53 = vld [vmem:[%s18149_s3 + $0x3d0] sm:$0xff] }
 0x429   :  { %v12058_v21 = vcombine.low %v4006_v53, %v4010_v62 }
 0x42a   :  { %10745 = vmatpush1.bf16.msra.mxu0 %v12010_v25  ;;  %v12052_v25 = vcombine.low %v3999_v54, %v4003_v55  ;;  %v12084_v54 = vcombine.low %v4031_v42, %v4035_v46 }
 0x42b   :  { %11073 = vmatpush1.bf16.msra.mxu1 %v12012_v1  ;;  %10746 = vmatprep.subr.bf16.mxu0 %v12019_v35  ;;  %v12059_v1 = vcombine.high %v4006_v53, %v4010_v62  ;;  %v12061_v35 = vcombine.high %v4007_v63, %v4011_v6  ;;  %v4051_v53 = vld [vmem:[%s18149_s3 + $0x538] sm:$0xff] }
 0x42c   :  { %11074 = vmatprep.subr.bf16.mxu1 %v12021_v2  ;;  %v4014_v2 = vld [vmem:[%s18149_s3 + $0x410] sm:$0xff] }
 0x42d   :  { %v12066_v20 = vcombine.low %v4014_v2, %v4018_v3 }
 0x42e   :  { %10747 = vmatpush1.bf16.msra.mxu0 %v12018_v13  ;;  %v12060_v13 = vcombine.low %v4007_v63, %v4011_v6 }
 0x42f   :  { %11075 = vmatpush1.bf16.msra.mxu1 %v12020_v10  ;;  %10748 = vmatprep.subr.bf16.mxu0 %v12027_v39  ;;  %v12067_v10 = vcombine.high %v4014_v2, %v4018_v3  ;;  %v12069_v39 = vcombine.high %v4015_v22, %v4019_v5  ;;  %v4059_v2 = vld [vmem:[%s18149_s3 + $0x578] sm:$0xff] }
 0x430   :  { %11076 = vmatprep.subr.bf16.mxu1 %v12029_v16  ;;  %v4022_v16 = vld [vmem:[%s18149_s3 + $0x450] sm:$0xff] }
 0x431   :  { %v12074_v47 = vcombine.low %v4022_v16, %v4026_v17 }
 0x432   :  { %10749 = vmatpush1.bf16.msra.mxu0 %v12026_v8  ;;  %v12068_v8 = vcombine.low %v4015_v22, %v4019_v5 }
 0x433   :  { %11077 = vmatpush1.bf16.msra.mxu1 %v12028_v15  ;;  %10750 = vmatprep.subr.bf16.mxu0 %v12035_v12  ;;  %v12075_v15 = vcombine.high %v4022_v16, %v4026_v17  ;;  %v4030_v12 = vld [vmem:[%s18149_s3 + $0x490] sm:$0xff]  ;;  %v4067_v16 = vld [vmem:[%s18149_s3 + $0x5b8] sm:$0xff] }
 0x434   :  { %11078 = vmatprep.subr.bf16.mxu1 %v12037_v38  ;;  %v4034_v38 = vld [vmem:[%s18149_s3 + $0x4b0] sm:$0xff] }
 0x436   :  { %10751 = vmatpush1.bf16.msra.mxu0 %v12034_v11  ;;  %v12076_v11 = vcombine.low %v4023_v30, %v4027_v33 }
 0x437   :  { %11079 = vmatpush1.bf16.msra.mxu1 %v12036_v23  ;;  %10752 = vmatprep.subr.bf16.mxu0 %v12043_v58  ;;  %v12083_v23 = vcombine.high %v4030_v12, %v4034_v38  ;;  %v12085_v58 = vcombine.high %v4031_v42, %v4035_v46 }
 0x438   :  { %11080 = vmatprep.subr.bf16.mxu1 %v12045_v36  ;;  %v4038_v36 = vld [vmem:[%s18149_s3 + $0x4d0] sm:$0xff] }
 0x439   :  { %v12091_v55 = vcombine.high %v4038_v36, %v4042_v50  ;;  %v12090_v62 = vcombine.low %v4038_v36, %v4042_v50  ;;  %v4083_v36 = vld [vmem:[%s18149_s3 + $0x638] sm:$0xff] }
 0x43a   :  { %10753 = vmatpush1.bf16.msra.mxu0 %v12042_v0 }
 0x43b   :  { %11081 = vmatpush1.bf16.msra.mxu1 %v12044_v59  ;;  %10754 = vmatprep.subr.bf16.mxu0 %v12051_v34  ;;  %v4046_v59 = vld [vmem:[%s18149_s3 + $0x510] sm:$0xff] }
 0x43c   :  { %11082 = vmatprep.subr.bf16.mxu1 %v12053_v60  ;;  %v4050_v34 = vld [vmem:[%s18149_s3 + $0x530] sm:$0xff]  ;;  %v4047_v60 = vld [vmem:[%s18149_s3 + $0x518] sm:$0xff] }
 0x43d   :  { %v12099_v6 = vcombine.high %v4046_v59, %v4050_v34  ;;  %v12098_v3 = vcombine.low %v4046_v59, %v4050_v34  ;;  %v12100_v22 = vcombine.low %v4047_v60, %v4051_v53  ;;  %v4091_v59 = vld [vmem:[%s18149_s3 + $0x678] sm:$0xff] }
 0x43e   :  { %10755 = vmatpush1.bf16.msra.mxu0 %v12050_v4  ;;  %v12101_v4 = vcombine.high %v4047_v60, %v4051_v53 }
 0x43f   :  { %11083 = vmatpush1.bf16.msra.mxu1 %v12052_v25  ;;  %10756 = vmatprep.subr.bf16.mxu0 %v12059_v1  ;;  %v4054_v25 = vld [vmem:[%s18149_s3 + $0x550] sm:$0xff] }
 0x440   :  { %11084 = vmatprep.subr.bf16.mxu1 %v12061_v35  ;;  %v4058_v1 = vld [vmem:[%s18149_s3 + $0x570] sm:$0xff]  ;;  %v4055_v35 = vld [vmem:[%s18149_s3 + $0x558] sm:$0xff] }
 0x441   :  { %v12107_v5 = vcombine.high %v4054_v25, %v4058_v1  ;;  %v12106_v17 = vcombine.low %v4054_v25, %v4058_v1  ;;  %v4099_v25 = vld [vmem:[%s18149_s3 + $0x6b8] sm:$0xff] }
 0x442   :  { %10757 = vmatpush1.bf16.msra.mxu0 %v12058_v21  ;;  %v12109_v21 = vcombine.high %v4055_v35, %v4059_v2 }
 0x443   :  { %11085 = vmatpush1.bf16.msra.mxu1 %v12060_v13  ;;  %10767 = vmatprep.subr.bf16.mxu0 %v12067_v10  ;;  %v4062_v13 = vld [vmem:[%s18149_s3 + $0x590] sm:$0xff] }
 0x444   :  { %11095 = vmatprep.subr.bf16.mxu1 %v12069_v39  ;;  %v4066_v10 = vld [vmem:[%s18149_s3 + $0x5b0] sm:$0xff]  ;;  %v4063_v39 = vld [vmem:[%s18149_s3 + $0x598] sm:$0xff] }
 0x445   :  { %10759 = vmatmul.mubr.bf16.vlgmr.msra.gmra.mrb[20].mxu0 %v15075_v28  ;;  %v12115_v30 = vcombine.high %v4062_v13, %v4066_v10  ;;  %v12117_v33 = vcombine.high %v4063_v39, %v4067_v16  ;;  %v12116_v42 = vcombine.low %v4063_v39, %v4067_v16 }
 0x446   :  { %11087 = vmatmul.mubr.bf16.vlgmr.msra.gmra.mrb[20].mxu1 %v15075_v28  ;;  %10768 = vmatpush1.bf16.msra.mxu0 %v12066_v20  ;;  %v4039_v28 = vld [vmem:[%s18149_s3 + $0x4d8] sm:$0xff]  ;;  %v12108_v20 = vcombine.low %v4055_v35, %v4059_v2 }
 0x447   :  { %10799 = vmatprep.mubr.bf16.mxu0 %v15083_v32  ;;  %11096 = vmatpush1.bf16.msra.mxu1 %v12068_v8  ;;  %v12093_v0 = vcombine.high %v4039_v28, %v4043_v51  ;;  %v12092_v63 = vcombine.low %v4039_v28, %v4043_v51  ;;  %v4070_v8 = vld [vmem:[%s18149_s3 + $0x5d0] sm:$0xff] }
 0x448   :  { %11127 = vmatprep.mubr.bf16.mxu1 %v15083_v32  ;;  %10769 = vmatprep.subr.bf16.mxu0 %v12075_v15  ;;  %v12082_v32 = vcombine.low %v4030_v12, %v4034_v38  ;;  %v4074_v15 = vld [vmem:[%s18149_s3 + $0x5f0] sm:$0xff]  ;;  %v4071_v12 = vld [vmem:[%s18149_s3 + $0x5d8] sm:$0xff] }
 0x449   :  { %11097 = vmatprep.subr.bf16.mxu1 %v12077_v41  ;;  %v4075_v38 = vld [vmem:[%s18149_s3 + $0x5f8] sm:$0xff]  ;;  %v12114_v41 = vcombine.low %v4062_v13, %v4066_v10  ;;  %v12123_v46 = vcombine.high %v4070_v8, %v4074_v15  ;;  %v12122_v50 = vcombine.low %v4070_v8, %v4074_v15 }
 0x44a   :  { %10770 = vmatpush1.bf16.msra.mxu0 %v12074_v47  ;;  %v12125_v47 = vcombine.high %v4071_v12, %v4075_v38  ;;  %v12124_v28 = vcombine.low %v4071_v12, %v4075_v38  ;;  %v4107_v13 = vld [vmem:[%s18149_s3 + $0x6f8] sm:$0xff] }
 0x44b   :  { %11098 = vmatpush1.bf16.msra.mxu1 %v12076_v11  ;;  %10771 = vmatprep.subr.bf16.mxu0 %v12083_v23  ;;  %v4078_v11 = vld [vmem:[%s18149_s3 + $0x610] sm:$0xff]  ;;  %v4115_v8 = vld [vmem:[%s18149_s3 + $0x738] sm:$0xff] }
 0x44c   :  { %11099 = vmatprep.subr.bf16.mxu1 %v12085_v58  ;;  %v4082_v23 = vld [vmem:[%s18149_s3 + $0x630] sm:$0xff]  ;;  %v4079_v58 = vld [vmem:[%s18149_s3 + $0x618] sm:$0xff] }
 0x44d   :  { %v12131_v51 = vcombine.high %v4078_v11, %v4082_v23  ;;  %v12130_v34 = vcombine.low %v4078_v11, %v4082_v23  ;;  %v12132_v60 = vcombine.low %v4079_v58, %v4083_v36  ;;  %v4123_v11 = vld [vmem:[%s18149_s3 + $0x778] sm:$0xff] }
 0x44e   :  { %10772 = vmatpush1.bf16.msra.mxu0 %v12082_v32  ;;  %v12133_v32 = vcombine.high %v4079_v58, %v4083_v36 }
 0x44f   :  { %11100 = vmatpush1.bf16.msra.mxu1 %v12084_v54  ;;  %10773 = vmatprep.subr.bf16.mxu0 %v12091_v55  ;;  %v4086_v54 = vld [vmem:[%s18149_s3 + $0x650] sm:$0xff] }
 0x450   :  { %11101 = vmatprep.subr.bf16.mxu1 %v12093_v0  ;;  %v4090_v55 = vld [vmem:[%s18149_s3 + $0x670] sm:$0xff]  ;;  %v4087_v0 = vld [vmem:[%s18149_s3 + $0x658] sm:$0xff] }
 0x451   :  { %v12139_v53 = vcombine.high %v4086_v54, %v4090_v55  ;;  %v12138_v1 = vcombine.low %v4086_v54, %v4090_v55  ;;  %v12140_v35 = vcombine.low %v4087_v0, %v4091_v59  ;;  %v4131_v54 = vld [vmem:[%s18149_s3 + $0x7b8] sm:$0xff] }
 0x452   :  { %10774 = vmatpush1.bf16.msra.mxu0 %v12090_v62  ;;  %v12141_v62 = vcombine.high %v4087_v0, %v4091_v59 }
 0x453   :  { %11102 = vmatpush1.bf16.msra.mxu1 %v12092_v63  ;;  %10775 = vmatprep.subr.bf16.mxu0 %v12099_v6  ;;  %v4094_v63 = vld [vmem:[%s18149_s3 + $0x690] sm:$0xff] }
 0x454   :  { %11103 = vmatprep.subr.bf16.mxu1 %v12101_v4  ;;  %v4098_v6 = vld [vmem:[%s18149_s3 + $0x6b0] sm:$0xff]  ;;  %v4095_v4 = vld [vmem:[%s18149_s3 + $0x698] sm:$0xff] }
 0x455   :  { %v12147_v2 = vcombine.high %v4094_v63, %v4098_v6  ;;  %v12146_v10 = vcombine.low %v4094_v63, %v4098_v6  ;;  %v12148_v39 = vcombine.low %v4095_v4, %v4099_v25  ;;  %v4139_v63 = vld [vmem:[%s18149_s3 + $0x7f8] sm:$0xff] }
 0x456   :  { %10776 = vmatpush1.bf16.msra.mxu0 %v12098_v3  ;;  %v12149_v3 = vcombine.high %v4095_v4, %v4099_v25 }
 0x457   :  { %11104 = vmatpush1.bf16.msra.mxu1 %v12100_v22  ;;  %10777 = vmatprep.subr.bf16.mxu0 %v12107_v5  ;;  %v4102_v22 = vld [vmem:[%s18149_s3 + $0x6d0] sm:$0xff] }
 0x458   :  { %11105 = vmatprep.subr.bf16.mxu1 %v12109_v21  ;;  %v4106_v5 = vld [vmem:[%s18149_s3 + $0x6f0] sm:$0xff]  ;;  %v4103_v21 = vld [vmem:[%s18149_s3 + $0x6d8] sm:$0xff] }
 0x459   :  { %v12155_v16 = vcombine.high %v4102_v22, %v4106_v5  ;;  %v12154_v15 = vcombine.low %v4102_v22, %v4106_v5  ;;  %v12156_v12 = vcombine.low %v4103_v21, %v4107_v13  ;;  %v4147_v22 = vld [vmem:[%s18149_s3 + $0x838] sm:$0xff] }
 0x45a   :  { %10778 = vmatpush1.bf16.msra.mxu0 %v12106_v17  ;;  %v12157_v17 = vcombine.high %v4103_v21, %v4107_v13 }
 0x45b   :  { %11106 = vmatpush1.bf16.msra.mxu1 %v12108_v20  ;;  %10779 = vmatprep.subr.bf16.mxu0 %v12115_v30  ;;  %v4110_v20 = vld [vmem:[%s18149_s3 + $0x710] sm:$0xff] }
 0x45c   :  { %11107 = vmatprep.subr.bf16.mxu1 %v12117_v33  ;;  %v4114_v30 = vld [vmem:[%s18149_s3 + $0x730] sm:$0xff]  ;;  %v4111_v33 = vld [vmem:[%s18149_s3 + $0x718] sm:$0xff] }
 0x45d   :  { %v12163_v38 = vcombine.high %v4110_v20, %v4114_v30  ;;  %v12162_v23 = vcombine.low %v4110_v20, %v4114_v30  ;;  %v12164_v58 = vcombine.low %v4111_v33, %v4115_v8  ;;  %v4151_v20 = vld [vmem:[%s18149_s3 + $0x858] sm:$0xff] }
 0x45e   :  { %10780 = vmatpush1.bf16.msra.mxu0 %v12114_v41  ;;  %v12165_v41 = vcombine.high %v4111_v33, %v4115_v8  ;;  %v4155_v30 = vld [vmem:[%s18149_s3 + $0x878] sm:$0xff] }
 0x45f   :  { %11108 = vmatpush1.bf16.msra.mxu1 %v12116_v42  ;;  %10781 = vmatprep.subr.bf16.mxu0 %v12123_v46  ;;  %v4118_v42 = vld [vmem:[%s18149_s3 + $0x750] sm:$0xff] }
 0x460   :  { %11109 = vmatprep.subr.bf16.mxu1 %v12125_v47  ;;  %v4122_v46 = vld [vmem:[%s18149_s3 + $0x770] sm:$0xff]  ;;  %v4119_v47 = vld [vmem:[%s18149_s3 + $0x758] sm:$0xff] }
 0x461   :  { %v12171_v36 = vcombine.high %v4118_v42, %v4122_v46  ;;  %v12170_v55 = vcombine.low %v4118_v42, %v4122_v46  ;;  %v12172_v0 = vcombine.low %v4119_v47, %v4123_v11  ;;  %v4163_v42 = vld [vmem:[%s18149_s3 + $0x8b8] sm:$0xff] }
 0x462   :  { %10782 = vmatpush1.bf16.msra.mxu0 %v12122_v50  ;;  %v12173_v50 = vcombine.high %v4119_v47, %v4123_v11  ;;  %v12204_v47 = vcombine.low %v4151_v20, %v4155_v30 }
 0x463   :  { %11110 = vmatpush1.bf16.msra.mxu1 %v12124_v28  ;;  %10783 = vmatprep.subr.bf16.mxu0 %v12131_v51  ;;  %v4126_v28 = vld [vmem:[%s18149_s3 + $0x790] sm:$0xff] }
 0x464   :  { %11111 = vmatprep.subr.bf16.mxu1 %v12133_v32  ;;  %v4130_v51 = vld [vmem:[%s18149_s3 + $0x7b0] sm:$0xff]  ;;  %v4127_v32 = vld [vmem:[%s18149_s3 + $0x798] sm:$0xff] }
 0x465   :  { %v12179_v59 = vcombine.high %v4126_v28, %v4130_v51  ;;  %v12178_v6 = vcombine.low %v4126_v28, %v4130_v51  ;;  %v12180_v4 = vcombine.low %v4127_v32, %v4131_v54 }
 0x466   :  { %10784 = vmatpush1.bf16.msra.mxu0 %v12130_v34  ;;  %v12181_v34 = vcombine.high %v4127_v32, %v4131_v54  ;;  %v4174_v54 = vld [vmem:[%s18149_s3 + $0x910] sm:$0xff] }
 0x467   :  { %11112 = vmatpush1.bf16.msra.mxu1 %v12132_v60  ;;  %10785 = vmatprep.subr.bf16.mxu0 %v12139_v53  ;;  %v4134_v60 = vld [vmem:[%s18149_s3 + $0x7d0] sm:$0xff] }
 0x468   :  { %11113 = vmatprep.subr.bf16.mxu1 %v12141_v62  ;;  %v4138_v53 = vld [vmem:[%s18149_s3 + $0x7f0] sm:$0xff]  ;;  %v4135_v62 = vld [vmem:[%s18149_s3 + $0x7d8] sm:$0xff] }
 0x469   :  { %v12187_v25 = vcombine.high %v4134_v60, %v4138_v53  ;;  %v12186_v5 = vcombine.low %v4134_v60, %v4138_v53  ;;  %v12188_v21 = vcombine.low %v4135_v62, %v4139_v63 }
 0x46a   :  { %10786 = vmatpush1.bf16.msra.mxu0 %v12138_v1  ;;  %v12189_v1 = vcombine.high %v4135_v62, %v4139_v63  ;;  %v4182_v63 = vld [vmem:[%s18149_s3 + $0x950] sm:$0xff] }
 0x46b   :  { %11114 = vmatpush1.bf16.msra.mxu1 %v12140_v35  ;;  %10787 = vmatprep.subr.bf16.mxu0 %v12147_v2  ;;  %v4142_v35 = vld [vmem:[%s18149_s3 + $0x810] sm:$0xff] }
 0x46c   :  { %11115 = vmatprep.subr.bf16.mxu1 %v12149_v3  ;;  %v4146_v2 = vld [vmem:[%s18149_s3 + $0x830] sm:$0xff]  ;;  %v4143_v3 = vld [vmem:[%s18149_s3 + $0x818] sm:$0xff] }
 0x46d   :  { %v12195_v13 = vcombine.high %v4142_v35, %v4146_v2  ;;  %v12196_v33 = vcombine.low %v4143_v3, %v4147_v22 }
 0x46e   :  { %10788 = vmatpush1.bf16.msra.mxu0 %v12146_v10  ;;  %v12197_v10 = vcombine.high %v4143_v3, %v4147_v22  ;;  %v4190_v22 = vld [vmem:[%s18149_s3 + $0x990] sm:$0xff] }
 0x46f   :  { %11116 = vmatpush1.bf16.msra.mxu1 %v12148_v39  ;;  %10789 = vmatprep.subr.bf16.mxu0 %v12155_v16  ;;  %v4150_v39 = vld [vmem:[%s18149_s3 + $0x850] sm:$0xff] }
 0x470   :  { %11117 = vmatprep.subr.bf16.mxu1 %v12157_v17  ;;  %v4154_v16 = vld [vmem:[%s18149_s3 + $0x870] sm:$0xff]  ;;  %v12194_v17 = vcombine.low %v4142_v35, %v4146_v2 }
 0x471   :  { %v12203_v8 = vcombine.high %v4150_v39, %v4154_v16  ;;  %v12202_v46 = vcombine.low %v4150_v39, %v4154_v16 }
 0x472   :  { %10790 = vmatpush1.bf16.msra.mxu0 %v12154_v15  ;;  %v4158_v15 = vld [vmem:[%s18149_s3 + $0x890] sm:$0xff] }
 0x473   :  { %11118 = vmatpush1.bf16.msra.mxu1 %v12156_v12  ;;  %10791 = vmatprep.subr.bf16.mxu0 %v12163_v38  ;;  %v4162_v12 = vld [vmem:[%s18149_s3 + $0x8b0] sm:$0xff]  ;;  %v12205_v38 = vcombine.high %v4151_v20, %v4155_v30 }
 0x474   :  { %11119 = vmatprep.subr.bf16.mxu1 %v12165_v41  ;;  %v4159_v41 = vld [vmem:[%s18149_s3 + $0x898] sm:$0xff]  ;;  %v12211_v11 = vcombine.high %v4158_v15, %v4162_v12  ;;  %v4198_v20 = vld [vmem:[%s18149_s3 + $0x9d0] sm:$0xff] }
 0x475   :  { %v12212_v28 = vcombine.low %v4159_v41, %v4163_v42  ;;  %v4202_v30 = vld [vmem:[%s18149_s3 + $0x9f0] sm:$0xff] }
 0x476   :  { %10792 = vmatpush1.bf16.msra.mxu0 %v12162_v23  ;;  %v12213_v23 = vcombine.high %v4159_v41, %v4163_v42  ;;  %v4206_v42 = vld [vmem:[%s18149_s3 + $0xa10] sm:$0xff] }
 0x477   :  { %11120 = vmatpush1.bf16.msra.mxu1 %v12164_v58  ;;  %10793 = vmatprep.subr.bf16.mxu0 %v12171_v36  ;;  %v4166_v58 = vld [vmem:[%s18149_s3 + $0x8d0] sm:$0xff] }
 0x478   :  { %11121 = vmatprep.subr.bf16.mxu1 %v12173_v50  ;;  %v4170_v36 = vld [vmem:[%s18149_s3 + $0x8f0] sm:$0xff]  ;;  %v4171_v50 = vld [vmem:[%s18149_s3 + $0x8f8] sm:$0xff] }
 0x479   :  { %v12219_v51 = vcombine.high %v4166_v58, %v4170_v36 }
 0x47a   :  { %10794 = vmatpush1.bf16.msra.mxu0 %v12170_v55  ;;  %v4178_v55 = vld [vmem:[%s18149_s3 + $0x930] sm:$0xff] }
 0x47b   :  { %11122 = vmatpush1.bf16.msra.mxu1 %v12172_v0  ;;  %10795 = vmatprep.subr.bf16.mxu0 %v12179_v59  ;;  %v4175_v0 = vld [vmem:[%s18149_s3 + $0x918] sm:$0xff]  ;;  %v12227_v53 = vcombine.high %v4174_v54, %v4178_v55 }
 0x47c   :  { %11123 = vmatprep.subr.bf16.mxu1 %v12181_v34  ;;  %v4179_v59 = vld [vmem:[%s18149_s3 + $0x938] sm:$0xff]  ;;  %v12218_v34 = vcombine.low %v4166_v58, %v4170_v36 }
 0x47d   :  { %v12229_v62 = vcombine.high %v4175_v0, %v4179_v59  ;;  %v12228_v35 = vcombine.low %v4175_v0, %v4179_v59  ;;  %v4222_v59 = vld [vmem:[%s18149_s3 + $0xa90] sm:$0xff] }
 0x47e   :  { %10796 = vmatpush1.bf16.msra.mxu0 %v12178_v6  ;;  %v4186_v6 = vld [vmem:[%s18149_s3 + $0x970] sm:$0xff] }
 0x47f   :  { %11124 = vmatpush1.bf16.msra.mxu1 %v12180_v4  ;;  %10797 = vmatprep.subr.bf16.mxu0 %v12187_v25  ;;  %v4183_v4 = vld [vmem:[%s18149_s3 + $0x958] sm:$0xff]  ;;  %v12235_v2 = vcombine.high %v4182_v63, %v4186_v6 }
 0x480   :  { %11125 = vmatprep.subr.bf16.mxu1 %v12189_v1  ;;  %v4187_v25 = vld [vmem:[%s18149_s3 + $0x978] sm:$0xff]  ;;  %v12226_v1 = vcombine.low %v4174_v54, %v4178_v55 }
 0x481   :  { %v12237_v3 = vcombine.high %v4183_v4, %v4187_v25  ;;  %v12236_v39 = vcombine.low %v4183_v4, %v4187_v25  ;;  %v4230_v25 = vld [vmem:[%s18149_s3 + $0xad0] sm:$0xff] }
 0x482   :  { %10798 = vmatpush1.bf16.msra.mxu0 %v12186_v5  ;;  %v4194_v5 = vld [vmem:[%s18149_s3 + $0x9b0] sm:$0xff] }
 0x483   :  { %11126 = vmatpush1.bf16.msra.mxu1 %v12188_v21  ;;  %10808 = vmatprep.subr.bf16.mxu0 %v12195_v13  ;;  %v4191_v21 = vld [vmem:[%s18149_s3 + $0x998] sm:$0xff]  ;;  %v12243_v16 = vcombine.high %v4190_v22, %v4194_v5 }
 0x484   :  { %11136 = vmatprep.subr.bf16.mxu1 %v12197_v10  ;;  %v4195_v13 = vld [vmem:[%s18149_s3 + $0x9b8] sm:$0xff]  ;;  %v12234_v10 = vcombine.low %v4182_v63, %v4186_v6 }
 0x485   :  { %10800 = vmatmul.mubr.bf16.vlgmr.msra.gmra.mrb[20].mxu0 %v15295_v18 }
 0x486   :  { %11128 = vmatmul.mubr.bf16.vlgmr.msra.gmra.mrb[20].mxu1 %v15295_v18  ;;  %10809 = vmatpush1.bf16.msra.mxu0 %v12194_v17  ;;  %v4167_v18 = vld [vmem:[%s18149_s3 + $0x8d8] sm:$0xff]  ;;  %v12245_v17 = vcombine.high %v4191_v21, %v4195_v13 }
 0x487   :  { %10840 = vmatprep.mubr.bf16.mxu0 %v15303_v29  ;;  %11137 = vmatpush1.bf16.msra.mxu1 %v12196_v33  ;;  %v12221_v32 = vcombine.high %v4167_v18, %v4171_v50  ;;  %v12220_v60 = vcombine.low %v4167_v18, %v4171_v50  ;;  %v4199_v33 = vld [vmem:[%s18149_s3 + $0x9d8] sm:$0xff]  ;;  %v4214_v50 = vld [vmem:[%s18149_s3 + $0xa50] sm:$0xff] }
 0x488   :  { %11168 = vmatprep.mubr.bf16.mxu1 %v15303_v29  ;;  %10810 = vmatprep.subr.bf16.mxu0 %v12203_v8  ;;  %v12210_v29 = vcombine.low %v4158_v15, %v4162_v12  ;;  %v4203_v8 = vld [vmem:[%s18149_s3 + $0x9f8] sm:$0xff]  ;;  %v12242_v15 = vcombine.low %v4190_v22, %v4194_v5  ;;  %v12244_v12 = vcombine.low %v4191_v21, %v4195_v13  ;;  %v4238_v13 = vld [vmem:[%s18149_s3 + $0xb10] sm:$0xff] }
 0x489   :  { %11138 = vmatprep.subr.bf16.mxu1 %v12205_v38  ;;  %v12251_v38 = vcombine.high %v4198_v20, %v4202_v30  ;;  %v12253_v41 = vcombine.high %v4199_v33, %v4203_v8  ;;  %v12252_v58 = vcombine.low %v4199_v33, %v4203_v8  ;;  %v4246_v8 = vld [vmem:[%s18149_s3 + $0xb50] sm:$0xff] }
 0x48a   :  { %10811 = vmatpush1.bf16.msra.mxu0 %v12202_v46  ;;  %v4210_v46 = vld [vmem:[%s18149_s3 + $0xa30] sm:$0xff] }
 0x48b   :  { %11139 = vmatpush1.bf16.msra.mxu1 %v12204_v47  ;;  %10812 = vmatprep.subr.bf16.mxu0 %v12211_v11  ;;  %v4207_v47 = vld [vmem:[%s18149_s3 + $0xa18] sm:$0xff]  ;;  %v12259_v36 = vcombine.high %v4206_v42, %v4210_v46 }
 0x48c   :  { %11140 = vmatprep.subr.bf16.mxu1 %v12213_v23  ;;  %v4211_v11 = vld [vmem:[%s18149_s3 + $0xa38] sm:$0xff]  ;;  %v12250_v23 = vcombine.low %v4198_v20, %v4202_v30 }
 0x48d   :  { %v12261_v18 = vcombine.high %v4207_v47, %v4211_v11  ;;  %v12260_v54 = vcombine.low %v4207_v47, %v4211_v11  ;;  %v4254_v11 = vld [vmem:[%s18149_s3 + $0xb90] sm:$0xff] }
 0x48e   :  { %10813 = vmatpush1.bf16.msra.mxu0 %v12210_v29  ;;  %v4218_v29 = vld [vmem:[%s18149_s3 + $0xa70] sm:$0xff] }
 0x48f   :  { %11141 = vmatpush1.bf16.msra.mxu1 %v12212_v28  ;;  %10814 = vmatprep.subr.bf16.mxu0 %v12219_v51  ;;  %v4215_v28 = vld [vmem:[%s18149_s3 + $0xa58] sm:$0xff]  ;;  %v12267_v55 = vcombine.high %v4214_v50, %v4218_v29 }
 0x490   :  { %11142 = vmatprep.subr.bf16.mxu1 %v12221_v32  ;;  %v4219_v51 = vld [vmem:[%s18149_s3 + $0xa78] sm:$0xff]  ;;  %v12258_v32 = vcombine.low %v4206_v42, %v4210_v46 }
 0x491   :  { %v12269_v0 = vcombine.high %v4215_v28, %v4219_v51  ;;  %v12268_v63 = vcombine.low %v4215_v28, %v4219_v51  ;;  %v4262_v51 = vld [vmem:[%s18149_s3 + $0xbd0] sm:$0xff] }
 0x492   :  { %10815 = vmatpush1.bf16.msra.mxu0 %v12218_v34  ;;  %v4226_v34 = vld [vmem:[%s18149_s3 + $0xab0] sm:$0xff] }
 0x493   :  { %11143 = vmatpush1.bf16.msra.mxu1 %v12220_v60  ;;  %10816 = vmatprep.subr.bf16.mxu0 %v12227_v53  ;;  %v4223_v60 = vld [vmem:[%s18149_s3 + $0xa98] sm:$0xff]  ;;  %v12275_v6 = vcombine.high %v4222_v59, %v4226_v34 }
 0x494   :  { %11144 = vmatprep.subr.bf16.mxu1 %v12229_v62  ;;  %v4227_v53 = vld [vmem:[%s18149_s3 + $0xab8] sm:$0xff]  ;;  %v12266_v62 = vcombine.low %v4214_v50, %v4218_v29 }
 0x495   :  { %v12277_v4 = vcombine.high %v4223_v60, %v4227_v53  ;;  %v12276_v22 = vcombine.low %v4223_v60, %v4227_v53  ;;  %v4270_v53 = vld [vmem:[%s18149_s3 + $0xc10] sm:$0xff] }
 0x496   :  { %10817 = vmatpush1.bf16.msra.mxu0 %v12226_v1  ;;  %v4234_v1 = vld [vmem:[%s18149_s3 + $0xaf0] sm:$0xff] }
 0x497   :  { %11145 = vmatpush1.bf16.msra.mxu1 %v12228_v35  ;;  %10818 = vmatprep.subr.bf16.mxu0 %v12235_v2  ;;  %v4231_v35 = vld [vmem:[%s18149_s3 + $0xad8] sm:$0xff]  ;;  %v12283_v5 = vcombine.high %v4230_v25, %v4234_v1 }
 0x498   :  { %11146 = vmatprep.subr.bf16.mxu1 %v12237_v3  ;;  %v4235_v2 = vld [vmem:[%s18149_s3 + $0xaf8] sm:$0xff]  ;;  %v12274_v3 = vcombine.low %v4222_v59, %v4226_v34 }
 0x499   :  { %v12285_v21 = vcombine.high %v4231_v35, %v4235_v2  ;;  %v12284_v20 = vcombine.low %v4231_v35, %v4235_v2  ;;  %v4278_v2 = vld [vmem:[%s18149_s3 + $0xc50] sm:$0xff] }
 0x49a   :  { %10819 = vmatpush1.bf16.msra.mxu0 %v12234_v10  ;;  %v4242_v10 = vld [vmem:[%s18149_s3 + $0xb30] sm:$0xff] }
 0x49b   :  { %11147 = vmatpush1.bf16.msra.mxu1 %v12236_v39  ;;  %10820 = vmatprep.subr.bf16.mxu0 %v12243_v16  ;;  %v4239_v39 = vld [vmem:[%s18149_s3 + $0xb18] sm:$0xff]  ;;  %v12291_v30 = vcombine.high %v4238_v13, %v4242_v10 }
 0x49c   :  { %11148 = vmatprep.subr.bf16.mxu1 %v12245_v17  ;;  %v4243_v16 = vld [vmem:[%s18149_s3 + $0xb38] sm:$0xff]  ;;  %v12282_v17 = vcombine.low %v4230_v25, %v4234_v1 }
 0x49d   :  { %v12293_v33 = vcombine.high %v4239_v39, %v4243_v16  ;;  %v12292_v42 = vcombine.low %v4239_v39, %v4243_v16  ;;  %v4286_v39 = vld [vmem:[%s18149_s3 + $0xc90] sm:$0xff] }
 0x49e   :  { %10821 = vmatpush1.bf16.msra.mxu0 %v12242_v15  ;;  %v4250_v15 = vld [vmem:[%s18149_s3 + $0xb70] sm:$0xff] }
 0x49f   :  { %11149 = vmatpush1.bf16.msra.mxu1 %v12244_v12  ;;  %10822 = vmatprep.subr.bf16.mxu0 %v12251_v38  ;;  %v4247_v12 = vld [vmem:[%s18149_s3 + $0xb58] sm:$0xff]  ;;  %v12299_v46 = vcombine.high %v4246_v8, %v4250_v15  ;;  %v4290_v16 = vld [vmem:[%s18149_s3 + $0xcb0] sm:$0xff] }
 0x4a0   :  { %11150 = vmatprep.subr.bf16.mxu1 %v12253_v41  ;;  %v4251_v38 = vld [vmem:[%s18149_s3 + $0xb78] sm:$0xff]  ;;  %v12290_v41 = vcombine.low %v4238_v13, %v4242_v10 }
 0x4a1   :  { %v12301_v47 = vcombine.high %v4247_v12, %v4251_v38  ;;  %v12300_v50 = vcombine.low %v4247_v12, %v4251_v38  ;;  %v4294_v38 = vld [vmem:[%s18149_s3 + $0xcd0] sm:$0xff] }
 0x4a2   :  { %10823 = vmatpush1.bf16.msra.mxu0 %v12250_v23  ;;  %v4258_v23 = vld [vmem:[%s18149_s3 + $0xbb0] sm:$0xff] }
 0x4a3   :  { %11151 = vmatpush1.bf16.msra.mxu1 %v12252_v58  ;;  %10824 = vmatprep.subr.bf16.mxu0 %v12259_v36  ;;  %v4255_v58 = vld [vmem:[%s18149_s3 + $0xb98] sm:$0xff]  ;;  %v12307_v29 = vcombine.high %v4254_v11, %v4258_v23 }
 0x4a4   :  { %11152 = vmatprep.subr.bf16.mxu1 %v12261_v18  ;;  %v4259_v36 = vld [vmem:[%s18149_s3 + $0xbb8] sm:$0xff]  ;;  %v12298_v18 = vcombine.low %v4246_v8, %v4250_v15  ;;  %v12339_v15 = vcombine.high %v4286_v39, %v4290_v16 }
 0x4a5   :  { %v12309_v28 = vcombine.high %v4255_v58, %v4259_v36  ;;  %v12308_v59 = vcombine.low %v4255_v58, %v4259_v36  ;;  %v4306_v58 = vld [vmem:[%s18149_s3 + $0xd30] sm:$0xff]  ;;  %v4303_v36 = vld [vmem:[%s18149_s3 + $0xd18] sm:$0xff] }
 0x4a6   :  { %10825 = vmatpush1.bf16.msra.mxu0 %v12258_v32  ;;  %v4266_v32 = vld [vmem:[%s18149_s3 + $0xbf0] sm:$0xff] }
 0x4a7   :  { %11153 = vmatpush1.bf16.msra.mxu1 %v12260_v54  ;;  %10826 = vmatprep.subr.bf16.mxu0 %v12267_v55  ;;  %v4263_v54 = vld [vmem:[%s18149_s3 + $0xbd8] sm:$0xff]  ;;  %v12315_v34 = vcombine.high %v4262_v51, %v4266_v32 }
 0x4a8   :  { %11154 = vmatprep.subr.bf16.mxu1 %v12269_v0  ;;  %v4267_v55 = vld [vmem:[%s18149_s3 + $0xbf8] sm:$0xff]  ;;  %v12306_v0 = vcombine.low %v4254_v11, %v4258_v23  ;;  %v4302_v23 = vld [vmem:[%s18149_s3 + $0xd10] sm:$0xff] }
 0x4a9   :  { %v12317_v60 = vcombine.high %v4263_v54, %v4267_v55  ;;  %v12316_v25 = vcombine.low %v4263_v54, %v4267_v55  ;;  %v4314_v54 = vld [vmem:[%s18149_s3 + $0xd70] sm:$0xff]  ;;  %v4311_v55 = vld [vmem:[%s18149_s3 + $0xd58] sm:$0xff] }
 0x4aa   :  { %10827 = vmatpush1.bf16.msra.mxu0 %v12266_v62  ;;  %v4274_v62 = vld [vmem:[%s18149_s3 + $0xc30] sm:$0xff] }
 0x4ab   :  { %11155 = vmatpush1.bf16.msra.mxu1 %v12268_v63  ;;  %10828 = vmatprep.subr.bf16.mxu0 %v12275_v6  ;;  %v4271_v63 = vld [vmem:[%s18149_s3 + $0xc18] sm:$0xff]  ;;  %v12323_v1 = vcombine.high %v4270_v53, %v4274_v62 }
 0x4ac   :  { %11156 = vmatprep.subr.bf16.mxu1 %v12277_v4  ;;  %v4275_v6 = vld [vmem:[%s18149_s3 + $0xc38] sm:$0xff]  ;;  %v12314_v4 = vcombine.low %v4262_v51, %v4266_v32  ;;  %v4310_v32 = vld [vmem:[%s18149_s3 + $0xd50] sm:$0xff] }
 0x4ad   :  { %v12325_v35 = vcombine.high %v4271_v63, %v4275_v6  ;;  %v12324_v13 = vcombine.low %v4271_v63, %v4275_v6  ;;  %v4318_v63 = vld [vmem:[%s18149_s3 + $0xd90] sm:$0xff] }
 0x4ae   :  { %10829 = vmatpush1.bf16.msra.mxu0 %v12274_v3  ;;  %v4282_v3 = vld [vmem:[%s18149_s3 + $0xc70] sm:$0xff] }
 0x4af   :  { %11157 = vmatpush1.bf16.msra.mxu1 %v12276_v22  ;;  %10830 = vmatprep.subr.bf16.mxu0 %v12283_v5  ;;  %v12322_v22 = vcombine.low %v4270_v53, %v4274_v62  ;;  %v4279_v5 = vld [vmem:[%s18149_s3 + $0xc58] sm:$0xff]  ;;  %v12331_v10 = vcombine.high %v4278_v2, %v4282_v3  ;;  %v12363_v53 = vcombine.high %v4310_v32, %v4314_v54  ;;  %v4322_v6 = vld [vmem:[%s18149_s3 + $0xdb0] sm:$0xff] }
 0x4b0   :  { %11158 = vmatprep.subr.bf16.mxu1 %v12285_v21  ;;  %v4283_v21 = vld [vmem:[%s18149_s3 + $0xc78] sm:$0xff] }
 0x4b1   :  { %v12332_v8 = vcombine.low %v4279_v5, %v4283_v21 }
 0x4b2   :  { %10831 = vmatpush1.bf16.msra.mxu0 %v12282_v17  ;;  %v12333_v17 = vcombine.high %v4279_v5, %v4283_v21 }
 0x4b3   :  { %11159 = vmatpush1.bf16.msra.mxu1 %v12284_v20  ;;  %10832 = vmatprep.subr.bf16.mxu0 %v12291_v30  ;;  %v4287_v20 = vld [vmem:[%s18149_s3 + $0xc98] sm:$0xff] }
 0x4b4   :  { %11160 = vmatprep.subr.bf16.mxu1 %v12293_v33  ;;  %v4291_v30 = vld [vmem:[%s18149_s3 + $0xcb8] sm:$0xff]  ;;  %v12330_v33 = vcombine.low %v4278_v2, %v4282_v3  ;;  %v12362_v3 = vcombine.low %v4310_v32, %v4314_v54 }
 0x4b5   :  { %v12341_v12 = vcombine.high %v4287_v20, %v4291_v30  ;;  %v4343_v32 = vld [vmem:[%s18149_s3 + $0xe58] sm:$0xff] }
 0x4b6   :  { %10833 = vmatpush1.bf16.msra.mxu0 %v12290_v41  ;;  %v4298_v41 = vld [vmem:[%s18149_s3 + $0xcf0] sm:$0xff]  ;;  %v4347_v54 = vld [vmem:[%s18149_s3 + $0xe78] sm:$0xff] }
 0x4b7   :  { %11161 = vmatpush1.bf16.msra.mxu1 %v12292_v42  ;;  %10834 = vmatprep.subr.bf16.mxu0 %v12299_v46  ;;  %v4299_v42 = vld [vmem:[%s18149_s3 + $0xcf8] sm:$0xff]  ;;  %v12340_v46 = vcombine.low %v4287_v20, %v4291_v30 }
 0x4b8   :  { %11162 = vmatprep.subr.bf16.mxu1 %v12301_v47  ;;  %v12347_v47 = vcombine.high %v4294_v38, %v4298_v41 }
 0x4ba   :  { %10835 = vmatpush1.bf16.msra.mxu0 %v12298_v18  ;;  %v4307_v18 = vld [vmem:[%s18149_s3 + $0xd38] sm:$0xff] }
 0x4bb   :  { %11163 = vmatpush1.bf16.msra.mxu1 %v12300_v50  ;;  %10836 = vmatprep.subr.bf16.mxu0 %v12307_v29  ;;  %v12346_v50 = vcombine.low %v4294_v38, %v4298_v41  ;;  %v12357_v51 = vcombine.high %v4303_v36, %v4307_v18 }
 0x4bc   :  { %11164 = vmatprep.subr.bf16.mxu1 %v12309_v28  ;;  %v12355_v28 = vcombine.high %v4302_v23, %v4306_v58 }
 0x4be   :  { %10837 = vmatpush1.bf16.msra.mxu0 %v12306_v0  ;;  %v4315_v0 = vld [vmem:[%s18149_s3 + $0xd78] sm:$0xff] }
 0x4bf   :  { %11165 = vmatpush1.bf16.msra.mxu1 %v12308_v59  ;;  %10838 = vmatprep.subr.bf16.mxu0 %v12315_v34  ;;  %v12354_v59 = vcombine.low %v4302_v23, %v4306_v58  ;;  %v4908_v34 = vld [vmem:[%s18150_s4] sm:$0xff]  ;;  %v12365_v62 = vcombine.high %v4311_v55, %v4315_v0  ;;  %v12364_v5 = vcombine.low %v4311_v55, %v4315_v0  ;;  %v4335_v23 = vld [vmem:[%s18149_s3 + $0xe18] sm:$0xff] }
 0x4c0   :  { %11166 = vmatprep.subr.bf16.mxu1 %v12317_v60  ;;  %v12356_v60 = vcombine.low %v4303_v36, %v4307_v18  ;;  %v4917_v2 = vrot.slane %v4908_v34, %v14813_v19  ;;  %v4339_v58 = vld [vmem:[%s18149_s3 + $0xe38] sm:$0xff] }
 0x4c1   :  { %v12388_v0 = vcombine.low %v4335_v23, %v4339_v58 }
 0x4c2   :  { %10839 = vmatpush1.bf16.msra.mxu0 %v12314_v4  ;;  %v4913_v4 = vrot.slane %v4908_v34, %v15016_v44  ;;  %v12371_v44 = vcombine.high %v4318_v63, %v4322_v6 }
 0x4c3   :  { %11167 = vmatpush1.bf16.msra.mxu1 %v12316_v25  ;;  %10849 = vmatprep.subr.bf16.mxu0 %v12323_v1  ;;  %v4319_v25 = vld [vmem:[%s18149_s3 + $0xd98] sm:$0xff] }
 0x4c4   :  { %11177 = vmatprep.subr.bf16.mxu1 %v12325_v35  ;;  %v4323_v1 = vld [vmem:[%s18149_s3 + $0xdb8] sm:$0xff]  ;;  %v4921_v35 = vrot.slane %v4908_v34, %v15236_v37  ;;  %v4330_v37 = vld [vmem:[%s18149_s3 + $0xdf0] sm:$0xff] }
 0x4c5   :  { %10841 = vmatmul.mubr.bf16.vlgmr.msra.gmra.mrb[20].mxu0 %v15512_v14 }
 0x4c6   :  { %11169 = vmatmul.mubr.bf16.vlgmr.msra.gmra.mrb[20].mxu1 %v15512_v14  ;;  %10850 = vmatpush1.bf16.msra.mxu0 %v12322_v22  ;;  %v4295_v14 = vld [vmem:[%s18149_s3 + $0xcd8] sm:$0xff]  ;;  %v4925_v22 = vrot.slane %v4908_v34, %v15025_v48  ;;  %v12397_v34 = vcombine.high %v4343_v32, %v4347_v54 }
 0x4c7   :  { %10881 = vmatprep.mubr.bf16.mxu0 %v15520_v26  ;;  %11178 = vmatpush1.bf16.msra.mxu1 %v12324_v13  ;;  %v12349_v11 = vcombine.high %v4295_v14, %v4299_v42  ;;  %v12348_v29 = vcombine.low %v4295_v14, %v4299_v42  ;;  %v12373_v13 = vcombine.high %v4319_v25, %v4323_v1  ;;  %v4327_v48 = vld [vmem:[%s18149_s3 + $0xdd8] sm:$0xff] }
 0x4c8   :  { %11209 = vmatprep.mubr.bf16.mxu1 %v15520_v26  ;;  %10851 = vmatprep.subr.bf16.mxu0 %v12331_v10  ;;  %v12338_v26 = vcombine.low %v4286_v39, %v4290_v16  ;;  %v4326_v10 = vld [vmem:[%s18149_s3 + $0xdd0] sm:$0xff]  ;;  %v12372_v14 = vcombine.low %v4319_v25, %v4323_v1 }
 0x4c9   :  { %11179 = vmatprep.subr.bf16.mxu1 %v12333_v17  ;;  %v4331_v17 = vld [vmem:[%s18149_s3 + $0xdf8] sm:$0xff]  ;;  %v12379_v42 = vcombine.high %v4326_v10, %v4330_v37  ;;  %v12378_v36 = vcombine.low %v4326_v10, %v4330_v37  ;;  %v4366_v10 = vld [vmem:[%s18149_s3 + $0xf10] sm:$0xff] }
 0x4ca   :  { %10852 = vmatpush1.bf16.msra.mxu0 %v12330_v33  ;;  %v12380_v18 = vcombine.low %v4327_v48, %v4331_v17  ;;  %v4370_v37 = vld [vmem:[%s18149_s3 + $0xf30] sm:$0xff] }
 0x4cb   :  { %11180 = vmatpush1.bf16.msra.mxu1 %v12332_v8  ;;  %10853 = vmatprep.subr.bf16.mxu0 %v12339_v15  ;;  %v12370_v15 = vcombine.low %v4318_v63, %v4322_v6  ;;  %v4355_v63 = vld [vmem:[%s18149_s3 + $0xeb8] sm:$0xff] }
 0x4cc   :  { %11181 = vmatprep.subr.bf16.mxu1 %v12341_v12 }
 0x4ce   :  { %10854 = vmatpush1.bf16.msra.mxu0 %v12338_v26 }
 0x4cf   :  { %11182 = vmatpush1.bf16.msra.mxu1 %v12340_v46  ;;  %10855 = vmatprep.subr.bf16.mxu0 %v12347_v47  ;;  %v12381_v46 = vcombine.high %v4327_v48, %v4331_v17  ;;  %v4334_v47 = vld [vmem:[%s18149_s3 + $0xe10] sm:$0xff]  ;;  %v12419_v17 = vcombine.high %v4366_v10, %v4370_v37 }
 0x4d0   :  { %11183 = vmatprep.subr.bf16.mxu1 %v12349_v11  ;;  %v4338_v11 = vld [vmem:[%s18149_s3 + $0xe30] sm:$0xff] }
 0x4d1   :  { %v12386_v55 = vcombine.low %v4334_v47, %v4338_v11 }
 0x4d2   :  { %10856 = vmatpush1.bf16.msra.mxu0 %v12346_v50  ;;  %v12387_v50 = vcombine.high %v4334_v47, %v4338_v11  ;;  %v4387_v47 = vld [vmem:[%s18149_s3 + $0xfb8] sm:$0xff] }
 0x4d3   :  { %11184 = vmatpush1.bf16.msra.mxu1 %v12348_v29  ;;  %10857 = vmatprep.subr.bf16.mxu0 %v12355_v28  ;;  %v12389_v29 = vcombine.high %v4335_v23, %v4339_v58  ;;  %v4342_v28 = vld [vmem:[%s18149_s3 + $0xe50] sm:$0xff] }
 0x4d4   :  { %11185 = vmatprep.subr.bf16.mxu1 %v12357_v51  ;;  %v4346_v51 = vld [vmem:[%s18149_s3 + $0xe70] sm:$0xff] }
 0x4d5   :  { %v12394_v6 = vcombine.low %v4342_v28, %v4346_v51 }
 0x4d6   :  { %10858 = vmatpush1.bf16.msra.mxu0 %v12354_v59  ;;  %v12395_v59 = vcombine.high %v4342_v28, %v4346_v51  ;;  %v4395_v28 = vld [vmem:[%s18149_s3 + $0xff8] sm:$0xff] }
 0x4d7   :  { %11186 = vmatpush1.bf16.msra.mxu1 %v12356_v60  ;;  %10859 = vmatprep.subr.bf16.mxu0 %v12363_v53  ;;  %v4350_v60 = vld [vmem:[%s18149_s3 + $0xe90] sm:$0xff] }
 0x4d8   :  { %v10391_v21 = vpop.f32.mrb[16].mxu0  ;;  %11187 = vmatprep.subr.bf16.mxu1 %v12365_v62  ;;  %v4354_v53 = vld [vmem:[%s18149_s3 + $0xeb0] sm:$0xff]  ;;  %v4351_v62 = vld [vmem:[%s18149_s3 + $0xe98] sm:$0xff] }
 0x4d9   :  { %v12974_v39 = vadd.f32 %v10391_v21, %v4913_v4  ;;  %v10719_v19 = vpop.f32.mrb[16].mxu1  ;;  %v10393_v16 = vpop.f32.mrb[17].mxu0  ;;  %v12396_v4 = vcombine.low %v4343_v32, %v4347_v54  ;;  %v12403_v25 = vcombine.high %v4350_v60, %v4354_v53  ;;  %v12405_v1 = vcombine.high %v4351_v62, %v4355_v63 }
 0x4da   :  { %v12976_v20 = vadd.f32 %v10719_v19, %v4921_v35  ;;  %v12975_v30 = vadd.f32 %v10393_v16, %v4917_v2  ;;  %v10721_v33 = vpop.f32.mrb[17].mxu1  ;;  %v10395_v8 = vpop.f32.mrb[18].mxu0  ;;  %10860 = vmatpush1.bf16.msra.mxu0 %v12362_v3  ;;  %v4358_v35 = vld [vmem:[%s18149_s3 + $0xed0] sm:$0xff]  ;;  %v4359_v3 = vld [vmem:[%s18149_s3 + $0xed8] sm:$0xff] }
 0x4db   :  { %11382 = vst [vmem:[#allocation2] sm:$0xff] %v12974_v39  ;;  %v12977_v12 = vadd.f32 %v10721_v33, %v4925_v22  ;;  %v10723_v38 = vpop.f32.mrb[18].mxu1  ;;  %11188 = vmatpush1.bf16.msra.mxu1 %v12364_v5  ;;  %v10396_v41 = vpop.f32.mrb[19].mxu0  ;;  %10861 = vmatprep.subr.bf16.mxu0 %v12371_v44  ;;  %v4362_v2 = vld [vmem:[%s18149_s3 + $0xef0] sm:$0xff]  ;;  %v4363_v22 = vld [vmem:[%s18149_s3 + $0xef8] sm:$0xff]  ;;  %v12402_v5 = vcombine.low %v4350_v60, %v4354_v53 }
 0x4dc   :  { %11384 = vst [vmem:[#allocation2 + $0x10] sm:$0xff] %v12976_v20  ;;  %11383 = vst [vmem:[#allocation2 + $0x8] sm:$0xff] %v12975_v30  ;;  %v10724_v26 = vpop.f32.mrb[19].mxu1  ;;  %11189 = vmatprep.subr.bf16.mxu1 %v12373_v13  ;;  %v12404_v44 = vcombine.low %v4351_v62, %v4355_v63  ;;  %v12411_v21 = vcombine.high %v4358_v35, %v4362_v2  ;;  %v12413_v13 = vcombine.high %v4359_v3, %v4363_v22  ;;  %v4367_v39 = vld [vmem:[%s18149_s3 + $0xf18] sm:$0xff]  ;;  %v4374_v30 = vld [vmem:[%s18149_s3 + $0xf50] sm:$0xff] }
 0x4dd   :  { %11385 = vst [vmem:[#allocation2 + $0x18] sm:$0xff] %v12977_v12  ;;  %v4371_v19 = vld [vmem:[%s18149_s3 + $0xf38] sm:$0xff]  ;;  %v12410_v16 = vcombine.low %v4358_v35, %v4362_v2  ;;  %v12412_v48 = vcombine.low %v4359_v3, %v4363_v22  ;;  %v4378_v33 = vld [vmem:[%s18149_s3 + $0xf70] sm:$0xff]  ;;  %v12418_v12 = vcombine.low %v4366_v10, %v4370_v37 }
 0x4de   :  { %10862 = vmatpush1.bf16.msra.mxu0 %v12370_v15  ;;  %v12421_v20 = vcombine.high %v4367_v39, %v4371_v19  ;;  %v4375_v8 = vld [vmem:[%s18149_s3 + $0xf58] sm:$0xff]  ;;  %v12420_v38 = vcombine.low %v4367_v39, %v4371_v19  ;;  %v12427_v41 = vcombine.high %v4374_v30, %v4378_v33  ;;  %v4386_v26 = vld [vmem:[%s18149_s3 + $0xfb0] sm:$0xff]  ;;  %v12426_v11 = vcombine.low %v4374_v30, %v4378_v33 }
 0x4df   :  { %11190 = vmatpush1.bf16.msra.mxu1 %v12372_v14  ;;  %10863 = vmatprep.subr.bf16.mxu0 %v12379_v42  ;;  %v4379_v15 = vld [vmem:[%s18149_s3 + $0xf78] sm:$0xff]  ;;  %v4382_v42 = vld [vmem:[%s18149_s3 + $0xf90] sm:$0xff] }
 0x4e0   :  { %11191 = vmatprep.subr.bf16.mxu1 %v12381_v46  ;;  %v12429_v14 = vcombine.high %v4375_v8, %v4379_v15  ;;  %v4383_v46 = vld [vmem:[%s18149_s3 + $0xf98] sm:$0xff]  ;;  %v12428_v23 = vcombine.low %v4375_v8, %v4379_v15  ;;  %v12435_v58 = vcombine.high %v4382_v42, %v4386_v26  ;;  %v12434_v51 = vcombine.low %v4382_v42, %v4386_v26  ;;  %v4430_v15 = vld [vmem:[%s18149_s3 + $0x1110] sm:$0xff] }
 0x4e1   :  { %v12436_v32 = vcombine.low %v4383_v46, %v4387_v47  ;;  %v4403_v60 = vld [vmem:[%s18149_s3 + $0x1038] sm:$0xff] }
 0x4e2   :  { %10864 = vmatpush1.bf16.msra.mxu0 %v12378_v36  ;;  %v12437_v36 = vcombine.high %v4383_v46, %v4387_v47  ;;  %v4407_v35 = vld [vmem:[%s18149_s3 + $0x1058] sm:$0xff]  ;;  %v4438_v47 = vld [vmem:[%s18149_s3 + $0x1150] sm:$0xff] }
 0x4e3   :  { %11192 = vmatpush1.bf16.msra.mxu1 %v12380_v18  ;;  %10865 = vmatprep.subr.bf16.mxu0 %v12387_v50  ;;  %v4390_v18 = vld [vmem:[%s18149_s3 + $0xfd0] sm:$0xff]  ;;  %v4411_v2 = vld [vmem:[%s18149_s3 + $0x1078] sm:$0xff] }
 0x4e4   :  { %11193 = vmatprep.subr.bf16.mxu1 %v12389_v29  ;;  %v4394_v50 = vld [vmem:[%s18149_s3 + $0xff0] sm:$0xff]  ;;  %v4391_v29 = vld [vmem:[%s18149_s3 + $0xfd8] sm:$0xff]  ;;  %v12460_v39 = vcombine.low %v4407_v35, %v4411_v2 }
 0x4e5   :  { %v12443_v54 = vcombine.high %v4390_v18, %v4394_v50  ;;  %v12442_v53 = vcombine.low %v4390_v18, %v4394_v50  ;;  %v12444_v62 = vcombine.low %v4391_v29, %v4395_v28  ;;  %v4419_v10 = vld [vmem:[%s18149_s3 + $0x10b8] sm:$0xff] }
 0x4e6   :  { %10866 = vmatpush1.bf16.msra.mxu0 %v12386_v55  ;;  %v12445_v55 = vcombine.high %v4391_v29, %v4395_v28  ;;  %v4446_v28 = vld [vmem:[%s18149_s3 + $0x1190] sm:$0xff] }
 0x4e7   :  { %11194 = vmatpush1.bf16.msra.mxu1 %v12388_v0  ;;  %10867 = vmatprep.subr.bf16.mxu0 %v12395_v59  ;;  %v4398_v0 = vld [vmem:[%s18149_s3 + $0x1010] sm:$0xff] }
 0x4e8   :  { %11195 = vmatprep.subr.bf16.mxu1 %v12397_v34  ;;  %v4402_v59 = vld [vmem:[%s18149_s3 + $0x1030] sm:$0xff]  ;;  %v4399_v34 = vld [vmem:[%s18149_s3 + $0x1018] sm:$0xff] }
 0x4e9   :  { %v12451_v63 = vcombine.high %v4398_v0, %v4402_v59  ;;  %v12452_v3 = vcombine.low %v4399_v34, %v4403_v60 }
 0x4ea   :  { %10868 = vmatpush1.bf16.msra.mxu0 %v12394_v6  ;;  %v12453_v6 = vcombine.high %v4399_v34, %v4403_v60  ;;  %v4454_v60 = vld [vmem:[%s18149_s3 + $0x11d0] sm:$0xff] }
 0x4eb   :  { %11196 = vmatpush1.bf16.msra.mxu1 %v12396_v4  ;;  %10869 = vmatprep.subr.bf16.mxu0 %v12403_v25  ;;  %v4406_v4 = vld [vmem:[%s18149_s3 + $0x1050] sm:$0xff] }
 0x4ec   :  { %11197 = vmatprep.subr.bf16.mxu1 %v12405_v1  ;;  %v4410_v25 = vld [vmem:[%s18149_s3 + $0x1070] sm:$0xff]  ;;  %v12450_v1 = vcombine.low %v4398_v0, %v4402_v59 }
 0x4ed   :  { %v12459_v22 = vcombine.high %v4406_v4, %v4410_v25  ;;  %v12458_v37 = vcombine.low %v4406_v4, %v4410_v25 }
 0x4ee   :  { %10870 = vmatpush1.bf16.msra.mxu0 %v12402_v5  ;;  %v4414_v5 = vld [vmem:[%s18149_s3 + $0x1090] sm:$0xff] }
 0x4ef   :  { %11198 = vmatpush1.bf16.msra.mxu1 %v12404_v44  ;;  %10871 = vmatprep.subr.bf16.mxu0 %v12411_v21  ;;  %v4418_v44 = vld [vmem:[%s18149_s3 + $0x10b0] sm:$0xff]  ;;  %v12461_v21 = vcombine.high %v4407_v35, %v4411_v2 }
 0x4f0   :  { %11199 = vmatprep.subr.bf16.mxu1 %v12413_v13  ;;  %v4415_v13 = vld [vmem:[%s18149_s3 + $0x1098] sm:$0xff]  ;;  %v12467_v19 = vcombine.high %v4414_v5, %v4418_v44  ;;  %v4462_v35 = vld [vmem:[%s18149_s3 + $0x1210] sm:$0xff] }
 0x4f1   :  { %v12468_v30 = vcombine.low %v4415_v13, %v4419_v10  ;;  %v4466_v2 = vld [vmem:[%s18149_s3 + $0x1230] sm:$0xff] }
 0x4f2   :  { %10872 = vmatpush1.bf16.msra.mxu0 %v12410_v16  ;;  %v12469_v16 = vcombine.high %v4415_v13, %v4419_v10  ;;  %v4470_v10 = vld [vmem:[%s18149_s3 + $0x1250] sm:$0xff] }
 0x4f3   :  { %11200 = vmatpush1.bf16.msra.mxu1 %v12412_v48  ;;  %10873 = vmatprep.subr.bf16.mxu0 %v12419_v17  ;;  %v4422_v48 = vld [vmem:[%s18149_s3 + $0x10d0] sm:$0xff] }
 0x4f4   :  { %11201 = vmatprep.subr.bf16.mxu1 %v12421_v20  ;;  %v4426_v17 = vld [vmem:[%s18149_s3 + $0x10f0] sm:$0xff]  ;;  %v4427_v20 = vld [vmem:[%s18149_s3 + $0x10f8] sm:$0xff] }
 0x4f5   :  { %v12475_v33 = vcombine.high %v4422_v48, %v4426_v17 }
 0x4f6   :  { %10874 = vmatpush1.bf16.msra.mxu0 %v12418_v12  ;;  %v4434_v12 = vld [vmem:[%s18149_s3 + $0x1130] sm:$0xff] }
 0x4f7   :  { %11202 = vmatpush1.bf16.msra.mxu1 %v12420_v38  ;;  %10875 = vmatprep.subr.bf16.mxu0 %v12427_v41  ;;  %v4431_v38 = vld [vmem:[%s18149_s3 + $0x1118] sm:$0xff]  ;;  %v12483_v26 = vcombine.high %v4430_v15, %v4434_v12 }
 0x4f8   :  { %11203 = vmatprep.subr.bf16.mxu1 %v12429_v14  ;;  %v4435_v41 = vld [vmem:[%s18149_s3 + $0x1138] sm:$0xff]  ;;  %v12474_v14 = vcombine.low %v4422_v48, %v4426_v17 }
 0x4f9   :  { %v12485_v46 = vcombine.high %v4431_v38, %v4435_v41  ;;  %v12484_v18 = vcombine.low %v4431_v38, %v4435_v41  ;;  %v4486_v41 = vld [vmem:[%s18149_s3 + $0x12d0] sm:$0xff] }
 0x4fa   :  { %10876 = vmatpush1.bf16.msra.mxu0 %v12426_v11  ;;  %v4442_v11 = vld [vmem:[%s18149_s3 + $0x1170] sm:$0xff] }
 0x4fb   :  { %11204 = vmatpush1.bf16.msra.mxu1 %v12428_v23  ;;  %10877 = vmatprep.subr.bf16.mxu0 %v12435_v58  ;;  %v4439_v23 = vld [vmem:[%s18149_s3 + $0x1158] sm:$0xff]  ;;  %v12491_v50 = vcombine.high %v4438_v47, %v4442_v11 }
 0x4fc   :  { %11205 = vmatprep.subr.bf16.mxu1 %v12437_v36  ;;  %v4443_v58 = vld [vmem:[%s18149_s3 + $0x1178] sm:$0xff]  ;;  %v12482_v36 = vcombine.low %v4430_v15, %v4434_v12 }
 0x4fd   :  { %v12493_v29 = vcombine.high %v4439_v23, %v4443_v58  ;;  %v12492_v0 = vcombine.low %v4439_v23, %v4443_v58  ;;  %v4494_v58 = vld [vmem:[%s18149_s3 + $0x1310] sm:$0xff] }
 0x4fe   :  { %10878 = vmatpush1.bf16.msra.mxu0 %v12434_v51  ;;  %v4450_v51 = vld [vmem:[%s18149_s3 + $0x11b0] sm:$0xff] }
 0x4ff   :  { %11206 = vmatpush1.bf16.msra.mxu1 %v12436_v32  ;;  %10879 = vmatprep.subr.bf16.mxu0 %v12443_v54  ;;  %v4447_v32 = vld [vmem:[%s18149_s3 + $0x1198] sm:$0xff]  ;;  %v12499_v59 = vcombine.high %v4446_v28, %v4450_v51 }
 0x500   :  { %11207 = vmatprep.subr.bf16.mxu1 %v12445_v55  ;;  %v4451_v54 = vld [vmem:[%s18149_s3 + $0x11b8] sm:$0xff]  ;;  %v12490_v55 = vcombine.low %v4438_v47, %v4442_v11 }
 0x501   :  { %v12501_v34 = vcombine.high %v4447_v32, %v4451_v54  ;;  %v12500_v4 = vcombine.low %v4447_v32, %v4451_v54  ;;  %v4502_v54 = vld [vmem:[%s18149_s3 + $0x1350] sm:$0xff] }
 0x502   :  { %10880 = vmatpush1.bf16.msra.mxu0 %v12442_v53  ;;  %v4458_v53 = vld [vmem:[%s18149_s3 + $0x11f0] sm:$0xff] }
 0x503   :  { %11208 = vmatpush1.bf16.msra.mxu1 %v12444_v62  ;;  %10890 = vmatprep.subr.bf16.mxu0 %v12451_v63  ;;  %v4455_v62 = vld [vmem:[%s18149_s3 + $0x11d8] sm:$0xff]  ;;  %v12507_v25 = vcombine.high %v4454_v60, %v4458_v53 }
 0x504   :  { %11218 = vmatprep.subr.bf16.mxu1 %v12453_v6  ;;  %v4459_v63 = vld [vmem:[%s18149_s3 + $0x11f8] sm:$0xff]  ;;  %v12498_v6 = vcombine.low %v4446_v28, %v4450_v51 }
 0x505   :  { %10882 = vmatmul.mubr.bf16.vlgmr.msra.gmra.mrb[20].mxu0 %v15734_v52 }
 0x506   :  { %11210 = vmatmul.mubr.bf16.vlgmr.msra.gmra.mrb[20].mxu1 %v15734_v52  ;;  %10891 = vmatpush1.bf16.msra.mxu0 %v12450_v1  ;;  %v4423_v52 = vld [vmem:[%s18149_s3 + $0x10d8] sm:$0xff]  ;;  %v12509_v1 = vcombine.high %v4455_v62, %v4459_v63 }
 0x507   :  { %10922 = vmatprep.mubr.bf16.mxu0 %v15742_v61  ;;  %11219 = vmatpush1.bf16.msra.mxu1 %v12452_v3  ;;  %v12477_v8 = vcombine.high %v4423_v52, %v4427_v20  ;;  %v12476_v42 = vcombine.low %v4423_v52, %v4427_v20  ;;  %v4463_v3 = vld [vmem:[%s18149_s3 + $0x1218] sm:$0xff]  ;;  %v4478_v20 = vld [vmem:[%s18149_s3 + $0x1290] sm:$0xff] }
 0x508   :  { %11250 = vmatprep.mubr.bf16.mxu1 %v15742_v61  ;;  %10892 = vmatprep.subr.bf16.mxu0 %v12459_v22  ;;  %v12466_v61 = vcombine.low %v4414_v5, %v4418_v44  ;;  %v4467_v22 = vld [vmem:[%s18149_s3 + $0x1238] sm:$0xff]  ;;  %v12506_v5 = vcombine.low %v4454_v60, %v4458_v53  ;;  %v12508_v44 = vcombine.low %v4455_v62, %v4459_v63  ;;  %v4510_v63 = vld [vmem:[%s18149_s3 + $0x1390] sm:$0xff] }
 0x509   :  { %11220 = vmatprep.subr.bf16.mxu1 %v12461_v21  ;;  %v12515_v21 = vcombine.high %v4462_v35, %v4466_v2  ;;  %v12517_v13 = vcombine.high %v4463_v3, %v4467_v22  ;;  %v12516_v48 = vcombine.low %v4463_v3, %v4467_v22  ;;  %v4518_v22 = vld [vmem:[%s18149_s3 + $0x13d0] sm:$0xff] }
 0x50a   :  { %10893 = vmatpush1.bf16.msra.mxu0 %v12458_v37  ;;  %v4474_v37 = vld [vmem:[%s18149_s3 + $0x1270] sm:$0xff] }
 0x50b   :  { %11221 = vmatpush1.bf16.msra.mxu1 %v12460_v39  ;;  %10894 = vmatprep.subr.bf16.mxu0 %v12467_v19  ;;  %v4471_v39 = vld [vmem:[%s18149_s3 + $0x1258] sm:$0xff]  ;;  %v12523_v17 = vcombine.high %v4470_v10, %v4474_v37 }
 0x50c   :  { %11222 = vmatprep.subr.bf16.mxu1 %v12469_v16  ;;  %v4475_v19 = vld [vmem:[%s18149_s3 + $0x1278] sm:$0xff]  ;;  %v12514_v16 = vcombine.low %v4462_v35, %v4466_v2 }
 0x50d   :  { %v12525_v52 = vcombine.high %v4471_v39, %v4475_v19  ;;  %v12524_v15 = vcombine.low %v4471_v39, %v4475_v19  ;;  %v4526_v19 = vld [vmem:[%s18149_s3 + $0x1410] sm:$0xff] }
 0x50e   :  { %10895 = vmatpush1.bf16.msra.mxu0 %v12466_v61  ;;  %v4482_v61 = vld [vmem:[%s18149_s3 + $0x12b0] sm:$0xff] }
 0x50f   :  { %11223 = vmatpush1.bf16.msra.mxu1 %v12468_v30  ;;  %10896 = vmatprep.subr.bf16.mxu0 %v12475_v33  ;;  %v4479_v30 = vld [vmem:[%s18149_s3 + $0x1298] sm:$0xff]  ;;  %v12531_v12 = vcombine.high %v4478_v20, %v4482_v61 }
 0x510   :  { %11224 = vmatprep.subr.bf16.mxu1 %v12477_v8  ;;  %v4483_v33 = vld [vmem:[%s18149_s3 + $0x12b8] sm:$0xff]  ;;  %v12522_v8 = vcombine.low %v4470_v10, %v4474_v37 }
 0x511   :  { %v12533_v38 = vcombine.high %v4479_v30, %v4483_v33  ;;  %v12532_v47 = vcombine.low %v4479_v30, %v4483_v33  ;;  %v4534_v33 = vld [vmem:[%s18149_s3 + $0x1450] sm:$0xff] }
 0x512   :  { %10897 = vmatpush1.bf16.msra.mxu0 %v12474_v14  ;;  %v4490_v14 = vld [vmem:[%s18149_s3 + $0x12f0] sm:$0xff] }
 0x513   :  { %11225 = vmatpush1.bf16.msra.mxu1 %v12476_v42  ;;  %10898 = vmatprep.subr.bf16.mxu0 %v12483_v26  ;;  %v4487_v42 = vld [vmem:[%s18149_s3 + $0x12d8] sm:$0xff]  ;;  %v12539_v11 = vcombine.high %v4486_v41, %v4490_v14 }
 0x514   :  { %11226 = vmatprep.subr.bf16.mxu1 %v12485_v46  ;;  %v4491_v26 = vld [vmem:[%s18149_s3 + $0x12f8] sm:$0xff]  ;;  %v12530_v46 = vcombine.low %v4478_v20, %v4482_v61 }
 0x515   :  { %v12541_v23 = vcombine.high %v4487_v42, %v4491_v26  ;;  %v12540_v28 = vcombine.low %v4487_v42, %v4491_v26  ;;  %v4542_v42 = vld [vmem:[%s18149_s3 + $0x1490] sm:$0xff] }
 0x516   :  { %10899 = vmatpush1.bf16.msra.mxu0 %v12482_v36  ;;  %v4498_v36 = vld [vmem:[%s18149_s3 + $0x1330] sm:$0xff] }
 0x517   :  { %11227 = vmatpush1.bf16.msra.mxu1 %v12484_v18  ;;  %10900 = vmatprep.subr.bf16.mxu0 %v12491_v50  ;;  %v4495_v18 = vld [vmem:[%s18149_s3 + $0x1318] sm:$0xff]  ;;  %v12547_v51 = vcombine.high %v4494_v58, %v4498_v36  ;;  %v4546_v26 = vld [vmem:[%s18149_s3 + $0x14b0] sm:$0xff] }
 0x518   :  { %11228 = vmatprep.subr.bf16.mxu1 %v12493_v29  ;;  %v4499_v50 = vld [vmem:[%s18149_s3 + $0x1338] sm:$0xff]  ;;  %v12538_v29 = vcombine.low %v4486_v41, %v4490_v14 }
 0x519   :  { %v12549_v32 = vcombine.high %v4495_v18, %v4499_v50  ;;  %v12548_v60 = vcombine.low %v4495_v18, %v4499_v50  ;;  %v4550_v50 = vld [vmem:[%s18149_s3 + $0x14d0] sm:$0xff] }
 0x51a   :  { %10901 = vmatpush1.bf16.msra.mxu0 %v12490_v55  ;;  %v4506_v55 = vld [vmem:[%s18149_s3 + $0x1370] sm:$0xff] }
 0x51b   :  { %11229 = vmatpush1.bf16.msra.mxu1 %v12492_v0  ;;  %10902 = vmatprep.subr.bf16.mxu0 %v12499_v59  ;;  %v4503_v0 = vld [vmem:[%s18149_s3 + $0x1358] sm:$0xff]  ;;  %v12555_v53 = vcombine.high %v4502_v54, %v4506_v55 }
 0x51c   :  { %11230 = vmatprep.subr.bf16.mxu1 %v12501_v34  ;;  %v4507_v59 = vld [vmem:[%s18149_s3 + $0x1378] sm:$0xff]  ;;  %v12546_v34 = vcombine.low %v4494_v58, %v4498_v36  ;;  %v12595_v36 = vcombine.high %v4542_v42, %v4546_v26 }
 0x51d   :  { %v12557_v62 = vcombine.high %v4503_v0, %v4507_v59  ;;  %v12556_v35 = vcombine.low %v4503_v0, %v4507_v59  ;;  %v4562_v0 = vld [vmem:[%s18149_s3 + $0x1530] sm:$0xff]  ;;  %v4559_v59 = vld [vmem:[%s18149_s3 + $0x1518] sm:$0xff] }
 0x51e   :  { %10903 = vmatpush1.bf16.msra.mxu0 %v12498_v6  ;;  %v4514_v6 = vld [vmem:[%s18149_s3 + $0x13b0] sm:$0xff] }
 0x51f   :  { %11231 = vmatpush1.bf16.msra.mxu1 %v12500_v4  ;;  %10904 = vmatprep.subr.bf16.mxu0 %v12507_v25  ;;  %v4511_v4 = vld [vmem:[%s18149_s3 + $0x1398] sm:$0xff]  ;;  %v12563_v2 = vcombine.high %v4510_v63, %v4514_v6 }
 0x520   :  { %11232 = vmatprep.subr.bf16.mxu1 %v12509_v1  ;;  %v4515_v25 = vld [vmem:[%s18149_s3 + $0x13b8] sm:$0xff]  ;;  %v12554_v1 = vcombine.low %v4502_v54, %v4506_v55  ;;  %v4558_v55 = vld [vmem:[%s18149_s3 + $0x1510] sm:$0xff] }
 0x521   :  { %v12565_v3 = vcombine.high %v4511_v4, %v4515_v25  ;;  %v12564_v10 = vcombine.low %v4511_v4, %v4515_v25  ;;  %v4570_v4 = vld [vmem:[%s18149_s3 + $0x1570] sm:$0xff]  ;;  %v4567_v25 = vld [vmem:[%s18149_s3 + $0x1558] sm:$0xff] }
 0x522   :  { %10905 = vmatpush1.bf16.msra.mxu0 %v12506_v5  ;;  %v4522_v5 = vld [vmem:[%s18149_s3 + $0x13f0] sm:$0xff] }
 0x523   :  { %11233 = vmatpush1.bf16.msra.mxu1 %v12508_v44  ;;  %10906 = vmatprep.subr.bf16.mxu0 %v12515_v21  ;;  %v4519_v44 = vld [vmem:[%s18149_s3 + $0x13d8] sm:$0xff]  ;;  %v12571_v37 = vcombine.high %v4518_v22, %v4522_v5 }
 0x524   :  { %11234 = vmatprep.subr.bf16.mxu1 %v12517_v13  ;;  %v4523_v21 = vld [vmem:[%s18149_s3 + $0x13f8] sm:$0xff]  ;;  %v12562_v13 = vcombine.low %v4510_v63, %v4514_v6  ;;  %v4566_v6 = vld [vmem:[%s18149_s3 + $0x1550] sm:$0xff] }
 0x525   :  { %v12573_v39 = vcombine.high %v4519_v44, %v4523_v21  ;;  %v12572_v20 = vcombine.low %v4519_v44, %v4523_v21  ;;  %v4578_v44 = vld [vmem:[%s18149_s3 + $0x15b0] sm:$0xff]  ;;  %v4575_v21 = vld [vmem:[%s18149_s3 + $0x1598] sm:$0xff] }
 0x526   :  { %10907 = vmatpush1.bf16.msra.mxu0 %v12514_v16  ;;  %v4530_v16 = vld [vmem:[%s18149_s3 + $0x1430] sm:$0xff] }
 0x527   :  { %11235 = vmatpush1.bf16.msra.mxu1 %v12516_v48  ;;  %10908 = vmatprep.subr.bf16.mxu0 %v12523_v17  ;;  %v4527_v48 = vld [vmem:[%s18149_s3 + $0x1418] sm:$0xff]  ;;  %v12579_v61 = vcombine.high %v4526_v19, %v4530_v16 }
 0x528   :  { %11236 = vmatprep.subr.bf16.mxu1 %v12525_v52  ;;  %v4531_v17 = vld [vmem:[%s18149_s3 + $0x1438] sm:$0xff]  ;;  %v12570_v52 = vcombine.low %v4518_v22, %v4522_v5  ;;  %v4574_v5 = vld [vmem:[%s18149_s3 + $0x1590] sm:$0xff] }
 0x529   :  { %v12581_v30 = vcombine.high %v4527_v48, %v4531_v17  ;;  %v12580_v41 = vcombine.low %v4527_v48, %v4531_v17  ;;  %v4586_v48 = vld [vmem:[%s18149_s3 + $0x15f0] sm:$0xff]  ;;  %v4583_v17 = vld [vmem:[%s18149_s3 + $0x15d8] sm:$0xff] }
 0x52a   :  { %10909 = vmatpush1.bf16.msra.mxu0 %v12522_v8  ;;  %v4538_v8 = vld [vmem:[%s18149_s3 + $0x1470] sm:$0xff] }
 0x52b   :  { %11237 = vmatpush1.bf16.msra.mxu1 %v12524_v15  ;;  %10910 = vmatprep.subr.bf16.mxu0 %v12531_v12  ;;  %v12578_v15 = vcombine.low %v4526_v19, %v4530_v16  ;;  %v4535_v12 = vld [vmem:[%s18149_s3 + $0x1458] sm:$0xff]  ;;  %v12587_v14 = vcombine.high %v4534_v33, %v4538_v8  ;;  %v4582_v16 = vld [vmem:[%s18149_s3 + $0x15d0] sm:$0xff] }
 0x52c   :  { %11238 = vmatprep.subr.bf16.mxu1 %v12533_v38  ;;  %v4539_v38 = vld [vmem:[%s18149_s3 + $0x1478] sm:$0xff] }
 0x52d   :  { %v12588_v58 = vcombine.low %v4535_v12, %v4539_v38 }
 0x52e   :  { %10911 = vmatpush1.bf16.msra.mxu0 %v12530_v46  ;;  %v12589_v46 = vcombine.high %v4535_v12, %v4539_v38  ;;  %v4591_v12 = vld [vmem:[%s18149_s3 + $0x1618] sm:$0xff] }
 0x52f   :  { %11239 = vmatpush1.bf16.msra.mxu1 %v12532_v47  ;;  %10912 = vmatprep.subr.bf16.mxu0 %v12539_v11  ;;  %v4543_v47 = vld [vmem:[%s18149_s3 + $0x1498] sm:$0xff] }
 0x530   :  { %11240 = vmatprep.subr.bf16.mxu1 %v12541_v23  ;;  %v4547_v11 = vld [vmem:[%s18149_s3 + $0x14b8] sm:$0xff]  ;;  %v12586_v23 = vcombine.low %v4534_v33, %v4538_v8  ;;  %v4590_v8 = vld [vmem:[%s18149_s3 + $0x1610] sm:$0xff] }
 0x531   :  { %v12597_v18 = vcombine.high %v4543_v47, %v4547_v11  ;;  %v4595_v38 = vld [vmem:[%s18149_s3 + $0x1638] sm:$0xff] }
 0x532   :  { %10913 = vmatpush1.bf16.msra.mxu0 %v12538_v29  ;;  %v4554_v29 = vld [vmem:[%s18149_s3 + $0x14f0] sm:$0xff] }
 0x533   :  { %11241 = vmatpush1.bf16.msra.mxu1 %v12540_v28  ;;  %10914 = vmatprep.subr.bf16.mxu0 %v12547_v51  ;;  %v4555_v28 = vld [vmem:[%s18149_s3 + $0x14f8] sm:$0xff]  ;;  %v12596_v51 = vcombine.low %v4543_v47, %v4547_v11  ;;  %v4602_v47 = vld [vmem:[%s18149_s3 + $0x1670] sm:$0xff] }
 0x534   :  { %11242 = vmatprep.subr.bf16.mxu1 %v12549_v32  ;;  %v12603_v32 = vcombine.high %v4550_v50, %v4554_v29  ;;  %v4599_v11 = vld [vmem:[%s18149_s3 + $0x1658] sm:$0xff] }
 0x536   :  { %10915 = vmatpush1.bf16.msra.mxu0 %v12546_v34  ;;  %v4563_v34 = vld [vmem:[%s18149_s3 + $0x1538] sm:$0xff] }
 0x537   :  { %11243 = vmatpush1.bf16.msra.mxu1 %v12548_v60  ;;  %10916 = vmatprep.subr.bf16.mxu0 %v12555_v53  ;;  %v12602_v60 = vcombine.low %v4550_v50, %v4554_v29  ;;  %v12613_v63 = vcombine.high %v4559_v59, %v4563_v34  ;;  %v4606_v29 = vld [vmem:[%s18149_s3 + $0x1690] sm:$0xff] }
 0x538   :  { %11244 = vmatprep.subr.bf16.mxu1 %v12557_v62  ;;  %v12611_v62 = vcombine.high %v4558_v55, %v4562_v0 }
 0x53a   :  { %10917 = vmatpush1.bf16.msra.mxu0 %v12554_v1  ;;  %v4571_v1 = vld [vmem:[%s18149_s3 + $0x1578] sm:$0xff] }
 0x53b   :  { %11245 = vmatpush1.bf16.msra.mxu1 %v12556_v35  ;;  %10918 = vmatprep.subr.bf16.mxu0 %v12563_v2  ;;  %v12610_v35 = vcombine.low %v4558_v55, %v4562_v0  ;;  %v12612_v2 = vcombine.low %v4559_v59, %v4563_v34  ;;  %v12621_v22 = vcombine.high %v4567_v25, %v4571_v1  ;;  %v4614_v0 = vld [vmem:[%s18149_s3 + $0x16d0] sm:$0xff]  ;;  %v4615_v34 = vld [vmem:[%s18149_s3 + $0x16d8] sm:$0xff] }
 0x53c   :  { %11246 = vmatprep.subr.bf16.mxu1 %v12565_v3  ;;  %v12619_v3 = vcombine.high %v4566_v6, %v4570_v4  ;;  %v4618_v59 = vld [vmem:[%s18149_s3 + $0x16f0] sm:$0xff] }
 0x53e   :  { %10919 = vmatpush1.bf16.msra.mxu0 %v12562_v13  ;;  %v4579_v13 = vld [vmem:[%s18149_s3 + $0x15b8] sm:$0xff] }
 0x53f   :  { %11247 = vmatpush1.bf16.msra.mxu1 %v12564_v10  ;;  %10920 = vmatprep.subr.bf16.mxu0 %v12571_v37  ;;  %v12618_v10 = vcombine.low %v4566_v6, %v4570_v4  ;;  %v12620_v37 = vcombine.low %v4567_v25, %v4571_v1  ;;  %v12629_v19 = vcombine.high %v4575_v21, %v4579_v13  ;;  %v4622_v4 = vld [vmem:[%s18149_s3 + $0x1710] sm:$0xff]  ;;  %v4623_v1 = vld [vmem:[%s18149_s3 + $0x1718] sm:$0xff] }
 0x540   :  { %11248 = vmatprep.subr.bf16.mxu1 %v12573_v39  ;;  %v12627_v39 = vcombine.high %v4574_v5, %v4578_v44  ;;  %v4626_v25 = vld [vmem:[%s18149_s3 + $0x1730] sm:$0xff] }
 0x542   :  { %10921 = vmatpush1.bf16.msra.mxu0 %v12570_v52  ;;  %v4587_v52 = vld [vmem:[%s18149_s3 + $0x15f8] sm:$0xff] }
 0x543   :  { %11249 = vmatpush1.bf16.msra.mxu1 %v12572_v20  ;;  %10931 = vmatprep.subr.bf16.mxu0 %v12579_v61  ;;  %v12626_v20 = vcombine.low %v4574_v5, %v4578_v44  ;;  %v12628_v61 = vcombine.low %v4575_v21, %v4579_v13  ;;  %v12637_v33 = vcombine.high %v4583_v17, %v4587_v52  ;;  %v4630_v44 = vld [vmem:[%s18149_s3 + $0x1750] sm:$0xff]  ;;  %v4631_v13 = vld [vmem:[%s18149_s3 + $0x1758] sm:$0xff] }
 0x544   :  { %11259 = vmatprep.subr.bf16.mxu1 %v12581_v30  ;;  %v12635_v30 = vcombine.high %v4582_v16, %v4586_v48  ;;  %v4634_v21 = vld [vmem:[%s18149_s3 + $0x1770] sm:$0xff] }
 0x545   :  { %10923 = vmatmul.mubr.bf16.vlgmr.msra.gmra.mrb[20].mxu0 %v15940_v7 }
 0x546   :  { %11251 = vmatmul.mubr.bf16.vlgmr.msra.gmra.mrb[20].mxu1 %v15940_v7  ;;  %10932 = vmatpush1.bf16.msra.mxu0 %v12578_v15  ;;  %v4551_v7 = vld [vmem:[%s18149_s3 + $0x14d8] sm:$0xff]  ;;  %v4594_v15 = vld [vmem:[%s18149_s3 + $0x1630] sm:$0xff] }
 0x547   :  { %10963 = vmatprep.mubr.bf16.mxu0 %v15948_v9  ;;  %11260 = vmatpush1.bf16.msra.mxu1 %v12580_v41  ;;  %v12605_v54 = vcombine.high %v4551_v7, %v4555_v28  ;;  %v12604_v53 = vcombine.low %v4551_v7, %v4555_v28  ;;  %v12634_v41 = vcombine.low %v4582_v16, %v4586_v48  ;;  %v4610_v7 = vld [vmem:[%s18149_s3 + $0x16b0] sm:$0xff]  ;;  %v4607_v28 = vld [vmem:[%s18149_s3 + $0x1698] sm:$0xff] }
 0x548   :  { %11291 = vmatprep.mubr.bf16.mxu1 %v15948_v9  ;;  %10933 = vmatprep.subr.bf16.mxu0 %v12587_v14  ;;  %v12594_v9 = vcombine.low %v4542_v42, %v4546_v26  ;;  %v12636_v14 = vcombine.low %v4583_v17, %v4587_v52  ;;  %v12643_v42 = vcombine.high %v4590_v8, %v4594_v15  ;;  %v4638_v48 = vld [vmem:[%s18149_s3 + $0x1790] sm:$0xff]  ;;  %v4639_v52 = vld [vmem:[%s18149_s3 + $0x1798] sm:$0xff] }
 0x549   :  { %11261 = vmatprep.subr.bf16.mxu1 %v12589_v46  ;;  %v12645_v26 = vcombine.high %v4591_v12, %v4595_v38  ;;  %v4598_v46 = vld [vmem:[%s18149_s3 + $0x1650] sm:$0xff] }
 0x54a   :  { %10934 = vmatpush1.bf16.msra.mxu0 %v12586_v23  ;;  %v4603_v23 = vld [vmem:[%s18149_s3 + $0x1678] sm:$0xff]  ;;  %v4642_v17 = vld [vmem:[%s18149_s3 + $0x17b0] sm:$0xff] }
 0x54b   :  { %11262 = vmatpush1.bf16.msra.mxu1 %v12588_v58  ;;  %10935 = vmatprep.subr.bf16.mxu0 %v12595_v36  ;;  %v12642_v58 = vcombine.low %v4590_v8, %v4594_v15  ;;  %v12644_v36 = vcombine.low %v4591_v12, %v4595_v38  ;;  %v12653_v50 = vcombine.high %v4599_v11, %v4603_v23  ;;  %v4646_v15 = vld [vmem:[%s18149_s3 + $0x17d0] sm:$0xff]  ;;  %v4647_v38 = vld [vmem:[%s18149_s3 + $0x17d8] sm:$0xff] }
 0x54c   :  { %11263 = vmatprep.subr.bf16.mxu1 %v12597_v18  ;;  %v12651_v18 = vcombine.high %v4598_v46, %v4602_v47  ;;  %v4650_v12 = vld [vmem:[%s18149_s3 + $0x17f0] sm:$0xff] }
 0x54e   :  { %10936 = vmatpush1.bf16.msra.mxu0 %v12594_v9  ;;  %v4611_v9 = vld [vmem:[%s18149_s3 + $0x16b8] sm:$0xff] }
 0x54f   :  { %11264 = vmatpush1.bf16.msra.mxu1 %v12596_v51  ;;  %10937 = vmatprep.subr.bf16.mxu0 %v12603_v32  ;;  %v12650_v51 = vcombine.low %v4598_v46, %v4602_v47  ;;  %v12652_v32 = vcombine.low %v4599_v11, %v4603_v23  ;;  %v12661_v55 = vcombine.high %v4607_v28, %v4611_v9  ;;  %v4654_v47 = vld [vmem:[%s18149_s3 + $0x1810] sm:$0xff]  ;;  %v4655_v23 = vld [vmem:[%s18149_s3 + $0x1818] sm:$0xff] }
 0x550   :  { %11265 = vmatprep.subr.bf16.mxu1 %v12605_v54  ;;  %v12659_v54 = vcombine.high %v4606_v29, %v4610_v7  ;;  %v4658_v11 = vld [vmem:[%s18149_s3 + $0x1830] sm:$0xff] }
 0x552   :  { %10938 = vmatpush1.bf16.msra.mxu0 %v12602_v60  ;;  %v4619_v60 = vld [vmem:[%s18149_s3 + $0x16f8] sm:$0xff] }
 0x553   :  { %11266 = vmatpush1.bf16.msra.mxu1 %v12604_v53  ;;  %10939 = vmatprep.subr.bf16.mxu0 %v12611_v62  ;;  %v12658_v53 = vcombine.low %v4606_v29, %v4610_v7  ;;  %v12660_v62 = vcombine.low %v4607_v28, %v4611_v9  ;;  %v12669_v6 = vcombine.high %v4615_v34, %v4619_v60  ;;  %v4662_v7 = vld [vmem:[%s18149_s3 + $0x1850] sm:$0xff] }
 0x554   :  { %11267 = vmatprep.subr.bf16.mxu1 %v12613_v63  ;;  %v12667_v63 = vcombine.high %v4614_v0, %v4618_v59  ;;  %v4666_v28 = vld [vmem:[%s18149_s3 + $0x1870] sm:$0xff]  ;;  %v12706_v9 = vcombine.low %v4654_v47, %v4658_v11 }
 0x556   :  { %10940 = vmatpush1.bf16.msra.mxu0 %v12610_v35  ;;  %v4627_v35 = vld [vmem:[%s18149_s3 + $0x1738] sm:$0xff] }
 0x557   :  { %11268 = vmatpush1.bf16.msra.mxu1 %v12612_v2  ;;  %10941 = vmatprep.subr.bf16.mxu0 %v12619_v3  ;;  %v12666_v2 = vcombine.low %v4614_v0, %v4618_v59  ;;  %v12668_v3 = vcombine.low %v4615_v34, %v4619_v60  ;;  %v12677_v5 = vcombine.high %v4623_v1, %v4627_v35  ;;  %v4670_v0 = vld [vmem:[%s18149_s3 + $0x1890] sm:$0xff]  ;;  %v4671_v60 = vld [vmem:[%s18149_s3 + $0x1898] sm:$0xff] }
 0x558   :  { %11269 = vmatprep.subr.bf16.mxu1 %v12621_v22  ;;  %v12675_v22 = vcombine.high %v4622_v4, %v4626_v25  ;;  %v4674_v59 = vld [vmem:[%s18149_s3 + $0x18b0] sm:$0xff] }
 0x55a   :  { %10942 = vmatpush1.bf16.msra.mxu0 %v12618_v10  ;;  %v4635_v10 = vld [vmem:[%s18149_s3 + $0x1778] sm:$0xff] }
 0x55b   :  { %11270 = vmatpush1.bf16.msra.mxu1 %v12620_v37  ;;  %10943 = vmatprep.subr.bf16.mxu0 %v12627_v39  ;;  %v12674_v37 = vcombine.low %v4622_v4, %v4626_v25  ;;  %v12676_v39 = vcombine.low %v4623_v1, %v4627_v35  ;;  %v12685_v16 = vcombine.high %v4631_v13, %v4635_v10  ;;  %v4678_v25 = vld [vmem:[%s18149_s3 + $0x18d0] sm:$0xff]  ;;  %v4683_v35 = vld [vmem:[%s18149_s3 + $0x18f8] sm:$0xff] }
 0x55c   :  { %11271 = vmatprep.subr.bf16.mxu1 %v12629_v19  ;;  %v12683_v19 = vcombine.high %v4630_v44, %v4634_v21  ;;  %v4682_v1 = vld [vmem:[%s18149_s3 + $0x18f0] sm:$0xff] }
 0x55e   :  { %10944 = vmatpush1.bf16.msra.mxu0 %v12626_v20  ;;  %v4643_v20 = vld [vmem:[%s18149_s3 + $0x17b8] sm:$0xff] }
 0x55f   :  { %11272 = vmatpush1.bf16.msra.mxu1 %v12628_v61  ;;  %10945 = vmatprep.subr.bf16.mxu0 %v12635_v30  ;;  %v12682_v61 = vcombine.low %v4630_v44, %v4634_v21  ;;  %v12684_v30 = vcombine.low %v4631_v13, %v4635_v10  ;;  %v12693_v8 = vcombine.high %v4639_v52, %v4643_v20  ;;  %v4690_v44 = vld [vmem:[%s18149_s3 + $0x1930] sm:$0xff]  ;;  %v4687_v21 = vld [vmem:[%s18149_s3 + $0x1918] sm:$0xff] }
 0x560   :  { %11273 = vmatprep.subr.bf16.mxu1 %v12637_v33  ;;  %v12691_v33 = vcombine.high %v4638_v48, %v4642_v17  ;;  %v4691_v13 = vld [vmem:[%s18149_s3 + $0x1938] sm:$0xff]  ;;  %v12730_v10 = vcombine.low %v4678_v25, %v4682_v1 }
 0x562   :  { %10946 = vmatpush1.bf16.msra.mxu0 %v12634_v41  ;;  %v4651_v41 = vld [vmem:[%s18149_s3 + $0x17f8] sm:$0xff] }
 0x563   :  { %11274 = vmatpush1.bf16.msra.mxu1 %v12636_v14  ;;  %10947 = vmatprep.subr.bf16.mxu0 %v12643_v42  ;;  %v12690_v14 = vcombine.low %v4638_v48, %v4642_v17  ;;  %v12692_v42 = vcombine.low %v4639_v52, %v4643_v20  ;;  %v12701_v46 = vcombine.high %v4647_v38, %v4651_v41  ;;  %v4698_v48 = vld [vmem:[%s18149_s3 + $0x1970] sm:$0xff]  ;;  %v4695_v17 = vld [vmem:[%s18149_s3 + $0x1958] sm:$0xff] }
 0x564   :  { %11275 = vmatprep.subr.bf16.mxu1 %v12645_v26  ;;  %v12699_v26 = vcombine.high %v4646_v15, %v4650_v12  ;;  %v4699_v52 = vld [vmem:[%s18149_s3 + $0x1978] sm:$0xff] }
 0x566   :  { %10948 = vmatpush1.bf16.msra.mxu0 %v12642_v58  ;;  %v4659_v58 = vld [vmem:[%s18149_s3 + $0x1838] sm:$0xff] }
 0x567   :  { %11276 = vmatpush1.bf16.msra.mxu1 %v12644_v36  ;;  %10949 = vmatprep.subr.bf16.mxu0 %v12651_v18  ;;  %v12698_v36 = vcombine.low %v4646_v15, %v4650_v12  ;;  %v12700_v18 = vcombine.low %v4647_v38, %v4651_v41  ;;  %v12709_v29 = vcombine.high %v4655_v23, %v4659_v58  ;;  %v4706_v15 = vld [vmem:[%s18149_s3 + $0x19b0] sm:$0xff]  ;;  %v4703_v12 = vld [vmem:[%s18149_s3 + $0x1998] sm:$0xff] }
 0x568   :  { %11277 = vmatprep.subr.bf16.mxu1 %v12653_v50  ;;  %v12707_v50 = vcombine.high %v4654_v47, %v4658_v11  ;;  %v4707_v38 = vld [vmem:[%s18149_s3 + $0x19b8] sm:$0xff]  ;;  %v4714_v47 = vld [vmem:[%s18149_s3 + $0x19f0] sm:$0xff] }
 0x569   :  { %v4711_v11 = vld [vmem:[%s18149_s3 + $0x19d8] sm:$0xff] }
 0x56a   :  { %10950 = vmatpush1.bf16.msra.mxu0 %v12650_v51  ;;  %v4663_v51 = vld [vmem:[%s18149_s3 + $0x1858] sm:$0xff] }
 0x56b   :  { %11278 = vmatpush1.bf16.msra.mxu1 %v12652_v32  ;;  %10951 = vmatprep.subr.bf16.mxu0 %v12659_v54  ;;  %v4667_v32 = vld [vmem:[%s18149_s3 + $0x1878] sm:$0xff]  ;;  %v12708_v54 = vcombine.low %v4655_v23, %v4659_v58 }
 0x56c   :  { %11279 = vmatprep.subr.bf16.mxu1 %v12661_v55  ;;  %v12715_v55 = vcombine.high %v4662_v7, %v4666_v28  ;;  %v12717_v34 = vcombine.high %v4663_v51, %v4667_v32  ;;  %v4715_v23 = vld [vmem:[%s18149_s3 + $0x19f8] sm:$0xff] }
 0x56e   :  { %10952 = vmatpush1.bf16.msra.mxu0 %v12658_v53  ;;  %v4675_v53 = vld [vmem:[%s18149_s3 + $0x18b8] sm:$0xff] }
 0x56f   :  { %11280 = vmatpush1.bf16.msra.mxu1 %v12660_v62  ;;  %10953 = vmatprep.subr.bf16.mxu0 %v12667_v63  ;;  %v12714_v62 = vcombine.low %v4662_v7, %v4666_v28  ;;  %v12716_v63 = vcombine.low %v4663_v51, %v4667_v32  ;;  %v12725_v4 = vcombine.high %v4671_v60, %v4675_v53  ;;  %v4722_v7 = vld [vmem:[%s18149_s3 + $0x1a30] sm:$0xff]  ;;  %v4719_v28 = vld [vmem:[%s18149_s3 + $0x1a18] sm:$0xff] }
 0x570   :  { %11281 = vmatprep.subr.bf16.mxu1 %v12669_v6  ;;  %v12723_v6 = vcombine.high %v4670_v0, %v4674_v59  ;;  %v12764_v32 = vcombine.low %v4711_v11, %v4715_v23 }
 0x572   :  { %10954 = vmatpush1.bf16.msra.mxu0 %v12666_v2  ;;  %v12724_v2 = vcombine.low %v4671_v60, %v4675_v53  ;;  %v4731_v60 = vld [vmem:[%s18149_s3 + $0x1a78] sm:$0xff] }
 0x573   :  { %11282 = vmatpush1.bf16.msra.mxu1 %v12668_v3  ;;  %10955 = vmatprep.subr.bf16.mxu0 %v12675_v22  ;;  %v12731_v3 = vcombine.high %v4678_v25, %v4682_v1  ;;  %v4738_v25 = vld [vmem:[%s18149_s3 + $0x1ab0] sm:$0xff]  ;;  %v4735_v1 = vld [vmem:[%s18149_s3 + $0x1a98] sm:$0xff] }
 0x574   :  { %11283 = vmatprep.subr.bf16.mxu1 %v12677_v5  ;;  %v4686_v5 = vld [vmem:[%s18149_s3 + $0x1910] sm:$0xff] }
 0x575   :  { %v12738_v20 = vcombine.low %v4686_v5, %v4690_v44 }
 0x576   :  { %10956 = vmatpush1.bf16.msra.mxu0 %v12674_v37 }
 0x577   :  { %11284 = vmatpush1.bf16.msra.mxu1 %v12676_v39  ;;  %10957 = vmatprep.subr.bf16.mxu0 %v12683_v19  ;;  %v12739_v39 = vcombine.high %v4686_v5, %v4690_v44  ;;  %v12741_v19 = vcombine.high %v4687_v21, %v4691_v13  ;;  %v4746_v5 = vld [vmem:[%s18149_s3 + $0x1af0] sm:$0xff]  ;;  %v4743_v44 = vld [vmem:[%s18149_s3 + $0x1ad8] sm:$0xff] }
 0x578   :  { %11285 = vmatprep.subr.bf16.mxu1 %v12685_v16  ;;  %v4694_v16 = vld [vmem:[%s18149_s3 + $0x1950] sm:$0xff] }
 0x579   :  { %v12746_v41 = vcombine.low %v4694_v16, %v4698_v48 }
 0x57a   :  { %10958 = vmatpush1.bf16.msra.mxu0 %v12682_v61  ;;  %v12740_v61 = vcombine.low %v4687_v21, %v4691_v13  ;;  %v4747_v21 = vld [vmem:[%s18149_s3 + $0x1af8] sm:$0xff] }
 0x57b   :  { %11286 = vmatpush1.bf16.msra.mxu1 %v12684_v30  ;;  %10959 = vmatprep.subr.bf16.mxu0 %v12691_v33  ;;  %v12747_v30 = vcombine.high %v4694_v16, %v4698_v48  ;;  %v12749_v33 = vcombine.high %v4695_v17, %v4699_v52  ;;  %v4754_v16 = vld [vmem:[%s18149_s3 + $0x1b30] sm:$0xff]  ;;  %v4751_v48 = vld [vmem:[%s18149_s3 + $0x1b18] sm:$0xff] }
 0x57c   :  { %11287 = vmatprep.subr.bf16.mxu1 %v12693_v8  ;;  %v4702_v8 = vld [vmem:[%s18149_s3 + $0x1990] sm:$0xff] }
 0x57d   :  { %v12754_v58 = vcombine.low %v4702_v8, %v4706_v15 }
 0x57e   :  { %10960 = vmatpush1.bf16.msra.mxu0 %v12690_v14  ;;  %v12748_v14 = vcombine.low %v4695_v17, %v4699_v52  ;;  %v4755_v17 = vld [vmem:[%s18149_s3 + $0x1b38] sm:$0xff] }
 0x57f   :  { %11288 = vmatpush1.bf16.msra.mxu1 %v12692_v42  ;;  %10961 = vmatprep.subr.bf16.mxu0 %v12699_v26  ;;  %v12755_v42 = vcombine.high %v4702_v8, %v4706_v15  ;;  %v12757_v26 = vcombine.high %v4703_v12, %v4707_v38  ;;  %v4762_v8 = vld [vmem:[%s18149_s3 + $0x1b70] sm:$0xff]  ;;  %v4759_v15 = vld [vmem:[%s18149_s3 + $0x1b58] sm:$0xff] }
 0x580   :  { %11289 = vmatprep.subr.bf16.mxu1 %v12701_v46  ;;  %v4710_v46 = vld [vmem:[%s18149_s3 + $0x19d0] sm:$0xff] }
 0x581   :  { %v12762_v51 = vcombine.low %v4710_v46, %v4714_v47 }
 0x582   :  { %10962 = vmatpush1.bf16.msra.mxu0 %v12698_v36  ;;  %v12756_v36 = vcombine.low %v4703_v12, %v4707_v38  ;;  %v4763_v12 = vld [vmem:[%s18149_s3 + $0x1b78] sm:$0xff] }
 0x583   :  { %11290 = vmatpush1.bf16.msra.mxu1 %v12700_v18  ;;  %10972 = vmatprep.subr.bf16.mxu0 %v12707_v50  ;;  %v12763_v18 = vcombine.high %v4710_v46, %v4714_v47  ;;  %v12765_v50 = vcombine.high %v4711_v11, %v4715_v23  ;;  %v4770_v46 = vld [vmem:[%s18149_s3 + $0x1bb0] sm:$0xff]  ;;  %v4767_v47 = vld [vmem:[%s18149_s3 + $0x1b98] sm:$0xff] }
 0x584   :  { %11300 = vmatprep.subr.bf16.mxu1 %v12709_v29  ;;  %v4718_v29 = vld [vmem:[%s18149_s3 + $0x1a10] sm:$0xff]  ;;  %v4771_v11 = vld [vmem:[%s18149_s3 + $0x1bb8] sm:$0xff] }
 0x585   :  { %10964 = vmatmul.mubr.bf16.vlgmr.msra.gmra.mrb[20].mxu0 %v16146_v45  ;;  %v12770_v53 = vcombine.low %v4718_v29, %v4722_v7 }
 0x586   :  { %11292 = vmatmul.mubr.bf16.vlgmr.msra.gmra.mrb[20].mxu1 %v16146_v45  ;;  %10973 = vmatpush1.bf16.msra.mxu0 %v12706_v9  ;;  %v4679_v45 = vld [vmem:[%s18149_s3 + $0x18d8] sm:$0xff] }
 0x587   :  { %11004 = vmatprep.mubr.bf16.mxu0 %v16154_v49  ;;  %11301 = vmatpush1.bf16.msra.mxu1 %v12708_v54  ;;  %v12733_v22 = vcombine.high %v4679_v45, %v4683_v35  ;;  %v12732_v37 = vcombine.low %v4679_v45, %v4683_v35  ;;  %v4723_v9 = vld [vmem:[%s18149_s3 + $0x1a38] sm:$0xff]  ;;  %v12771_v54 = vcombine.high %v4718_v29, %v4722_v7  ;;  %v4778_v29 = vld [vmem:[%s18149_s3 + $0x1bf0] sm:$0xff] }
 0x588   :  { %11332 = vmatprep.mubr.bf16.mxu1 %v16154_v49  ;;  %10974 = vmatprep.subr.bf16.mxu0 %v12715_v55  ;;  %v12722_v49 = vcombine.low %v4670_v0, %v4674_v59  ;;  %v12773_v55 = vcombine.high %v4719_v28, %v4723_v9  ;;  %v4726_v0 = vld [vmem:[%s18149_s3 + $0x1a50] sm:$0xff]  ;;  %v4739_v45 = vld [vmem:[%s18149_s3 + $0x1ab8] sm:$0xff] }
 0x589   :  { %11302 = vmatprep.subr.bf16.mxu1 %v12717_v34  ;;  %v4730_v59 = vld [vmem:[%s18149_s3 + $0x1a70] sm:$0xff]  ;;  %v4727_v34 = vld [vmem:[%s18149_s3 + $0x1a58] sm:$0xff] }
 0x58a   :  { %10975 = vmatpush1.bf16.msra.mxu0 %v12714_v62  ;;  %v12772_v62 = vcombine.low %v4719_v28, %v4723_v9  ;;  %v12778_v35 = vcombine.low %v4726_v0, %v4730_v59  ;;  %v4775_v7 = vld [vmem:[%s18149_s3 + $0x1bd8] sm:$0xff] }
 0x58b   :  { %11303 = vmatpush1.bf16.msra.mxu1 %v12716_v63  ;;  %10976 = vmatprep.subr.bf16.mxu0 %v12723_v6  ;;  %v12779_v63 = vcombine.high %v4726_v0, %v4730_v59  ;;  %v12781_v6 = vcombine.high %v4727_v34, %v4731_v60  ;;  %v4779_v28 = vld [vmem:[%s18149_s3 + $0x1bf8] sm:$0xff]  ;;  %v4786_v0 = vld [vmem:[%s18149_s3 + $0x1c30] sm:$0xff] }
 0x58c   :  { %11304 = vmatprep.subr.bf16.mxu1 %v12725_v4  ;;  %v4734_v4 = vld [vmem:[%s18149_s3 + $0x1a90] sm:$0xff]  ;;  %v4783_v59 = vld [vmem:[%s18149_s3 + $0x1c18] sm:$0xff] }
 0x58d   :  { %v12786_v13 = vcombine.low %v4734_v4, %v4738_v25 }
 0x58e   :  { %10977 = vmatpush1.bf16.msra.mxu0 %v12722_v49  ;;  %v12780_v49 = vcombine.low %v4727_v34, %v4731_v60  ;;  %v4787_v34 = vld [vmem:[%s18149_s3 + $0x1c38] sm:$0xff] }
 0x58f   :  { %11305 = vmatpush1.bf16.msra.mxu1 %v12724_v2  ;;  %10978 = vmatprep.subr.bf16.mxu0 %v12731_v3  ;;  %v12787_v2 = vcombine.high %v4734_v4, %v4738_v25  ;;  %v12789_v3 = vcombine.high %v4735_v1, %v4739_v45  ;;  %v4794_v4 = vld [vmem:[%s18149_s3 + $0x1c70] sm:$0xff] }
 0x590   :  { %11306 = vmatprep.subr.bf16.mxu1 %v12733_v22  ;;  %v4742_v22 = vld [vmem:[%s18149_s3 + $0x1ad0] sm:$0xff] }
 0x591   :  { %v12794_v52 = vcombine.low %v4742_v22, %v4746_v5 }
 0x592   :  { %10979 = vmatpush1.bf16.msra.mxu0 %v12730_v10  ;;  %v12788_v10 = vcombine.low %v4735_v1, %v4739_v45  ;;  %v4791_v1 = vld [vmem:[%s18149_s3 + $0x1c58] sm:$0xff] }
 0x593   :  { %11307 = vmatpush1.bf16.msra.mxu1 %v12732_v37  ;;  %10980 = vmatprep.subr.bf16.mxu0 %v12739_v39  ;;  %v12795_v37 = vcombine.high %v4742_v22, %v4746_v5  ;;  %v12797_v39 = vcombine.high %v4743_v44, %v4747_v21  ;;  %v4795_v45 = vld [vmem:[%s18149_s3 + $0x1c78] sm:$0xff] }
 0x594   :  { %11308 = vmatprep.subr.bf16.mxu1 %v12741_v19  ;;  %v4750_v19 = vld [vmem:[%s18149_s3 + $0x1b10] sm:$0xff]  ;;  %v12845_v22 = vcombine.high %v4791_v1, %v4795_v45  ;;  %v4799_v5 = vld [vmem:[%s18149_s3 + $0x1c98] sm:$0xff] }
 0x595   :  { %v12802_v38 = vcombine.low %v4750_v19, %v4754_v16 }
 0x596   :  { %10981 = vmatpush1.bf16.msra.mxu0 %v12738_v20  ;;  %v12796_v20 = vcombine.low %v4743_v44, %v4747_v21  ;;  %v4803_v44 = vld [vmem:[%s18149_s3 + $0x1cb8] sm:$0xff] }
 0x597   :  { %11309 = vmatpush1.bf16.msra.mxu1 %v12740_v61  ;;  %10982 = vmatprep.subr.bf16.mxu0 %v12747_v30  ;;  %v12803_v61 = vcombine.high %v4750_v19, %v4754_v16  ;;  %v12805_v30 = vcombine.high %v4751_v48, %v4755_v17  ;;  %v4810_v19 = vld [vmem:[%s18149_s3 + $0x1cf0] sm:$0xff]  ;;  %v4811_v16 = vld [vmem:[%s18149_s3 + $0x1cf8] sm:$0xff] }
 0x598   :  { %11310 = vmatprep.subr.bf16.mxu1 %v12749_v33  ;;  %v4758_v33 = vld [vmem:[%s18149_s3 + $0x1b50] sm:$0xff] }
 0x599   :  { %v12810_v23 = vcombine.low %v4758_v33, %v4762_v8 }
 0x59a   :  { %10983 = vmatpush1.bf16.msra.mxu0 %v12746_v41  ;;  %v12804_v41 = vcombine.low %v4751_v48, %v4755_v17  ;;  %v12852_v48 = vcombine.low %v4799_v5, %v4803_v44 }
 0x59b   :  { %11311 = vmatpush1.bf16.msra.mxu1 %v12748_v14  ;;  %10984 = vmatprep.subr.bf16.mxu0 %v12755_v42  ;;  %v12811_v14 = vcombine.high %v4758_v33, %v4762_v8  ;;  %v12813_v42 = vcombine.high %v4759_v15, %v4763_v12  ;;  %v4819_v33 = vld [vmem:[%s18149_s3 + $0x1d38] sm:$0xff] }
 0x59c   :  { %11312 = vmatprep.subr.bf16.mxu1 %v12757_v26  ;;  %v4766_v26 = vld [vmem:[%s18149_s3 + $0x1b90] sm:$0xff] }
 0x59d   :  { %v12818_v9 = vcombine.low %v4766_v26, %v4770_v46 }
 0x59e   :  { %10985 = vmatpush1.bf16.msra.mxu0 %v12754_v58  ;;  %v12812_v58 = vcombine.low %v4759_v15, %v4763_v12 }
 0x59f   :  { %11313 = vmatpush1.bf16.msra.mxu1 %v12756_v36  ;;  %10986 = vmatprep.subr.bf16.mxu0 %v12763_v18  ;;  %v12819_v36 = vcombine.high %v4766_v26, %v4770_v46  ;;  %v12821_v18 = vcombine.high %v4767_v47, %v4771_v11  ;;  %v4827_v26 = vld [vmem:[%s18149_s3 + $0x1d78] sm:$0xff] }
 0x5a0   :  { %11314 = vmatprep.subr.bf16.mxu1 %v12765_v50  ;;  %v4774_v50 = vld [vmem:[%s18149_s3 + $0x1bd0] sm:$0xff] }
 0x5a1   :  { %v12826_v60 = vcombine.low %v4774_v50, %v4778_v29 }
 0x5a2   :  { %10987 = vmatpush1.bf16.msra.mxu0 %v12762_v51  ;;  %v12820_v51 = vcombine.low %v4767_v47, %v4771_v11 }
 0x5a3   :  { %11315 = vmatpush1.bf16.msra.mxu1 %v12764_v32  ;;  %10988 = vmatprep.subr.bf16.mxu0 %v12771_v54  ;;  %v12827_v32 = vcombine.high %v4774_v50, %v4778_v29  ;;  %v12829_v54 = vcombine.high %v4775_v7, %v4779_v28  ;;  %v4835_v50 = vld [vmem:[%s18149_s3 + $0x1db8] sm:$0xff] }
 0x5a4   :  { %11316 = vmatprep.subr.bf16.mxu1 %v12773_v55  ;;  %v4782_v55 = vld [vmem:[%s18149_s3 + $0x1c10] sm:$0xff] }
 0x5a5   :  { %v12834_v25 = vcombine.low %v4782_v55, %v4786_v0 }
 0x5a6   :  { %10989 = vmatpush1.bf16.msra.mxu0 %v12770_v53  ;;  %v12828_v53 = vcombine.low %v4775_v7, %v4779_v28 }
 0x5a7   :  { %11317 = vmatpush1.bf16.msra.mxu1 %v12772_v62  ;;  %10990 = vmatprep.subr.bf16.mxu0 %v12779_v63  ;;  %v12835_v62 = vcombine.high %v4782_v55, %v4786_v0  ;;  %v12837_v63 = vcombine.high %v4783_v59, %v4787_v34  ;;  %v4843_v55 = vld [vmem:[%s18149_s3 + $0x1df8] sm:$0xff] }
 0x5a8   :  { %11318 = vmatprep.subr.bf16.mxu1 %v12781_v6  ;;  %v4790_v6 = vld [vmem:[%s18149_s3 + $0x1c50] sm:$0xff] }
 0x5a9   :  { %v12842_v21 = vcombine.low %v4790_v6, %v4794_v4 }
 0x5aa   :  { %10991 = vmatpush1.bf16.msra.mxu0 %v12778_v35  ;;  %v12836_v35 = vcombine.low %v4783_v59, %v4787_v34 }
 0x5ab   :  { %11319 = vmatpush1.bf16.msra.mxu1 %v12780_v49  ;;  %10992 = vmatprep.subr.bf16.mxu0 %v12787_v2  ;;  %v12843_v49 = vcombine.high %v4790_v6, %v4794_v4  ;;  %v4798_v2 = vld [vmem:[%s18149_s3 + $0x1c90] sm:$0xff]  ;;  %v4851_v6 = vld [vmem:[%s18149_s3 + $0x1e38] sm:$0xff] }
 0x5ac   :  { %11320 = vmatprep.subr.bf16.mxu1 %v12789_v3  ;;  %v4802_v3 = vld [vmem:[%s18149_s3 + $0x1cb0] sm:$0xff] }
 0x5ae   :  { %10993 = vmatpush1.bf16.msra.mxu0 %v12786_v13  ;;  %v12844_v13 = vcombine.low %v4791_v1, %v4795_v45 }
 0x5af   :  { %11321 = vmatpush1.bf16.msra.mxu1 %v12788_v10  ;;  %10994 = vmatprep.subr.bf16.mxu0 %v12795_v37  ;;  %v12851_v10 = vcombine.high %v4798_v2, %v4802_v3  ;;  %v12853_v37 = vcombine.high %v4799_v5, %v4803_v44 }
 0x5b0   :  { %11322 = vmatprep.subr.bf16.mxu1 %v12797_v39  ;;  %v4806_v39 = vld [vmem:[%s18149_s3 + $0x1cd0] sm:$0xff] }
 0x5b1   :  { %v12859_v17 = vcombine.high %v4806_v39, %v4810_v19  ;;  %v12858_v8 = vcombine.low %v4806_v39, %v4810_v19  ;;  %v4867_v39 = vld [vmem:[%s18149_s3 + $0x1eb8] sm:$0xff] }
 0x5b2   :  { %10995 = vmatpush1.bf16.msra.mxu0 %v12794_v52 }
 0x5b3   :  { %11323 = vmatpush1.bf16.msra.mxu1 %v12796_v20  ;;  %10996 = vmatprep.subr.bf16.mxu0 %v12803_v61  ;;  %v4814_v20 = vld [vmem:[%s18149_s3 + $0x1d10] sm:$0xff] }
 0x5b4   :  { %11324 = vmatprep.subr.bf16.mxu1 %v12805_v30  ;;  %v4818_v61 = vld [vmem:[%s18149_s3 + $0x1d30] sm:$0xff]  ;;  %v4815_v30 = vld [vmem:[%s18149_s3 + $0x1d18] sm:$0xff] }
 0x5b5   :  { %v12867_v12 = vcombine.high %v4814_v20, %v4818_v61  ;;  %v12866_v46 = vcombine.low %v4814_v20, %v4818_v61  ;;  %v12868_v47 = vcombine.low %v4815_v30, %v4819_v33  ;;  %v4875_v20 = vld [vmem:[%s18149_s3 + $0x1ef8] sm:$0xff] }
 0x5b6   :  { %10997 = vmatpush1.bf16.msra.mxu0 %v12802_v38  ;;  %v12869_v38 = vcombine.high %v4815_v30, %v4819_v33 }
 0x5b7   :  { %11325 = vmatpush1.bf16.msra.mxu1 %v12804_v41  ;;  %10998 = vmatprep.subr.bf16.mxu0 %v12811_v14  ;;  %v4822_v41 = vld [vmem:[%s18149_s3 + $0x1d50] sm:$0xff] }
 0x5b8   :  { %11326 = vmatprep.subr.bf16.mxu1 %v12813_v42  ;;  %v4826_v14 = vld [vmem:[%s18149_s3 + $0x1d70] sm:$0xff]  ;;  %v4823_v42 = vld [vmem:[%s18149_s3 + $0x1d58] sm:$0xff] }
 0x5b9   :  { %v12875_v11 = vcombine.high %v4822_v41, %v4826_v14  ;;  %v12874_v29 = vcombine.low %v4822_v41, %v4826_v14  ;;  %v12876_v7 = vcombine.low %v4823_v42, %v4827_v26  ;;  %v4883_v41 = vld [vmem:[%s18149_s3 + $0x1f38] sm:$0xff] }
 0x5ba   :  { %10999 = vmatpush1.bf16.msra.mxu0 %v12810_v23  ;;  %v12877_v23 = vcombine.high %v4823_v42, %v4827_v26 }
 0x5bb   :  { %11327 = vmatpush1.bf16.msra.mxu1 %v12812_v58  ;;  %11000 = vmatprep.subr.bf16.mxu0 %v12819_v36  ;;  %v4830_v58 = vld [vmem:[%s18149_s3 + $0x1d90] sm:$0xff] }
 0x5bc   :  { %11328 = vmatprep.subr.bf16.mxu1 %v12821_v18  ;;  %v4834_v36 = vld [vmem:[%s18149_s3 + $0x1db0] sm:$0xff]  ;;  %v4831_v18 = vld [vmem:[%s18149_s3 + $0x1d98] sm:$0xff] }
 0x5bd   :  { %v12883_v28 = vcombine.high %v4830_v58, %v4834_v36  ;;  %v12882_v0 = vcombine.low %v4830_v58, %v4834_v36  ;;  %v12884_v59 = vcombine.low %v4831_v18, %v4835_v50  ;;  %v4891_v58 = vld [vmem:[%s18149_s3 + $0x1f78] sm:$0xff] }
 0x5be   :  { %11001 = vmatpush1.bf16.msra.mxu0 %v12818_v9  ;;  %v12885_v9 = vcombine.high %v4831_v18, %v4835_v50 }
 0x5bf   :  { %11329 = vmatpush1.bf16.msra.mxu1 %v12820_v51  ;;  %11002 = vmatprep.subr.bf16.mxu0 %v12827_v32  ;;  %v4838_v51 = vld [vmem:[%s18149_s3 + $0x1dd0] sm:$0xff] }
 0x5c0   :  { %11330 = vmatprep.subr.bf16.mxu1 %v12829_v54  ;;  %v4842_v32 = vld [vmem:[%s18149_s3 + $0x1df0] sm:$0xff]  ;;  %v4839_v54 = vld [vmem:[%s18149_s3 + $0x1dd8] sm:$0xff] }
 0x5c1   :  { %v12891_v34 = vcombine.high %v4838_v51, %v4842_v32  ;;  %v12890_v4 = vcombine.low %v4838_v51, %v4842_v32  ;;  %v4899_v51 = vld [vmem:[%s18149_s3 + $0x1fb8] sm:$0xff] }
 0x5c2   :  { %11003 = vmatpush1.bf16.msra.mxu0 %v12826_v60  ;;  %v12893_v60 = vcombine.high %v4839_v54, %v4843_v55 }
 0x5c3   :  { %11331 = vmatpush1.bf16.msra.mxu1 %v12828_v53  ;;  %11013 = vmatprep.subr.bf16.mxu0 %v12835_v62  ;;  %v4846_v53 = vld [vmem:[%s18149_s3 + $0x1e10] sm:$0xff] }
 0x5c4   :  { %11341 = vmatprep.subr.bf16.mxu1 %v12837_v63  ;;  %v4850_v62 = vld [vmem:[%s18149_s3 + $0x1e30] sm:$0xff]  ;;  %v4847_v63 = vld [vmem:[%s18149_s3 + $0x1e18] sm:$0xff] }
 0x5c5   :  { %11005 = vmatmul.mubr.bf16.vlgmr.msra.gmra.mrb[20].mxu0 %v16357_v24  ;;  %v12899_v1 = vcombine.high %v4846_v53, %v4850_v62  ;;  %v12901_v45 = vcombine.high %v4847_v63, %v4851_v6  ;;  %v12900_v5 = vcombine.low %v4847_v63, %v4851_v6 }
 0x5c6   :  { %11333 = vmatmul.mubr.bf16.vlgmr.msra.gmra.mrb[20].mxu1 %v16357_v24  ;;  %11014 = vmatpush1.bf16.msra.mxu0 %v12834_v25  ;;  %v4807_v24 = vld [vmem:[%s18149_s3 + $0x1cd8] sm:$0xff]  ;;  %v12892_v25 = vcombine.low %v4839_v54, %v4843_v55 }
 0x5c7   :  { %11045 = vmatprep.mubr.bf16.mxu0 %v16365_v27  ;;  %11342 = vmatpush1.bf16.msra.mxu1 %v12836_v35  ;;  %v12861_v52 = vcombine.high %v4807_v24, %v4811_v16  ;;  %v12860_v15 = vcombine.low %v4807_v24, %v4811_v16  ;;  %v4854_v35 = vld [vmem:[%s18149_s3 + $0x1e50] sm:$0xff] }
 0x5c8   :  { %11373 = vmatprep.mubr.bf16.mxu1 %v16365_v27  ;;  %11015 = vmatprep.subr.bf16.mxu0 %v12843_v49  ;;  %v12850_v27 = vcombine.low %v4798_v2, %v4802_v3  ;;  %v4858_v49 = vld [vmem:[%s18149_s3 + $0x1e70] sm:$0xff]  ;;  %v4855_v2 = vld [vmem:[%s18149_s3 + $0x1e58] sm:$0xff] }
 0x5c9   :  { %11343 = vmatprep.subr.bf16.mxu1 %v12845_v22  ;;  %v4859_v3 = vld [vmem:[%s18149_s3 + $0x1e78] sm:$0xff]  ;;  %v12898_v22 = vcombine.low %v4846_v53, %v4850_v62  ;;  %v12907_v44 = vcombine.high %v4854_v35, %v4858_v49  ;;  %v12906_v19 = vcombine.low %v4854_v35, %v4858_v49 }
 0x5ca   :  { %11016 = vmatpush1.bf16.msra.mxu0 %v12842_v21  ;;  %v12909_v21 = vcombine.high %v4855_v2, %v4859_v3  ;;  %v12908_v24 = vcombine.low %v4855_v2, %v4859_v3  ;;  %v4907_v53 = vld [vmem:[%s18149_s3 + $0x1ff8] sm:$0xff] }
 0x5cb   :  { %11344 = vmatpush1.bf16.msra.mxu1 %v12844_v13  ;;  %11017 = vmatprep.subr.bf16.mxu0 %v12851_v10  ;;  %v4862_v13 = vld [vmem:[%s18149_s3 + $0x1e90] sm:$0xff] }
 0x5cc   :  { %11345 = vmatprep.subr.bf16.mxu1 %v12853_v37  ;;  %v4866_v10 = vld [vmem:[%s18149_s3 + $0x1eb0] sm:$0xff]  ;;  %v4863_v37 = vld [vmem:[%s18149_s3 + $0x1e98] sm:$0xff] }
 0x5cd   :  { %v12915_v16 = vcombine.high %v4862_v13, %v4866_v10  ;;  %v12914_v61 = vcombine.low %v4862_v13, %v4866_v10  ;;  %v12916_v30 = vcombine.low %v4863_v37, %v4867_v39 }
 0x5ce   :  { %11018 = vmatpush1.bf16.msra.mxu0 %v12850_v27  ;;  %v12917_v27 = vcombine.high %v4863_v37, %v4867_v39 }
 0x5cf   :  { %11346 = vmatpush1.bf16.msra.mxu1 %v12852_v48  ;;  %11019 = vmatprep.subr.bf16.mxu0 %v12859_v17  ;;  %v4870_v48 = vld [vmem:[%s18149_s3 + $0x1ed0] sm:$0xff] }
 0x5d0   :  { %11347 = vmatprep.subr.bf16.mxu1 %v12861_v52  ;;  %v4874_v17 = vld [vmem:[%s18149_s3 + $0x1ef0] sm:$0xff]  ;;  %v4871_v52 = vld [vmem:[%s18149_s3 + $0x1ed8] sm:$0xff] }
 0x5d1   :  { %v12923_v33 = vcombine.high %v4870_v48, %v4874_v17  ;;  %v12922_v14 = vcombine.low %v4870_v48, %v4874_v17  ;;  %v12924_v42 = vcombine.low %v4871_v52, %v4875_v20 }
 0x5d2   :  { %11020 = vmatpush1.bf16.msra.mxu0 %v12858_v8  ;;  %v12925_v8 = vcombine.high %v4871_v52, %v4875_v20 }
 0x5d3   :  { %11348 = vmatpush1.bf16.msra.mxu1 %v12860_v15  ;;  %11021 = vmatprep.subr.bf16.mxu0 %v12867_v12  ;;  %v4878_v15 = vld [vmem:[%s18149_s3 + $0x1f10] sm:$0xff] }
 0x5d4   :  { %11349 = vmatprep.subr.bf16.mxu1 %v12869_v38  ;;  %v4882_v12 = vld [vmem:[%s18149_s3 + $0x1f30] sm:$0xff]  ;;  %v4879_v38 = vld [vmem:[%s18149_s3 + $0x1f18] sm:$0xff] }
 0x5d5   :  { %v12931_v26 = vcombine.high %v4878_v15, %v4882_v12  ;;  %v12930_v36 = vcombine.low %v4878_v15, %v4882_v12  ;;  %v12932_v18 = vcombine.low %v4879_v38, %v4883_v41 }
 0x5d6   :  { %11022 = vmatpush1.bf16.msra.mxu0 %v12866_v46  ;;  %v12933_v46 = vcombine.high %v4879_v38, %v4883_v41 }
 0x5d7   :  { %11350 = vmatpush1.bf16.msra.mxu1 %v12868_v47  ;;  %11023 = vmatprep.subr.bf16.mxu0 %v12875_v11  ;;  %v4886_v47 = vld [vmem:[%s18149_s3 + $0x1f50] sm:$0xff] }
 0x5d8   :  { %11351 = vmatprep.subr.bf16.mxu1 %v12877_v23  ;;  %v4890_v11 = vld [vmem:[%s18149_s3 + $0x1f70] sm:$0xff]  ;;  %v4887_v23 = vld [vmem:[%s18149_s3 + $0x1f58] sm:$0xff] }
 0x5d9   :  { %v12939_v50 = vcombine.high %v4886_v47, %v4890_v11  ;;  %v12938_v32 = vcombine.low %v4886_v47, %v4890_v11  ;;  %v12940_v54 = vcombine.low %v4887_v23, %v4891_v58 }
 0x5da   :  { %11024 = vmatpush1.bf16.msra.mxu0 %v12874_v29  ;;  %v12941_v29 = vcombine.high %v4887_v23, %v4891_v58 }
 0x5db   :  { %11352 = vmatpush1.bf16.msra.mxu1 %v12876_v7  ;;  %11025 = vmatprep.subr.bf16.mxu0 %v12883_v28  ;;  %v4894_v7 = vld [vmem:[%s18149_s3 + $0x1f90] sm:$0xff] }
 0x5dc   :  { %11353 = vmatprep.subr.bf16.mxu1 %v12885_v9  ;;  %v4898_v28 = vld [vmem:[%s18149_s3 + $0x1fb0] sm:$0xff]  ;;  %v4895_v9 = vld [vmem:[%s18149_s3 + $0x1f98] sm:$0xff] }
 0x5dd   :  { %v12947_v55 = vcombine.high %v4894_v7, %v4898_v28  ;;  %v12946_v62 = vcombine.low %v4894_v7, %v4898_v28  ;;  %v12948_v63 = vcombine.low %v4895_v9, %v4899_v51 }
 0x5de   :  { %11026 = vmatpush1.bf16.msra.mxu0 %v12882_v0  ;;  %v12949_v0 = vcombine.high %v4895_v9, %v4899_v51 }
 0x5df   :  { %11354 = vmatpush1.bf16.msra.mxu1 %v12884_v59  ;;  %11027 = vmatprep.subr.bf16.mxu0 %v12891_v34  ;;  %v4902_v59 = vld [vmem:[%s18149_s3 + $0x1fd0] sm:$0xff] }
 0x5e0   :  { %11355 = vmatprep.subr.bf16.mxu1 %v12893_v60  ;;  %v4906_v34 = vld [vmem:[%s18149_s3 + $0x1ff0] sm:$0xff]  ;;  %v4903_v60 = vld [vmem:[%s18149_s3 + $0x1fd8] sm:$0xff]  ;;  %s13183_s3 = smov [#allocation2]  }
 0x5e1   :  { %v12955_v6 = vcombine.high %v4902_v59, %v4906_v34  ;;  %s11396_s17 = sshll.u32 %s13183_s3, 4  ;;  %s11397_s17 = int_to_ptr.vmem [resolvable:$true] %s11396_s17 }
 0x5e2   :  { %11028 = vmatpush1.bf16.msra.mxu0 %v12890_v4  ;;  %v12957_v4 = vcombine.high %v4903_v60, %v4907_v53  ;;  %s13135_s18 = scalar_lea.vmem %s11397_s17, 512  ;;  %p13140_p1 = scmp.lt.s32.totalorder %s11397_s17, %s11397_s17 }
 0x5e3   :  { %11356 = vmatpush1.bf16.msra.mxu1 %v12892_v25  ;;  %11029 = vmatprep.subr.bf16.mxu0 %v12899_v1  ;;  %v12954_v25 = vcombine.low %v4902_v59, %v4906_v34  ;;  %v12956_v1 = vcombine.low %v4903_v60, %v4907_v53  ;;  %p13136_p0 = scmp.ne.s32.totalorder %s11397_s17, %s13135_s18  ;;  %p13141_p2 = scmp.lt.s32.totalorder %s13135_s18, %s13135_s18 }
 0x5e4   :  { %11357 = vmatprep.subr.bf16.mxu1 %v12901_v45 }
 0x5e5   :  { %p13142_p3 = por %p13141_p2, %p13140_p1 }
 0x5e6   :  { %11030 = vmatpush1.bf16.msra.mxu0 %v12898_v22 }
 0x5e7   :  { %11358 = vmatpush1.bf16.msra.mxu1 %v12900_v5  ;;  %11031 = vmatprep.subr.bf16.mxu0 %v12907_v44  ;;  %p13143_p4 = pnand %p13142_p3, %p13136_p0 }
 0x5e8   :  { %11359 = vmatprep.subr.bf16.mxu1 %v12909_v21 }
 0x5ea   :  { %11032 = vmatpush1.bf16.msra.mxu0 %v12906_v19 }
 0x5eb   :  { %11360 = vmatpush1.bf16.msra.mxu1 %v12908_v24  ;;  %11033 = vmatprep.subr.bf16.mxu0 %v12915_v16 }
 0x5ec   :  { %11361 = vmatprep.subr.bf16.mxu1 %v12917_v27 }
 0x5ee   :  { %11034 = vmatpush1.bf16.msra.mxu0 %v12914_v61 }
 0x5ef   :  { %11362 = vmatpush1.bf16.msra.mxu1 %v12916_v30  ;;  %11035 = vmatprep.subr.bf16.mxu0 %v12923_v33 }
 0x5f0   :  { %11363 = vmatprep.subr.bf16.mxu1 %v12925_v8 }
 0x5f2   :  { %11036 = vmatpush1.bf16.msra.mxu0 %v12922_v14 }
 0x5f3   :  { %11364 = vmatpush1.bf16.msra.mxu1 %v12924_v42  ;;  %11037 = vmatprep.subr.bf16.mxu0 %v12931_v26 }
 0x5f4   :  { %11365 = vmatprep.subr.bf16.mxu1 %v12933_v46 }
 0x5f6   :  { %11038 = vmatpush1.bf16.msra.mxu0 %v12930_v36 }
 0x5f7   :  { %11366 = vmatpush1.bf16.msra.mxu1 %v12932_v18  ;;  %11039 = vmatprep.subr.bf16.mxu0 %v12939_v50 }
 0x5f8   :  { %11367 = vmatprep.subr.bf16.mxu1 %v12941_v29 }
 0x5fa   :  { %11040 = vmatpush1.bf16.msra.mxu0 %v12938_v32 }
 0x5fb   :  { %11368 = vmatpush1.bf16.msra.mxu1 %v12940_v54  ;;  %11041 = vmatprep.subr.bf16.mxu0 %v12947_v55 }
 0x5fc   :  { %11369 = vmatprep.subr.bf16.mxu1 %v12949_v0 }
 0x5fe   :  { %11042 = vmatpush1.bf16.msra.mxu0 %v12946_v62 }
 0x5ff   :  { %11370 = vmatpush1.bf16.msra.mxu1 %v12948_v63  ;;  %11043 = vmatprep.subr.bf16.mxu0 %v12955_v6 }
 0x600   :  { %11371 = vmatprep.subr.bf16.mxu1 %v12957_v4 }
 0x602   :  { %11044 = vmatpush1.bf16.msra.mxu0 %v12954_v25 }
 0x603   :  { %11372 = vmatpush1.bf16.msra.mxu1 %v12956_v1 }
 0x605   :  { %11046 = vmatmul.mubr.bf16.vlgmr.msra.gmra.mrb[20].mxu0 %v16560_v31 }
 0x606   :  { %11374 = vmatmul.mubr.bf16.vlgmr.msra.gmra.mrb[20].mxu1 %v16560_v31 }
 0x607   :  { %13146 = shalt.err (!%p13143_p4)
}
 0x608   :  { %s13147_s20 = scalar_lea.hbm %s18151_s5, 512 }
 0x609   :  { %p13148_p5 = scmp.ne.s32.totalorder %s18151_s5, %s13147_s20  ;;  %p13151_p6 = scmp.lt.u32.totalorder %s13147_s20, %s18151_s5 }
 0x60b   :  { %p13153_p7 = pnand %p13151_p6, %p13148_p5 }
 0x60d   :  { %13156 = shalt.err (!%p13153_p7)
}
 0x60e   :  { %11399 = dma.vmem_to_hbm [thread:$0]  %s11397_s17, 512, %s18151_s5, [#allocation3]   ;;  %v13134_v31 = vld [vmem:[%s18150_s4] sm:$0xff] }
 0x60f   :  { %v4929_v45 = vrot.slane %v13134_v31, %v15448_v57  ;;  %v4937_v35 = vrot.slane %v13134_v31, %v15673_v56  ;;  %v4933_v49 = vrot.slane %v13134_v31, %v15245_v43  ;;  %v4941_v2 = vrot.slane %v13134_v31, %v15457_v40  ;;  %s13184_s0 = smov [#allocation4]  }
 0x610   :  { %s11406_s29 = sshll.u32 %s13184_s0, 4  ;;  %s11407_s29 = int_to_ptr.vmem [resolvable:$true] %s11406_s29 }
 0x611   :  { %s13157_s4 = scalar_lea.vmem %s11407_s29, 512  ;;  %p13162_p9 = scmp.lt.s32.totalorder %s11407_s29, %s11407_s29 }
 0x612   :  { %p13158_p8 = scmp.ne.s32.totalorder %s11407_s29, %s13157_s4  ;;  %p13163_p10 = scmp.lt.s32.totalorder %s13157_s4, %s13157_s4 }
 0x614   :  { %p13164_p11 = por %p13163_p10, %p13162_p9 }
 0x616   :  { %p13165_p12 = pnand %p13164_p11, %p13158_p8 }
 0x6d8   :  { %v11047_v3 = vpop.f32.mrb[20].mxu0 }
 0x6d9   :  { %v12978_v22 = vadd.f32 %v11047_v3, %v4929_v45  ;;  %v11375_v5 = vpop.f32.mrb[20].mxu1  ;;  %v11049_v44 = vpop.f32.mrb[21].mxu0 }
 0x6da   :  { %v12980_v21 = vadd.f32 %v11375_v5, %v4937_v35  ;;  %v12979_v13 = vadd.f32 %v11049_v44, %v4933_v49  ;;  %v11377_v10 = vpop.f32.mrb[21].mxu1  ;;  %v11051_v37 = vpop.f32.mrb[22].mxu0 }
 0x6db   :  { %11386 = vst [vmem:[#allocation4] sm:$0xff] %v12978_v22  ;;  %v12981_v39 = vadd.f32 %v11377_v10, %v4941_v2  ;;  %v11379_v19 = vpop.f32.mrb[22].mxu1  ;;  %v11052_v57 = vpop.f32.mrb[23].mxu0 }
 0x6dc   :  { %11388 = vst [vmem:[#allocation4 + $0x10] sm:$0xff] %v12980_v21  ;;  %11387 = vst [vmem:[#allocation4 + $0x8] sm:$0xff] %v12979_v13  ;;  %v11380_v43 = vpop.f32.mrb[23].mxu1 }
 0x6dd   :  { %11389 = vst [vmem:[#allocation4 + $0x18] sm:$0xff] %v12981_v39 }
 0x6de   :  { %13168 = shalt.err (!%p13165_p12)
}
 0x6df   :  { %s13169_s7 = scalar_lea.hbm %s18152_s6, 512 }
 0x6e0   :  { %p13170_p13 = scmp.ne.s32.totalorder %s18152_s6, %s13169_s7  ;;  %p13173_p0 = scmp.lt.u32.totalorder %s13169_s7, %s18152_s6 }
 0x6e2   :  { %p13175_p1 = pnand %p13173_p0, %p13170_p13 }
 0x6e4   :  { %13178 = shalt.err (!%p13175_p1)
}
 0x6e5   :  { %11409 = dma.vmem_to_hbm [thread:$0]  %s11407_s29, 512, %s18152_s6, [#allocation5]  }
 0x6e6   :  { %13179 = dma.done.wait [#allocation3], 512  }
 0x6e7   :  { %13180 = vsyncadd [#allocation3], 4294966784 }
 0x6e8   :  { %13181 = dma.done.wait [#allocation5], 512  }
 0x6e9   :  { %13182 = vsyncadd [#allocation5], 4294966784 }
 0x6ea   :  { %11416 = vsyncpa [#allocation3], 1 }
 0x6eb   :  { %11417 = vsyncpa [#allocation5], 1 }

</bundles_post_ra>
